<compile_context>
chip_gen: v7x
topology: tpu7x:2x2x1
jax: 0.10.0
libtpu: 0.0.40
codegen_flags: <defaults>
</compile_context>

<pallas_src>
import jax
import jax.numpy as jnp
from jax import lax
from jax.experimental import pallas as pl
from jax.experimental.pallas import tpu as pltpu

EPS = 1e-5

PLANES = 32
RATIO = 4
C1 = PLANES // RATIO        # 8
C2 = C1 * 2                 # 16
INTER = PLANES // 2         # 16  (SpatialGCN inter_plane)
N, H, W = 2, 16, 16
P = H * W                   # 256


# ----------------------------------------------------------------------------
# small in-kernel helpers (plain 2D dots + one-pass BN statistics)
# ----------------------------------------------------------------------------
def _mm(a, b):
    """a (m,k) @ b (k,n) -> (m,n)."""
    return lax.dot_general(a, b, (((1,), (0,)), ((), ())),
                           preferred_element_type=jnp.float32)


def _mm_nt(a, b):
    """a (m,k) @ b(n,k)^T -> (m,n) (contract last dims of both)."""
    return lax.dot_general(a, b, (((1,), (1,)), ((), ())),
                           preferred_element_type=jnp.float32)


def _bn_rows(y, gamma2, beta2, c):
    """Train-mode BN of a row-stacked (2C, P) tile.
       Rows [0:C] = batch 0, rows [C:2C] = batch 1 (same channels);
       gamma2/beta2 are pre-tiled (2C, 1); stats over both halves and all columns."""
    cnt = 2.0 * y.shape[1]
    cs = jnp.sum(y, axis=1, keepdims=True)                 # (2C, 1)
    cq = jnp.sum(y * y, axis=1, keepdims=True)
    s = cs[:c] + cs[c:]                                    # (C, 1)  aligned sublane slices
    q = cq[:c] + cq[c:]
    mean = s / cnt
    var = jnp.maximum(q / cnt - mean * mean, 0.0)
    inv = lax.rsqrt(var + EPS)
    mean2 = jnp.concatenate([mean, mean], axis=0)
    inv2 = jnp.concatenate([inv, inv], axis=0)
    return gamma2 * (y - mean2) * inv2 + beta2


def _bn_cols(y, gamma, beta):
    """BN where the channels are the COLUMNS of y (R, C); stats over all rows."""
    cnt = float(y.shape[0])
    s = jnp.sum(y, axis=0, keepdims=True)
    q = jnp.sum(y * y, axis=0, keepdims=True)
    mean = s / cnt
    var = jnp.maximum(q / cnt - mean * mean, 0.0)
    inv = lax.rsqrt(var + EPS)
    return gamma * (y - mean) * inv + beta


# ----------------------------------------------------------------------------
# the single fused forward kernel (grid=(1,), all operands resident in VMEM)
# ----------------------------------------------------------------------------
def _spin_kernel(x_ref, t1_ref, t2_ref, t3_ref, dww_ref, dwbn_ref,
                 kvq_w_ref, kvq_b_ref,
                 gwg_w_ref, gwg_bn_ref, gout_w_ref, gout_b_ref, gout_bn_ref,
                 mt_ref,
                 phi_w_ref, phi_bn_ref, th_w_ref, th_bn_ref,
                 adj_w_ref, adj_bn_ref, wg_w_ref, wg_bn_ref,
                 w3_ref, bn3_ref, fa_w_ref, fb_w_ref, fin_bn_ref,
                 o_ref):
    # row-stacked trunk: (2*32, 256), batch on sublanes, free reshape
    x = x_ref[...].reshape(2 * PLANES, P)

    # ---- local branch: 3x (depthwise 3x3 s2 conv + BN2d), ONE matmul per stage ----
    cur = x
    t_refs = (t1_ref, t2_ref, t3_ref)
    for s in range(3):
        scaled = [cur * dww_ref[:, s * 9 + k: s * 9 + k + 1] for k in range(9)]
        big = jnp.concatenate(scaled, axis=1)                    # (64, 9*P_in)
        tap = t_refs[s][...].astype(jnp.float32)                 # (9*P_in, P_out), exact cast
        pre = _mm(big, tap)                                      # (64, P_out)
        cur = _bn_rows(pre, dwbn_ref[2 * s], dwbn_ref[2 * s + 1], PLANES)
    loc = cur                                                    # (64, 4)

    # ---- SpatialGCN on the local features (batched via block-diag weights) ----
    kvq = _mm(kvq_w_ref[...], loc) + kvq_b_ref[...]              # (96, 4): [k;v;q] x 2 batches
    av3 = []
    for n in range(2):                                           # tiny per-batch bmm/softmax
        b0 = 48 * n
        k_cf = kvq[b0:b0 + INTER]
        v_cf = kvq[b0 + INTER:b0 + 2 * INTER]
        q_cf = kvq[b0 + 2 * INTER:b0 + 3 * INTER]
        avt = _mm_nt(v_cf, q_cf)                                 # (16,16) == (q @ v^T)^T
        m = jnp.max(avt, axis=0, keepdims=True)
        e = jnp.exp(avt - m)
        avt = e / jnp.sum(e, axis=0, keepdims=True)              # softmax(dim=2) of AV
        av3.append(_mm(avt, k_cf))                               # (16, 4) == (k @ AV)^T
    av3 = jnp.concatenate(av3, axis=0)                           # (32, 4) row-stacked
    avw = _bn_rows(_mm(gwg_w_ref[...], av3),
                   gwg_bn_ref[0], gwg_bn_ref[1], INTER)          # conv_wg + bn_wg
    gcn = _bn_rows(_mm(gout_w_ref[...], avw) + gout_b_ref[...],
                   gout_bn_ref[0], gout_bn_ref[1], PLANES)       # out conv + BN
    gcn = jnp.maximum(gcn + loc, 0.0)                            # (64, 4)

    # ---- bilinear upsample (align_corners=True) fused with x*local + x ----
    slf = x * _mm(gcn, mt_ref[...]) + x                          # (64, 256)
    fin = _mm(fa_w_ref[...], slf)                                # final-conv partial (slf dies)

    # ---- interaction space graph reasoning ----
    xsq = _bn_rows(_mm(phi_w_ref[...], x), phi_bn_ref[0], phi_bn_ref[1], C2)   # (32, 256)
    bt = _bn_rows(_mm(th_w_ref[...], x), th_bn_ref[0], th_bn_ref[1], C1)       # (16, 256)
    zidt = jnp.concatenate(
        [_mm_nt(xsq[C2 * n:C2 * (n + 1)], bt[C1 * n:C1 * (n + 1)]) for n in range(2)],
        axis=0)                                                  # (32, 8)
    zadj = _bn_cols(_mm(zidt, adj_w_ref[...]),                   # conv_adj (pre-transposed) + bn_adj
                    adj_bn_ref[0], adj_bn_ref[1])
    z2 = zadj + zidt                                             # z += z_idt
    zw = _bn_rows(_mm(wg_w_ref[...], z2), wg_bn_ref[0], wg_bn_ref[1], C2)      # (32, 8)
    y = jnp.concatenate(
        [_mm(zw[C2 * n:C2 * (n + 1)], bt[C1 * n:C1 * (n + 1)]) for n in range(2)],
        axis=0)                                                  # (32, 256) = z @ b
    g3 = _bn_rows(_mm(w3_ref[...], y), bn3_ref[0], bn3_ref[1], PLANES)         # conv3 + bn3
    gout = jnp.maximum(x + g3, 0.0)

    # ---- final: conv1x1(cat(slf, g_out)) + BN (concat removed via weight split) ----
    fin = _bn_rows(fin + _mm(fb_w_ref[...], gout),
                   fin_bn_ref[0], fin_bn_ref[1], PLANES)
    o_ref[...] = fin.reshape(2, PLANES, P).astype(o_ref.dtype)


# ----------------------------------------------------------------------------
# init-time constant builders (plain JAX, one-time, folded into params)
# ----------------------------------------------------------------------------
def _interp_matrix(out_size, in_size):
    """Bilinear (align_corners=True) 1-D interpolation matrix (out, in)."""
    if in_size == 1:
        return jnp.ones((out_size, 1), jnp.float32)
    src = jnp.arange(out_size, dtype=jnp.float32) * ((in_size - 1) / (out_size - 1))
    i0 = jnp.clip(jnp.floor(src).astype(jnp.int32), 0, in_size - 1)
    i1 = jnp.clip(i0 + 1, 0, in_size - 1)
    w1 = src - i0.astype(jnp.float32)
    w0 = 1.0 - w1
    m0 = jax.nn.one_hot(i0, in_size, dtype=jnp.float32) * w0[:, None]
    m1 = jax.nn.one_hot(i1, in_size, dtype=jnp.float32) * w1[:, None]
    return m0 + m1


def _tap_stack(hi, wi):
    """(9*hi*wi, ho*wo) bf16: vertically stacked, TRANSPOSED 0/1 gather matrices for
       a 3x3 stride-2 pad-1 depthwise conv; tap k = kh*3 + kw; OOB taps are zero."""
    ho, wo = hi // 2, wi // 2
    blocks = []
    for kh in range(3):
        for kw in range(3):
            sh = 2 * jnp.arange(ho) + kh - 1
            sw = 2 * jnp.arange(wo) + kw - 1
            rh = (sh[:, None] == jnp.arange(hi)[None, :]).astype(jnp.float32)  # (ho, hi)
            rw = (sw[:, None] == jnp.arange(wi)[None, :]).astype(jnp.float32)  # (wo, wi)
            blocks.append(jnp.kron(rh, rw).T)                                  # (hi*wi, ho*wo)
    return jnp.concatenate(blocks, axis=0).astype(jnp.bfloat16)


# ----------------------------------------------------------------------------
# parameters (deterministic, synthetic) in kernel-ready layouts
# ----------------------------------------------------------------------------
def make_params():
    keys = iter(jax.random.split(jax.random.PRNGKey(0), 64))

    def rnd(shape, scale=0.1):
        return (scale * jax.random.normal(next(keys), shape)).astype(jnp.float32)

    def blockdiag(w):                       # shared 1x1-conv weight -> 2-batch block-diag
        co, ci = w.shape
        z = jnp.zeros((co, ci), jnp.float32)
        return jnp.concatenate([jnp.concatenate([w, z], axis=1),
                                jnp.concatenate([z, w], axis=1)], axis=0)

    def tile2(v):                           # (C, 1) -> (2C, 1) (same params for both batches)
        return jnp.concatenate([v, v], axis=0)

    def bn_rows(c):
        g = 1.0 + rnd((c, 1), 0.1)
        b = rnd((c, 1), 0.05)
        return jnp.stack([tile2(g), tile2(b)])          # (2, 2c, 1)

    def bn_cols(c):
        g = 1.0 + rnd((1, c), 0.1)
        b = rnd((1, c), 0.05)
        return jnp.stack([g, b])                        # (2, 1, c)

    p = {}

    # local branch: 3 depthwise 3x3 s2 convs (per-channel tap weights, no bias) + BN
    dw_cols, dw_bn = [], []
    for _ in range(3):
        w = rnd((PLANES, 9), 0.2)                       # (channel, tap)
        dw_cols.append(jnp.concatenate([w, w], axis=0))  # tiled over batch rows -> (64, 9)
        g = 1.0 + rnd((PLANES, 1), 0.1)
        b = rnd((PLANES, 1), 0.05)
        dw_bn += [tile2(g), tile2(b)]
    p["dww"] = jnp.concatenate(dw_cols, axis=1)         # (64, 27)
    p["dwbn"] = jnp.stack(dw_bn)                        # (6, 64, 1)

    # SpatialGCN: fused k/v/q projection, conv_wg, out conv (all block-diag over batch)
    kvq = jnp.concatenate([rnd((INTER, PLANES)) for _ in range(3)], axis=0)      # (48, 32)
    kvq_b = jnp.concatenate([rnd((INTER, 1), 0.05) for _ in range(3)], axis=0)   # (48, 1)
    p["kvq_w"] = blockdiag(kvq)                         # (96, 64)
    p["kvq_b"] = tile2(kvq_b)                           # (96, 1)
    p["gwg_w"] = blockdiag(rnd((INTER, INTER)))         # (32, 32)
    p["gwg_bn"] = bn_rows(INTER)                        # (2, 32, 1)
    p["gout_w"] = blockdiag(rnd((PLANES, INTER)))       # (64, 32)
    p["gout_b"] = tile2(rnd((PLANES, 1), 0.05))         # (64, 1)
    p["gout_bn"] = bn_rows(PLANES)                      # (2, 64, 1)

    # interaction-space branch (conv_adj pre-transposed; others block-diag)
    p["phi_w"] = blockdiag(rnd((C2, PLANES)));   p["phi_bn"] = bn_rows(C2)
    p["th_w"] = blockdiag(rnd((C1, PLANES)));    p["th_bn"] = bn_rows(C1)
    p["adj_w"] = rnd((C1, C1)).T;                p["adj_bn"] = bn_cols(C1)
    p["wg_w"] = blockdiag(rnd((C2, C2)));        p["wg_bn"] = bn_rows(C2)
    p["conv3_w"] = blockdiag(rnd((PLANES, C2))); p["bn3"] = bn_rows(PLANES)

    # final 1x1 conv over cat(slf, g_out): split into two halves, block-diag over batch
    fw = rnd((PLANES, 2 * PLANES))
    p["fa_w"] = blockdiag(fw[:, :PLANES])               # (64, 64)
    p["fb_w"] = blockdiag(fw[:, PLANES:])               # (64, 64)
    p["fin_bn"] = bn_rows(PLANES)

    # constants: stacked transposed tap matrices (bf16, exact 0/1) + upsample matrix
    p["t1"] = _tap_stack(H, W)                          # (2304, 64) bf16
    p["t2"] = _tap_stack(H // 2, W // 2)                # (576, 16)  bf16
    p["t3"] = _tap_stack(H // 4, W // 4)                # (144, 4)   bf16
    p["mt"] = jnp.transpose(jnp.kron(_interp_matrix(H, H // 8),
                                     _interp_matrix(W, W // 8)))      # (4, 256)
    return p


# ----------------------------------------------------------------------------
# wrapper: one pallas_call, full-array blocks
# ----------------------------------------------------------------------------
_INPUT_KEYS = ("t1", "t2", "t3", "dww", "dwbn",
               "kvq_w", "kvq_b", "gwg_w", "gwg_bn", "gout_w", "gout_b", "gout_bn",
               "mt",
               "phi_w", "phi_bn", "th_w", "th_bn",
               "adj_w", "adj_bn", "wg_w", "wg_bn",
               "conv3_w", "bn3", "fa_w", "fb_w", "fin_bn")


def _fullspec(a):
    nd = a.ndim
    return pl.BlockSpec(a.shape, lambda i, nd=nd: (0,) * nd)


def spin_forward(feat_nchw, p):
    nb, c, hh, ww = feat_nchw.shape
    x_cf = feat_nchw.reshape(nb, c, hh * ww)             # free reshape of NCHW
    inputs = [x_cf] + [p[k] for k in _INPUT_KEYS]
    out = pl.pallas_call(
        _spin_kernel,
        grid=(1,),
        in_specs=[_fullspec(a) for a in inputs],
        out_specs=pl.BlockSpec((nb, c, hh * ww), lambda i: (0, 0, 0)),
        out_shape=jax.ShapeDtypeStruct((nb, c, hh * ww), jnp.float32),
        compiler_params=pltpu.CompilerParams(dimension_semantics=("arbitrary",)),
    )(*inputs)
    return out.reshape(nb, c, hh, ww)


if __name__ == "__main__":
    params = make_params()
    x = jax.random.normal(jax.random.PRNGKey(0), (N, PLANES, H, W), dtype=jnp.float32)
    fwd = jax.jit(spin_forward)
    out = jax.block_until_ready(fwd(x, params))
    assert out.shape == (N, PLANES, H, W)
    assert bool(jnp.all(jnp.isfinite(out)))
    print("KERNEL_OK")
</pallas_src>

<mosaic_0001>
module attributes {stable_mosaic.version = 11 : i64} {
  func.func @_spin_kernel(%arg0: i32, %arg1: memref<2x32x256xf32, #tpu.memory_space<vmem>>, %arg2: memref<2304x64xbf16, #tpu.memory_space<vmem>>, %arg3: memref<576x16xbf16, #tpu.memory_space<vmem>>, %arg4: memref<144x4xbf16, #tpu.memory_space<vmem>>, %arg5: memref<64x27xf32, #tpu.memory_space<vmem>>, %arg6: memref<6x64x1xf32, #tpu.memory_space<vmem>>, %arg7: memref<96x64xf32, #tpu.memory_space<vmem>>, %arg8: memref<96x1xf32, #tpu.memory_space<vmem>>, %arg9: memref<32x32xf32, #tpu.memory_space<vmem>>, %arg10: memref<2x32x1xf32, #tpu.memory_space<vmem>>, %arg11: memref<64x32xf32, #tpu.memory_space<vmem>>, %arg12: memref<64x1xf32, #tpu.memory_space<vmem>>, %arg13: memref<2x64x1xf32, #tpu.memory_space<vmem>>, %arg14: memref<4x256xf32, #tpu.memory_space<vmem>>, %arg15: memref<32x64xf32, #tpu.memory_space<vmem>>, %arg16: memref<2x32x1xf32, #tpu.memory_space<vmem>>, %arg17: memref<16x64xf32, #tpu.memory_space<vmem>>, %arg18: memref<2x16x1xf32, #tpu.memory_space<vmem>>, %arg19: memref<8x8xf32, #tpu.memory_space<vmem>>, %arg20: memref<2x1x8xf32, #tpu.memory_space<vmem>>, %arg21: memref<32x32xf32, #tpu.memory_space<vmem>>, %arg22: memref<2x32x1xf32, #tpu.memory_space<vmem>>, %arg23: memref<64x32xf32, #tpu.memory_space<vmem>>, %arg24: memref<2x64x1xf32, #tpu.memory_space<vmem>>, %arg25: memref<64x64xf32, #tpu.memory_space<vmem>>, %arg26: memref<64x64xf32, #tpu.memory_space<vmem>>, %arg27: memref<2x64x1xf32, #tpu.memory_space<vmem>>, %arg28: memref<2x32x256xf32, #tpu.memory_space<vmem>>) attributes {dimension_semantics = [#tpu.dimension_semantics<arbitrary>], iteration_bounds = array<i64: 1>, scalar_prefetch = 0 : i64, scratch_operands = 0 : i64, tpu.core_type = #tpu.core_type<tc>, window_params = [{pipeline_mode = #tpu.pipeline_mode<synchronous>, transform_indices = @transform_0, window_bounds = array<i64: 2, 32, 256>}, {pipeline_mode = #tpu.pipeline_mode<synchronous>, transform_indices = @transform_1, window_bounds = array<i64: 2304, 64>}, {pipeline_mode = #tpu.pipeline_mode<synchronous>, transform_indices = @transform_2, window_bounds = array<i64: 576, 16>}, {pipeline_mode = #tpu.pipeline_mode<synchronous>, transform_indices = @transform_3, window_bounds = array<i64: 144, 4>}, {pipeline_mode = #tpu.pipeline_mode<synchronous>, transform_indices = @transform_4, window_bounds = array<i64: 64, 27>}, {pipeline_mode = #tpu.pipeline_mode<synchronous>, transform_indices = @transform_5, window_bounds = array<i64: 6, 64, 1>}, {pipeline_mode = #tpu.pipeline_mode<synchronous>, transform_indices = @transform_6, window_bounds = array<i64: 96, 64>}, {pipeline_mode = #tpu.pipeline_mode<synchronous>, transform_indices = @transform_7, window_bounds = array<i64: 96, 1>}, {pipeline_mode = #tpu.pipeline_mode<synchronous>, transform_indices = @transform_8, window_bounds = array<i64: 32, 32>}, {pipeline_mode = #tpu.pipeline_mode<synchronous>, transform_indices = @transform_9, window_bounds = array<i64: 2, 32, 1>}, {pipeline_mode = #tpu.pipeline_mode<synchronous>, transform_indices = @transform_10, window_bounds = array<i64: 64, 32>}, {pipeline_mode = #tpu.pipeline_mode<synchronous>, transform_indices = @transform_11, window_bounds = array<i64: 64, 1>}, {pipeline_mode = #tpu.pipeline_mode<synchronous>, transform_indices = @transform_12, window_bounds = array<i64: 2, 64, 1>}, {pipeline_mode = #tpu.pipeline_mode<synchronous>, transform_indices = @transform_13, window_bounds = array<i64: 4, 256>}, {pipeline_mode = #tpu.pipeline_mode<synchronous>, transform_indices = @transform_14, window_bounds = array<i64: 32, 64>}, {pipeline_mode = #tpu.pipeline_mode<synchronous>, transform_indices = @transform_15, window_bounds = array<i64: 2, 32, 1>}, {pipeline_mode = #tpu.pipeline_mode<synchronous>, transform_indices = @transform_16, window_bounds = array<i64: 16, 64>}, {pipeline_mode = #tpu.pipeline_mode<synchronous>, transform_indices = @transform_17, window_bounds = array<i64: 2, 16, 1>}, {pipeline_mode = #tpu.pipeline_mode<synchronous>, transform_indices = @transform_18, window_bounds = array<i64: 8, 8>}, {pipeline_mode = #tpu.pipeline_mode<synchronous>, transform_indices = @transform_19, window_bounds = array<i64: 2, 1, 8>}, {pipeline_mode = #tpu.pipeline_mode<synchronous>, transform_indices = @transform_20, window_bounds = array<i64: 32, 32>}, {pipeline_mode = #tpu.pipeline_mode<synchronous>, transform_indices = @transform_21, window_bounds = array<i64: 2, 32, 1>}, {pipeline_mode = #tpu.pipeline_mode<synchronous>, transform_indices = @transform_22, window_bounds = array<i64: 64, 32>}, {pipeline_mode = #tpu.pipeline_mode<synchronous>, transform_indices = @transform_23, window_bounds = array<i64: 2, 64, 1>}, {pipeline_mode = #tpu.pipeline_mode<synchronous>, transform_indices = @transform_24, window_bounds = array<i64: 64, 64>}, {pipeline_mode = #tpu.pipeline_mode<synchronous>, transform_indices = @transform_25, window_bounds = array<i64: 64, 64>}, {pipeline_mode = #tpu.pipeline_mode<synchronous>, transform_indices = @transform_26, window_bounds = array<i64: 2, 64, 1>}, {pipeline_mode = #tpu.pipeline_mode<synchronous>, transform_indices = @transform_27, window_bounds = array<i64: 2, 32, 256>}]} {
    %c0 = arith.constant 0 : index
    %c0_0 = arith.constant 0 : index
    %c0_1 = arith.constant 0 : index
    %0 = vector.load %arg1[%c0, %c0_0, %c0_1] : memref<2x32x256xf32, #tpu.memory_space<vmem>>, vector<2x32x256xf32>
    %1 = vector.shape_cast %0 : vector<2x32x256xf32> to vector<64x256xf32>
    %c0_2 = arith.constant 0 : index
    %c0_3 = arith.constant 0 : index
    %2 = vector.load %arg5[%c0_2, %c0_3] : memref<64x27xf32, #tpu.memory_space<vmem>>, vector<64x1xf32>
    %3 = vector.broadcast %2 : vector<64x1xf32> to vector<64x256xf32>
    %4 = arith.mulf %1, %3 : vector<64x256xf32>
    %c0_4 = arith.constant 0 : index
    %c1 = arith.constant 1 : index
    %5 = vector.load %arg5[%c0_4, %c1] : memref<64x27xf32, #tpu.memory_space<vmem>>, vector<64x1xf32>
    %6 = vector.broadcast %5 : vector<64x1xf32> to vector<64x256xf32>
    %7 = arith.mulf %1, %6 : vector<64x256xf32>
    %c0_5 = arith.constant 0 : index
    %c2 = arith.constant 2 : index
    %8 = vector.load %arg5[%c0_5, %c2] : memref<64x27xf32, #tpu.memory_space<vmem>>, vector<64x1xf32>
    %9 = vector.broadcast %8 : vector<64x1xf32> to vector<64x256xf32>
    %10 = arith.mulf %1, %9 : vector<64x256xf32>
    %c0_6 = arith.constant 0 : index
    %c3 = arith.constant 3 : index
    %11 = vector.load %arg5[%c0_6, %c3] : memref<64x27xf32, #tpu.memory_space<vmem>>, vector<64x1xf32>
    %12 = vector.broadcast %11 : vector<64x1xf32> to vector<64x256xf32>
    %13 = arith.mulf %1, %12 : vector<64x256xf32>
    %c0_7 = arith.constant 0 : index
    %c4 = arith.constant 4 : index
    %14 = vector.load %arg5[%c0_7, %c4] : memref<64x27xf32, #tpu.memory_space<vmem>>, vector<64x1xf32>
    %15 = vector.broadcast %14 : vector<64x1xf32> to vector<64x256xf32>
    %16 = arith.mulf %1, %15 : vector<64x256xf32>
    %c0_8 = arith.constant 0 : index
    %c5 = arith.constant 5 : index
    %17 = vector.load %arg5[%c0_8, %c5] : memref<64x27xf32, #tpu.memory_space<vmem>>, vector<64x1xf32>
    %18 = vector.broadcast %17 : vector<64x1xf32> to vector<64x256xf32>
    %19 = arith.mulf %1, %18 : vector<64x256xf32>
    %c0_9 = arith.constant 0 : index
    %c6 = arith.constant 6 : index
    %20 = vector.load %arg5[%c0_9, %c6] : memref<64x27xf32, #tpu.memory_space<vmem>>, vector<64x1xf32>
    %21 = vector.broadcast %20 : vector<64x1xf32> to vector<64x256xf32>
    %22 = arith.mulf %1, %21 : vector<64x256xf32>
    %c0_10 = arith.constant 0 : index
    %c7 = arith.constant 7 : index
    %23 = vector.load %arg5[%c0_10, %c7] : memref<64x27xf32, #tpu.memory_space<vmem>>, vector<64x1xf32>
    %24 = vector.broadcast %23 : vector<64x1xf32> to vector<64x256xf32>
    %25 = arith.mulf %1, %24 : vector<64x256xf32>
    %c0_11 = arith.constant 0 : index
    %c8 = arith.constant 8 : index
    %26 = vector.load %arg5[%c0_11, %c8] : memref<64x27xf32, #tpu.memory_space<vmem>>, vector<64x1xf32>
    %27 = vector.broadcast %26 : vector<64x1xf32> to vector<64x256xf32>
    %28 = arith.mulf %1, %27 : vector<64x256xf32>
    %29 = tpu.concatenate %4, %7, %10, %13, %16, %19, %22, %25, %28 in 1 : vector<64x256xf32>, vector<64x256xf32>, vector<64x256xf32>, vector<64x256xf32>, vector<64x256xf32>, vector<64x256xf32>, vector<64x256xf32>, vector<64x256xf32>, vector<64x256xf32> -> vector<64x2304xf32>
    %c0_12 = arith.constant 0 : index
    %c0_13 = arith.constant 0 : index
    %30 = vector.load %arg2[%c0_12, %c0_13] : memref<2304x64xbf16, #tpu.memory_space<vmem>>, vector<2304x64xbf16>
    %31 = arith.extf %30 : vector<2304x64xbf16> to vector<2304x64xf32>
    %cst = arith.constant dense<0.000000e+00> : vector<64x64xf32>
    %32 = tpu.matmul %29, %31, %cst {dimension_numbers = #tpu.dot_dimension_numbers<[1], [0], [0], [1], [0, 0, 1, 1], [], []>} : vector<64x2304xf32>, vector<2304x64xf32>, vector<64x64xf32> -> vector<64x64xf32>
    %c0_14 = arith.constant 0 : index
    %c0_15 = arith.constant 0 : index
    %c0_16 = arith.constant 0 : index
    %33 = vector.load %arg6[%c0_14, %c0_15, %c0_16] : memref<6x64x1xf32, #tpu.memory_space<vmem>>, vector<1x64x1xf32>
    %34 = vector.shape_cast %33 : vector<1x64x1xf32> to vector<64x1xf32>
    %c1_17 = arith.constant 1 : index
    %c0_18 = arith.constant 0 : index
    %c0_19 = arith.constant 0 : index
    %35 = vector.load %arg6[%c1_17, %c0_18, %c0_19] : memref<6x64x1xf32, #tpu.memory_space<vmem>>, vector<1x64x1xf32>
    %36 = vector.shape_cast %35 : vector<1x64x1xf32> to vector<64x1xf32>
    %cst_20 = arith.constant dense<0.000000e+00> : vector<64xf32>
    %37 = vector.multi_reduction <add>, %32, %cst_20 [1] : vector<64x64xf32> to vector<64xf32>
    %38 = vector.shape_cast %37 : vector<64xf32> to vector<64x1xf32>
    %39 = arith.mulf %32, %32 : vector<64x64xf32>
    %cst_21 = arith.constant dense<0.000000e+00> : vector<64xf32>
    %40 = vector.multi_reduction <add>, %39, %cst_21 [1] : vector<64x64xf32> to vector<64xf32>
    %41 = vector.shape_cast %40 : vector<64xf32> to vector<64x1xf32>
    %42 = vector.extract_strided_slice %38 {offsets = [0, 0], sizes = [32, 1], strides = [1, 1]} : vector<64x1xf32> to vector<32x1xf32>
    %43 = vector.extract_strided_slice %38 {offsets = [32, 0], sizes = [32, 1], strides = [1, 1]} : vector<64x1xf32> to vector<32x1xf32>
    %44 = arith.addf %42, %43 : vector<32x1xf32>
    %45 = vector.extract_strided_slice %41 {offsets = [0, 0], sizes = [32, 1], strides = [1, 1]} : vector<64x1xf32> to vector<32x1xf32>
    %46 = vector.extract_strided_slice %41 {offsets = [32, 0], sizes = [32, 1], strides = [1, 1]} : vector<64x1xf32> to vector<32x1xf32>
    %47 = arith.addf %45, %46 : vector<32x1xf32>
    %cst_22 = arith.constant 1.280000e+02 : f32
    %48 = vector.broadcast %cst_22 : f32 to vector<32x1xf32>
    %49 = arith.divf %44, %48 : vector<32x1xf32>
    %cst_23 = arith.constant 1.280000e+02 : f32
    %50 = vector.broadcast %cst_23 : f32 to vector<32x1xf32>
    %51 = arith.divf %47, %50 : vector<32x1xf32>
    %52 = arith.mulf %49, %49 : vector<32x1xf32>
    %53 = arith.subf %51, %52 : vector<32x1xf32>
    %cst_24 = arith.constant 0.000000e+00 : f32
    %54 = vector.broadcast %cst_24 : f32 to vector<32x1xf32>
    %55 = arith.maximumf %53, %54 : vector<32x1xf32>
    %cst_25 = arith.constant 9.99999974E-6 : f32
    %56 = vector.broadcast %cst_25 : f32 to vector<32x1xf32>
    %57 = arith.addf %55, %56 : vector<32x1xf32>
    %58 = math.rsqrt %57 : vector<32x1xf32>
    %59 = tpu.concatenate %49, %49 in 0 : vector<32x1xf32>, vector<32x1xf32> -> vector<64x1xf32>
    %60 = tpu.concatenate %58, %58 in 0 : vector<32x1xf32>, vector<32x1xf32> -> vector<64x1xf32>
    %61 = vector.broadcast %59 : vector<64x1xf32> to vector<64x64xf32>
    %62 = arith.subf %32, %61 : vector<64x64xf32>
    %63 = vector.broadcast %34 : vector<64x1xf32> to vector<64x64xf32>
    %64 = arith.mulf %63, %62 : vector<64x64xf32>
    %65 = vector.broadcast %60 : vector<64x1xf32> to vector<64x64xf32>
    %66 = arith.mulf %64, %65 : vector<64x64xf32>
    %67 = vector.broadcast %36 : vector<64x1xf32> to vector<64x64xf32>
    %68 = arith.addf %66, %67 : vector<64x64xf32>
    %c0_26 = arith.constant 0 : index
    %c9 = arith.constant 9 : index
    %69 = vector.load %arg5[%c0_26, %c9] : memref<64x27xf32, #tpu.memory_space<vmem>>, vector<64x1xf32>
    %70 = vector.broadcast %69 : vector<64x1xf32> to vector<64x64xf32>
    %71 = arith.mulf %68, %70 : vector<64x64xf32>
    %c0_27 = arith.constant 0 : index
    %c10 = arith.constant 10 : index
    %72 = vector.load %arg5[%c0_27, %c10] : memref<64x27xf32, #tpu.memory_space<vmem>>, vector<64x1xf32>
    %73 = vector.broadcast %72 : vector<64x1xf32> to vector<64x64xf32>
    %74 = arith.mulf %68, %73 : vector<64x64xf32>
    %c0_28 = arith.constant 0 : index
    %c11 = arith.constant 11 : index
    %75 = vector.load %arg5[%c0_28, %c11] : memref<64x27xf32, #tpu.memory_space<vmem>>, vector<64x1xf32>
    %76 = vector.broadcast %75 : vector<64x1xf32> to vector<64x64xf32>
    %77 = arith.mulf %68, %76 : vector<64x64xf32>
    %c0_29 = arith.constant 0 : index
    %c12 = arith.constant 12 : index
    %78 = vector.load %arg5[%c0_29, %c12] : memref<64x27xf32, #tpu.memory_space<vmem>>, vector<64x1xf32>
    %79 = vector.broadcast %78 : vector<64x1xf32> to vector<64x64xf32>
    %80 = arith.mulf %68, %79 : vector<64x64xf32>
    %c0_30 = arith.constant 0 : index
    %c13 = arith.constant 13 : index
    %81 = vector.load %arg5[%c0_30, %c13] : memref<64x27xf32, #tpu.memory_space<vmem>>, vector<64x1xf32>
    %82 = vector.broadcast %81 : vector<64x1xf32> to vector<64x64xf32>
    %83 = arith.mulf %68, %82 : vector<64x64xf32>
    %c0_31 = arith.constant 0 : index
    %c14 = arith.constant 14 : index
    %84 = vector.load %arg5[%c0_31, %c14] : memref<64x27xf32, #tpu.memory_space<vmem>>, vector<64x1xf32>
    %85 = vector.broadcast %84 : vector<64x1xf32> to vector<64x64xf32>
    %86 = arith.mulf %68, %85 : vector<64x64xf32>
    %c0_32 = arith.constant 0 : index
    %c15 = arith.constant 15 : index
    %87 = vector.load %arg5[%c0_32, %c15] : memref<64x27xf32, #tpu.memory_space<vmem>>, vector<64x1xf32>
    %88 = vector.broadcast %87 : vector<64x1xf32> to vector<64x64xf32>
    %89 = arith.mulf %68, %88 : vector<64x64xf32>
    %c0_33 = arith.constant 0 : index
    %c16 = arith.constant 16 : index
    %90 = vector.load %arg5[%c0_33, %c16] : memref<64x27xf32, #tpu.memory_space<vmem>>, vector<64x1xf32>
    %91 = vector.broadcast %90 : vector<64x1xf32> to vector<64x64xf32>
    %92 = arith.mulf %68, %91 : vector<64x64xf32>
    %c0_34 = arith.constant 0 : index
    %c17 = arith.constant 17 : index
    %93 = vector.load %arg5[%c0_34, %c17] : memref<64x27xf32, #tpu.memory_space<vmem>>, vector<64x1xf32>
    %94 = vector.broadcast %93 : vector<64x1xf32> to vector<64x64xf32>
    %95 = arith.mulf %68, %94 : vector<64x64xf32>
    %96 = tpu.concatenate %71, %74, %77, %80, %83, %86, %89, %92, %95 in 1 : vector<64x64xf32>, vector<64x64xf32>, vector<64x64xf32>, vector<64x64xf32>, vector<64x64xf32>, vector<64x64xf32>, vector<64x64xf32>, vector<64x64xf32>, vector<64x64xf32> -> vector<64x576xf32>
    %c0_35 = arith.constant 0 : index
    %c0_36 = arith.constant 0 : index
    %97 = vector.load %arg3[%c0_35, %c0_36] : memref<576x16xbf16, #tpu.memory_space<vmem>>, vector<576x16xbf16>
    %98 = arith.extf %97 : vector<576x16xbf16> to vector<576x16xf32>
    %cst_37 = arith.constant dense<0.000000e+00> : vector<64x16xf32>
    %99 = tpu.matmul %96, %98, %cst_37 {dimension_numbers = #tpu.dot_dimension_numbers<[1], [0], [0], [1], [0, 0, 1, 1], [], []>} : vector<64x576xf32>, vector<576x16xf32>, vector<64x16xf32> -> vector<64x16xf32>
    %c2_38 = arith.constant 2 : index
    %c0_39 = arith.constant 0 : index
    %c0_40 = arith.constant 0 : index
    %100 = vector.load %arg6[%c2_38, %c0_39, %c0_40] : memref<6x64x1xf32, #tpu.memory_space<vmem>>, vector<1x64x1xf32>
    %101 = vector.shape_cast %100 : vector<1x64x1xf32> to vector<64x1xf32>
    %c3_41 = arith.constant 3 : index
    %c0_42 = arith.constant 0 : index
    %c0_43 = arith.constant 0 : index
    %102 = vector.load %arg6[%c3_41, %c0_42, %c0_43] : memref<6x64x1xf32, #tpu.memory_space<vmem>>, vector<1x64x1xf32>
    %103 = vector.shape_cast %102 : vector<1x64x1xf32> to vector<64x1xf32>
    %cst_44 = arith.constant dense<0.000000e+00> : vector<64xf32>
    %104 = vector.multi_reduction <add>, %99, %cst_44 [1] : vector<64x16xf32> to vector<64xf32>
    %105 = vector.shape_cast %104 : vector<64xf32> to vector<64x1xf32>
    %106 = arith.mulf %99, %99 : vector<64x16xf32>
    %cst_45 = arith.constant dense<0.000000e+00> : vector<64xf32>
    %107 = vector.multi_reduction <add>, %106, %cst_45 [1] : vector<64x16xf32> to vector<64xf32>
    %108 = vector.shape_cast %107 : vector<64xf32> to vector<64x1xf32>
    %109 = vector.extract_strided_slice %105 {offsets = [0, 0], sizes = [32, 1], strides = [1, 1]} : vector<64x1xf32> to vector<32x1xf32>
    %110 = vector.extract_strided_slice %105 {offsets = [32, 0], sizes = [32, 1], strides = [1, 1]} : vector<64x1xf32> to vector<32x1xf32>
    %111 = arith.addf %109, %110 : vector<32x1xf32>
    %112 = vector.extract_strided_slice %108 {offsets = [0, 0], sizes = [32, 1], strides = [1, 1]} : vector<64x1xf32> to vector<32x1xf32>
    %113 = vector.extract_strided_slice %108 {offsets = [32, 0], sizes = [32, 1], strides = [1, 1]} : vector<64x1xf32> to vector<32x1xf32>
    %114 = arith.addf %112, %113 : vector<32x1xf32>
    %cst_46 = arith.constant 3.200000e+01 : f32
    %115 = vector.broadcast %cst_46 : f32 to vector<32x1xf32>
    %116 = arith.divf %111, %115 : vector<32x1xf32>
    %cst_47 = arith.constant 3.200000e+01 : f32
    %117 = vector.broadcast %cst_47 : f32 to vector<32x1xf32>
    %118 = arith.divf %114, %117 : vector<32x1xf32>
    %119 = arith.mulf %116, %116 : vector<32x1xf32>
    %120 = arith.subf %118, %119 : vector<32x1xf32>
    %cst_48 = arith.constant 0.000000e+00 : f32
    %121 = vector.broadcast %cst_48 : f32 to vector<32x1xf32>
    %122 = arith.maximumf %120, %121 : vector<32x1xf32>
    %cst_49 = arith.constant 9.99999974E-6 : f32
    %123 = vector.broadcast %cst_49 : f32 to vector<32x1xf32>
    %124 = arith.addf %122, %123 : vector<32x1xf32>
    %125 = math.rsqrt %124 : vector<32x1xf32>
    %126 = tpu.concatenate %116, %116 in 0 : vector<32x1xf32>, vector<32x1xf32> -> vector<64x1xf32>
    %127 = tpu.concatenate %125, %125 in 0 : vector<32x1xf32>, vector<32x1xf32> -> vector<64x1xf32>
    %128 = vector.broadcast %126 : vector<64x1xf32> to vector<64x16xf32>
    %129 = arith.subf %99, %128 : vector<64x16xf32>
    %130 = vector.broadcast %101 : vector<64x1xf32> to vector<64x16xf32>
    %131 = arith.mulf %130, %129 : vector<64x16xf32>
    %132 = vector.broadcast %127 : vector<64x1xf32> to vector<64x16xf32>
    %133 = arith.mulf %131, %132 : vector<64x16xf32>
    %134 = vector.broadcast %103 : vector<64x1xf32> to vector<64x16xf32>
    %135 = arith.addf %133, %134 : vector<64x16xf32>
    %c0_50 = arith.constant 0 : index
    %c18 = arith.constant 18 : index
    %136 = vector.load %arg5[%c0_50, %c18] : memref<64x27xf32, #tpu.memory_space<vmem>>, vector<64x1xf32>
    %137 = vector.broadcast %136 : vector<64x1xf32> to vector<64x16xf32>
    %138 = arith.mulf %135, %137 : vector<64x16xf32>
    %c0_51 = arith.constant 0 : index
    %c19 = arith.constant 19 : index
    %139 = vector.load %arg5[%c0_51, %c19] : memref<64x27xf32, #tpu.memory_space<vmem>>, vector<64x1xf32>
    %140 = vector.broadcast %139 : vector<64x1xf32> to vector<64x16xf32>
    %141 = arith.mulf %135, %140 : vector<64x16xf32>
    %c0_52 = arith.constant 0 : index
    %c20 = arith.constant 20 : index
    %142 = vector.load %arg5[%c0_52, %c20] : memref<64x27xf32, #tpu.memory_space<vmem>>, vector<64x1xf32>
    %143 = vector.broadcast %142 : vector<64x1xf32> to vector<64x16xf32>
    %144 = arith.mulf %135, %143 : vector<64x16xf32>
    %c0_53 = arith.constant 0 : index
    %c21 = arith.constant 21 : index
    %145 = vector.load %arg5[%c0_53, %c21] : memref<64x27xf32, #tpu.memory_space<vmem>>, vector<64x1xf32>
    %146 = vector.broadcast %145 : vector<64x1xf32> to vector<64x16xf32>
    %147 = arith.mulf %135, %146 : vector<64x16xf32>
    %c0_54 = arith.constant 0 : index
    %c22 = arith.constant 22 : index
    %148 = vector.load %arg5[%c0_54, %c22] : memref<64x27xf32, #tpu.memory_space<vmem>>, vector<64x1xf32>
    %149 = vector.broadcast %148 : vector<64x1xf32> to vector<64x16xf32>
    %150 = arith.mulf %135, %149 : vector<64x16xf32>
    %c0_55 = arith.constant 0 : index
    %c23 = arith.constant 23 : index
    %151 = vector.load %arg5[%c0_55, %c23] : memref<64x27xf32, #tpu.memory_space<vmem>>, vector<64x1xf32>
    %152 = vector.broadcast %151 : vector<64x1xf32> to vector<64x16xf32>
    %153 = arith.mulf %135, %152 : vector<64x16xf32>
    %c0_56 = arith.constant 0 : index
    %c24 = arith.constant 24 : index
    %154 = vector.load %arg5[%c0_56, %c24] : memref<64x27xf32, #tpu.memory_space<vmem>>, vector<64x1xf32>
    %155 = vector.broadcast %154 : vector<64x1xf32> to vector<64x16xf32>
    %156 = arith.mulf %135, %155 : vector<64x16xf32>
    %c0_57 = arith.constant 0 : index
    %c25 = arith.constant 25 : index
    %157 = vector.load %arg5[%c0_57, %c25] : memref<64x27xf32, #tpu.memory_space<vmem>>, vector<64x1xf32>
    %158 = vector.broadcast %157 : vector<64x1xf32> to vector<64x16xf32>
    %159 = arith.mulf %135, %158 : vector<64x16xf32>
    %c0_58 = arith.constant 0 : index
    %c26 = arith.constant 26 : index
    %160 = vector.load %arg5[%c0_58, %c26] : memref<64x27xf32, #tpu.memory_space<vmem>>, vector<64x1xf32>
    %161 = vector.broadcast %160 : vector<64x1xf32> to vector<64x16xf32>
    %162 = arith.mulf %135, %161 : vector<64x16xf32>
    %163 = tpu.concatenate %138, %141, %144, %147, %150, %153, %156, %159, %162 in 1 : vector<64x16xf32>, vector<64x16xf32>, vector<64x16xf32>, vector<64x16xf32>, vector<64x16xf32>, vector<64x16xf32>, vector<64x16xf32>, vector<64x16xf32>, vector<64x16xf32> -> vector<64x144xf32>
    %c0_59 = arith.constant 0 : index
    %c0_60 = arith.constant 0 : index
    %164 = vector.load %arg4[%c0_59, %c0_60] : memref<144x4xbf16, #tpu.memory_space<vmem>>, vector<144x4xbf16>
    %165 = arith.extf %164 : vector<144x4xbf16> to vector<144x4xf32>
    %cst_61 = arith.constant dense<0.000000e+00> : vector<64x4xf32>
    %166 = tpu.matmul %163, %165, %cst_61 {dimension_numbers = #tpu.dot_dimension_numbers<[1], [0], [0], [1], [0, 0, 1, 1], [], []>} : vector<64x144xf32>, vector<144x4xf32>, vector<64x4xf32> -> vector<64x4xf32>
    %c4_62 = arith.constant 4 : index
    %c0_63 = arith.constant 0 : index
    %c0_64 = arith.constant 0 : index
    %167 = vector.load %arg6[%c4_62, %c0_63, %c0_64] : memref<6x64x1xf32, #tpu.memory_space<vmem>>, vector<1x64x1xf32>
    %168 = vector.shape_cast %167 : vector<1x64x1xf32> to vector<64x1xf32>
    %c5_65 = arith.constant 5 : index
    %c0_66 = arith.constant 0 : index
    %c0_67 = arith.constant 0 : index
    %169 = vector.load %arg6[%c5_65, %c0_66, %c0_67] : memref<6x64x1xf32, #tpu.memory_space<vmem>>, vector<1x64x1xf32>
    %170 = vector.shape_cast %169 : vector<1x64x1xf32> to vector<64x1xf32>
    %cst_68 = arith.constant dense<0.000000e+00> : vector<64xf32>
    %171 = vector.multi_reduction <add>, %166, %cst_68 [1] : vector<64x4xf32> to vector<64xf32>
    %172 = vector.shape_cast %171 : vector<64xf32> to vector<64x1xf32>
    %173 = arith.mulf %166, %166 : vector<64x4xf32>
    %cst_69 = arith.constant dense<0.000000e+00> : vector<64xf32>
    %174 = vector.multi_reduction <add>, %173, %cst_69 [1] : vector<64x4xf32> to vector<64xf32>
    %175 = vector.shape_cast %174 : vector<64xf32> to vector<64x1xf32>
    %176 = vector.extract_strided_slice %172 {offsets = [0, 0], sizes = [32, 1], strides = [1, 1]} : vector<64x1xf32> to vector<32x1xf32>
    %177 = vector.extract_strided_slice %172 {offsets = [32, 0], sizes = [32, 1], strides = [1, 1]} : vector<64x1xf32> to vector<32x1xf32>
    %178 = arith.addf %176, %177 : vector<32x1xf32>
    %179 = vector.extract_strided_slice %175 {offsets = [0, 0], sizes = [32, 1], strides = [1, 1]} : vector<64x1xf32> to vector<32x1xf32>
    %180 = vector.extract_strided_slice %175 {offsets = [32, 0], sizes = [32, 1], strides = [1, 1]} : vector<64x1xf32> to vector<32x1xf32>
    %181 = arith.addf %179, %180 : vector<32x1xf32>
    %cst_70 = arith.constant 8.000000e+00 : f32
    %182 = vector.broadcast %cst_70 : f32 to vector<32x1xf32>
    %183 = arith.divf %178, %182 : vector<32x1xf32>
    %cst_71 = arith.constant 8.000000e+00 : f32
    %184 = vector.broadcast %cst_71 : f32 to vector<32x1xf32>
    %185 = arith.divf %181, %184 : vector<32x1xf32>
    %186 = arith.mulf %183, %183 : vector<32x1xf32>
    %187 = arith.subf %185, %186 : vector<32x1xf32>
    %cst_72 = arith.constant 0.000000e+00 : f32
    %188 = vector.broadcast %cst_72 : f32 to vector<32x1xf32>
    %189 = arith.maximumf %187, %188 : vector<32x1xf32>
    %cst_73 = arith.constant 9.99999974E-6 : f32
    %190 = vector.broadcast %cst_73 : f32 to vector<32x1xf32>
    %191 = arith.addf %189, %190 : vector<32x1xf32>
    %192 = math.rsqrt %191 : vector<32x1xf32>
    %193 = tpu.concatenate %183, %183 in 0 : vector<32x1xf32>, vector<32x1xf32> -> vector<64x1xf32>
    %194 = tpu.concatenate %192, %192 in 0 : vector<32x1xf32>, vector<32x1xf32> -> vector<64x1xf32>
    %195 = vector.broadcast %193 : vector<64x1xf32> to vector<64x4xf32>
    %196 = arith.subf %166, %195 : vector<64x4xf32>
    %197 = vector.broadcast %168 : vector<64x1xf32> to vector<64x4xf32>
    %198 = arith.mulf %197, %196 : vector<64x4xf32>
    %199 = vector.broadcast %194 : vector<64x1xf32> to vector<64x4xf32>
    %200 = arith.mulf %198, %199 : vector<64x4xf32>
    %201 = vector.broadcast %170 : vector<64x1xf32> to vector<64x4xf32>
    %202 = arith.addf %200, %201 : vector<64x4xf32>
    %c0_74 = arith.constant 0 : index
    %c0_75 = arith.constant 0 : index
    %203 = vector.load %arg7[%c0_74, %c0_75] : memref<96x64xf32, #tpu.memory_space<vmem>>, vector<96x64xf32>
    %cst_76 = arith.constant dense<0.000000e+00> : vector<96x4xf32>
    %204 = tpu.matmul %203, %202, %cst_76 {dimension_numbers = #tpu.dot_dimension_numbers<[1], [0], [0], [1], [0, 0, 1, 1], [], []>} : vector<96x64xf32>, vector<64x4xf32>, vector<96x4xf32> -> vector<96x4xf32>
    %c0_77 = arith.constant 0 : index
    %c0_78 = arith.constant 0 : index
    %205 = vector.load %arg8[%c0_77, %c0_78] : memref<96x1xf32, #tpu.memory_space<vmem>>, vector<96x1xf32>
    %206 = vector.broadcast %205 : vector<96x1xf32> to vector<96x4xf32>
    %207 = arith.addf %204, %206 : vector<96x4xf32>
    %208 = vector.extract_strided_slice %207 {offsets = [0, 0], sizes = [16, 4], strides = [1, 1]} : vector<96x4xf32> to vector<16x4xf32>
    %209 = vector.extract_strided_slice %207 {offsets = [16, 0], sizes = [16, 4], strides = [1, 1]} : vector<96x4xf32> to vector<16x4xf32>
    %210 = vector.extract_strided_slice %207 {offsets = [32, 0], sizes = [16, 4], strides = [1, 1]} : vector<96x4xf32> to vector<16x4xf32>
    %cst_79 = arith.constant dense<0.000000e+00> : vector<16x16xf32>
    %211 = tpu.matmul %209, %210, %cst_79 {dimension_numbers = #tpu.dot_dimension_numbers<[1], [1], [0], [0], [0, 0, 1, 0], [], []>} : vector<16x4xf32>, vector<16x4xf32>, vector<16x16xf32> -> vector<16x16xf32>
    %cst_80 = arith.constant dense<0xFF800000> : vector<16xf32>
    %212 = vector.multi_reduction <maximumf>, %211, %cst_80 [0] : vector<16x16xf32> to vector<16xf32>
    %213 = vector.shape_cast %212 : vector<16xf32> to vector<1x16xf32>
    %214 = vector.broadcast %213 : vector<1x16xf32> to vector<16x16xf32>
    %215 = arith.subf %211, %214 : vector<16x16xf32>
    %216 = math.exp %215 : vector<16x16xf32>
    %cst_81 = arith.constant dense<0.000000e+00> : vector<16xf32>
    %217 = vector.multi_reduction <add>, %216, %cst_81 [0] : vector<16x16xf32> to vector<16xf32>
    %218 = vector.shape_cast %217 : vector<16xf32> to vector<1x16xf32>
    %219 = vector.broadcast %218 : vector<1x16xf32> to vector<16x16xf32>
    %220 = arith.divf %216, %219 : vector<16x16xf32>
    %cst_82 = arith.constant dense<0.000000e+00> : vector<16x4xf32>
    %221 = tpu.matmul %220, %208, %cst_82 {dimension_numbers = #tpu.dot_dimension_numbers<[1], [0], [0], [1], [0, 0, 1, 1], [], []>} : vector<16x16xf32>, vector<16x4xf32>, vector<16x4xf32> -> vector<16x4xf32>
    %222 = vector.extract_strided_slice %207 {offsets = [48, 0], sizes = [16, 4], strides = [1, 1]} : vector<96x4xf32> to vector<16x4xf32>
    %223 = vector.extract_strided_slice %207 {offsets = [64, 0], sizes = [16, 4], strides = [1, 1]} : vector<96x4xf32> to vector<16x4xf32>
    %224 = vector.extract_strided_slice %207 {offsets = [80, 0], sizes = [16, 4], strides = [1, 1]} : vector<96x4xf32> to vector<16x4xf32>
    %cst_83 = arith.constant dense<0.000000e+00> : vector<16x16xf32>
    %225 = tpu.matmul %223, %224, %cst_83 {dimension_numbers = #tpu.dot_dimension_numbers<[1], [1], [0], [0], [0, 0, 1, 0], [], []>} : vector<16x4xf32>, vector<16x4xf32>, vector<16x16xf32> -> vector<16x16xf32>
    %cst_84 = arith.constant dense<0xFF800000> : vector<16xf32>
    %226 = vector.multi_reduction <maximumf>, %225, %cst_84 [0] : vector<16x16xf32> to vector<16xf32>
    %227 = vector.shape_cast %226 : vector<16xf32> to vector<1x16xf32>
    %228 = vector.broadcast %227 : vector<1x16xf32> to vector<16x16xf32>
    %229 = arith.subf %225, %228 : vector<16x16xf32>
    %230 = math.exp %229 : vector<16x16xf32>
    %cst_85 = arith.constant dense<0.000000e+00> : vector<16xf32>
    %231 = vector.multi_reduction <add>, %230, %cst_85 [0] : vector<16x16xf32> to vector<16xf32>
    %232 = vector.shape_cast %231 : vector<16xf32> to vector<1x16xf32>
    %233 = vector.broadcast %232 : vector<1x16xf32> to vector<16x16xf32>
    %234 = arith.divf %230, %233 : vector<16x16xf32>
    %cst_86 = arith.constant dense<0.000000e+00> : vector<16x4xf32>
    %235 = tpu.matmul %234, %222, %cst_86 {dimension_numbers = #tpu.dot_dimension_numbers<[1], [0], [0], [1], [0, 0, 1, 1], [], []>} : vector<16x16xf32>, vector<16x4xf32>, vector<16x4xf32> -> vector<16x4xf32>
    %236 = tpu.concatenate %221, %235 in 0 : vector<16x4xf32>, vector<16x4xf32> -> vector<32x4xf32>
    %c0_87 = arith.constant 0 : index
    %c0_88 = arith.constant 0 : index
    %237 = vector.load %arg9[%c0_87, %c0_88] : memref<32x32xf32, #tpu.memory_space<vmem>>, vector<32x32xf32>
    %cst_89 = arith.constant dense<0.000000e+00> : vector<32x4xf32>
    %238 = tpu.matmul %237, %236, %cst_89 {dimension_numbers = #tpu.dot_dimension_numbers<[1], [0], [0], [1], [0, 0, 1, 1], [], []>} : vector<32x32xf32>, vector<32x4xf32>, vector<32x4xf32> -> vector<32x4xf32>
    %c0_90 = arith.constant 0 : index
    %c0_91 = arith.constant 0 : index
    %c0_92 = arith.constant 0 : index
    %239 = vector.load %arg10[%c0_90, %c0_91, %c0_92] : memref<2x32x1xf32, #tpu.memory_space<vmem>>, vector<1x32x1xf32>
    %240 = vector.shape_cast %239 : vector<1x32x1xf32> to vector<32x1xf32>
    %c1_93 = arith.constant 1 : index
    %c0_94 = arith.constant 0 : index
    %c0_95 = arith.constant 0 : index
    %241 = vector.load %arg10[%c1_93, %c0_94, %c0_95] : memref<2x32x1xf32, #tpu.memory_space<vmem>>, vector<1x32x1xf32>
    %242 = vector.shape_cast %241 : vector<1x32x1xf32> to vector<32x1xf32>
    %cst_96 = arith.constant dense<0.000000e+00> : vector<32xf32>
    %243 = vector.multi_reduction <add>, %238, %cst_96 [1] : vector<32x4xf32> to vector<32xf32>
    %244 = vector.shape_cast %243 : vector<32xf32> to vector<32x1xf32>
    %245 = arith.mulf %238, %238 : vector<32x4xf32>
    %cst_97 = arith.constant dense<0.000000e+00> : vector<32xf32>
    %246 = vector.multi_reduction <add>, %245, %cst_97 [1] : vector<32x4xf32> to vector<32xf32>
    %247 = vector.shape_cast %246 : vector<32xf32> to vector<32x1xf32>
    %248 = vector.extract_strided_slice %244 {offsets = [0, 0], sizes = [16, 1], strides = [1, 1]} : vector<32x1xf32> to vector<16x1xf32>
    %249 = vector.extract_strided_slice %244 {offsets = [16, 0], sizes = [16, 1], strides = [1, 1]} : vector<32x1xf32> to vector<16x1xf32>
    %250 = arith.addf %248, %249 : vector<16x1xf32>
    %251 = vector.extract_strided_slice %247 {offsets = [0, 0], sizes = [16, 1], strides = [1, 1]} : vector<32x1xf32> to vector<16x1xf32>
    %252 = vector.extract_strided_slice %247 {offsets = [16, 0], sizes = [16, 1], strides = [1, 1]} : vector<32x1xf32> to vector<16x1xf32>
    %253 = arith.addf %251, %252 : vector<16x1xf32>
    %cst_98 = arith.constant 8.000000e+00 : f32
    %254 = vector.broadcast %cst_98 : f32 to vector<16x1xf32>
    %255 = arith.divf %250, %254 : vector<16x1xf32>
    %cst_99 = arith.constant 8.000000e+00 : f32
    %256 = vector.broadcast %cst_99 : f32 to vector<16x1xf32>
    %257 = arith.divf %253, %256 : vector<16x1xf32>
    %258 = arith.mulf %255, %255 : vector<16x1xf32>
    %259 = arith.subf %257, %258 : vector<16x1xf32>
    %cst_100 = arith.constant 0.000000e+00 : f32
    %260 = vector.broadcast %cst_100 : f32 to vector<16x1xf32>
    %261 = arith.maximumf %259, %260 : vector<16x1xf32>
    %cst_101 = arith.constant 9.99999974E-6 : f32
    %262 = vector.broadcast %cst_101 : f32 to vector<16x1xf32>
    %263 = arith.addf %261, %262 : vector<16x1xf32>
    %264 = math.rsqrt %263 : vector<16x1xf32>
    %265 = tpu.concatenate %255, %255 in 0 : vector<16x1xf32>, vector<16x1xf32> -> vector<32x1xf32>
    %266 = tpu.concatenate %264, %264 in 0 : vector<16x1xf32>, vector<16x1xf32> -> vector<32x1xf32>
    %267 = vector.broadcast %265 : vector<32x1xf32> to vector<32x4xf32>
    %268 = arith.subf %238, %267 : vector<32x4xf32>
    %269 = vector.broadcast %240 : vector<32x1xf32> to vector<32x4xf32>
    %270 = arith.mulf %269, %268 : vector<32x4xf32>
    %271 = vector.broadcast %266 : vector<32x1xf32> to vector<32x4xf32>
    %272 = arith.mulf %270, %271 : vector<32x4xf32>
    %273 = vector.broadcast %242 : vector<32x1xf32> to vector<32x4xf32>
    %274 = arith.addf %272, %273 : vector<32x4xf32>
    %c0_102 = arith.constant 0 : index
    %c0_103 = arith.constant 0 : index
    %275 = vector.load %arg11[%c0_102, %c0_103] : memref<64x32xf32, #tpu.memory_space<vmem>>, vector<64x32xf32>
    %cst_104 = arith.constant dense<0.000000e+00> : vector<64x4xf32>
    %276 = tpu.matmul %275, %274, %cst_104 {dimension_numbers = #tpu.dot_dimension_numbers<[1], [0], [0], [1], [0, 0, 1, 1], [], []>} : vector<64x32xf32>, vector<32x4xf32>, vector<64x4xf32> -> vector<64x4xf32>
    %c0_105 = arith.constant 0 : index
    %c0_106 = arith.constant 0 : index
    %277 = vector.load %arg12[%c0_105, %c0_106] : memref<64x1xf32, #tpu.memory_space<vmem>>, vector<64x1xf32>
    %278 = vector.broadcast %277 : vector<64x1xf32> to vector<64x4xf32>
    %279 = arith.addf %276, %278 : vector<64x4xf32>
    %c0_107 = arith.constant 0 : index
    %c0_108 = arith.constant 0 : index
    %c0_109 = arith.constant 0 : index
    %280 = vector.load %arg13[%c0_107, %c0_108, %c0_109] : memref<2x64x1xf32, #tpu.memory_space<vmem>>, vector<1x64x1xf32>
    %281 = vector.shape_cast %280 : vector<1x64x1xf32> to vector<64x1xf32>
    %c1_110 = arith.constant 1 : index
    %c0_111 = arith.constant 0 : index
    %c0_112 = arith.constant 0 : index
    %282 = vector.load %arg13[%c1_110, %c0_111, %c0_112] : memref<2x64x1xf32, #tpu.memory_space<vmem>>, vector<1x64x1xf32>
    %283 = vector.shape_cast %282 : vector<1x64x1xf32> to vector<64x1xf32>
    %cst_113 = arith.constant dense<0.000000e+00> : vector<64xf32>
    %284 = vector.multi_reduction <add>, %279, %cst_113 [1] : vector<64x4xf32> to vector<64xf32>
    %285 = vector.shape_cast %284 : vector<64xf32> to vector<64x1xf32>
    %286 = arith.mulf %279, %279 : vector<64x4xf32>
    %cst_114 = arith.constant dense<0.000000e+00> : vector<64xf32>
    %287 = vector.multi_reduction <add>, %286, %cst_114 [1] : vector<64x4xf32> to vector<64xf32>
    %288 = vector.shape_cast %287 : vector<64xf32> to vector<64x1xf32>
    %289 = vector.extract_strided_slice %285 {offsets = [0, 0], sizes = [32, 1], strides = [1, 1]} : vector<64x1xf32> to vector<32x1xf32>
    %290 = vector.extract_strided_slice %285 {offsets = [32, 0], sizes = [32, 1], strides = [1, 1]} : vector<64x1xf32> to vector<32x1xf32>
    %291 = arith.addf %289, %290 : vector<32x1xf32>
    %292 = vector.extract_strided_slice %288 {offsets = [0, 0], sizes = [32, 1], strides = [1, 1]} : vector<64x1xf32> to vector<32x1xf32>
    %293 = vector.extract_strided_slice %288 {offsets = [32, 0], sizes = [32, 1], strides = [1, 1]} : vector<64x1xf32> to vector<32x1xf32>
    %294 = arith.addf %292, %293 : vector<32x1xf32>
    %cst_115 = arith.constant 8.000000e+00 : f32
    %295 = vector.broadcast %cst_115 : f32 to vector<32x1xf32>
    %296 = arith.divf %291, %295 : vector<32x1xf32>
    %cst_116 = arith.constant 8.000000e+00 : f32
    %297 = vector.broadcast %cst_116 : f32 to vector<32x1xf32>
    %298 = arith.divf %294, %297 : vector<32x1xf32>
    %299 = arith.mulf %296, %296 : vector<32x1xf32>
    %300 = arith.subf %298, %299 : vector<32x1xf32>
    %cst_117 = arith.constant 0.000000e+00 : f32
    %301 = vector.broadcast %cst_117 : f32 to vector<32x1xf32>
    %302 = arith.maximumf %300, %301 : vector<32x1xf32>
    %cst_118 = arith.constant 9.99999974E-6 : f32
    %303 = vector.broadcast %cst_118 : f32 to vector<32x1xf32>
    %304 = arith.addf %302, %303 : vector<32x1xf32>
    %305 = math.rsqrt %304 : vector<32x1xf32>
    %306 = tpu.concatenate %296, %296 in 0 : vector<32x1xf32>, vector<32x1xf32> -> vector<64x1xf32>
    %307 = tpu.concatenate %305, %305 in 0 : vector<32x1xf32>, vector<32x1xf32> -> vector<64x1xf32>
    %308 = vector.broadcast %306 : vector<64x1xf32> to vector<64x4xf32>
    %309 = arith.subf %279, %308 : vector<64x4xf32>
    %310 = vector.broadcast %281 : vector<64x1xf32> to vector<64x4xf32>
    %311 = arith.mulf %310, %309 : vector<64x4xf32>
    %312 = vector.broadcast %307 : vector<64x1xf32> to vector<64x4xf32>
    %313 = arith.mulf %311, %312 : vector<64x4xf32>
    %314 = vector.broadcast %283 : vector<64x1xf32> to vector<64x4xf32>
    %315 = arith.addf %313, %314 : vector<64x4xf32>
    %316 = arith.addf %315, %202 : vector<64x4xf32>
    %cst_119 = arith.constant 0.000000e+00 : f32
    %317 = vector.broadcast %cst_119 : f32 to vector<64x4xf32>
    %318 = arith.maximumf %316, %317 : vector<64x4xf32>
    %c0_120 = arith.constant 0 : index
    %c0_121 = arith.constant 0 : index
    %319 = vector.load %arg14[%c0_120, %c0_121] : memref<4x256xf32, #tpu.memory_space<vmem>>, vector<4x256xf32>
    %cst_122 = arith.constant dense<0.000000e+00> : vector<64x256xf32>
    %320 = tpu.matmul %318, %319, %cst_122 {dimension_numbers = #tpu.dot_dimension_numbers<[1], [0], [0], [1], [0, 0, 1, 1], [], []>} : vector<64x4xf32>, vector<4x256xf32>, vector<64x256xf32> -> vector<64x256xf32>
    %321 = arith.mulf %1, %320 : vector<64x256xf32>
    %322 = arith.addf %321, %1 : vector<64x256xf32>
    %c0_123 = arith.constant 0 : index
    %c0_124 = arith.constant 0 : index
    %323 = vector.load %arg25[%c0_123, %c0_124] : memref<64x64xf32, #tpu.memory_space<vmem>>, vector<64x64xf32>
    %cst_125 = arith.constant dense<0.000000e+00> : vector<64x256xf32>
    %324 = tpu.matmul %323, %322, %cst_125 {dimension_numbers = #tpu.dot_dimension_numbers<[1], [0], [0], [1], [0, 0, 1, 1], [], []>} : vector<64x64xf32>, vector<64x256xf32>, vector<64x256xf32> -> vector<64x256xf32>
    %c0_126 = arith.constant 0 : index
    %c0_127 = arith.constant 0 : index
    %325 = vector.load %arg15[%c0_126, %c0_127] : memref<32x64xf32, #tpu.memory_space<vmem>>, vector<32x64xf32>
    %cst_128 = arith.constant dense<0.000000e+00> : vector<32x256xf32>
    %326 = tpu.matmul %325, %1, %cst_128 {dimension_numbers = #tpu.dot_dimension_numbers<[1], [0], [0], [1], [0, 0, 1, 1], [], []>} : vector<32x64xf32>, vector<64x256xf32>, vector<32x256xf32> -> vector<32x256xf32>
    %c0_129 = arith.constant 0 : index
    %c0_130 = arith.constant 0 : index
    %c0_131 = arith.constant 0 : index
    %327 = vector.load %arg16[%c0_129, %c0_130, %c0_131] : memref<2x32x1xf32, #tpu.memory_space<vmem>>, vector<1x32x1xf32>
    %328 = vector.shape_cast %327 : vector<1x32x1xf32> to vector<32x1xf32>
    %c1_132 = arith.constant 1 : index
    %c0_133 = arith.constant 0 : index
    %c0_134 = arith.constant 0 : index
    %329 = vector.load %arg16[%c1_132, %c0_133, %c0_134] : memref<2x32x1xf32, #tpu.memory_space<vmem>>, vector<1x32x1xf32>
    %330 = vector.shape_cast %329 : vector<1x32x1xf32> to vector<32x1xf32>
    %cst_135 = arith.constant dense<0.000000e+00> : vector<32xf32>
    %331 = vector.multi_reduction <add>, %326, %cst_135 [1] : vector<32x256xf32> to vector<32xf32>
    %332 = vector.shape_cast %331 : vector<32xf32> to vector<32x1xf32>
    %333 = arith.mulf %326, %326 : vector<32x256xf32>
    %cst_136 = arith.constant dense<0.000000e+00> : vector<32xf32>
    %334 = vector.multi_reduction <add>, %333, %cst_136 [1] : vector<32x256xf32> to vector<32xf32>
    %335 = vector.shape_cast %334 : vector<32xf32> to vector<32x1xf32>
    %336 = vector.extract_strided_slice %332 {offsets = [0, 0], sizes = [16, 1], strides = [1, 1]} : vector<32x1xf32> to vector<16x1xf32>
    %337 = vector.extract_strided_slice %332 {offsets = [16, 0], sizes = [16, 1], strides = [1, 1]} : vector<32x1xf32> to vector<16x1xf32>
    %338 = arith.addf %336, %337 : vector<16x1xf32>
    %339 = vector.extract_strided_slice %335 {offsets = [0, 0], sizes = [16, 1], strides = [1, 1]} : vector<32x1xf32> to vector<16x1xf32>
    %340 = vector.extract_strided_slice %335 {offsets = [16, 0], sizes = [16, 1], strides = [1, 1]} : vector<32x1xf32> to vector<16x1xf32>
    %341 = arith.addf %339, %340 : vector<16x1xf32>
    %cst_137 = arith.constant 5.120000e+02 : f32
    %342 = vector.broadcast %cst_137 : f32 to vector<16x1xf32>
    %343 = arith.divf %338, %342 : vector<16x1xf32>
    %cst_138 = arith.constant 5.120000e+02 : f32
    %344 = vector.broadcast %cst_138 : f32 to vector<16x1xf32>
    %345 = arith.divf %341, %344 : vector<16x1xf32>
    %346 = arith.mulf %343, %343 : vector<16x1xf32>
    %347 = arith.subf %345, %346 : vector<16x1xf32>
    %cst_139 = arith.constant 0.000000e+00 : f32
    %348 = vector.broadcast %cst_139 : f32 to vector<16x1xf32>
    %349 = arith.maximumf %347, %348 : vector<16x1xf32>
    %cst_140 = arith.constant 9.99999974E-6 : f32
    %350 = vector.broadcast %cst_140 : f32 to vector<16x1xf32>
    %351 = arith.addf %349, %350 : vector<16x1xf32>
    %352 = math.rsqrt %351 : vector<16x1xf32>
    %353 = tpu.concatenate %343, %343 in 0 : vector<16x1xf32>, vector<16x1xf32> -> vector<32x1xf32>
    %354 = tpu.concatenate %352, %352 in 0 : vector<16x1xf32>, vector<16x1xf32> -> vector<32x1xf32>
    %355 = vector.broadcast %353 : vector<32x1xf32> to vector<32x256xf32>
    %356 = arith.subf %326, %355 : vector<32x256xf32>
    %357 = vector.broadcast %328 : vector<32x1xf32> to vector<32x256xf32>
    %358 = arith.mulf %357, %356 : vector<32x256xf32>
    %359 = vector.broadcast %354 : vector<32x1xf32> to vector<32x256xf32>
    %360 = arith.mulf %358, %359 : vector<32x256xf32>
    %361 = vector.broadcast %330 : vector<32x1xf32> to vector<32x256xf32>
    %362 = arith.addf %360, %361 : vector<32x256xf32>
    %c0_141 = arith.constant 0 : index
    %c0_142 = arith.constant 0 : index
    %363 = vector.load %arg17[%c0_141, %c0_142] : memref<16x64xf32, #tpu.memory_space<vmem>>, vector<16x64xf32>
    %cst_143 = arith.constant dense<0.000000e+00> : vector<16x256xf32>
    %364 = tpu.matmul %363, %1, %cst_143 {dimension_numbers = #tpu.dot_dimension_numbers<[1], [0], [0], [1], [0, 0, 1, 1], [], []>} : vector<16x64xf32>, vector<64x256xf32>, vector<16x256xf32> -> vector<16x256xf32>
    %c0_144 = arith.constant 0 : index
    %c0_145 = arith.constant 0 : index
    %c0_146 = arith.constant 0 : index
    %365 = vector.load %arg18[%c0_144, %c0_145, %c0_146] : memref<2x16x1xf32, #tpu.memory_space<vmem>>, vector<1x16x1xf32>
    %366 = vector.shape_cast %365 : vector<1x16x1xf32> to vector<16x1xf32>
    %c1_147 = arith.constant 1 : index
    %c0_148 = arith.constant 0 : index
    %c0_149 = arith.constant 0 : index
    %367 = vector.load %arg18[%c1_147, %c0_148, %c0_149] : memref<2x16x1xf32, #tpu.memory_space<vmem>>, vector<1x16x1xf32>
    %368 = vector.shape_cast %367 : vector<1x16x1xf32> to vector<16x1xf32>
    %cst_150 = arith.constant dense<0.000000e+00> : vector<16xf32>
    %369 = vector.multi_reduction <add>, %364, %cst_150 [1] : vector<16x256xf32> to vector<16xf32>
    %370 = vector.shape_cast %369 : vector<16xf32> to vector<16x1xf32>
    %371 = arith.mulf %364, %364 : vector<16x256xf32>
    %cst_151 = arith.constant dense<0.000000e+00> : vector<16xf32>
    %372 = vector.multi_reduction <add>, %371, %cst_151 [1] : vector<16x256xf32> to vector<16xf32>
    %373 = vector.shape_cast %372 : vector<16xf32> to vector<16x1xf32>
    %374 = vector.extract_strided_slice %370 {offsets = [0, 0], sizes = [8, 1], strides = [1, 1]} : vector<16x1xf32> to vector<8x1xf32>
    %375 = vector.extract_strided_slice %370 {offsets = [8, 0], sizes = [8, 1], strides = [1, 1]} : vector<16x1xf32> to vector<8x1xf32>
    %376 = arith.addf %374, %375 : vector<8x1xf32>
    %377 = vector.extract_strided_slice %373 {offsets = [0, 0], sizes = [8, 1], strides = [1, 1]} : vector<16x1xf32> to vector<8x1xf32>
    %378 = vector.extract_strided_slice %373 {offsets = [8, 0], sizes = [8, 1], strides = [1, 1]} : vector<16x1xf32> to vector<8x1xf32>
    %379 = arith.addf %377, %378 : vector<8x1xf32>
    %cst_152 = arith.constant 5.120000e+02 : f32
    %380 = vector.broadcast %cst_152 : f32 to vector<8x1xf32>
    %381 = arith.divf %376, %380 : vector<8x1xf32>
    %cst_153 = arith.constant 5.120000e+02 : f32
    %382 = vector.broadcast %cst_153 : f32 to vector<8x1xf32>
    %383 = arith.divf %379, %382 : vector<8x1xf32>
    %384 = arith.mulf %381, %381 : vector<8x1xf32>
    %385 = arith.subf %383, %384 : vector<8x1xf32>
    %cst_154 = arith.constant 0.000000e+00 : f32
    %386 = vector.broadcast %cst_154 : f32 to vector<8x1xf32>
    %387 = arith.maximumf %385, %386 : vector<8x1xf32>
    %cst_155 = arith.constant 9.99999974E-6 : f32
    %388 = vector.broadcast %cst_155 : f32 to vector<8x1xf32>
    %389 = arith.addf %387, %388 : vector<8x1xf32>
    %390 = math.rsqrt %389 : vector<8x1xf32>
    %391 = tpu.concatenate %381, %381 in 0 : vector<8x1xf32>, vector<8x1xf32> -> vector<16x1xf32>
    %392 = tpu.concatenate %390, %390 in 0 : vector<8x1xf32>, vector<8x1xf32> -> vector<16x1xf32>
    %393 = vector.broadcast %391 : vector<16x1xf32> to vector<16x256xf32>
    %394 = arith.subf %364, %393 : vector<16x256xf32>
    %395 = vector.broadcast %366 : vector<16x1xf32> to vector<16x256xf32>
    %396 = arith.mulf %395, %394 : vector<16x256xf32>
    %397 = vector.broadcast %392 : vector<16x1xf32> to vector<16x256xf32>
    %398 = arith.mulf %396, %397 : vector<16x256xf32>
    %399 = vector.broadcast %368 : vector<16x1xf32> to vector<16x256xf32>
    %400 = arith.addf %398, %399 : vector<16x256xf32>
    %401 = vector.extract_strided_slice %362 {offsets = [0, 0], sizes = [16, 256], strides = [1, 1]} : vector<32x256xf32> to vector<16x256xf32>
    %402 = vector.extract_strided_slice %400 {offsets = [0, 0], sizes = [8, 256], strides = [1, 1]} : vector<16x256xf32> to vector<8x256xf32>
    %cst_156 = arith.constant dense<0.000000e+00> : vector<16x8xf32>
    %403 = tpu.matmul %401, %402, %cst_156 {dimension_numbers = #tpu.dot_dimension_numbers<[1], [1], [0], [0], [0, 0, 1, 0], [], []>} : vector<16x256xf32>, vector<8x256xf32>, vector<16x8xf32> -> vector<16x8xf32>
    %404 = vector.extract_strided_slice %362 {offsets = [16, 0], sizes = [16, 256], strides = [1, 1]} : vector<32x256xf32> to vector<16x256xf32>
    %405 = vector.extract_strided_slice %400 {offsets = [8, 0], sizes = [8, 256], strides = [1, 1]} : vector<16x256xf32> to vector<8x256xf32>
    %cst_157 = arith.constant dense<0.000000e+00> : vector<16x8xf32>
    %406 = tpu.matmul %404, %405, %cst_157 {dimension_numbers = #tpu.dot_dimension_numbers<[1], [1], [0], [0], [0, 0, 1, 0], [], []>} : vector<16x256xf32>, vector<8x256xf32>, vector<16x8xf32> -> vector<16x8xf32>
    %407 = tpu.concatenate %403, %406 in 0 : vector<16x8xf32>, vector<16x8xf32> -> vector<32x8xf32>
    %c0_158 = arith.constant 0 : index
    %c0_159 = arith.constant 0 : index
    %408 = vector.load %arg19[%c0_158, %c0_159] : memref<8x8xf32, #tpu.memory_space<vmem>>, vector<8x8xf32>
    %cst_160 = arith.constant dense<0.000000e+00> : vector<32x8xf32>
    %409 = tpu.matmul %407, %408, %cst_160 {dimension_numbers = #tpu.dot_dimension_numbers<[1], [0], [0], [1], [0, 0, 1, 1], [], []>} : vector<32x8xf32>, vector<8x8xf32>, vector<32x8xf32> -> vector<32x8xf32>
    %c0_161 = arith.constant 0 : index
    %c0_162 = arith.constant 0 : index
    %c0_163 = arith.constant 0 : index
    %410 = vector.load %arg20[%c0_161, %c0_162, %c0_163] : memref<2x1x8xf32, #tpu.memory_space<vmem>>, vector<1x1x8xf32>
    %411 = vector.shape_cast %410 : vector<1x1x8xf32> to vector<1x8xf32>
    %c1_164 = arith.constant 1 : index
    %c0_165 = arith.constant 0 : index
    %c0_166 = arith.constant 0 : index
    %412 = vector.load %arg20[%c1_164, %c0_165, %c0_166] : memref<2x1x8xf32, #tpu.memory_space<vmem>>, vector<1x1x8xf32>
    %413 = vector.shape_cast %412 : vector<1x1x8xf32> to vector<1x8xf32>
    %cst_167 = arith.constant dense<0.000000e+00> : vector<8xf32>
    %414 = vector.multi_reduction <add>, %409, %cst_167 [0] : vector<32x8xf32> to vector<8xf32>
    %415 = vector.shape_cast %414 : vector<8xf32> to vector<1x8xf32>
    %416 = arith.mulf %409, %409 : vector<32x8xf32>
    %cst_168 = arith.constant dense<0.000000e+00> : vector<8xf32>
    %417 = vector.multi_reduction <add>, %416, %cst_168 [0] : vector<32x8xf32> to vector<8xf32>
    %418 = vector.shape_cast %417 : vector<8xf32> to vector<1x8xf32>
    %cst_169 = arith.constant 3.200000e+01 : f32
    %419 = vector.broadcast %cst_169 : f32 to vector<1x8xf32>
    %420 = arith.divf %415, %419 : vector<1x8xf32>
    %cst_170 = arith.constant 3.200000e+01 : f32
    %421 = vector.broadcast %cst_170 : f32 to vector<1x8xf32>
    %422 = arith.divf %418, %421 : vector<1x8xf32>
    %423 = arith.mulf %420, %420 : vector<1x8xf32>
    %424 = arith.subf %422, %423 : vector<1x8xf32>
    %cst_171 = arith.constant 0.000000e+00 : f32
    %425 = vector.broadcast %cst_171 : f32 to vector<1x8xf32>
    %426 = arith.maximumf %424, %425 : vector<1x8xf32>
    %cst_172 = arith.constant 9.99999974E-6 : f32
    %427 = vector.broadcast %cst_172 : f32 to vector<1x8xf32>
    %428 = arith.addf %426, %427 : vector<1x8xf32>
    %429 = math.rsqrt %428 : vector<1x8xf32>
    %430 = vector.broadcast %420 : vector<1x8xf32> to vector<32x8xf32>
    %431 = arith.subf %409, %430 : vector<32x8xf32>
    %432 = vector.broadcast %411 : vector<1x8xf32> to vector<32x8xf32>
    %433 = arith.mulf %432, %431 : vector<32x8xf32>
    %434 = vector.broadcast %429 : vector<1x8xf32> to vector<32x8xf32>
    %435 = arith.mulf %433, %434 : vector<32x8xf32>
    %436 = vector.broadcast %413 : vector<1x8xf32> to vector<32x8xf32>
    %437 = arith.addf %435, %436 : vector<32x8xf32>
    %438 = arith.addf %437, %407 : vector<32x8xf32>
    %c0_173 = arith.constant 0 : index
    %c0_174 = arith.constant 0 : index
    %439 = vector.load %arg21[%c0_173, %c0_174] : memref<32x32xf32, #tpu.memory_space<vmem>>, vector<32x32xf32>
    %cst_175 = arith.constant dense<0.000000e+00> : vector<32x8xf32>
    %440 = tpu.matmul %439, %438, %cst_175 {dimension_numbers = #tpu.dot_dimension_numbers<[1], [0], [0], [1], [0, 0, 1, 1], [], []>} : vector<32x32xf32>, vector<32x8xf32>, vector<32x8xf32> -> vector<32x8xf32>
    %c0_176 = arith.constant 0 : index
    %c0_177 = arith.constant 0 : index
    %c0_178 = arith.constant 0 : index
    %441 = vector.load %arg22[%c0_176, %c0_177, %c0_178] : memref<2x32x1xf32, #tpu.memory_space<vmem>>, vector<1x32x1xf32>
    %442 = vector.shape_cast %441 : vector<1x32x1xf32> to vector<32x1xf32>
    %c1_179 = arith.constant 1 : index
    %c0_180 = arith.constant 0 : index
    %c0_181 = arith.constant 0 : index
    %443 = vector.load %arg22[%c1_179, %c0_180, %c0_181] : memref<2x32x1xf32, #tpu.memory_space<vmem>>, vector<1x32x1xf32>
    %444 = vector.shape_cast %443 : vector<1x32x1xf32> to vector<32x1xf32>
    %cst_182 = arith.constant dense<0.000000e+00> : vector<32xf32>
    %445 = vector.multi_reduction <add>, %440, %cst_182 [1] : vector<32x8xf32> to vector<32xf32>
    %446 = vector.shape_cast %445 : vector<32xf32> to vector<32x1xf32>
    %447 = arith.mulf %440, %440 : vector<32x8xf32>
    %cst_183 = arith.constant dense<0.000000e+00> : vector<32xf32>
    %448 = vector.multi_reduction <add>, %447, %cst_183 [1] : vector<32x8xf32> to vector<32xf32>
    %449 = vector.shape_cast %448 : vector<32xf32> to vector<32x1xf32>
    %450 = vector.extract_strided_slice %446 {offsets = [0, 0], sizes = [16, 1], strides = [1, 1]} : vector<32x1xf32> to vector<16x1xf32>
    %451 = vector.extract_strided_slice %446 {offsets = [16, 0], sizes = [16, 1], strides = [1, 1]} : vector<32x1xf32> to vector<16x1xf32>
    %452 = arith.addf %450, %451 : vector<16x1xf32>
    %453 = vector.extract_strided_slice %449 {offsets = [0, 0], sizes = [16, 1], strides = [1, 1]} : vector<32x1xf32> to vector<16x1xf32>
    %454 = vector.extract_strided_slice %449 {offsets = [16, 0], sizes = [16, 1], strides = [1, 1]} : vector<32x1xf32> to vector<16x1xf32>
    %455 = arith.addf %453, %454 : vector<16x1xf32>
    %cst_184 = arith.constant 1.600000e+01 : f32
    %456 = vector.broadcast %cst_184 : f32 to vector<16x1xf32>
    %457 = arith.divf %452, %456 : vector<16x1xf32>
    %cst_185 = arith.constant 1.600000e+01 : f32
    %458 = vector.broadcast %cst_185 : f32 to vector<16x1xf32>
    %459 = arith.divf %455, %458 : vector<16x1xf32>
    %460 = arith.mulf %457, %457 : vector<16x1xf32>
    %461 = arith.subf %459, %460 : vector<16x1xf32>
    %cst_186 = arith.constant 0.000000e+00 : f32
    %462 = vector.broadcast %cst_186 : f32 to vector<16x1xf32>
    %463 = arith.maximumf %461, %462 : vector<16x1xf32>
    %cst_187 = arith.constant 9.99999974E-6 : f32
    %464 = vector.broadcast %cst_187 : f32 to vector<16x1xf32>
    %465 = arith.addf %463, %464 : vector<16x1xf32>
    %466 = math.rsqrt %465 : vector<16x1xf32>
    %467 = tpu.concatenate %457, %457 in 0 : vector<16x1xf32>, vector<16x1xf32> -> vector<32x1xf32>
    %468 = tpu.concatenate %466, %466 in 0 : vector<16x1xf32>, vector<16x1xf32> -> vector<32x1xf32>
    %469 = vector.broadcast %467 : vector<32x1xf32> to vector<32x8xf32>
    %470 = arith.subf %440, %469 : vector<32x8xf32>
    %471 = vector.broadcast %442 : vector<32x1xf32> to vector<32x8xf32>
    %472 = arith.mulf %471, %470 : vector<32x8xf32>
    %473 = vector.broadcast %468 : vector<32x1xf32> to vector<32x8xf32>
    %474 = arith.mulf %472, %473 : vector<32x8xf32>
    %475 = vector.broadcast %444 : vector<32x1xf32> to vector<32x8xf32>
    %476 = arith.addf %474, %475 : vector<32x8xf32>
    %477 = vector.extract_strided_slice %476 {offsets = [0, 0], sizes = [16, 8], strides = [1, 1]} : vector<32x8xf32> to vector<16x8xf32>
    %478 = vector.extract_strided_slice %400 {offsets = [0, 0], sizes = [8, 256], strides = [1, 1]} : vector<16x256xf32> to vector<8x256xf32>
    %cst_188 = arith.constant dense<0.000000e+00> : vector<16x256xf32>
    %479 = tpu.matmul %477, %478, %cst_188 {dimension_numbers = #tpu.dot_dimension_numbers<[1], [0], [0], [1], [0, 0, 1, 1], [], []>} : vector<16x8xf32>, vector<8x256xf32>, vector<16x256xf32> -> vector<16x256xf32>
    %480 = vector.extract_strided_slice %476 {offsets = [16, 0], sizes = [16, 8], strides = [1, 1]} : vector<32x8xf32> to vector<16x8xf32>
    %481 = vector.extract_strided_slice %400 {offsets = [8, 0], sizes = [8, 256], strides = [1, 1]} : vector<16x256xf32> to vector<8x256xf32>
    %cst_189 = arith.constant dense<0.000000e+00> : vector<16x256xf32>
    %482 = tpu.matmul %480, %481, %cst_189 {dimension_numbers = #tpu.dot_dimension_numbers<[1], [0], [0], [1], [0, 0, 1, 1], [], []>} : vector<16x8xf32>, vector<8x256xf32>, vector<16x256xf32> -> vector<16x256xf32>
    %483 = tpu.concatenate %479, %482 in 0 : vector<16x256xf32>, vector<16x256xf32> -> vector<32x256xf32>
    %c0_190 = arith.constant 0 : index
    %c0_191 = arith.constant 0 : index
    %484 = vector.load %arg23[%c0_190, %c0_191] : memref<64x32xf32, #tpu.memory_space<vmem>>, vector<64x32xf32>
    %cst_192 = arith.constant dense<0.000000e+00> : vector<64x256xf32>
    %485 = tpu.matmul %484, %483, %cst_192 {dimension_numbers = #tpu.dot_dimension_numbers<[1], [0], [0], [1], [0, 0, 1, 1], [], []>} : vector<64x32xf32>, vector<32x256xf32>, vector<64x256xf32> -> vector<64x256xf32>
    %c0_193 = arith.constant 0 : index
    %c0_194 = arith.constant 0 : index
    %c0_195 = arith.constant 0 : index
    %486 = vector.load %arg24[%c0_193, %c0_194, %c0_195] : memref<2x64x1xf32, #tpu.memory_space<vmem>>, vector<1x64x1xf32>
    %487 = vector.shape_cast %486 : vector<1x64x1xf32> to vector<64x1xf32>
    %c1_196 = arith.constant 1 : index
    %c0_197 = arith.constant 0 : index
    %c0_198 = arith.constant 0 : index
    %488 = vector.load %arg24[%c1_196, %c0_197, %c0_198] : memref<2x64x1xf32, #tpu.memory_space<vmem>>, vector<1x64x1xf32>
    %489 = vector.shape_cast %488 : vector<1x64x1xf32> to vector<64x1xf32>
    %cst_199 = arith.constant dense<0.000000e+00> : vector<64xf32>
    %490 = vector.multi_reduction <add>, %485, %cst_199 [1] : vector<64x256xf32> to vector<64xf32>
    %491 = vector.shape_cast %490 : vector<64xf32> to vector<64x1xf32>
    %492 = arith.mulf %485, %485 : vector<64x256xf32>
    %cst_200 = arith.constant dense<0.000000e+00> : vector<64xf32>
    %493 = vector.multi_reduction <add>, %492, %cst_200 [1] : vector<64x256xf32> to vector<64xf32>
    %494 = vector.shape_cast %493 : vector<64xf32> to vector<64x1xf32>
    %495 = vector.extract_strided_slice %491 {offsets = [0, 0], sizes = [32, 1], strides = [1, 1]} : vector<64x1xf32> to vector<32x1xf32>
    %496 = vector.extract_strided_slice %491 {offsets = [32, 0], sizes = [32, 1], strides = [1, 1]} : vector<64x1xf32> to vector<32x1xf32>
    %497 = arith.addf %495, %496 : vector<32x1xf32>
    %498 = vector.extract_strided_slice %494 {offsets = [0, 0], sizes = [32, 1], strides = [1, 1]} : vector<64x1xf32> to vector<32x1xf32>
    %499 = vector.extract_strided_slice %494 {offsets = [32, 0], sizes = [32, 1], strides = [1, 1]} : vector<64x1xf32> to vector<32x1xf32>
    %500 = arith.addf %498, %499 : vector<32x1xf32>
    %cst_201 = arith.constant 5.120000e+02 : f32
    %501 = vector.broadcast %cst_201 : f32 to vector<32x1xf32>
    %502 = arith.divf %497, %501 : vector<32x1xf32>
    %cst_202 = arith.constant 5.120000e+02 : f32
    %503 = vector.broadcast %cst_202 : f32 to vector<32x1xf32>
    %504 = arith.divf %500, %503 : vector<32x1xf32>
    %505 = arith.mulf %502, %502 : vector<32x1xf32>
    %506 = arith.subf %504, %505 : vector<32x1xf32>
    %cst_203 = arith.constant 0.000000e+00 : f32
    %507 = vector.broadcast %cst_203 : f32 to vector<32x1xf32>
    %508 = arith.maximumf %506, %507 : vector<32x1xf32>
    %cst_204 = arith.constant 9.99999974E-6 : f32
    %509 = vector.broadcast %cst_204 : f32 to vector<32x1xf32>
    %510 = arith.addf %508, %509 : vector<32x1xf32>
    %511 = math.rsqrt %510 : vector<32x1xf32>
    %512 = tpu.concatenate %502, %502 in 0 : vector<32x1xf32>, vector<32x1xf32> -> vector<64x1xf32>
    %513 = tpu.concatenate %511, %511 in 0 : vector<32x1xf32>, vector<32x1xf32> -> vector<64x1xf32>
    %514 = vector.broadcast %512 : vector<64x1xf32> to vector<64x256xf32>
    %515 = arith.subf %485, %514 : vector<64x256xf32>
    %516 = vector.broadcast %487 : vector<64x1xf32> to vector<64x256xf32>
    %517 = arith.mulf %516, %515 : vector<64x256xf32>
    %518 = vector.broadcast %513 : vector<64x1xf32> to vector<64x256xf32>
    %519 = arith.mulf %517, %518 : vector<64x256xf32>
    %520 = vector.broadcast %489 : vector<64x1xf32> to vector<64x256xf32>
    %521 = arith.addf %519, %520 : vector<64x256xf32>
    %522 = arith.addf %1, %521 : vector<64x256xf32>
    %cst_205 = arith.constant 0.000000e+00 : f32
    %523 = vector.broadcast %cst_205 : f32 to vector<64x256xf32>
    %524 = arith.maximumf %522, %523 : vector<64x256xf32>
    %c0_206 = arith.constant 0 : index
    %c0_207 = arith.constant 0 : index
    %525 = vector.load %arg26[%c0_206, %c0_207] : memref<64x64xf32, #tpu.memory_space<vmem>>, vector<64x64xf32>
    %cst_208 = arith.constant dense<0.000000e+00> : vector<64x256xf32>
    %526 = tpu.matmul %525, %524, %cst_208 {dimension_numbers = #tpu.dot_dimension_numbers<[1], [0], [0], [1], [0, 0, 1, 1], [], []>} : vector<64x64xf32>, vector<64x256xf32>, vector<64x256xf32> -> vector<64x256xf32>
    %527 = arith.addf %324, %526 : vector<64x256xf32>
    %c0_209 = arith.constant 0 : index
    %c0_210 = arith.constant 0 : index
    %c0_211 = arith.constant 0 : index
    %528 = vector.load %arg27[%c0_209, %c0_210, %c0_211] : memref<2x64x1xf32, #tpu.memory_space<vmem>>, vector<1x64x1xf32>
    %529 = vector.shape_cast %528 : vector<1x64x1xf32> to vector<64x1xf32>
    %c1_212 = arith.constant 1 : index
    %c0_213 = arith.constant 0 : index
    %c0_214 = arith.constant 0 : index
    %530 = vector.load %arg27[%c1_212, %c0_213, %c0_214] : memref<2x64x1xf32, #tpu.memory_space<vmem>>, vector<1x64x1xf32>
    %531 = vector.shape_cast %530 : vector<1x64x1xf32> to vector<64x1xf32>
    %cst_215 = arith.constant dense<0.000000e+00> : vector<64xf32>
    %532 = vector.multi_reduction <add>, %527, %cst_215 [1] : vector<64x256xf32> to vector<64xf32>
    %533 = vector.shape_cast %532 : vector<64xf32> to vector<64x1xf32>
    %534 = arith.mulf %527, %527 : vector<64x256xf32>
    %cst_216 = arith.constant dense<0.000000e+00> : vector<64xf32>
    %535 = vector.multi_reduction <add>, %534, %cst_216 [1] : vector<64x256xf32> to vector<64xf32>
    %536 = vector.shape_cast %535 : vector<64xf32> to vector<64x1xf32>
    %537 = vector.extract_strided_slice %533 {offsets = [0, 0], sizes = [32, 1], strides = [1, 1]} : vector<64x1xf32> to vector<32x1xf32>
    %538 = vector.extract_strided_slice %533 {offsets = [32, 0], sizes = [32, 1], strides = [1, 1]} : vector<64x1xf32> to vector<32x1xf32>
    %539 = arith.addf %537, %538 : vector<32x1xf32>
    %540 = vector.extract_strided_slice %536 {offsets = [0, 0], sizes = [32, 1], strides = [1, 1]} : vector<64x1xf32> to vector<32x1xf32>
    %541 = vector.extract_strided_slice %536 {offsets = [32, 0], sizes = [32, 1], strides = [1, 1]} : vector<64x1xf32> to vector<32x1xf32>
    %542 = arith.addf %540, %541 : vector<32x1xf32>
    %cst_217 = arith.constant 5.120000e+02 : f32
    %543 = vector.broadcast %cst_217 : f32 to vector<32x1xf32>
    %544 = arith.divf %539, %543 : vector<32x1xf32>
    %cst_218 = arith.constant 5.120000e+02 : f32
    %545 = vector.broadcast %cst_218 : f32 to vector<32x1xf32>
    %546 = arith.divf %542, %545 : vector<32x1xf32>
    %547 = arith.mulf %544, %544 : vector<32x1xf32>
    %548 = arith.subf %546, %547 : vector<32x1xf32>
    %cst_219 = arith.constant 0.000000e+00 : f32
    %549 = vector.broadcast %cst_219 : f32 to vector<32x1xf32>
    %550 = arith.maximumf %548, %549 : vector<32x1xf32>
    %cst_220 = arith.constant 9.99999974E-6 : f32
    %551 = vector.broadcast %cst_220 : f32 to vector<32x1xf32>
    %552 = arith.addf %550, %551 : vector<32x1xf32>
    %553 = math.rsqrt %552 : vector<32x1xf32>
    %554 = tpu.concatenate %544, %544 in 0 : vector<32x1xf32>, vector<32x1xf32> -> vector<64x1xf32>
    %555 = tpu.concatenate %553, %553 in 0 : vector<32x1xf32>, vector<32x1xf32> -> vector<64x1xf32>
    %556 = vector.broadcast %554 : vector<64x1xf32> to vector<64x256xf32>
    %557 = arith.subf %527, %556 : vector<64x256xf32>
    %558 = vector.broadcast %529 : vector<64x1xf32> to vector<64x256xf32>
    %559 = arith.mulf %558, %557 : vector<64x256xf32>
    %560 = vector.broadcast %555 : vector<64x1xf32> to vector<64x256xf32>
    %561 = arith.mulf %559, %560 : vector<64x256xf32>
    %562 = vector.broadcast %531 : vector<64x1xf32> to vector<64x256xf32>
    %563 = arith.addf %561, %562 : vector<64x256xf32>
    %564 = vector.shape_cast %563 : vector<64x256xf32> to vector<2x32x256xf32>
    %c0_221 = arith.constant 0 : index
    %c0_222 = arith.constant 0 : index
    %c0_223 = arith.constant 0 : index
    %565 = vector.load %arg28[%c0_221, %c0_222, %c0_223] : memref<2x32x256xf32, #tpu.memory_space<vmem>>, vector<2x32x256xf32>
    tpu.vector_store %arg28[%c0_221, %c0_222, %c0_223], %564 {strides = array<i32>} : memref<2x32x256xf32, #tpu.memory_space<vmem>>, vector<2x32x256xf32>,
    return
  }
  func.func @transform_0(%arg0: i32) -> (i32, i32, i32) {
    %c0_i32 = arith.constant 0 : i32
    %c0_i32_0 = arith.constant 0 : i32
    %c0_i32_1 = arith.constant 0 : i32
    %c0_i32_2 = arith.constant 0 : i32
    return %c0_i32, %c0_i32_0, %c0_i32_1 : i32, i32, i32
  }
  func.func @transform_1(%arg0: i32) -> (i32, i32) {
    %c0_i32 = arith.constant 0 : i32
    %c0_i32_0 = arith.constant 0 : i32
    %c0_i32_1 = arith.constant 0 : i32
    return %c0_i32, %c0_i32_0 : i32, i32
  }
  func.func @transform_2(%arg0: i32) -> (i32, i32) {
    %c0_i32 = arith.constant 0 : i32
    %c0_i32_0 = arith.constant 0 : i32
    %c0_i32_1 = arith.constant 0 : i32
    return %c0_i32, %c0_i32_0 : i32, i32
  }
  func.func @transform_3(%arg0: i32) -> (i32, i32) {
    %c0_i32 = arith.constant 0 : i32
    %c0_i32_0 = arith.constant 0 : i32
    %c0_i32_1 = arith.constant 0 : i32
    return %c0_i32, %c0_i32_0 : i32, i32
  }
  func.func @transform_4(%arg0: i32) -> (i32, i32) {
    %c0_i32 = arith.constant 0 : i32
    %c0_i32_0 = arith.constant 0 : i32
    %c0_i32_1 = arith.constant 0 : i32
    return %c0_i32, %c0_i32_0 : i32, i32
  }
  func.func @transform_5(%arg0: i32) -> (i32, i32, i32) {
    %c0_i32 = arith.constant 0 : i32
    %c0_i32_0 = arith.constant 0 : i32
    %c0_i32_1 = arith.constant 0 : i32
    %c0_i32_2 = arith.constant 0 : i32
    return %c0_i32, %c0_i32_0, %c0_i32_1 : i32, i32, i32
  }
  func.func @transform_6(%arg0: i32) -> (i32, i32) {
    %c0_i32 = arith.constant 0 : i32
    %c0_i32_0 = arith.constant 0 : i32
    %c0_i32_1 = arith.constant 0 : i32
    return %c0_i32, %c0_i32_0 : i32, i32
  }
  func.func @transform_7(%arg0: i32) -> (i32, i32) {
    %c0_i32 = arith.constant 0 : i32
    %c0_i32_0 = arith.constant 0 : i32
    %c0_i32_1 = arith.constant 0 : i32
    return %c0_i32, %c0_i32_0 : i32, i32
  }
  func.func @transform_8(%arg0: i32) -> (i32, i32) {
    %c0_i32 = arith.constant 0 : i32
    %c0_i32_0 = arith.constant 0 : i32
    %c0_i32_1 = arith.constant 0 : i32
    return %c0_i32, %c0_i32_0 : i32, i32
  }
  func.func @transform_9(%arg0: i32) -> (i32, i32, i32) {
    %c0_i32 = arith.constant 0 : i32
    %c0_i32_0 = arith.constant 0 : i32
    %c0_i32_1 = arith.constant 0 : i32
    %c0_i32_2 = arith.constant 0 : i32
    return %c0_i32, %c0_i32_0, %c0_i32_1 : i32, i32, i32
  }
  func.func @transform_10(%arg0: i32) -> (i32, i32) {
    %c0_i32 = arith.constant 0 : i32
    %c0_i32_0 = arith.constant 0 : i32
    %c0_i32_1 = arith.constant 0 : i32
    return %c0_i32, %c0_i32_0 : i32, i32
  }
  func.func @transform_11(%arg0: i32) -> (i32, i32) {
    %c0_i32 = arith.constant 0 : i32
    %c0_i32_0 = arith.constant 0 : i32
    %c0_i32_1 = arith.constant 0 : i32
    return %c0_i32, %c0_i32_0 : i32, i32
  }
  func.func @transform_12(%arg0: i32) -> (i32, i32, i32) {
    %c0_i32 = arith.constant 0 : i32
    %c0_i32_0 = arith.constant 0 : i32
    %c0_i32_1 = arith.constant 0 : i32
    %c0_i32_2 = arith.constant 0 : i32
    return %c0_i32, %c0_i32_0, %c0_i32_1 : i32, i32, i32
  }
  func.func @transform_13(%arg0: i32) -> (i32, i32) {
    %c0_i32 = arith.constant 0 : i32
    %c0_i32_0 = arith.constant 0 : i32
    %c0_i32_1 = arith.constant 0 : i32
    return %c0_i32, %c0_i32_0 : i32, i32
  }
  func.func @transform_14(%arg0: i32) -> (i32, i32) {
    %c0_i32 = arith.constant 0 : i32
    %c0_i32_0 = arith.constant 0 : i32
    %c0_i32_1 = arith.constant 0 : i32
    return %c0_i32, %c0_i32_0 : i32, i32
  }
  func.func @transform_15(%arg0: i32) -> (i32, i32, i32) {
    %c0_i32 = arith.constant 0 : i32
    %c0_i32_0 = arith.constant 0 : i32
    %c0_i32_1 = arith.constant 0 : i32
    %c0_i32_2 = arith.constant 0 : i32
    return %c0_i32, %c0_i32_0, %c0_i32_1 : i32, i32, i32
  }
  func.func @transform_16(%arg0: i32) -> (i32, i32) {
    %c0_i32 = arith.constant 0 : i32
    %c0_i32_0 = arith.constant 0 : i32
    %c0_i32_1 = arith.constant 0 : i32
    return %c0_i32, %c0_i32_0 : i32, i32
  }
  func.func @transform_17(%arg0: i32) -> (i32, i32, i32) {
    %c0_i32 = arith.constant 0 : i32
    %c0_i32_0 = arith.constant 0 : i32
    %c0_i32_1 = arith.constant 0 : i32
    %c0_i32_2 = arith.constant 0 : i32
    return %c0_i32, %c0_i32_0, %c0_i32_1 : i32, i32, i32
  }
  func.func @transform_18(%arg0: i32) -> (i32, i32) {
    %c0_i32 = arith.constant 0 : i32
    %c0_i32_0 = arith.constant 0 : i32
    %c0_i32_1 = arith.constant 0 : i32
    return %c0_i32, %c0_i32_0 : i32, i32
  }
  func.func @transform_19(%arg0: i32) -> (i32, i32, i32) {
    %c0_i32 = arith.constant 0 : i32
    %c0_i32_0 = arith.constant 0 : i32
    %c0_i32_1 = arith.constant 0 : i32
    %c0_i32_2 = arith.constant 0 : i32
    return %c0_i32, %c0_i32_0, %c0_i32_1 : i32, i32, i32
  }
  func.func @transform_20(%arg0: i32) -> (i32, i32) {
    %c0_i32 = arith.constant 0 : i32
    %c0_i32_0 = arith.constant 0 : i32
    %c0_i32_1 = arith.constant 0 : i32
    return %c0_i32, %c0_i32_0 : i32, i32
  }
  func.func @transform_21(%arg0: i32) -> (i32, i32, i32) {
    %c0_i32 = arith.constant 0 : i32
    %c0_i32_0 = arith.constant 0 : i32
    %c0_i32_1 = arith.constant 0 : i32
    %c0_i32_2 = arith.constant 0 : i32
    return %c0_i32, %c0_i32_0, %c0_i32_1 : i32, i32, i32
  }
  func.func @transform_22(%arg0: i32) -> (i32, i32) {
    %c0_i32 = arith.constant 0 : i32
    %c0_i32_0 = arith.constant 0 : i32
    %c0_i32_1 = arith.constant 0 : i32
    return %c0_i32, %c0_i32_0 : i32, i32
  }
  func.func @transform_23(%arg0: i32) -> (i32, i32, i32) {
    %c0_i32 = arith.constant 0 : i32
    %c0_i32_0 = arith.constant 0 : i32
    %c0_i32_1 = arith.constant 0 : i32
    %c0_i32_2 = arith.constant 0 : i32
    return %c0_i32, %c0_i32_0, %c0_i32_1 : i32, i32, i32
  }
  func.func @transform_24(%arg0: i32) -> (i32, i32) {
    %c0_i32 = arith.constant 0 : i32
    %c0_i32_0 = arith.constant 0 : i32
    %c0_i32_1 = arith.constant 0 : i32
    return %c0_i32, %c0_i32_0 : i32, i32
  }
  func.func @transform_25(%arg0: i32) -> (i32, i32) {
    %c0_i32 = arith.constant 0 : i32
    %c0_i32_0 = arith.constant 0 : i32
    %c0_i32_1 = arith.constant 0 : i32
    return %c0_i32, %c0_i32_0 : i32, i32
  }
  func.func @transform_26(%arg0: i32) -> (i32, i32, i32) {
    %c0_i32 = arith.constant 0 : i32
    %c0_i32_0 = arith.constant 0 : i32
    %c0_i32_1 = arith.constant 0 : i32
    %c0_i32_2 = arith.constant 0 : i32
    return %c0_i32, %c0_i32_0, %c0_i32_1 : i32, i32, i32
  }
  func.func @transform_27(%arg0: i32) -> (i32, i32, i32) {
    %c0_i32 = arith.constant 0 : i32
    %c0_i32_0 = arith.constant 0 : i32
    %c0_i32_1 = arith.constant 0 : i32
    %c0_i32_2 = arith.constant 0 : i32
    return %c0_i32, %c0_i32_0, %c0_i32_1 : i32, i32, i32
  }
}

</mosaic_0001>

<bundles_post_ra>
// kernel: spin_forward.1
= control target key start
LH: loop header
LB: loop body
LE: loop exit
PB: predicated region body
PF: predicated region fallthrough
CT: control target
= control target key end

     0   :  { %v15651_v0 = vmov 0   ;;  %v11498_v25 = vmov 2   ;;  %v11499_v26 = vmov 1   ;;  %v11500_v45 = vmov 3   ;;  %s11527_s28 = smov 16   ;;  %s15609_s4 = inlined_call_operand.vmem [shape: f32[64,27], index: 4, kind: input, shape index: {}]   ;;  %s15610_s1 = inlined_call_operand.vmem [shape: bf16[2304,64], index: 1, kind: input, shape index: {}]   ;;  %s15611_s0 = inlined_call_operand.vmem [shape: f32[2,32,256], index: 0, kind: input, shape index: {}]   ;;  %s15612_s5 = inlined_call_operand.vmem [shape: f32[6,64,1], index: 5, kind: input, shape index: {}]   ;;  %s15613_s2 = inlined_call_operand.vmem [shape: bf16[576,16], index: 2, kind: input, shape index: {}]   ;;  %s15614_s3 = inlined_call_operand.vmem [shape: bf16[144,4], index: 3, kind: input, shape index: {}]   ;;  %s15615_s7 = inlined_call_operand.vmem [shape: f32[96,1], index: 7, kind: input, shape index: {}]   ;;  %s15616_s6 = inlined_call_operand.vmem [shape: f32[96,64], index: 6, kind: input, shape index: {}]   ;;  %s15617_s8 = inlined_call_operand.vmem [shape: f32[32,32], index: 8, kind: input, shape index: {}]   ;;  %s15618_s9 = inlined_call_operand.vmem [shape: f32[2,32,1], index: 9, kind: input, shape index: {}]   ;;  %s15619_s11 = inlined_call_operand.vmem [shape: f32[64,1], index: 11, kind: input, shape index: {}]   ;;  %s15620_s10 = inlined_call_operand.vmem [shape: f32[64,32], index: 10, kind: input, shape index: {}]   ;;  %s15621_s12 = inlined_call_operand.vmem [shape: f32[2,64,1], index: 12, kind: input, shape index: {}]   ;;  %s15622_s14 = inlined_call_operand.vmem [shape: f32[32,64], index: 14, kind: input, shape index: {}]   ;;  %s15623_s16 = inlined_call_operand.vmem [shape: f32[16,64], index: 16, kind: input, shape index: {}]   ;;  %s15624_s13 = inlined_call_operand.vmem [shape: f32[4,256], index: 13, kind: input, shape index: {}]   ;;  %s15625_s17 = inlined_call_operand.vmem [shape: f32[2,16,1], index: 17, kind: input, shape index: {}]   ;;  %s15626_s15 = inlined_call_operand.vmem [shape: f32[2,32,1], index: 15, kind: input, shape index: {}]   ;;  %s15627_s18 = inlined_call_operand.vmem [shape: f32[8,8], index: 18, kind: input, shape index: {}]   ;;  %s15628_s20 = inlined_call_operand.vmem [shape: f32[32,32], index: 20, kind: input, shape index: {}]   ;;  %s15629_s19 = inlined_call_operand.vmem [shape: f32[2,1,8], index: 19, kind: input, shape index: {}]   ;;  %s15630_s21 = inlined_call_operand.vmem [shape: f32[2,32,1], index: 21, kind: input, shape index: {}]   ;;  %s15631_s22 = inlined_call_operand.vmem [shape: f32[64,32], index: 22, kind: input, shape index: {}]   ;;  %s15632_s23 = inlined_call_operand.vmem [shape: f32[2,64,1], index: 23, kind: input, shape index: {}]   ;;  %s15633_s24 = inlined_call_operand.vmem [shape: f32[64,64], index: 24, kind: input, shape index: {}]   ;;  %s15634_s25 = inlined_call_operand.vmem [shape: f32[64,64], index: 25, kind: input, shape index: {}]   ;;  %s15635_s26 = inlined_call_operand.vmem [shape: f32[2,64,1], index: 26, kind: input, shape index: {}]   ;;  %s15636_s27 = inlined_call_operand.vmem [shape: f32[2,32,256], index: 27, kind: output, shape index: {}]  }
   0x1   :  { %15666 = sst [smem:[#allocation31_spill]] %s15609_s4  ;;  %10970 = vset.pattern.permute.xlu1 %v15651_v0  ;;  %10969 = vset.pattern.permute.xlu0 %v15651_v0  ;;  %v11501_v46 = vmov 4   ;;  %v11502_v47 = vmov 6   ;;  %v11503_v48 = vmov 5   ;;  %v11504_v49 = vmov 7  }
   0x2   :  { %15667 = sst [smem:[#allocation32_spill]] %s15610_s1  ;;  %v11505_v50 = vmov 8   ;;  %vm2088_vm0 = vcmask 523264   ;;  %vm3355_vm1 = vcmask 130048   ;;  %vm4193_vm2 = vcmask 261120  }
   0x3   :  { %15668 = sst [smem:[#allocation33_spill]] %s15611_s0  ;;  %vm4202_vm3 = vcmask 392192   ;;  %vm4219_vm4 = vcmask 654336   ;;  %vm4228_vm5 = vcmask 785408   ;;  %vm4237_vm6 = vcmask 916480  }
   0x4   :  { %15669 = sst [smem:[#allocation34_spill]] %s15612_s5  ;;  %s15680_s29 = sld [smem:[#allocation33_spill]]  ;;  %vm4429_vm7 = vcmask 31744   ;;  %vm6031_vm9 = vcmask 1043456   ;;  %vm6758_vm10 = vcmask 64512  }
   0x5   :  { %15670 = sst [smem:[#allocation35_spill]] %s15613_s2  ;;  %s15681_s4 = sld [smem:[#allocation34_spill]]  ;;  %vm14326_vm8 = vmpackc.low %vm4429_vm7, %vm4429_vm7 }
   0x6   :  { %15671 = sst [smem:[#allocation36_spill]] %s15614_s3  ;;  %s15693_s0 = sld [smem:[#allocation35_spill]] }
   0x7   :  { %15672 = sst [smem:[#allocation37_spill]] %s15615_s7  ;;  %s15679_s7 = sld [smem:[#allocation32_spill]] }
   0x8   :  { %15673 = sst [smem:[#allocation38_spill]] %s15616_s6  ;;  %s11515_s5 = smov 64  }
   0x9   :  { %15674 = sst [smem:[#allocation39_spill]] %s15617_s8  ;;  %s15762_s6 = sld [smem:[#allocation36_spill]] }
   0xa   :  { %15675 = sst [smem:[#allocation40_spill]] %s15618_s9  ;;  %s15678_s8 = sld [smem:[#allocation31_spill]]  ;;  %v11893_v51 = vld [vmem:[%s15680_s29] sm:$0xff]  ;;  %v11898_v52 = vld [vmem:[%s15680_s29 + $0x8] sm:$0xff]  ;;  %v11906_v57 = vld [vmem:[%s15680_s29 + $0x10] sm:$0xff] }
   0xb   :  { %15676 = sst [smem:[#allocation41_spill]] %s15619_s11  ;;  %v11911_v58 = vld [vmem:[%s15680_s29 + $0x18] sm:$0xff]  ;;  %v11923_v61 = vld [vmem:[%s15680_s29 + $0x28] sm:$0xff]  ;;  %s11526_s3 = smov 48  }
   0xc   :  { %15677 = sst [smem:[#allocation42_spill]] %s15620_s10  ;;  %s11531_s11 = smov 96  }
   0xd   :  { %v9356_v5 = vld [vmem:[%s15679_s7 + $0x40] sm:$0xff]   ;;  %v9357_v7 = vld [vmem:[%s15679_s7 + $0x48] sm:$0xff]   ;;  %v9358_v13 = vld [vmem:[%s15679_s7 + $0x50] sm:$0xff]   ;;  %s15796_s9 = sld [smem:[#allocation39_spill]]  ;;  %s15797_s10 = sld [smem:[#allocation40_spill]] }
   0xe   :  { %10383 = vmatprep.subr.bf16.mxu0 %v9356_v5  ;;  %v8594_v6 = vld [vmem:[%s15679_s7] sm:$0xff]   ;;  %v9349_v9 = vld [vmem:[%s15679_s7 + $0x8] sm:$0xff]   ;;  %v9350_v15 = vld [vmem:[%s15679_s7 + $0x10] sm:$0xff]  }
   0xf   :  { %10385 = vmatpush3.bf16.msra.mxu0 %v8594_v6  ;;  %v9372_v11 = vld [vmem:[%s15679_s7 + $0xc0] sm:$0xff]   ;;  %v9373_v14 = vld [vmem:[%s15679_s7 + $0xc8] sm:$0xff]   ;;  %v9359_v19 = vld [vmem:[%s15679_s7 + $0x58] sm:$0xff]  }
  0x10   :  { %v11678_v1 = vld [vmem:[%s15678_s8 + $0x10] sm:$0xff]  ;;  %v11683_v2 = vld [vmem:[%s15678_s8] sm:$0xff]  ;;  %v11690_v3 = vld [vmem:[%s15678_s8 + $0x18] sm:$0xff]  ;;  %10387 = vmatprep.subr.bf16.mxu0 %v9357_v7  ;;  %10415 = vmatprep.subr.bf16.mxu1 %v9372_v11 }
  0x11   :  { %122 = vperm.xlu1 %10970, %v11678_v1   ;;  %112 = vperm.xlu0 %10969, %v11683_v2   ;;  %v11695_v4 = vld [vmem:[%s15678_s8 + $0x8] sm:$0xff]  ;;  %v11719_v10 = vld [vmem:[%s15678_s8 + $0x20] sm:$0xff]  ;;  %v11744_v17 = vld [vmem:[%s15678_s8 + $0x38] sm:$0xff] }
  0x12   :  { %v11711_v8 = vld [vmem:[%s15678_s8 + $0x28] sm:$0xff]  ;;  %v9364_v12 = vld [vmem:[%s15679_s7 + $0x80] sm:$0xff]   ;;  %v11749_v18 = vld [vmem:[%s15678_s8 + $0x30] sm:$0xff] }
  0x13   :  { %10389 = vmatpush3.bf16.msra.mxu0 %v9349_v9  ;;  %10417 = vmatpush3.bf16.msra.mxu1 %v9364_v12  ;;  %v9365_v16 = vld [vmem:[%s15679_s7 + $0x88] sm:$0xff]   ;;  %v9374_v20 = vld [vmem:[%s15679_s7 + $0xd0] sm:$0xff]   ;;  %v9351_v21 = vld [vmem:[%s15679_s7 + $0x18] sm:$0xff]  }
  0x14   :  { %10391 = vmatprep.subr.bf16.mxu0 %v9358_v13  ;;  %10419 = vmatprep.subr.bf16.mxu1 %v9373_v14  ;;  %v9366_v22 = vld [vmem:[%s15679_s7 + $0x90] sm:$0xff]   ;;  %v9360_v23 = vld [vmem:[%s15679_s7 + $0x60] sm:$0xff]   ;;  %v9375_v24 = vld [vmem:[%s15679_s7 + $0xd8] sm:$0xff]  }
  0x15   :  { %127 = vperm.xlu1 %10970, %v11690_v3   ;;  %117 = vperm.xlu0 %10969, %v11695_v4   ;;  %v9352_v27 = vld [vmem:[%s15679_s7 + $0x20] sm:$0xff]   ;;  %v9367_v28 = vld [vmem:[%s15679_s7 + $0x98] sm:$0xff]   ;;  %v9361_v29 = vld [vmem:[%s15679_s7 + $0x68] sm:$0xff]  }
  0x16   :  { %v9376_v30 = vld [vmem:[%s15679_s7 + $0xe0] sm:$0xff]   ;;  %v9353_v31 = vld [vmem:[%s15679_s7 + $0x28] sm:$0xff]   ;;  %v9362_v33 = vld [vmem:[%s15679_s7 + $0x70] sm:$0xff]  }
  0x17   :  { %10393 = vmatpush3.bf16.msra.mxu0 %v9350_v15  ;;  %10421 = vmatpush3.bf16.msra.mxu1 %v9365_v16  ;;  %v9368_v32 = vld [vmem:[%s15679_s7 + $0xa0] sm:$0xff]   ;;  %v9377_v34 = vld [vmem:[%s15679_s7 + $0xe8] sm:$0xff]   ;;  %v9354_v35 = vld [vmem:[%s15679_s7 + $0x30] sm:$0xff]  }
  0x18   :  { %10395 = vmatprep.subr.bf16.mxu0 %v9359_v19  ;;  %10423 = vmatprep.subr.bf16.mxu1 %v9374_v20  ;;  %v9369_v36 = vld [vmem:[%s15679_s7 + $0xa8] sm:$0xff]   ;;  %v9363_v37 = vld [vmem:[%s15679_s7 + $0x78] sm:$0xff]   ;;  %v9378_v38 = vld [vmem:[%s15679_s7 + $0xf0] sm:$0xff]  }
  0x19   :  { %137 = vperm.xlu1 %10970, %v11711_v8   ;;  %132 = vperm.xlu0 %10969, %v11719_v10   ;;  %v9355_v39 = vld [vmem:[%s15679_s7 + $0x38] sm:$0xff]   ;;  %v9388_v40 = vld [vmem:[%s15679_s7 + $0x140] sm:$0xff]   ;;  %v9370_v41 = vld [vmem:[%s15679_s7 + $0xb0] sm:$0xff]  }
  0x1a   :  { %v9379_v42 = vld [vmem:[%s15679_s7 + $0xf8] sm:$0xff]   ;;  %v9404_v44 = vld [vmem:[%s15679_s7 + $0x1c0] sm:$0xff]   ;;  %v9389_v60 = vld [vmem:[%s15679_s7 + $0x148] sm:$0xff]  }
  0x1b   :  { %10397 = vmatpush3.bf16.msra.mxu0 %v9351_v21  ;;  %10425 = vmatpush3.bf16.msra.mxu1 %v9366_v22  ;;  %v9371_v43 = vld [vmem:[%s15679_s7 + $0xb8] sm:$0xff]   ;;  %v9380_v59 = vld [vmem:[%s15679_s7 + $0x100] sm:$0xff]   ;;  %v9381_v7 = vld [vmem:[%s15679_s7 + $0x108] sm:$0xff]  }
  0x1c   :  { %10399 = vmatprep.subr.bf16.mxu0 %v9360_v23  ;;  %10427 = vmatprep.subr.bf16.mxu1 %v9375_v24  ;;  %v11934_v9 = vld [vmem:[%s15680_s29 + $0x20] sm:$0xff]  ;;  %v9390_v12 = vld [vmem:[%s15679_s7 + $0x150] sm:$0xff]   ;;  %v11943_v13 = vld [vmem:[%s15680_s29 + $0x38] sm:$0xff] }
  0x1d   :  { %147 = vperm.xlu1 %10970, %v11744_v17   ;;  %142 = vperm.xlu0 %10969, %v11749_v18   ;;  %v11950_v19 = vld [vmem:[%s15680_s29 + $0x48] sm:$0xff]  ;;  %v11955_v20 = vld [vmem:[%s15680_s29 + $0x30] sm:$0xff] }
  0x1e   :  { %v9382_v22 = vld [vmem:[%s15679_s7 + $0x110] sm:$0xff]  }
  0x1f   :  { %10401 = vmatpush3.bf16.msra.mxu0 %v9352_v27  ;;  %10429 = vmatpush3.bf16.msra.mxu1 %v9367_v28 }
  0x20   :  { %10403 = vmatprep.subr.bf16.mxu0 %v9361_v29  ;;  %10431 = vmatprep.subr.bf16.mxu1 %v9376_v30  ;;  %v9383_v29 = vld [vmem:[%s15679_s7 + $0x118] sm:$0xff]  }
  0x21   :  { %10972 = vset.pattern.permute.xlu1 %v11498_v25  ;;  %10971 = vset.pattern.permute.xlu0 %v11499_v26  ;;  %v11981_v30 = vld [vmem:[%s15680_s29 + $0x58] sm:$0xff] }
  0x22   :  { %215 = vperm.xlu1 %10972, %v11683_v2   ;;  %167 = vperm.xlu0 %10971, %v11683_v2  }
  0x23   :  { %10405 = vmatpush3.bf16.msra.mxu0 %v9353_v31  ;;  %10433 = vmatpush3.bf16.msra.mxu1 %v9368_v32  ;;  %v9392_v32 = vld [vmem:[%s15679_s7 + $0x160] sm:$0xff]  }
  0x24   :  { %10407 = vmatprep.subr.bf16.mxu0 %v9362_v33  ;;  %10435 = vmatprep.subr.bf16.mxu1 %v9377_v34 }
  0x26   :  { %10973 = vset.pattern.permute.xlu1 %v11499_v26  ;;  %179 = vperm.xlu0 %10971, %v11690_v3  }
  0x27   :  { %171 = vperm.xlu1 %10973, %v11695_v4   ;;  %10409 = vmatpush3.bf16.msra.mxu0 %v9354_v35  ;;  %v11993_v35 = vld [vmem:[%s15680_s29 + $0x68] sm:$0xff] }
  0x28   :  { %10437 = vmatpush3.bf16.msra.mxu1 %v9369_v36  ;;  %10411 = vmatprep.subr.bf16.mxu0 %v9363_v37  ;;  %v11999_v37 = vld [vmem:[%s15680_s29 + $0x50] sm:$0xff] }
  0x29   :  { %10439 = vmatprep.subr.bf16.mxu1 %v9378_v38 }
  0x2a   :  { %191 = vperm.xlu0 %10971, %v11749_v18  }
  0x2b   :  { %175 = vperm.xlu1 %10973, %v11678_v1   ;;  %10413 = vmatpush3.bf16.msra.mxu0 %v9355_v39 }
  0x2c   :  { %10447 = vmatprep.subr.bf16.mxu0 %v9388_v40  ;;  %10441 = vmatpush3.bf16.msra.mxu1 %v9370_v41  ;;  %v9384_v40 = vld [vmem:[%s15679_s7 + $0x120] sm:$0xff]   ;;  %v9393_v41 = vld [vmem:[%s15679_s7 + $0x168] sm:$0xff]  }
  0x2d   :  { %10443 = vmatprep.subr.bf16.mxu1 %v9379_v42  ;;  %v12012_v42 = vld [vmem:[%s15680_s29 + $0x60] sm:$0xff] }
  0x2e   :  { %10977 = vset.pattern.permute.xlu0 %v11498_v25 }
  0x2f   :  { %10974 = vset.pattern.permute.xlu1 %v11498_v25  ;;  %219 = vperm.xlu0 %10977, %v11695_v4  }
  0x30   :  { %223 = vperm.xlu1 %10974, %v11678_v1   ;;  %10445 = vmatpush3.bf16.msra.mxu1 %v9371_v43 }
  0x31   :  { %10479 = vmatprep.subr.bf16.mxu1 %v9404_v44 }
  0x33   :  { %231 = vperm.xlu0 %10977, %v11719_v10  }
  0x34   :  { %227 = vperm.xlu1 %10974, %v11690_v3  }
  0x37   :  { %243 = vperm.xlu0 %10977, %v11744_v17  }
  0x38   :  { %10975 = vset.pattern.permute.xlu1 %v11499_v26 }
  0x39   :  { %183 = vperm.xlu1 %10975, %v11719_v10  }
  0x3b   :  { %10981 = vset.pattern.permute.xlu0 %v11500_v45 }
  0x3c   :  { %267 = vperm.xlu0 %10981, %v11695_v4  }
  0x3d   :  { %187 = vperm.xlu1 %10975, %v11711_v8  }
  0x40   :  { %10983 = vset.pattern.permute.xlu0 %v11501_v46 }
  0x41   :  { %10976 = vset.pattern.permute.xlu1 %v11498_v25  ;;  %319 = vperm.xlu0 %10983, %v11678_v1   ;;  %v9391_v25 = vld [vmem:[%s15679_s7 + $0x158] sm:$0xff]  }
  0x42   :  { %235 = vperm.xlu1 %10976, %v11711_v8  }
  0x45   :  { %331 = vperm.xlu0 %10983, %v11711_v8  }
  0x46   :  { %239 = vperm.xlu1 %10976, %v11749_v18  }
  0x49   :  { %10986 = vset.pattern.permute.xlu0 %v11500_v45 }
  0x4a   :  { %10978 = vset.pattern.permute.xlu1 %v11499_v26  ;;  %279 = vperm.xlu0 %10986, %v11719_v10   ;;  %v11970_v26 = vld [vmem:[%s15680_s29 + $0x40] sm:$0xff] }
  0x4b   :  { %195 = vperm.xlu1 %10978, %v11744_v17  }
  0x4e   :  { %291 = vperm.xlu0 %10986, %v11744_v17  }
  0x4f   :  { %10979 = vset.pattern.permute.xlu1 %v11500_v45 }
  0x50   :  { %263 = vperm.xlu1 %10979, %v11683_v2  }
  0x52   :  { %10989 = vset.pattern.permute.xlu0 %v11502_v47 }
  0x53   :  { %407 = vperm.xlu0 %10989, %v11683_v2  }
  0x54   :  { %10980 = vset.pattern.permute.xlu1 %v11501_v46 }
  0x55   :  { %311 = vperm.xlu1 %10980, %v11683_v2  }
  0x57   :  { %10991 = vset.pattern.permute.xlu0 %v11503_v48 }
  0x58   :  { %367 = vperm.xlu0 %10991, %v11678_v1  }
  0x59   :  { %315 = vperm.xlu1 %10980, %v11695_v4  }
  0x5c   :  { %379 = vperm.xlu0 %10991, %v11711_v8  }
  0x5d   :  { %10982 = vset.pattern.permute.xlu1 %v11500_v45 }
  0x5e   :  { %271 = vperm.xlu1 %10982, %v11678_v1  }
  0x60   :  { %10994 = vset.pattern.permute.xlu0 %v11502_v47 }
  0x61   :  { %419 = vperm.xlu0 %10994, %v11690_v3  }
  0x62   :  { %275 = vperm.xlu1 %10982, %v11690_v3  }
  0x65   :  { %431 = vperm.xlu0 %10994, %v11749_v18  }
  0x66   :  { %10984 = vset.pattern.permute.xlu1 %v11501_v46 }
  0x67   :  { %323 = vperm.xlu1 %10984, %v11690_v3  }
  0x69   :  { %10997 = vset.pattern.permute.xlu0 %v11504_v49 }
  0x6a   :  { %455 = vperm.xlu0 %10997, %v11683_v2  }
  0x6b   :  { %327 = vperm.xlu1 %10984, %v11719_v10  }
  0x6e   :  { %11000 = vset.pattern.permute.xlu0 %v11505_v50 }
  0x6f   :  { %10985 = vset.pattern.permute.xlu1 %v11500_v45  ;;  %507 = vperm.xlu0 %11000, %v11695_v4   ;;  %v9396_v45 = vld [vmem:[%s15679_s7 + $0x180] sm:$0xff]  }
  0x70   :  { %283 = vperm.xlu1 %10985, %v11711_v8  }
  0x73   :  { %11002 = vset.pattern.permute.xlu0 %v11504_v49 }
  0x74   :  { %287 = vperm.xlu1 %10985, %v11749_v18   ;;  %467 = vperm.xlu0 %11002, %v11690_v3  }
  0x78   :  { %10987 = vset.pattern.permute.xlu1 %v11501_v46  ;;  %11004 = vset.pattern.permute.xlu0 %v11505_v50 }
  0x79   :  { %335 = vperm.xlu1 %10987, %v11749_v18   ;;  %519 = vperm.xlu0 %11004, %v11719_v10  }
  0x7d   :  { %339 = vperm.xlu1 %10987, %v11744_v17   ;;  %11006 = vset.pattern.permute.xlu0 %v11504_v49 }
  0x7e   :  { %479 = vperm.xlu0 %11006, %v11749_v18  }
  0x81   :  { %10988 = vset.pattern.permute.xlu1 %v11503_v48 }
  0x82   :  { %359 = vperm.xlu1 %10988, %v11683_v2   ;;  %11008 = vset.pattern.permute.xlu0 %v11505_v50 }
  0x83   :  { %531 = vperm.xlu0 %11008, %v11744_v17  }
  0x86   :  { %363 = vperm.xlu1 %10988, %v11695_v4  }
  0x8a   :  { %10990 = vset.pattern.permute.xlu1 %v11502_v47 }
  0x8b   :  { %411 = vperm.xlu1 %10990, %v11695_v4  }
  0x8f   :  { %415 = vperm.xlu1 %10990, %v11678_v1  }
  0x90   :  { %v123_v53 = vpop.permute.xlu1 %122  ;;  %v113_v54 = vpop.permute.xlu0 %112 }
  0x91   :  { %v150_v55 = vmul.f32 %v113_v54, %v11893_v51  ;;  %v151_v56 = vmul.f32 %v113_v54, %v11898_v52  ;;  %v155_v11 = vmul.f32 %v123_v53, %v11923_v61  ;;  %v154_v16 = vmul.f32 %v123_v53, %v11934_v9 }
  0x93   :  { %10992 = vset.pattern.permute.xlu1 %v11503_v48  ;;  %1190 = vmatprep.mubr.f32.mxu0 %v151_v56  ;;  %v12029_v56 = vld [vmem:[%s15680_s29 + $0x78] sm:$0xff] }
  0x94   :  { %v128_v62 = vpop.permute.xlu1 %127  ;;  %371 = vperm.xlu1 %10992, %v11690_v3   ;;  %v118_v63 = vpop.permute.xlu0 %117  ;;  %1191 = vmatmul.mubr.f32.vlgmr.msra.gmra.mrb[0].mxu0 %v150_v55 }
  0x95   :  { %v152_v5 = vmul.f32 %v118_v63, %v11906_v57  ;;  %v153_v6 = vmul.f32 %v118_v63, %v11911_v58  ;;  %10449 = vmatpush3.bf16.msra.mxu0 %v9380_v59  ;;  %v157_v21 = vmul.f32 %v128_v62, %v11943_v13  ;;  %v156_v28 = vmul.f32 %v128_v62, %v11955_v20  ;;  %v9405_v63 = vld [vmem:[%s15679_s7 + $0x1c8] sm:$0xff]  }
  0x96   :  { %10451 = vmatprep.subr.bf16.mxu0 %v9389_v60  ;;  %v9394_v60 = vld [vmem:[%s15679_s7 + $0x170] sm:$0xff]  }
  0x97   :  { %1195 = vmatprep.mubr.f32.mxu0 %v153_v6  ;;  %v12044_v6 = vld [vmem:[%s15680_s29 + $0x70] sm:$0xff] }
  0x98   :  { %v138_v14 = vpop.permute.xlu1 %137  ;;  %375 = vperm.xlu1 %10992, %v11719_v10   ;;  %1196 = vmatmul.mubr.f32.gmra.mrb[2].mxu0 %v152_v5  ;;  %v133_v15 = vpop.permute.xlu0 %132 }
  0x99   :  { %1200 = vmatprep.mubr.f32.mxu0 %v155_v11  ;;  %10453 = vmatpush3.bf16.msra.mxu0 %v9381_v7  ;;  %v159_v27 = vmul.f32 %v133_v15, %v11950_v19  ;;  %v158_v31 = vmul.f32 %v133_v15, %v11970_v26  ;;  %v161_v38 = vmul.f32 %v138_v14, %v11981_v30 }
  0x9a   :  { %10455 = vmatprep.subr.bf16.mxu0 %v9390_v12  ;;  %v160_v46 = vmul.f32 %v138_v14, %v11999_v37  ;;  %v9386_v14 = vld [vmem:[%s15679_s7 + $0x130] sm:$0xff]  }
  0x9c   :  { %v11961_v23 = vpop.permute.xlu1 %147  ;;  %10993 = vset.pattern.permute.xlu1 %v11502_v47  ;;  %1201 = vmatmul.mubr.f32.gmra.mrb[4].mxu0 %v154_v16  ;;  %v143_v24 = vpop.permute.xlu0 %142  ;;  %v9395_v16 = vld [vmem:[%s15679_s7 + $0x178] sm:$0xff]  }
  0x9d   :  { %423 = vperm.xlu1 %10993, %v11719_v10   ;;  %1205 = vmatprep.mubr.f32.mxu0 %v157_v21  ;;  %v163_v43 = vmul.f32 %v143_v24, %v11993_v35  ;;  %v162_v59 = vmul.f32 %v143_v24, %v12012_v42  ;;  %v165_v7 = vmul.f32 %v11961_v23, %v12029_v56 }
  0x9e   :  { %10457 = vmatpush3.bf16.msra.mxu0 %v9382_v22  ;;  %v164_v21 = vmul.f32 %v11961_v23, %v12044_v6  ;;  %v9397_v23 = vld [vmem:[%s15679_s7 + $0x188] sm:$0xff]  }
  0x9f   :  { %10459 = vmatprep.subr.bf16.mxu0 %v9391_v25 }
  0xa0   :  { %1206 = vmatmul.mubr.f32.gmra.mrb[6].mxu0 %v156_v28 }
  0xa1   :  { %427 = vperm.xlu1 %10993, %v11711_v8   ;;  %v11988_v33 = vpop.permute.xlu1 %215  ;;  %v168_v34 = vpop.permute.xlu0 %167  ;;  %1210 = vmatprep.mubr.f32.mxu0 %v159_v27  ;;  %v9387_v27 = vld [vmem:[%s15679_s7 + $0x138] sm:$0xff]  }
  0xa2   :  { %10461 = vmatpush3.bf16.msra.mxu0 %v9383_v29  ;;  %v199_v36 = vmul.f32 %v168_v34, %v11898_v52  ;;  %v198_v39 = vmul.f32 %v168_v34, %v11893_v51  ;;  %v247_v22 = vmul.f32 %v11988_v33, %v11898_v52 }
  0xa3   :  { %10463 = vmatprep.subr.bf16.mxu0 %v9392_v32  ;;  %v246_v32 = vmul.f32 %v11988_v33, %v11893_v51 }
  0xa4   :  { %1211 = vmatmul.mubr.f32.gmra.mrb[8].mxu0 %v158_v31  ;;  %1295 = vmatprep.mubr.f32.mxu1 %v199_v36  ;;  %v9406_v31 = vld [vmem:[%s15679_s7 + $0x1d0] sm:$0xff]   ;;  %v9412_v36 = vld [vmem:[%s15679_s7 + $0x200] sm:$0xff]  }
  0xa5   :  { %10995 = vset.pattern.permute.xlu1 %v11503_v48  ;;  %1215 = vmatprep.mubr.f32.mxu0 %v161_v38  ;;  %v180_v44 = vpop.permute.xlu0 %179  ;;  %v9385_v48 = vld [vmem:[%s15679_s7 + $0x128] sm:$0xff]   ;;  %v9398_v38 = vld [vmem:[%s15679_s7 + $0x190] sm:$0xff]  }
  0xa6   :  { %10465 = vmatpush3.bf16.msra.mxu0 %v9384_v40  ;;  %383 = vperm.xlu1 %10995, %v11749_v18   ;;  %v172_v53 = vpop.permute.xlu1 %171  ;;  %v205_v15 = vmul.f32 %v180_v44, %v11943_v13  ;;  %v204_v24 = vmul.f32 %v180_v44, %v11955_v20  ;;  %v9407_v40 = vld [vmem:[%s15679_s7 + $0x1d8] sm:$0xff]  }
  0xa7   :  { %v200_v54 = vmul.f32 %v172_v53, %v11906_v57  ;;  %v201_v55 = vmul.f32 %v172_v53, %v11911_v58  ;;  %1296 = vmatmul.mubr.f32.vlgmr.msra.gmra.mrb[0].mxu1 %v198_v39  ;;  %10467 = vmatprep.subr.bf16.mxu0 %v9393_v41  ;;  %v9421_v39 = vld [vmem:[%s15679_s7 + $0x248] sm:$0xff]   ;;  %v9399_v44 = vld [vmem:[%s15679_s7 + $0x198] sm:$0xff]   ;;  %v9422_v53 = vld [vmem:[%s15679_s7 + $0x250] sm:$0xff]  }
  0xa8   :  { %1216 = vmatmul.mubr.f32.gmra.mrb[10].mxu0 %v160_v46  ;;  %10481 = vmatpush3.bf16.msra.mxu1 %v9396_v45 }
  0xa9   :  { %1300 = vmatprep.mubr.f32.mxu1 %v201_v55  ;;  %1220 = vmatprep.mubr.f32.mxu0 %v163_v43  ;;  %v12035_v62 = vpop.permute.xlu0 %191  ;;  %v9414_v55 = vld [vmem:[%s15679_s7 + $0x210] sm:$0xff]  }
  0xaa   :  { %10469 = vmatpush3.bf16.msra.mxu0 %v9385_v48  ;;  %387 = vperm.xlu1 %10995, %v11744_v17   ;;  %v176_v5 = vpop.permute.xlu1 %175 }
  0xab   :  { %v202_v11 = vmul.f32 %v176_v5, %v11934_v9  ;;  %v203_v12 = vmul.f32 %v176_v5, %v11923_v61  ;;  %1301 = vmatmul.mubr.f32.gmra.mrb[2].mxu1 %v200_v54  ;;  %10471 = vmatprep.subr.bf16.mxu0 %v9394_v60 }
  0xac   :  { %1221 = vmatmul.mubr.f32.gmra.mrb[12].mxu0 %v162_v59  ;;  %10483 = vmatprep.subr.bf16.mxu1 %v9405_v63 }
  0xad   :  { %1225 = vmatprep.mubr.f32.mxu0 %v165_v7  ;;  %1305 = vmatprep.mubr.f32.mxu1 %v203_v12  ;;  %v9423_v7 = vld [vmem:[%s15679_s7 + $0x258] sm:$0xff]  }
  0xae   :  { %10473 = vmatpush3.bf16.msra.mxu0 %v9386_v14  ;;  %10996 = vset.pattern.permute.xlu1 %v11502_v47  ;;  %v220_v28 = vpop.permute.xlu0 %219  ;;  %v9420_v47 = vld [vmem:[%s15679_s7 + $0x240] sm:$0xff]  }
  0xaf   :  { %1306 = vmatmul.mubr.f32.gmra.mrb[4].mxu1 %v202_v11  ;;  %435 = vperm.xlu1 %10996, %v11744_v17   ;;  %v224_v25 = vpop.permute.xlu1 %223  ;;  %v249_v29 = vmul.f32 %v220_v28, %v11911_v58  ;;  %v248_v33 = vmul.f32 %v220_v28, %v11906_v57  ;;  %v211_v11 = vmul.f32 %v12035_v62, %v11993_v35  ;;  %v9424_v28 = vld [vmem:[%s15679_s7 + $0x260] sm:$0xff]  }
  0xb0   :  { %1226 = vmatmul.mubr.f32.gmra.mrb[14].mxu0 %v164_v21  ;;  %10475 = vmatprep.subr.bf16.mxu0 %v9395_v16  ;;  %v251_v41 = vmul.f32 %v224_v25, %v11923_v61  ;;  %v250_v54 = vmul.f32 %v224_v25, %v11934_v9  ;;  %v9400_v16 = vld [vmem:[%s15679_s7 + $0x1a0] sm:$0xff]  }
  0xb1   :  { %1310 = vmatprep.mubr.f32.mxu1 %v205_v15  ;;  %1400 = vmatprep.mubr.f32.mxu0 %v247_v22  ;;  %v210_v15 = vmul.f32 %v12035_v62, %v12012_v42  ;;  %v9409_v62 = vld [vmem:[%s15679_s7 + $0x1e8] sm:$0xff]  }
  0xb2   :  { %10477 = vmatpush3.bf16.msra.mxu0 %v9387_v27  ;;  %10485 = vmatpush3.bf16.msra.mxu1 %v9397_v23  ;;  %v232_v60 = vpop.permute.xlu0 %231  ;;  %v9401_v27 = vld [vmem:[%s15679_s7 + $0x1a8] sm:$0xff]  }
  0xb3   :  { %1311 = vmatmul.mubr.f32.gmra.mrb[6].mxu1 %v204_v24  ;;  %10998 = vset.pattern.permute.xlu1 %v11505_v50  ;;  %v228_v34 = vpop.permute.xlu1 %227  ;;  %v255_v14 = vmul.f32 %v232_v60, %v11950_v19  ;;  %v254_v21 = vmul.f32 %v232_v60, %v11970_v26  ;;  %v9415_v24 = vld [vmem:[%s15679_s7 + $0x218] sm:$0xff]  }
  0xb4   :  { %503 = vperm.xlu1 %10998, %v11683_v2   ;;  %10511 = vmatprep.subr.bf16.mxu0 %v9420_v47  ;;  %v9413_v2 = vld [vmem:[%s15679_s7 + $0x208] sm:$0xff]   ;;  %v253_v48 = vmul.f32 %v228_v34, %v11943_v13  ;;  %v252_v12 = vmul.f32 %v228_v34, %v11955_v20  ;;  %v9410_v47 = vld [vmem:[%s15679_s7 + $0x1f0] sm:$0xff]   ;;  %v9427_v60 = vld [vmem:[%s15679_s7 + $0x278] sm:$0xff]  }
  0xb5   :  { %1401 = vmatmul.mubr.f32.vlgmr.msra.gmra.mrb[16].mxu0 %v246_v32  ;;  %10487 = vmatprep.subr.bf16.mxu1 %v9406_v31  ;;  %v9425_v31 = vld [vmem:[%s15679_s7 + $0x268] sm:$0xff]  }
  0xb6   :  { %1405 = vmatprep.mubr.f32.mxu0 %v249_v29  ;;  %10513 = vmatpush3.bf16.msra.mxu0 %v9412_v36  ;;  %v244_v34 = vpop.permute.xlu0 %243  ;;  %v9402_v36 = vld [vmem:[%s15679_s7 + $0x1b0] sm:$0xff]  }
  0xb7   :  { %10489 = vmatpush3.bf16.msra.mxu1 %v9398_v38  ;;  %10515 = vmatprep.subr.bf16.mxu0 %v9421_v39  ;;  %v9411_v38 = vld [vmem:[%s15679_s7 + $0x1f8] sm:$0xff]  }
  0xb8   :  { %10999 = vset.pattern.permute.xlu1 %v11504_v49  ;;  %v184_v43 = vpop.permute.xlu1 %183  ;;  %10491 = vmatprep.subr.bf16.mxu1 %v9407_v40 }
  0xb9   :  { %v206_v45 = vmul.f32 %v184_v43, %v11970_v26  ;;  %v207_v46 = vmul.f32 %v184_v43, %v11950_v19  ;;  %1406 = vmatmul.mubr.f32.gmra.mrb[18].mxu0 %v248_v33  ;;  %459 = vperm.xlu1 %10999, %v11695_v4   ;;  %v9408_v4 = vld [vmem:[%s15679_s7 + $0x1e0] sm:$0xff]   ;;  %v261_v33 = vmul.f32 %v244_v34, %v12029_v56  ;;  %v9403_v43 = vld [vmem:[%s15679_s7 + $0x1b8] sm:$0xff]  }
  0xba   :  { %1410 = vmatprep.mubr.f32.mxu0 %v251_v41  ;;  %10517 = vmatpush3.bf16.msra.mxu0 %v9413_v2 }
  0xbb   :  { %1315 = vmatprep.mubr.f32.mxu1 %v207_v46  ;;  %10493 = vmatpush3.bf16.msra.mxu1 %v9399_v44  ;;  %v260_v44 = vmul.f32 %v244_v34, %v12044_v6  ;;  %v9436_v46 = vld [vmem:[%s15679_s7 + $0x2c0] sm:$0xff]  }
  0xbc   :  { %v188_v59 = vpop.permute.xlu1 %187  ;;  %1316 = vmatmul.mubr.f32.gmra.mrb[8].mxu1 %v206_v45  ;;  %10519 = vmatprep.subr.bf16.mxu0 %v9422_v53  ;;  %v9426_v45 = vld [vmem:[%s15679_s7 + $0x270] sm:$0xff]  }
  0xbd   :  { %v208_v63 = vmul.f32 %v188_v59, %v11999_v37  ;;  %v209_v5 = vmul.f32 %v188_v59, %v11981_v30  ;;  %1411 = vmatmul.mubr.f32.gmra.mrb[20].mxu0 %v250_v54  ;;  %463 = vperm.xlu1 %10999, %v11678_v1   ;;  %v9418_v54 = vld [vmem:[%s15679_s7 + $0x230] sm:$0xff]  }
  0xbe   :  { %1415 = vmatprep.mubr.f32.mxu0 %v253_v48  ;;  %10521 = vmatpush3.bf16.msra.mxu0 %v9414_v55 }
  0xbf   :  { %1320 = vmatprep.mubr.f32.mxu1 %v209_v5  ;;  %10495 = vmatprep.subr.bf16.mxu1 %v9408_v4  ;;  %v9428_v4 = vld [vmem:[%s15679_s7 + $0x280] sm:$0xff]   ;;  %v9419_v5 = vld [vmem:[%s15679_s7 + $0x238] sm:$0xff]  }
  0xc0   :  { %1321 = vmatmul.mubr.f32.gmra.mrb[10].mxu1 %v208_v63  ;;  %10523 = vmatprep.subr.bf16.mxu0 %v9423_v7 }
  0xc1   :  { %1416 = vmatmul.mubr.f32.gmra.mrb[22].mxu0 %v252_v12  ;;  %11001 = vset.pattern.permute.xlu1 %v11505_v50  ;;  %v236_v22 = vpop.permute.xlu1 %235 }
  0xc2   :  { %v257_v25 = vmul.f32 %v236_v22, %v11981_v30  ;;  %511 = vperm.xlu1 %11001, %v11678_v1   ;;  %1325 = vmatprep.mubr.f32.mxu1 %v211_v11  ;;  %v9416_v1 = vld [vmem:[%s15679_s7 + $0x220] sm:$0xff]   ;;  %v256_v32 = vmul.f32 %v236_v22, %v11999_v37  ;;  %v9437_v11 = vld [vmem:[%s15679_s7 + $0x2c8] sm:$0xff]  }
  0xc3   :  { %1420 = vmatprep.mubr.f32.mxu0 %v255_v14  ;;  %10497 = vmatpush3.bf16.msra.mxu1 %v9400_v16  ;;  %v9429_v16 = vld [vmem:[%s15679_s7 + $0x288] sm:$0xff]  }
  0xc4   :  { %1326 = vmatmul.mubr.f32.gmra.mrb[12].mxu1 %v210_v15  ;;  %10525 = vmatpush3.bf16.msra.mxu0 %v9415_v24  ;;  %v9452_v15 = vld [vmem:[%s15679_s7 + $0x340] sm:$0xff]   ;;  %v9453_v24 = vld [vmem:[%s15679_s7 + $0x348] sm:$0xff]  }
  0xc5   :  { %1421 = vmatmul.mubr.f32.gmra.mrb[24].mxu0 %v254_v21  ;;  %v240_v23 = vpop.permute.xlu1 %239  ;;  %10499 = vmatprep.subr.bf16.mxu1 %v9409_v62  ;;  %v9438_v21 = vld [vmem:[%s15679_s7 + $0x2d0] sm:$0xff]  }
  0xc6   :  { %v259_v29 = vmul.f32 %v240_v23, %v11993_v35  ;;  %1425 = vmatprep.mubr.f32.mxu0 %v257_v25  ;;  %515 = vperm.xlu1 %11001, %v11690_v3   ;;  %v9417_v3 = vld [vmem:[%s15679_s7 + $0x228] sm:$0xff]   ;;  %v258_v40 = vmul.f32 %v240_v23, %v12012_v42  ;;  %v9430_v23 = vld [vmem:[%s15679_s7 + $0x290] sm:$0xff]  }
  0xc7   :  { %10501 = vmatpush3.bf16.msra.mxu1 %v9401_v27  ;;  %10527 = vmatprep.subr.bf16.mxu0 %v9424_v28 }
  0xc8   :  { %10529 = vmatpush3.bf16.msra.mxu0 %v9416_v1  ;;  %10503 = vmatprep.subr.bf16.mxu1 %v9410_v47  ;;  %v9454_v1 = vld [vmem:[%s15679_s7 + $0x350] sm:$0xff]  }
  0xc9   :  { %1426 = vmatmul.mubr.f32.gmra.mrb[26].mxu0 %v256_v32  ;;  %10531 = vmatprep.subr.bf16.mxu0 %v9425_v31  ;;  %v9439_v31 = vld [vmem:[%s15679_s7 + $0x2d8] sm:$0xff]  }
  0xca   :  { %1430 = vmatprep.mubr.f32.mxu0 %v259_v29  ;;  %11003 = vset.pattern.permute.xlu1 %v11504_v49  ;;  %v196_v39 = vpop.permute.xlu1 %195 }
  0xcb   :  { %v212_v2 = vmul.f32 %v196_v39, %v12044_v6  ;;  %v213_v41 = vmul.f32 %v196_v39, %v12029_v56  ;;  %471 = vperm.xlu1 %11003, %v11719_v10   ;;  %10505 = vmatpush3.bf16.msra.mxu1 %v9402_v36  ;;  %v268_v10 = vpop.permute.xlu0 %267  ;;  %v9431_v36 = vld [vmem:[%s15679_s7 + $0x298] sm:$0xff]   ;;  %v9440_v39 = vld [vmem:[%s15679_s7 + $0x2e0] sm:$0xff]  }
  0xcc   :  { %10533 = vmatpush3.bf16.msra.mxu0 %v9417_v3  ;;  %10507 = vmatprep.subr.bf16.mxu1 %v9411_v38  ;;  %v297_v59 = vmul.f32 %v268_v10, %v11911_v58  ;;  %v296_v63 = vmul.f32 %v268_v10, %v11906_v57  ;;  %v9455_v3 = vld [vmem:[%s15679_s7 + $0x358] sm:$0xff]  }
  0xcd   :  { %1431 = vmatmul.mubr.f32.gmra.mrb[28].mxu0 %v258_v40  ;;  %1330 = vmatprep.mubr.f32.mxu1 %v213_v41  ;;  %v9447_v41 = vld [vmem:[%s15679_s7 + $0x318] sm:$0xff]  }
  0xce   :  { %1331 = vmatmul.mubr.f32.gmra.mrb[14].mxu1 %v212_v2  ;;  %1435 = vmatprep.mubr.f32.mxu0 %v261_v33 }
  0xcf   :  { %475 = vperm.xlu1 %11003, %v11711_v8   ;;  %v264_v53 = vpop.permute.xlu1 %263  ;;  %10509 = vmatpush3.bf16.msra.mxu1 %v9403_v43  ;;  %v320_v7 = vpop.permute.xlu0 %319  ;;  %v9432_v43 = vld [vmem:[%s15679_s7 + $0x2a0] sm:$0xff]  }
  0xd0   :  { %v294_v55 = vmul.f32 %v264_v53, %v11893_v51  ;;  %v295_v48 = vmul.f32 %v264_v53, %v11898_v52  ;;  %10535 = vmatprep.subr.bf16.mxu0 %v9426_v45  ;;  %10543 = vmatprep.subr.bf16.mxu1 %v9436_v46  ;;  %v347_v28 = vmul.f32 %v320_v7, %v11923_v61  ;;  %v9441_v46 = vld [vmem:[%s15679_s7 + $0x2e8] sm:$0xff]  }
  0xd1   :  { %1436 = vmatmul.mubr.f32.gmra.mrb[30].mxu0 %v260_v44  ;;  %v346_v29 = vmul.f32 %v320_v7, %v11934_v9  ;;  %v9456_v44 = vld [vmem:[%s15679_s7 + $0x360] sm:$0xff]  }
  0xd2   :  { %10537 = vmatpush3.bf16.msra.mxu0 %v9418_v54  ;;  %1505 = vmatprep.mubr.f32.mxu1 %v295_v48  ;;  %v9433_v48 = vld [vmem:[%s15679_s7 + $0x2a8] sm:$0xff]  }
  0xd3   :  { %11005 = vset.pattern.permute.xlu1 %v11505_v50  ;;  %1506 = vmatmul.mubr.f32.vlgmr.msra.gmra.mrb[16].mxu1 %v294_v55  ;;  %v12226_v27 = vpop.permute.xlu0 %331  ;;  %v9448_v55 = vld [vmem:[%s15679_s7 + $0x320] sm:$0xff]  }
  0xd4   :  { %523 = vperm.xlu1 %11005, %v11711_v8   ;;  %v312_v12 = vpop.permute.xlu1 %311  ;;  %10539 = vmatprep.subr.bf16.mxu0 %v9427_v60  ;;  %v9444_v8 = vld [vmem:[%s15679_s7 + $0x300] sm:$0xff]   ;;  %v9442_v60 = vld [vmem:[%s15679_s7 + $0x2f0] sm:$0xff]  }
  0xd5   :  { %v342_v14 = vmul.f32 %v312_v12, %v11893_v51  ;;  %v343_v50 = vmul.f32 %v312_v12, %v11898_v52  ;;  %1510 = vmatprep.mubr.f32.mxu1 %v297_v59  ;;  %10545 = vmatpush3.bf16.msra.mxu1 %v9428_v4  ;;  %v9457_v59 = vld [vmem:[%s15679_s7 + $0x368] sm:$0xff]   ;;  %v9434_v12 = vld [vmem:[%s15679_s7 + $0x2b0] sm:$0xff]  }
  0xd6   :  { %10541 = vmatpush3.bf16.msra.mxu0 %v9419_v5  ;;  %10547 = vmatprep.subr.bf16.mxu1 %v9437_v11  ;;  %v9449_v11 = vld [vmem:[%s15679_s7 + $0x328] sm:$0xff]  }
  0xd7   :  { %1511 = vmatmul.mubr.f32.gmra.mrb[18].mxu1 %v296_v63  ;;  %1610 = vmatprep.mubr.f32.mxu0 %v343_v50  ;;  %v280_v34 = vpop.permute.xlu0 %279  ;;  %v353_v63 = vmul.f32 %v12226_v27, %v11981_v30  ;;  %v352_v50 = vmul.f32 %v12226_v27, %v11999_v37  ;;  %v9468_v27 = vld [vmem:[%s15679_s7 + $0x3c0] sm:$0xff]  }
  0xd8   :  { %527 = vperm.xlu1 %11005, %v11749_v18   ;;  %v316_v22 = vpop.permute.xlu1 %315  ;;  %10575 = vmatprep.subr.bf16.mxu0 %v9452_v15  ;;  %v9445_v18 = vld [vmem:[%s15679_s7 + $0x308] sm:$0xff]   ;;  %v303_v2 = vmul.f32 %v280_v34, %v11950_v19  ;;  %v302_v45 = vmul.f32 %v280_v34, %v11970_v26  ;;  %v9443_v15 = vld [vmem:[%s15679_s7 + $0x2f8] sm:$0xff]  }
  0xd9   :  { %v344_v25 = vmul.f32 %v316_v22, %v11906_v57  ;;  %v345_v62 = vmul.f32 %v316_v22, %v11911_v58  ;;  %1611 = vmatmul.mubr.f32.vlgmr.msra.gmra.mrb[32].mxu0 %v342_v14  ;;  %10549 = vmatpush3.bf16.msra.mxu1 %v9429_v16  ;;  %v9458_v14 = vld [vmem:[%s15679_s7 + $0x370] sm:$0xff]  }
  0xda   :  { %10577 = vmatpush3.bf16.msra.mxu0 %v9444_v8  ;;  %10551 = vmatprep.subr.bf16.mxu1 %v9438_v21  ;;  %v9450_v22 = vld [vmem:[%s15679_s7 + $0x330] sm:$0xff]  }
  0xdb   :  { %1615 = vmatprep.mubr.f32.mxu0 %v345_v62  ;;  %10579 = vmatprep.subr.bf16.mxu0 %v9453_v24  ;;  %v292_v24 = vpop.permute.xlu0 %291  ;;  %v9459_v62 = vld [vmem:[%s15679_s7 + $0x378] sm:$0xff]  }
  0xdc   :  { %11007 = vset.pattern.permute.xlu1 %v11504_v49 }
  0xdd   :  { %1616 = vmatmul.mubr.f32.gmra.mrb[34].mxu0 %v344_v25  ;;  %483 = vperm.xlu1 %11007, %v11744_v17   ;;  %v272_v47 = vpop.permute.xlu1 %271  ;;  %v9446_v17 = vld [vmem:[%s15679_s7 + $0x310] sm:$0xff]   ;;  %v9435_v25 = vld [vmem:[%s15679_s7 + $0x2b8] sm:$0xff]  }
  0xde   :  { %v298_v49 = vmul.f32 %v272_v47, %v11934_v9  ;;  %v299_v32 = vmul.f32 %v272_v47, %v11923_v61  ;;  %1620 = vmatprep.mubr.f32.mxu0 %v347_v28  ;;  %10581 = vmatpush3.bf16.msra.mxu0 %v9445_v18  ;;  %v9451_v47 = vld [vmem:[%s15679_s7 + $0x338] sm:$0xff]  }
  0xdf   :  { %10553 = vmatpush3.bf16.msra.mxu1 %v9430_v23  ;;  %10583 = vmatprep.subr.bf16.mxu0 %v9454_v1  ;;  %v309_v1 = vmul.f32 %v292_v24, %v12029_v56 }
  0xe0   :  { %1515 = vmatprep.mubr.f32.mxu1 %v299_v32  ;;  %10555 = vmatprep.subr.bf16.mxu1 %v9439_v31  ;;  %v308_v31 = vmul.f32 %v292_v24, %v12044_v6  ;;  %v9463_v24 = vld [vmem:[%s15679_s7 + $0x398] sm:$0xff]  }
  0xe1   :  { %v276_v38 = vpop.permute.xlu1 %275  ;;  %1516 = vmatmul.mubr.f32.gmra.mrb[20].mxu1 %v298_v49  ;;  %1621 = vmatmul.mubr.f32.gmra.mrb[36].mxu0 %v346_v29  ;;  %v9484_v29 = vld [vmem:[%s15679_s7 + $0x440] sm:$0xff]  }
  0xe2   :  { %v300_v33 = vmul.f32 %v276_v38, %v11955_v20  ;;  %v301_v40 = vmul.f32 %v276_v38, %v11943_v13  ;;  %10585 = vmatpush3.bf16.msra.mxu0 %v9446_v17  ;;  %11009 = vset.pattern.permute.xlu1 %v15651_v0  ;;  %v408_v17 = vpop.permute.xlu0 %407 }
  0xe3   :  { %10557 = vmatpush3.bf16.msra.mxu1 %v9431_v36  ;;  %10587 = vmatprep.subr.bf16.mxu0 %v9455_v3 }
  0xe4   :  { %1520 = vmatprep.mubr.f32.mxu1 %v301_v40  ;;  %10559 = vmatprep.subr.bf16.mxu1 %v9440_v39  ;;  %v439_v39 = vmul.f32 %v408_v17, %v11898_v52 }
  0xe5   :  { %1521 = vmatmul.mubr.f32.gmra.mrb[22].mxu1 %v300_v33  ;;  %v438_v33 = vmul.f32 %v408_v17, %v11893_v51  ;;  %v9474_v17 = vld [vmem:[%s15679_s7 + $0x3f0] sm:$0xff]  }
  0xe6   :  { %v324_v10 = vpop.permute.xlu1 %323  ;;  %1525 = vmatprep.mubr.f32.mxu1 %v303_v2  ;;  %10589 = vmatpush3.bf16.msra.mxu0 %v9447_v41 }
  0xe7   :  { %v348_v53 = vmul.f32 %v324_v10, %v11955_v20  ;;  %v349_v54 = vmul.f32 %v324_v10, %v11943_v13  ;;  %10561 = vmatpush3.bf16.msra.mxu1 %v9432_v43  ;;  %10591 = vmatprep.subr.bf16.mxu0 %v9456_v44  ;;  %v368_v43 = vpop.permute.xlu0 %367  ;;  %v9476_v44 = vld [vmem:[%s15679_s7 + $0x400] sm:$0xff]  }
  0xe8   :  { %10563 = vmatprep.subr.bf16.mxu1 %v9441_v46  ;;  %v9485_v46 = vld [vmem:[%s15679_s7 + $0x448] sm:$0xff]  }
  0xe9   :  { %1526 = vmatmul.mubr.f32.gmra.mrb[24].mxu1 %v302_v45  ;;  %1625 = vmatprep.mubr.f32.mxu0 %v349_v54  ;;  %v9460_v45 = vld [vmem:[%s15679_s7 + $0x380] sm:$0xff]   ;;  %v395_v54 = vmul.f32 %v368_v43, %v11923_v61 }
  0xea   :  { %v328_v4 = vpop.permute.xlu1 %327  ;;  %1626 = vmatmul.mubr.f32.gmra.mrb[38].mxu0 %v348_v53 }
  0xeb   :  { %v350_v5 = vmul.f32 %v328_v4, %v11970_v26  ;;  %v351_v7 = vmul.f32 %v328_v4, %v11950_v19  ;;  %10593 = vmatpush3.bf16.msra.mxu0 %v9448_v55  ;;  %10565 = vmatpush3.bf16.msra.mxu1 %v9433_v48  ;;  %v12354_v55 = vpop.permute.xlu0 %379  ;;  %v9477_v48 = vld [vmem:[%s15679_s7 + $0x408] sm:$0xff]   ;;  %v9486_v4 = vld [vmem:[%s15679_s7 + $0x450] sm:$0xff]  }
  0xec   :  { %10595 = vmatprep.subr.bf16.mxu0 %v9457_v59  ;;  %10567 = vmatprep.subr.bf16.mxu1 %v9442_v60  ;;  %v9461_v59 = vld [vmem:[%s15679_s7 + $0x388] sm:$0xff]   ;;  %v9470_v60 = vld [vmem:[%s15679_s7 + $0x3d0] sm:$0xff]  }
  0xed   :  { %1630 = vmatprep.mubr.f32.mxu0 %v351_v7 }
  0xee   :  { %1631 = vmatmul.mubr.f32.gmra.mrb[40].mxu0 %v350_v5 }
  0xef   :  { %v284_v16 = vpop.permute.xlu1 %283  ;;  %1635 = vmatprep.mubr.f32.mxu0 %v353_v63  ;;  %10597 = vmatpush3.bf16.msra.mxu0 %v9449_v11  ;;  %v394_v63 = vmul.f32 %v368_v43, %v11934_v9  ;;  %v9466_v43 = vld [vmem:[%s15679_s7 + $0x3b0] sm:$0xff]  }
  0xf0   :  { %v304_v8 = vmul.f32 %v284_v16, %v11999_v37  ;;  %v305_v21 = vmul.f32 %v284_v16, %v11981_v30  ;;  %10569 = vmatpush3.bf16.msra.mxu1 %v9434_v12  ;;  %10599 = vmatprep.subr.bf16.mxu0 %v9458_v14  ;;  %v9462_v12 = vld [vmem:[%s15679_s7 + $0x390] sm:$0xff]   ;;  %v420_v14 = vpop.permute.xlu0 %419 }
  0xf1   :  { %10571 = vmatprep.subr.bf16.mxu1 %v9443_v15  ;;  %v9478_v15 = vld [vmem:[%s15679_s7 + $0x410] sm:$0xff]  }
  0xf2   :  { %1530 = vmatprep.mubr.f32.mxu1 %v305_v21  ;;  %1636 = vmatmul.mubr.f32.gmra.mrb[42].mxu0 %v352_v50  ;;  %v9471_v50 = vld [vmem:[%s15679_s7 + $0x3d8] sm:$0xff]  }
  0xf3   :  { %v288_v28 = vpop.permute.xlu1 %287  ;;  %1531 = vmatmul.mubr.f32.gmra.mrb[26].mxu1 %v304_v8  ;;  %10601 = vmatpush3.bf16.msra.mxu0 %v9450_v22  ;;  %v445_v22 = vmul.f32 %v420_v14, %v11943_v13 }
  0xf4   :  { %v306_v18 = vmul.f32 %v288_v28, %v12012_v42  ;;  %v307_v23 = vmul.f32 %v288_v28, %v11993_v35  ;;  %10573 = vmatpush3.bf16.msra.mxu1 %v9435_v25  ;;  %10603 = vmatprep.subr.bf16.mxu0 %v9459_v62  ;;  %v9472_v25 = vld [vmem:[%s15679_s7 + $0x3e0] sm:$0xff]   ;;  %v444_v62 = vmul.f32 %v420_v14, %v11955_v20 }
  0xf5   :  { %10607 = vmatprep.subr.bf16.mxu1 %v9468_v27  ;;  %v9488_v27 = vld [vmem:[%s15679_s7 + $0x460] sm:$0xff]  }
  0xf6   :  { %1535 = vmatprep.mubr.f32.mxu1 %v307_v23  ;;  %v11414_v14 = vld [vmem:[%s15680_s29] sm:$0xff] }
  0xf7   :  { %1536 = vmatmul.mubr.f32.gmra.mrb[28].mxu1 %v306_v18  ;;  %10605 = vmatpush3.bf16.msra.mxu0 %v9451_v47  ;;  %v9480_v47 = vld [vmem:[%s15679_s7 + $0x420] sm:$0xff]  }
  0xf8   :  { %v336_v49 = vpop.permute.xlu1 %335  ;;  %1540 = vmatprep.mubr.f32.mxu1 %v309_v1  ;;  %10639 = vmatprep.subr.bf16.mxu0 %v9484_v29  ;;  %v9464_v1 = vld [vmem:[%s15679_s7 + $0x3a0] sm:$0xff]   ;;  %v9473_v29 = vld [vmem:[%s15679_s7 + $0x3e8] sm:$0xff]  }
  0xf9   :  { %v354_v32 = vmul.f32 %v336_v49, %v12012_v42  ;;  %v355_v34 = vmul.f32 %v336_v49, %v11993_v35 }
  0xfb   :  { %1541 = vmatmul.mubr.f32.gmra.mrb[30].mxu1 %v308_v31  ;;  %1640 = vmatprep.mubr.f32.mxu0 %v355_v34  ;;  %v401_v31 = vmul.f32 %v12354_v55, %v11981_v30  ;;  %v9465_v34 = vld [vmem:[%s15679_s7 + $0x3a8] sm:$0xff]  }
  0xfc   :  { %v340_v36 = vpop.permute.xlu1 %339  ;;  %1641 = vmatmul.mubr.f32.gmra.mrb[44].mxu0 %v354_v32 }
  0xfd   :  { %v356_v3 = vmul.f32 %v340_v36, %v12044_v6  ;;  %v357_v38 = vmul.f32 %v340_v36, %v12029_v56  ;;  %v9481_v36 = vld [vmem:[%s15679_s7 + $0x428] sm:$0xff]  }
  0xff   :  { %1645 = vmatprep.mubr.f32.mxu0 %v357_v38  ;;  %v400_v38 = vmul.f32 %v12354_v55, %v11999_v37  ;;  %v9483_v55 = vld [vmem:[%s15679_s7 + $0x438] sm:$0xff]  }
 0x100   :  { %1646 = vmatmul.mubr.f32.gmra.mrb[46].mxu0 %v356_v3  ;;  %v11506_v3 = vmov 12  }
 0x101   :  { %v360_v40 = vpop.permute.xlu1 %359  ;;  %1820 = vmatprep.mubr.f32.mxu0 %v439_v39  ;;  %v9490_v39 = vld [vmem:[%s15679_s7 + $0x470] sm:$0xff]  }
 0x102   :  { %v390_v2 = vmul.f32 %v360_v40, %v11893_v51  ;;  %v391_v41 = vmul.f32 %v360_v40, %v11898_v52  ;;  %v9469_v51 = vld [vmem:[%s15679_s7 + $0x3c8] sm:$0xff]  }
 0x104   :  { %1715 = vmatprep.mubr.f32.mxu1 %v391_v41  ;;  %1821 = vmatmul.mubr.f32.vlgmr.msra.gmra.mrb[48].mxu0 %v438_v33  ;;  %v12441_v33 = vld [vmem:[%s15678_s8] sm:$0xff] }
 0x105   :  { %v364_v52 = vpop.permute.xlu1 %363  ;;  %1716 = vmatmul.mubr.f32.vlgmr.msra.gmra.mrb[32].mxu1 %v390_v2  ;;  %10641 = vmatpush3.bf16.msra.mxu0 %v9476_v44  ;;  %v432_v44 = vpop.permute.xlu0 %431 }
 0x106   :  { %v392_v10 = vmul.f32 %v364_v52, %v11906_v57  ;;  %v393_v53 = vmul.f32 %v364_v52, %v11911_v58  ;;  %10609 = vmatpush3.bf16.msra.mxu1 %v9460_v45  ;;  %10643 = vmatprep.subr.bf16.mxu0 %v9485_v46  ;;  %v9475_v45 = vld [vmem:[%s15679_s7 + $0x3f8] sm:$0xff]   ;;  %v9482_v46 = vld [vmem:[%s15679_s7 + $0x430] sm:$0xff]  }
 0x107   :  { %10611 = vmatprep.subr.bf16.mxu1 %v9469_v51  ;;  %v11507_v51 = vmov 10  }
 0x108   :  { %1720 = vmatprep.mubr.f32.mxu1 %v393_v53  ;;  %11016 = vset.pattern.permute.xlu0 %v11507_v51  ;;  %v451_v53 = vmul.f32 %v432_v44, %v11993_v35 }
 0x109   :  { %1721 = vmatmul.mubr.f32.gmra.mrb[34].mxu1 %v392_v10  ;;  %10645 = vmatpush3.bf16.msra.mxu0 %v9477_v48 }
 0x10a   :  { %v412_v5 = vpop.permute.xlu1 %411  ;;  %1725 = vmatprep.mubr.f32.mxu1 %v395_v54  ;;  %10613 = vmatpush3.bf16.msra.mxu1 %v9461_v59  ;;  %v9467_v54 = vld [vmem:[%s15679_s7 + $0x3b8] sm:$0xff]  }
 0x10b   :  { %v440_v7 = vmul.f32 %v412_v5, %v11906_v57  ;;  %v441_v11 = vmul.f32 %v412_v5, %v11911_v58  ;;  %10615 = vmatprep.subr.bf16.mxu1 %v9470_v60  ;;  %10647 = vmatprep.subr.bf16.mxu0 %v9486_v4  ;;  %v9487_v57 = vld [vmem:[%s15679_s7 + $0x458] sm:$0xff]   ;;  %v2072_v58 = vld [vmem:[%s15681_s4 + $0x8] sm:$0xff]  ;;  %v12479_v4 = vld [vmem:[%s15678_s8 + $0x10] sm:$0xff] }
 0x10c   :  { %2217 = vperm.xlu1 %11009, %v2072_v58   ;;  %v8409_v60 = vld [vmem:[%s15681_s4 + $0x48] sm:$0xff]  ;;  %2383 = vperm.xlu0 %11016, %v12479_v4  }
 0x10d   :  { %1726 = vmatmul.mubr.f32.gmra.mrb[36].mxu1 %v394_v63  ;;  %1825 = vmatprep.mubr.f32.mxu0 %v441_v11  ;;  %v456_v63 = vpop.permute.xlu0 %455 }
 0x10e   :  { %v416_v16 = vpop.permute.xlu1 %415  ;;  %1826 = vmatmul.mubr.f32.gmra.mrb[50].mxu0 %v440_v7  ;;  %10617 = vmatpush3.bf16.msra.mxu1 %v9462_v12  ;;  %v11412_v7 = vld [vmem:[%s15680_s29 + $0x8] sm:$0xff] }
 0x10f   :  { %v442_v8 = vmul.f32 %v416_v16, %v11934_v9  ;;  %v443_v21 = vmul.f32 %v416_v16, %v11923_v61  ;;  %10619 = vmatprep.subr.bf16.mxu1 %v9471_v50  ;;  %10649 = vmatpush3.bf16.msra.mxu0 %v9478_v15  ;;  %v9479_v9 = vld [vmem:[%s15679_s7 + $0x418] sm:$0xff]   ;;  %v8408_v61 = vld [vmem:[%s15681_s4 + $0x40] sm:$0xff]  ;;  %v487_v11 = vmul.f32 %v11412_v7, %v456_v63  ;;  %v12492_v12 = vld [vmem:[%s15678_s8 + $0x8] sm:$0xff] }
 0x110   :  { %10651 = vmatprep.subr.bf16.mxu0 %v9487_v57  ;;  %2288 = vperm.xlu1 %11009, %v8408_v61   ;;  %v486_v50 = vmul.f32 %v11414_v14, %v456_v63  ;;  %v12505_v16 = vld [vmem:[%s15678_s8 + $0x18] sm:$0xff]  ;;  %v11418_v61 = vld [vmem:[%s15680_s29 + $0x10] sm:$0xff] }
 0x111   :  { %1830 = vmatprep.mubr.f32.mxu0 %v443_v21  ;;  %11017 = vset.pattern.permute.xlu0 %v11506_v3  ;;  %v508_v21 = vpop.permute.xlu0 %507 }
 0x112   :  { %1831 = vmatmul.mubr.f32.gmra.mrb[52].mxu0 %v442_v8  ;;  %10621 = vmatpush3.bf16.msra.mxu1 %v9463_v24  ;;  %v2074_v8 = vld [vmem:[%s15681_s4 + $0x18] sm:$0xff] }
 0x113   :  { %v372_v28 = vpop.permute.xlu1 %371  ;;  %1835 = vmatprep.mubr.f32.mxu0 %v445_v22  ;;  %10623 = vmatprep.subr.bf16.mxu1 %v9472_v25  ;;  %v11417_v25 = vld [vmem:[%s15680_s29 + $0x18] sm:$0xff] }
 0x114   :  { %v396_v18 = vmul.f32 %v372_v28, %v11955_v20  ;;  %v397_v23 = vmul.f32 %v372_v28, %v11943_v13  ;;  %10653 = vmatpush3.bf16.msra.mxu0 %v9479_v9  ;;  %v9489_v13 = vld [vmem:[%s15679_s7 + $0x468] sm:$0xff]   ;;  %11010 = vset.pattern.permute.xlu1 %v11506_v3  ;;  %v537_v9 = vmul.f32 %v11417_v25, %v508_v21 }
 0x115   :  { %10655 = vmatprep.subr.bf16.mxu0 %v9488_v27  ;;  %2455 = vperm.xlu1 %11010, %v12441_v33  }
 0x116   :  { %1730 = vmatprep.mubr.f32.mxu1 %v397_v23  ;;  %1836 = vmatmul.mubr.f32.gmra.mrb[54].mxu0 %v444_v62  ;;  %v536_v62 = vmul.f32 %v11418_v61, %v508_v21  ;;  %v12529_v23 = vld [vmem:[%s15678_s8 + $0x30] sm:$0xff] }
 0x117   :  { %v376_v20 = vpop.permute.xlu1 %375  ;;  %1731 = vmatmul.mubr.f32.gmra.mrb[38].mxu1 %v396_v18  ;;  %2459 = vperm.xlu0 %11017, %v12492_v12  }
 0x118   :  { %v398_v49 = vmul.f32 %v376_v20, %v11970_v26  ;;  %v399_v32 = vmul.f32 %v376_v20, %v11950_v19  ;;  %10625 = vmatpush3.bf16.msra.mxu1 %v9464_v1  ;;  %10657 = vmatpush3.bf16.msra.mxu0 %v9480_v47  ;;  %v468_v1 = vpop.permute.xlu0 %467  ;;  %v2075_v47 = vld [vmem:[%s15681_s4 + $0x20] sm:$0xff] }
 0x119   :  { %10627 = vmatprep.subr.bf16.mxu1 %v9473_v29  ;;  %10659 = vmatprep.subr.bf16.mxu0 %v9489_v13  ;;  %v11420_v13 = vld [vmem:[%s15680_s29 + $0x20] sm:$0xff] }
 0x11a   :  { %1735 = vmatprep.mubr.f32.mxu1 %v399_v32  ;;  %11011 = vset.pattern.permute.xlu1 %v11507_v51  ;;  %v11422_v32 = vld [vmem:[%s15680_s29 + $0x38] sm:$0xff] }
 0x11b   :  { %1736 = vmatmul.mubr.f32.gmra.mrb[40].mxu1 %v398_v49  ;;  %2375 = vperm.xlu1 %11011, %v12441_v33  }
 0x11c   :  { %v424_v40 = vpop.permute.xlu1 %423  ;;  %1740 = vmatprep.mubr.f32.mxu1 %v401_v31  ;;  %10629 = vmatpush3.bf16.msra.mxu1 %v9465_v34  ;;  %v11421_v31 = vld [vmem:[%s15680_s29 + $0x28] sm:$0xff]  ;;  %v493_v34 = vmul.f32 %v11422_v32, %v468_v1 }
 0x11d   :  { %v446_v2 = vmul.f32 %v424_v40, %v11970_v26  ;;  %v447_v41 = vmul.f32 %v424_v40, %v11950_v19  ;;  %10631 = vmatprep.subr.bf16.mxu1 %v9474_v17  ;;  %10661 = vmatpush3.bf16.msra.mxu0 %v9481_v36  ;;  %v9491_v19 = vld [vmem:[%s15679_s7 + $0x478] sm:$0xff]   ;;  %v11423_v36 = vld [vmem:[%s15680_s29 + $0x30] sm:$0xff] }
 0x11e   :  { %10663 = vmatprep.subr.bf16.mxu0 %v9490_v39  ;;  %2467 = vperm.xlu0 %11017, %v12505_v16   ;;  %v8411_v17 = vld [vmem:[%s15681_s4 + $0x58] sm:$0xff] }
 0x11f   :  { %1741 = vmatmul.mubr.f32.gmra.mrb[42].mxu1 %v400_v38  ;;  %1840 = vmatprep.mubr.f32.mxu0 %v447_v41  ;;  %v492_v38 = vmul.f32 %v11423_v36, %v468_v1  ;;  %v520_v41 = vpop.permute.xlu0 %519  ;;  %v2078_v1 = vld [vmem:[%s15681_s4 + $0x38] sm:$0xff] }
 0x120   :  { %v428_v26 = vpop.permute.xlu1 %427  ;;  %1841 = vmatmul.mubr.f32.gmra.mrb[56].mxu0 %v446_v2  ;;  %10633 = vmatpush3.bf16.msra.mxu1 %v9466_v43 }
 0x121   :  { %v448_v52 = vmul.f32 %v428_v26, %v11999_v37  ;;  %v449_v10 = vmul.f32 %v428_v26, %v11981_v30  ;;  %10635 = vmatprep.subr.bf16.mxu1 %v9475_v45  ;;  %10665 = vmatpush3.bf16.msra.mxu0 %v9482_v46  ;;  %v450_v30 = vmul.f32 %v432_v44, %v12012_v42  ;;  %v11424_v46 = vld [vmem:[%s15680_s29 + $0x48] sm:$0xff] }
 0x122   :  { %10667 = vmatprep.subr.bf16.mxu0 %v9491_v19  ;;  %11012 = vset.pattern.permute.xlu1 %v15651_v0  ;;  %v543_v19 = vmul.f32 %v11424_v46, %v520_v41  ;;  %v2076_v26 = vld [vmem:[%s15681_s4 + $0x28] sm:$0xff] }
 0x123   :  { %1845 = vmatprep.mubr.f32.mxu0 %v449_v10  ;;  %2293 = vperm.xlu1 %11012, %v8409_v60   ;;  %v11427_v60 = vld [vmem:[%s15680_s29 + $0x58] sm:$0xff] }
 0x124   :  { %1846 = vmatmul.mubr.f32.gmra.mrb[58].mxu0 %v448_v52  ;;  %10637 = vmatpush3.bf16.msra.mxu1 %v9467_v54  ;;  %v11425_v52 = vld [vmem:[%s15680_s29 + $0x40] sm:$0xff] }
 0x125   :  { %v384_v37 = vpop.permute.xlu1 %383  ;;  %1850 = vmatprep.mubr.f32.mxu0 %v451_v53  ;;  %10669 = vmatpush3.bf16.msra.mxu0 %v9483_v55  ;;  %v542_v10 = vmul.f32 %v11425_v52, %v520_v41 }
 0x126   :  { %v402_v48 = vmul.f32 %v384_v37, %v12012_v42  ;;  %v403_v59 = vmul.f32 %v384_v37, %v11993_v35 }
 0x127   :  { %11013 = vset.pattern.permute.xlu1 %v11507_v51 }
 0x128   :  { %1745 = vmatprep.mubr.f32.mxu1 %v403_v59  ;;  %1851 = vmatmul.mubr.f32.gmra.mrb[60].mxu0 %v450_v30  ;;  %v480_v30 = vpop.permute.xlu0 %479 }
 0x129   :  { %v388_v5 = vpop.permute.xlu1 %387  ;;  %1746 = vmatmul.mubr.f32.gmra.mrb[44].mxu1 %v402_v48  ;;  %2379 = vperm.xlu1 %11013, %v12492_v12   ;;  %v11426_v48 = vld [vmem:[%s15680_s29 + $0x50] sm:$0xff] }
 0x12a   :  { %v404_v35 = vmul.f32 %v388_v5, %v12044_v6  ;;  %v405_v42 = vmul.f32 %v388_v5, %v12029_v56  ;;  %v11428_v5 = vld [vmem:[%s15680_s29 + $0x68] sm:$0xff] }
 0x12c   :  { %1750 = vmatprep.mubr.f32.mxu1 %v405_v42  ;;  %v12576_v42 = vld [vmem:[%s15678_s8 + $0x20] sm:$0xff] }
 0x12d   :  { %1751 = vmatmul.mubr.f32.gmra.mrb[46].mxu1 %v404_v35  ;;  %11014 = vset.pattern.permute.xlu1 %v15651_v0  ;;  %v499_v35 = vmul.f32 %v11428_v5, %v480_v30 }
 0x12e   :  { %v436_v15 = vpop.permute.xlu1 %435  ;;  %1925 = vmatprep.mubr.f32.mxu1 %v487_v11  ;;  %2227 = vperm.xlu1 %11014, %v2074_v8   ;;  %v8413_v8 = vld [vmem:[%s15681_s4 + $0x68] sm:$0xff] }
 0x12f   :  { %v452_v57 = vmul.f32 %v436_v15, %v12044_v6  ;;  %v453_v58 = vmul.f32 %v436_v15, %v12029_v56  ;;  %v12515_v56 = vld [vmem:[%s15678_s8 + $0x28] sm:$0xff] }
 0x130   :  { %2475 = vperm.xlu0 %11017, %v12515_v56  }
 0x131   :  { %1855 = vmatprep.mubr.f32.mxu0 %v453_v58  ;;  %1926 = vmatmul.mubr.f32.vlgmr.msra.gmra.mrb[48].mxu1 %v486_v50 }
 0x132   :  { %1856 = vmatmul.mubr.f32.gmra.mrb[62].mxu0 %v452_v57  ;;  %11015 = vset.pattern.permute.xlu1 %v11506_v3  ;;  %v532_v57 = vpop.permute.xlu0 %531 }
 0x133   :  { %v504_v6 = vpop.permute.xlu1 %503  ;;  %2463 = vperm.xlu1 %11015, %v12479_v4  }
 0x134   :  { %v534_v22 = vmul.f32 %v11414_v14, %v504_v6  ;;  %v535_v24 = vmul.f32 %v11412_v7, %v504_v6  ;;  %2479 = vperm.xlu0 %11017, %v12529_v23   ;;  %v11430_v7 = vld [vmem:[%s15680_s29 + $0x60] sm:$0xff] }
 0x135   :  { %v498_v11 = vmul.f32 %v11430_v7, %v480_v30 }
 0x136   :  { %2030 = vmatprep.mubr.f32.mxu0 %v535_v24 }
 0x137   :  { %2031 = vmatmul.mubr.f32.vlgmr.msra.gmra.mrb[64].mxu0 %v534_v22  ;;  %11018 = vset.pattern.permute.xlu1 %v15651_v0  ;;  %v11431_v22 = vld [vmem:[%s15680_s29 + $0x78] sm:$0xff] }
 0x138   :  { %v460_v27 = vpop.permute.xlu1 %459  ;;  %2035 = vmatprep.mubr.f32.mxu0 %v537_v9  ;;  %2232 = vperm.xlu1 %11018, %v2075_v47   ;;  %v549_v24 = vmul.f32 %v11431_v22, %v532_v57 }
 0x139   :  { %v488_v28 = vmul.f32 %v11418_v61, %v460_v27  ;;  %v489_v18 = vmul.f32 %v11417_v25, %v460_v27  ;;  %v11432_v25 = vld [vmem:[%s15680_s29 + $0x70] sm:$0xff] }
 0x13a   :  { %v548_v9 = vmul.f32 %v11432_v25, %v532_v57 }
 0x13b   :  { %1930 = vmatprep.mubr.f32.mxu1 %v489_v18  ;;  %2036 = vmatmul.mubr.f32.gmra.mrb[66].mxu0 %v536_v62 }
 0x13c   :  { %v464_v29 = vpop.permute.xlu1 %463  ;;  %1931 = vmatmul.mubr.f32.gmra.mrb[50].mxu1 %v488_v28  ;;  %2303 = vperm.xlu1 %11018, %v8411_v17   ;;  %v11508_v28 = vmov 16  }
 0x13d   :  { %v490_v20 = vmul.f32 %v11420_v13, %v464_v29  ;;  %v491_v49 = vmul.f32 %v11421_v31, %v464_v29 }
 0x13f   :  { %1935 = vmatprep.mubr.f32.mxu1 %v491_v49 }
 0x140   :  { %1936 = vmatmul.mubr.f32.gmra.mrb[52].mxu1 %v490_v20  ;;  %11019 = vset.pattern.permute.xlu1 %v11507_v51  ;;  %v8414_v20 = vld [vmem:[%s15681_s4 + $0x70] sm:$0xff] }
 0x141   :  { %v512_v39 = vpop.permute.xlu1 %511  ;;  %1940 = vmatprep.mubr.f32.mxu1 %v493_v34  ;;  %2387 = vperm.xlu1 %11019, %v12505_v16  }
 0x142   :  { %v538_v40 = vmul.f32 %v11420_v13, %v512_v39  ;;  %v539_v2 = vmul.f32 %v11421_v31, %v512_v39 }
 0x144   :  { %1941 = vmatmul.mubr.f32.gmra.mrb[54].mxu1 %v492_v38  ;;  %2040 = vmatprep.mubr.f32.mxu0 %v539_v2 }
 0x145   :  { %v516_v43 = vpop.permute.xlu1 %515  ;;  %2041 = vmatmul.mubr.f32.gmra.mrb[68].mxu0 %v538_v40  ;;  %11020 = vset.pattern.permute.xlu1 %v15651_v0 }
 0x146   :  { %v540_v44 = vmul.f32 %v11423_v36, %v516_v43  ;;  %v541_v45 = vmul.f32 %v11422_v32, %v516_v43  ;;  %2237 = vperm.xlu1 %11020, %v2076_v26  }
 0x148   :  { %2045 = vmatprep.mubr.f32.mxu0 %v541_v45 }
 0x149   :  { %2046 = vmatmul.mubr.f32.gmra.mrb[70].mxu0 %v540_v44 }
 0x14a   :  { %v472_v53 = vpop.permute.xlu1 %471  ;;  %2050 = vmatprep.mubr.f32.mxu0 %v543_v19  ;;  %11021 = vset.pattern.permute.xlu1 %v11506_v3 }
 0x14b   :  { %v494_v54 = vmul.f32 %v11425_v52, %v472_v53  ;;  %v495_v55 = vmul.f32 %v11424_v46, %v472_v53  ;;  %2471 = vperm.xlu1 %11021, %v12576_v42  }
 0x14d   :  { %1945 = vmatprep.mubr.f32.mxu1 %v495_v55  ;;  %2051 = vmatmul.mubr.f32.gmra.mrb[72].mxu0 %v542_v10 }
 0x14e   :  { %v476_v37 = vpop.permute.xlu1 %475  ;;  %1946 = vmatmul.mubr.f32.gmra.mrb[56].mxu1 %v494_v54 }
 0x14f   :  { %v496_v59 = vmul.f32 %v11426_v48, %v476_v37  ;;  %v497_v63 = vmul.f32 %v11427_v60, %v476_v37  ;;  %11022 = vset.pattern.permute.xlu1 %v11507_v51 }
 0x150   :  { %2391 = vperm.xlu1 %11022, %v12576_v42  }
 0x151   :  { %1950 = vmatprep.mubr.f32.mxu1 %v497_v63 }
 0x152   :  { %1951 = vmatmul.mubr.f32.gmra.mrb[58].mxu1 %v496_v59 }
 0x153   :  { %v524_v14 = vpop.permute.xlu1 %523  ;;  %1955 = vmatprep.mubr.f32.mxu1 %v499_v35 }
 0x154   :  { %v544_v50 = vmul.f32 %v11426_v48, %v524_v14  ;;  %v545_v15 = vmul.f32 %v11427_v60, %v524_v14  ;;  %11023 = vset.pattern.permute.xlu1 %v15651_v0 }
 0x155   :  { %2313 = vperm.xlu1 %11023, %v8413_v8  }
 0x156   :  { %1956 = vmatmul.mubr.f32.gmra.mrb[60].mxu1 %v498_v11  ;;  %2055 = vmatprep.mubr.f32.mxu0 %v545_v15 }
 0x157   :  { %v528_v58 = vpop.permute.xlu1 %527  ;;  %2056 = vmatmul.mubr.f32.gmra.mrb[74].mxu0 %v544_v50 }
 0x158   :  { %v546_v21 = vmul.f32 %v11430_v7, %v528_v58  ;;  %v547_v6 = vmul.f32 %v11428_v5, %v528_v58 }
 0x159   :  { %11024 = vset.pattern.permute.xlu1 %v11508_v28 }
 0x15a   :  { %2060 = vmatprep.mubr.f32.mxu0 %v547_v6  ;;  %2615 = vperm.xlu1 %11024, %v12441_v33   ;;  %v11509_v6 = vmov 14  }
 0x15b   :  { %2061 = vmatmul.mubr.f32.gmra.mrb[76].mxu0 %v546_v21  ;;  %11027 = vset.pattern.permute.xlu0 %v11509_v6 }
 0x15c   :  { %v484_v61 = vpop.permute.xlu1 %483  ;;  %2065 = vmatprep.mubr.f32.mxu0 %v549_v24  ;;  %2535 = vperm.xlu0 %11027, %v12441_v33  }
 0x15d   :  { %v500_v62 = vmul.f32 %v11432_v25, %v484_v61  ;;  %v501_v27 = vmul.f32 %v11431_v22, %v484_v61 }
 0x15e   :  { %11025 = vset.pattern.permute.xlu1 %v11507_v51 }
 0x15f   :  { %1960 = vmatprep.mubr.f32.mxu1 %v501_v27  ;;  %2066 = vmatmul.mubr.f32.gmra.mrb[78].mxu0 %v548_v9 }
 0x160   :  { %1961 = vmatmul.mubr.f32.gmra.mrb[62].mxu1 %v500_v62  ;;  %2395 = vperm.xlu1 %11025, %v12515_v56  }
 0x164   :  { %11026 = vset.pattern.permute.xlu1 %v15651_v0 }
 0x165   :  { %2247 = vperm.xlu1 %11026, %v2078_v1  }
 0x167   :  { %v9567_v18 = vpop.f32.mrb[0].mxu0 }
 0x168   :  { %v9568_v47 = vpop.f32.mrb[1].mxu0 }
 0x169   :  { %v9569_v29 = vadd.f32 %v9568_v47, %v9567_v18  ;;  %2318 = vperm.xlu1 %11026, %v8414_v20  }
 0x16b   :  { %v9570_v13 = vpop.f32.mrb[2].mxu0 }
 0x16c   :  { %v9571_v31 = vpop.f32.mrb[3].mxu0 }
 0x16d   :  { %v9572_v49 = vadd.f32 %v9571_v31, %v9570_v13  ;;  %11028 = vset.pattern.permute.xlu1 %v11508_v28 }
 0x16e   :  { %2619 = vperm.xlu1 %11028, %v12492_v12  }
 0x16f   :  { %v9573_v32 = vpop.f32.mrb[4].mxu0 }
 0x170   :  { %v9574_v34 = vpop.f32.mrb[5].mxu0 }
 0x171   :  { %v9575_v17 = vadd.f32 %v9574_v34, %v9573_v32 }
 0x172   :  { %11029 = vset.pattern.permute.xlu1 %v11507_v51 }
 0x173   :  { %v9576_v36 = vpop.f32.mrb[6].mxu0  ;;  %2399 = vperm.xlu1 %11029, %v12529_v23  }
 0x174   :  { %v9577_v38 = vpop.f32.mrb[7].mxu0 }
 0x175   :  { %v9578_v39 = vadd.f32 %v9577_v38, %v9576_v36 }
 0x177   :  { %v9579_v40 = vpop.f32.mrb[8].mxu0  ;;  %11030 = vset.pattern.permute.xlu1 %v15651_v0 }
 0x178   :  { %v9580_v2 = vpop.f32.mrb[9].mxu0 }
 0x179   :  { %v9581_v41 = vadd.f32 %v9580_v2, %v9579_v40 }
 0x17a   :  { %v9623_v43 = vpop.f32.mrb[0].mxu1 }
 0x17b   :  { %v9582_v44 = vpop.f32.mrb[10].mxu0  ;;  %v9624_v45 = vpop.f32.mrb[1].mxu1 }
 0x17c   :  { %v9583_v46 = vpop.f32.mrb[11].mxu0  ;;  %v9625_v19 = vadd.f32 %v9624_v45, %v9623_v43 }
 0x17d   :  { %v9584_v26 = vadd.f32 %v9583_v46, %v9582_v44 }
 0x17e   :  { %v1298_v52 = vadd.f32 %v9625_v19, %v9569_v29  ;;  %v9626_v10 = vpop.f32.mrb[2].mxu1 }
 0x17f   :  { %v9627_v53 = vpop.f32.mrb[3].mxu1  ;;  %v9585_v54 = vpop.f32.mrb[12].mxu0 }
 0x180   :  { %v9628_v55 = vadd.f32 %v9627_v53, %v9626_v10  ;;  %v9586_v30 = vpop.f32.mrb[13].mxu0 }
 0x181   :  { %v9587_v37 = vadd.f32 %v9586_v30, %v9585_v54 }
 0x182   :  { %v1303_v48 = vadd.f32 %v9628_v55, %v9572_v49  ;;  %v9629_v59 = vpop.f32.mrb[4].mxu1 }
 0x183   :  { %v9630_v60 = vpop.f32.mrb[5].mxu1  ;;  %v9588_v63 = vpop.f32.mrb[14].mxu0 }
 0x184   :  { %v9631_v5 = vadd.f32 %v9630_v60, %v9629_v59  ;;  %v9589_v35 = vpop.f32.mrb[15].mxu0 }
 0x185   :  { %v9590_v7 = vadd.f32 %v9589_v35, %v9588_v63 }
 0x186   :  { %v1308_v11 = vadd.f32 %v9631_v5, %v9575_v17  ;;  %v9632_v14 = vpop.f32.mrb[6].mxu1 }
 0x187   :  { %v9633_v50 = vpop.f32.mrb[7].mxu1 }
 0x188   :  { %v9634_v15 = vadd.f32 %v9633_v50, %v9632_v14  ;;  %v9679_v57 = vpop.f32.mrb[16].mxu0 }
 0x189   :  { %v9680_v58 = vpop.f32.mrb[17].mxu0 }
 0x18a   :  { %v1313_v8 = vadd.f32 %v9634_v15, %v9578_v39  ;;  %v9681_v21 = vadd.f32 %v9680_v58, %v9679_v57 }
 0x18c   :  { %v1403_v22 = vadd.f32 %v9681_v21, %v1298_v52  ;;  %v9682_v24 = vpop.f32.mrb[18].mxu0 }
 0x18d   :  { %v9683_v25 = vpop.f32.mrb[19].mxu0 }
 0x18e   :  { %v9684_v9 = vadd.f32 %v9683_v25, %v9682_v24 }
 0x18f   :  { %v9635_v61 = vpop.f32.mrb[8].mxu1 }
 0x190   :  { %v1408_v62 = vadd.f32 %v9684_v9, %v1303_v48  ;;  %v9685_v27 = vpop.f32.mrb[20].mxu0  ;;  %v9636_v18 = vpop.f32.mrb[9].mxu1 }
 0x191   :  { %v9637_v1 = vadd.f32 %v9636_v18, %v9635_v61  ;;  %v9686_v47 = vpop.f32.mrb[21].mxu0 }
 0x192   :  { %v9687_v29 = vadd.f32 %v9686_v47, %v9685_v27 }
 0x193   :  { %v1318_v13 = vadd.f32 %v9637_v1, %v9581_v41  ;;  %v9638_v20 = vpop.f32.mrb[10].mxu1 }
 0x194   :  { %v1413_v31 = vadd.f32 %v9687_v29, %v1308_v11  ;;  %v9688_v49 = vpop.f32.mrb[22].mxu0  ;;  %v9639_v32 = vpop.f32.mrb[11].mxu1 }
 0x195   :  { %v9640_v34 = vadd.f32 %v9639_v32, %v9638_v20  ;;  %v9689_v17 = vpop.f32.mrb[23].mxu0 }
 0x196   :  { %v9690_v36 = vadd.f32 %v9689_v17, %v9688_v49 }
 0x197   :  { %v1323_v33 = vadd.f32 %v9640_v34, %v9584_v26  ;;  %v9641_v38 = vpop.f32.mrb[12].mxu1 }
 0x198   :  { %v1418_v39 = vadd.f32 %v9690_v36, %v1313_v8  ;;  %v9691_v40 = vpop.f32.mrb[24].mxu0  ;;  %v9642_v2 = vpop.f32.mrb[13].mxu1 }
 0x199   :  { %v9643_v43 = vadd.f32 %v9642_v2, %v9641_v38  ;;  %v9692_v44 = vpop.f32.mrb[25].mxu0 }
 0x19a   :  { %v9693_v45 = vadd.f32 %v9692_v44, %v9691_v40 }
 0x19b   :  { %v1328_v46 = vadd.f32 %v9643_v43, %v9587_v37 }
 0x19c   :  { %v1423_v19 = vadd.f32 %v9693_v45, %v1318_v13  ;;  %v9694_v52 = vpop.f32.mrb[26].mxu0 }
 0x19d   :  { %v9695_v10 = vpop.f32.mrb[27].mxu0 }
 0x19e   :  { %v9696_v41 = vadd.f32 %v9695_v10, %v9694_v52 }
 0x1a0   :  { %v1428_v53 = vadd.f32 %v9696_v41, %v1323_v33  ;;  %v9697_v54 = vpop.f32.mrb[28].mxu0 }
 0x1a1   :  { %v9698_v55 = vpop.f32.mrb[29].mxu0  ;;  %v9644_v30 = vpop.f32.mrb[14].mxu1 }
 0x1a2   :  { %v9699_v48 = vadd.f32 %v9698_v55, %v9697_v54  ;;  %v9645_v59 = vpop.f32.mrb[15].mxu1 }
 0x1a3   :  { %v9646_v60 = vadd.f32 %v9645_v59, %v9644_v30 }
 0x1a4   :  { %v1433_v26 = vadd.f32 %v9699_v48, %v1328_v46  ;;  %v9700_v63 = vpop.f32.mrb[30].mxu0 }
 0x1a5   :  { %v1333_v5 = vadd.f32 %v9646_v60, %v9590_v7  ;;  %v9701_v35 = vpop.f32.mrb[31].mxu0 }
 0x1a6   :  { %v9702_v11 = vadd.f32 %v9701_v35, %v9700_v63  ;;  %v9735_v14 = vpop.f32.mrb[16].mxu1 }
 0x1a7   :  { %v9736_v50 = vpop.f32.mrb[17].mxu1 }
 0x1a8   :  { %v1438_v15 = vadd.f32 %v9702_v11, %v1333_v5  ;;  %v9737_v37 = vadd.f32 %v9736_v50, %v9735_v14 }
 0x1aa   :  { %v1508_v57 = vadd.f32 %v9737_v37, %v1403_v22  ;;  %v9738_v58 = vpop.f32.mrb[18].mxu1 }
 0x1ab   :  { %v9739_v8 = vpop.f32.mrb[19].mxu1 }
 0x1ac   :  { %v9740_v21 = vadd.f32 %v9739_v8, %v9738_v58  ;;  %v9791_v24 = vpop.f32.mrb[32].mxu0 }
 0x1ad   :  { %v9792_v25 = vpop.f32.mrb[33].mxu0 }
 0x1ae   :  { %v1513_v9 = vadd.f32 %v9740_v21, %v1408_v62  ;;  %v9793_v61 = vadd.f32 %v9792_v25, %v9791_v24 }
 0x1b0   :  { %v1613_v27 = vadd.f32 %v9793_v61, %v1508_v57  ;;  %v9794_v18 = vpop.f32.mrb[34].mxu0 }
 0x1b1   :  { %v9795_v1 = vpop.f32.mrb[35].mxu0 }
 0x1b2   :  { %v9796_v47 = vadd.f32 %v9795_v1, %v9794_v18 }
 0x1b4   :  { %v1618_v29 = vadd.f32 %v9796_v47, %v1513_v9  ;;  %v9741_v7 = vpop.f32.mrb[20].mxu1  ;;  %v9797_v13 = vpop.f32.mrb[36].mxu0 }
 0x1b5   :  { %v9742_v20 = vpop.f32.mrb[21].mxu1  ;;  %v9798_v49 = vpop.f32.mrb[37].mxu0 }
 0x1b6   :  { %v9743_v32 = vadd.f32 %v9742_v20, %v9741_v7  ;;  %v9799_v34 = vadd.f32 %v9798_v49, %v9797_v13 }
 0x1b8   :  { %v1518_v17 = vadd.f32 %v9743_v32, %v1413_v31  ;;  %v9744_v22 = vpop.f32.mrb[22].mxu1 }
 0x1b9   :  { %v9745_v36 = vpop.f32.mrb[23].mxu1 }
 0x1ba   :  { %v1623_v33 = vadd.f32 %v9799_v34, %v1518_v17  ;;  %v9746_v38 = vadd.f32 %v9745_v36, %v9744_v22 }
 0x1bc   :  { %v1523_v40 = vadd.f32 %v9746_v38, %v1418_v39  ;;  %v9747_v2 = vpop.f32.mrb[24].mxu1 }
 0x1bd   :  { %v9748_v62 = vpop.f32.mrb[25].mxu1  ;;  %v9800_v43 = vpop.f32.mrb[38].mxu0 }
 0x1be   :  { %v9749_v44 = vadd.f32 %v9748_v62, %v9747_v2  ;;  %v9801_v45 = vpop.f32.mrb[39].mxu0 }
 0x1bf   :  { %v9802_v46 = vadd.f32 %v9801_v45, %v9800_v43 }
 0x1c0   :  { %v1528_v52 = vadd.f32 %v9749_v44, %v1423_v19 }
 0x1c1   :  { %v1628_v10 = vadd.f32 %v9802_v46, %v1523_v40  ;;  %v9803_v41 = vpop.f32.mrb[40].mxu0 }
 0x1c2   :  { %v9804_v54 = vpop.f32.mrb[41].mxu0 }
 0x1c3   :  { %v9805_v55 = vadd.f32 %v9804_v54, %v9803_v41 }
 0x1c5   :  { %v1633_v30 = vadd.f32 %v9805_v55, %v1528_v52  ;;  %v9806_v48 = vpop.f32.mrb[42].mxu0 }
 0x1c6   :  { %v9750_v59 = vpop.f32.mrb[26].mxu1  ;;  %v9807_v31 = vpop.f32.mrb[43].mxu0 }
 0x1c7   :  { %v9751_v60 = vpop.f32.mrb[27].mxu1  ;;  %v9808_v63 = vadd.f32 %v9807_v31, %v9806_v48 }
 0x1c8   :  { %v9752_v5 = vadd.f32 %v9751_v60, %v9750_v59 }
 0x1ca   :  { %v1533_v35 = vadd.f32 %v9752_v5, %v1428_v53  ;;  %v9753_v39 = vpop.f32.mrb[28].mxu1 }
 0x1cb   :  { %v9754_v11 = vpop.f32.mrb[29].mxu1 }
 0x1cc   :  { %v1638_v14 = vadd.f32 %v9808_v63, %v1533_v35  ;;  %v9755_v50 = vadd.f32 %v9754_v11, %v9753_v39 }
 0x1ce   :  { %v1538_v37 = vadd.f32 %v9755_v50, %v1433_v26  ;;  %v9756_v57 = vpop.f32.mrb[30].mxu1 }
 0x1cf   :  { %v9757_v58 = vpop.f32.mrb[31].mxu1  ;;  %v9809_v19 = vpop.f32.mrb[44].mxu0 }
 0x1d0   :  { %v9758_v8 = vadd.f32 %v9757_v58, %v9756_v57  ;;  %v9810_v21 = vpop.f32.mrb[45].mxu0 }
 0x1d1   :  { %v9811_v24 = vadd.f32 %v9810_v21, %v9809_v19 }
 0x1d2   :  { %v1543_v25 = vadd.f32 %v9758_v8, %v1438_v15 }
 0x1d3   :  { %v1643_v9 = vadd.f32 %v9811_v24, %v1538_v37  ;;  %v9812_v61 = vpop.f32.mrb[46].mxu0 }
 0x1d4   :  { %v9813_v18 = vpop.f32.mrb[47].mxu0 }
 0x1d5   :  { %v9814_v1 = vadd.f32 %v9813_v18, %v9812_v61 }
 0x1d7   :  { %v1648_v47 = vadd.f32 %v9814_v1, %v1543_v25  ;;  %v9903_v7 = vpop.f32.mrb[48].mxu0 }
 0x1d8   :  { %v9847_v13 = vpop.f32.mrb[32].mxu1  ;;  %v9904_v53 = vpop.f32.mrb[49].mxu0 }
 0x1d9   :  { %v9848_v20 = vpop.f32.mrb[33].mxu1  ;;  %v9905_v49 = vadd.f32 %v9904_v53, %v9903_v7 }
 0x1da   :  { %v9849_v32 = vadd.f32 %v9848_v20, %v9847_v13 }
 0x1dc   :  { %v1718_v34 = vadd.f32 %v9849_v32, %v1613_v27  ;;  %v9850_v26 = vpop.f32.mrb[34].mxu1 }
 0x1dd   :  { %v9851_v17 = vpop.f32.mrb[35].mxu1 }
 0x1de   :  { %v1823_v22 = vadd.f32 %v9905_v49, %v1718_v34  ;;  %v9852_v36 = vadd.f32 %v9851_v17, %v9850_v26 }
 0x1e0   :  { %v1723_v38 = vadd.f32 %v9852_v36, %v1618_v29  ;;  %v9853_v40 = vpop.f32.mrb[36].mxu1 }
 0x1e1   :  { %v9854_v2 = vpop.f32.mrb[37].mxu1  ;;  %v9906_v15 = vpop.f32.mrb[50].mxu0 }
 0x1e2   :  { %v9855_v62 = vadd.f32 %v9854_v2, %v9853_v40  ;;  %v9907_v43 = vpop.f32.mrb[51].mxu0 }
 0x1e3   :  { %v9908_v44 = vadd.f32 %v9907_v43, %v9906_v15 }
 0x1e4   :  { %v1728_v45 = vadd.f32 %v9855_v62, %v1623_v33 }
 0x1e5   :  { %v12612_v46 = vadd.f32 %v9908_v44, %v1723_v38  ;;  %v9909_v52 = vpop.f32.mrb[52].mxu0 }
 0x1e6   :  { %v9910_v41 = vpop.f32.mrb[53].mxu0 }
 0x1e7   :  { %v9911_v54 = vadd.f32 %v9910_v41, %v9909_v52 }
 0x1e9   :  { %v12614_v55 = vadd.f32 %v9911_v54, %v1728_v45  ;;  %v9912_v27 = vpop.f32.mrb[54].mxu0 }
 0x1ea   :  { %v9856_v48 = vpop.f32.mrb[38].mxu1  ;;  %v9913_v59 = vpop.f32.mrb[55].mxu0 }
 0x1eb   :  { %v9857_v31 = vpop.f32.mrb[39].mxu1  ;;  %v9914_v60 = vadd.f32 %v9913_v59, %v9912_v27 }
 0x1ec   :  { %v9858_v29 = vadd.f32 %v9857_v31, %v9856_v48 }
 0x1ee   :  { %v1733_v63 = vadd.f32 %v9858_v29, %v1628_v10  ;;  %v9859_v5 = vpop.f32.mrb[40].mxu1 }
 0x1ef   :  { %v9860_v35 = vpop.f32.mrb[41].mxu1 }
 0x1f0   :  { %v12616_v39 = vadd.f32 %v9914_v60, %v1733_v63  ;;  %v9861_v11 = vadd.f32 %v9860_v35, %v9859_v5 }
 0x1f2   :  { %v1738_v33 = vadd.f32 %v9861_v11, %v1633_v30  ;;  %v9862_v50 = vpop.f32.mrb[42].mxu1 }
 0x1f3   :  { %v9863_v37 = vpop.f32.mrb[43].mxu1  ;;  %v9915_v57 = vpop.f32.mrb[56].mxu0 }
 0x1f4   :  { %v9864_v58 = vadd.f32 %v9863_v37, %v9862_v50  ;;  %v9916_v19 = vpop.f32.mrb[57].mxu0 }
 0x1f5   :  { %v9917_v8 = vadd.f32 %v9916_v19, %v9915_v57 }
 0x1f6   :  { %v1743_v21 = vadd.f32 %v9864_v58, %v1638_v14 }
 0x1f7   :  { %v12618_v24 = vadd.f32 %v9917_v8, %v1738_v33  ;;  %v9918_v25 = vpop.f32.mrb[58].mxu0 }
 0x1f8   :  { %v9919_v61 = vpop.f32.mrb[59].mxu0 }
 0x1f9   :  { %v9920_v18 = vadd.f32 %v9919_v61, %v9918_v25 }
 0x1fb   :  { %v12620_v1 = vadd.f32 %v9920_v18, %v1743_v21  ;;  %v9921_v10 = vpop.f32.mrb[60].mxu0 }
 0x1fc   :  { %v9865_v7 = vpop.f32.mrb[44].mxu1  ;;  %v9922_v13 = vpop.f32.mrb[61].mxu0 }
 0x1fd   :  { %v9866_v53 = vpop.f32.mrb[45].mxu1  ;;  %v9923_v20 = vadd.f32 %v9922_v13, %v9921_v10 }
 0x1fe   :  { %v9867_v30 = vadd.f32 %v9866_v53, %v9865_v7 }
 0x200   :  { %v1748_v49 = vadd.f32 %v9867_v30, %v1643_v9  ;;  %v9868_v32 = vpop.f32.mrb[46].mxu1 }
 0x201   :  { %v9869_v34 = vpop.f32.mrb[47].mxu1 }
 0x202   :  { %v12622_v26 = vadd.f32 %v9923_v20, %v1748_v49  ;;  %v9870_v17 = vadd.f32 %v9869_v34, %v9868_v32 }
 0x204   :  { %v1753_v14 = vadd.f32 %v9870_v17, %v1648_v47  ;;  %v9959_v36 = vpop.f32.mrb[48].mxu1 }
 0x205   :  { %v9924_v38 = vpop.f32.mrb[62].mxu0  ;;  %v9960_v40 = vpop.f32.mrb[49].mxu1 }
 0x206   :  { %v9961_v2 = vadd.f32 %v9960_v40, %v9959_v36  ;;  %v9925_v15 = vpop.f32.mrb[63].mxu0 }
 0x207   :  { %v9926_v62 = vadd.f32 %v9925_v15, %v9924_v38 }
 0x208   :  { %v1928_v43 = vadd.f32 %v9961_v2, %v1823_v22 }
 0x209   :  { %v12624_v44 = vadd.f32 %v9926_v62, %v1753_v14 }
 0x20a   :  { %v10015_v45 = vpop.f32.mrb[64].mxu0 }
 0x20b   :  { %v10016_v52 = vpop.f32.mrb[65].mxu0 }
 0x20c   :  { %v10017_v41 = vadd.f32 %v10016_v52, %v10015_v45 }
 0x20e   :  { %v12626_v9 = vadd.f32 %v10017_v41, %v1928_v43  ;;  %v10018_v54 = vpop.f32.mrb[66].mxu0 }
 0x20f   :  { %v9962_v27 = vpop.f32.mrb[50].mxu1  ;;  %v10019_v48 = vpop.f32.mrb[67].mxu0 }
 0x210   :  { %v9963_v59 = vpop.f32.mrb[51].mxu1  ;;  %v2089_v47 = vsel %vm2088_vm0, %v12626_v9, 0.0  ;;  %v10020_v31 = vadd.f32 %v10019_v48, %v10018_v54  ;;  %v2113_v60 = vmul.f32 %v12626_v9, %v12626_v9 }
 0x211   :  { %v9964_v22 = vadd.f32 %v9963_v59, %v9962_v27  ;;  %2090 = vadd.xlane.f32.xlu1 %v2089_v47 }
 0x212   :  { %v2121_v35 = vsel %vm2088_vm0, %v2113_v60, 0.0 }
 0x213   :  { %v1933_v29 = vadd.f32 %v9964_v22, %v12612_v46  ;;  %v9965_v63 = vpop.f32.mrb[52].mxu1 }
 0x214   :  { %v9966_v5 = vpop.f32.mrb[53].mxu1 }
 0x215   :  { %v12634_v11 = vadd.f32 %v10020_v31, %v1933_v29  ;;  %v9967_v33 = vadd.f32 %v9966_v5, %v9965_v63  ;;  %2122 = vadd.xlane.f32.xlu1 %v2121_v35 }
 0x217   :  { %v1938_v50 = vadd.f32 %v9967_v33, %v12614_v55  ;;  %v9968_v37 = vpop.f32.mrb[54].mxu1  ;;  %v2092_v57 = vsel %vm2088_vm0, %v12634_v11, 0.0  ;;  %v2114_v8 = vmul.f32 %v12634_v11, %v12634_v11 }
 0x218   :  { %v9969_v58 = vpop.f32.mrb[55].mxu1  ;;  %v10021_v19 = vpop.f32.mrb[68].mxu0 }
 0x219   :  { %v9970_v46 = vadd.f32 %v9969_v58, %v9968_v37  ;;  %v10022_v21 = vpop.f32.mrb[69].mxu0  ;;  %2093 = vadd.xlane.f32.xlu1 %v2092_v57  ;;  %v2124_v55 = vsel %vm2088_vm0, %v2114_v8, 0.0  ;;  %v12673_v37 = vpop.permute.xlu1 %2217 }
 0x21a   :  { %v10023_v25 = vadd.f32 %v10022_v21, %v10021_v19 }
 0x21b   :  { %v1943_v61 = vadd.f32 %v9970_v46, %v12616_v39 }
 0x21c   :  { %v12642_v18 = vadd.f32 %v10023_v25, %v1938_v50  ;;  %v10024_v10 = vpop.f32.mrb[70].mxu0 }
 0x21d   :  { %v10025_v7 = vpop.f32.mrb[71].mxu0  ;;  %2125 = vadd.xlane.f32.xlu1 %v2124_v55 }
 0x21e   :  { %v10026_v13 = vadd.f32 %v10025_v7, %v10024_v10  ;;  %v2095_v30 = vsel %vm2088_vm0, %v12642_v18, 0.0  ;;  %v2115_v49 = vmul.f32 %v12642_v18, %v12642_v18  ;;  %v12679_v10 = vpop.permute.xlu1 %2288 }
 0x220   :  { %v12645_v53 = vadd.f32 %v10026_v13, %v1943_v61  ;;  %v10027_v20 = vpop.f32.mrb[72].mxu0  ;;  %v2127_v36 = vsel %vm2088_vm0, %v2115_v49, 0.0 }
 0x221   :  { %v9971_v32 = vpop.f32.mrb[56].mxu1  ;;  %2096 = vadd.xlane.f32.xlu1 %v2095_v30  ;;  %v10028_v39 = vpop.f32.mrb[73].mxu0 }
 0x222   :  { %v9972_v34 = vpop.f32.mrb[57].mxu1  ;;  %v10029_v17 = vadd.f32 %v10028_v39, %v10027_v20  ;;  %v2098_v43 = vsel %vm2088_vm0, %v12645_v53, 0.0  ;;  %v2116_v45 = vmul.f32 %v12645_v53, %v12645_v53  ;;  %v8415_v20 = vld [vmem:[%s15681_s4 + $0x78] sm:$0xff]  ;;  %v12690_v30 = vpop.permute.xlu1 %2455 }
 0x223   :  { %v9973_v14 = vadd.f32 %v9972_v34, %v9971_v32  ;;  %v12703_v34 = vld [vmem:[%s15678_s8 + $0x38] sm:$0xff] }
 0x224   :  { %v2130_v60 = vsel %vm2088_vm0, %v2116_v45, 0.0 }
 0x225   :  { %v1948_v38 = vadd.f32 %v9973_v14, %v12618_v24  ;;  %v9974_v40 = vpop.f32.mrb[58].mxu1  ;;  %2128 = vadd.xlane.f32.xlu1 %v2127_v36 }
 0x226   :  { %v9975_v2 = vpop.f32.mrb[59].mxu1  ;;  %v12698_v39 = vpop.permute.xlu1 %2375 }
 0x227   :  { %v12653_v15 = vadd.f32 %v10029_v17, %v1948_v38  ;;  %v9976_v62 = vadd.f32 %v9975_v2, %v9974_v40  ;;  %v12734_v40 = vld [vmem:[%s15678_s8] sm:$0xff] }
 0x228   :  { %15682 = vst [vmem:[#allocation2_spill] sm:$0xff] %v12734_v40 }
 0x229   :  { %v1953_v52 = vadd.f32 %v9976_v62, %v12620_v1  ;;  %v9977_v41 = vpop.f32.mrb[60].mxu1  ;;  %2099 = vadd.xlane.f32.xlu1 %v2098_v43  ;;  %v2101_v54 = vsel %vm2088_vm0, %v12653_v15, 0.0  ;;  %v2117_v24 = vmul.f32 %v12653_v15, %v12653_v15 }
 0x22a   :  { %v9978_v27 = vpop.f32.mrb[61].mxu1  ;;  %v10030_v48 = vpop.f32.mrb[74].mxu0  ;;  %2102 = vadd.xlane.f32.xlu0 %v2101_v54  ;;  %v2077_v54 = vld [vmem:[%s15681_s4 + $0x30] sm:$0xff] }
 0x22b   :  { %v9979_v59 = vadd.f32 %v9978_v27, %v9977_v41  ;;  %v10031_v47 = vpop.f32.mrb[75].mxu0  ;;  %v2133_v1 = vsel %vm2088_vm0, %v2117_v24, 0.0  ;;  %v12709_v14 = vpop.permute.xlu1 %2293 }
 0x22c   :  { %v10032_v31 = vadd.f32 %v10031_v47, %v10030_v48  ;;  %v12785_v48 = vpop.permute.xlu0 %2383 }
 0x22d   :  { %v1958_v22 = vadd.f32 %v9979_v59, %v12622_v26  ;;  %2131 = vadd.xlane.f32.xlu1 %v2130_v60 }
 0x22e   :  { %v12667_v29 = vadd.f32 %v10032_v31, %v1953_v52  ;;  %v10033_v63 = vpop.f32.mrb[76].mxu0  ;;  %2134 = vadd.xlane.f32.xlu0 %v2133_v1  ;;  %v8412_v52 = vld [vmem:[%s15681_s4 + $0x60] sm:$0xff] }
 0x22f   :  { %v10034_v5 = vpop.f32.mrb[77].mxu0 }
 0x230   :  { %v10035_v35 = vadd.f32 %v10034_v5, %v10033_v63  ;;  %v2104_v33 = vsel %vm2088_vm0, %v12667_v29, 0.0  ;;  %v2118_v50 = vmul.f32 %v12667_v29, %v12667_v29  ;;  %v12789_v47 = vpop.permute.xlu0 %2459 }
 0x232   :  { %v12675_v57 = vadd.f32 %v10035_v35, %v1958_v22  ;;  %2105 = vadd.xlane.f32.xlu0 %v2104_v33  ;;  %v10036_v26 = vpop.f32.mrb[78].mxu0  ;;  %v2136_v25 = vsel %vm2088_vm0, %v2118_v50, 0.0 }
 0x233   :  { %v9980_v58 = vpop.f32.mrb[62].mxu1  ;;  %v10037_v19 = vpop.f32.mrb[79].mxu0 }
 0x234   :  { %v9981_v8 = vpop.f32.mrb[63].mxu1  ;;  %v10038_v46 = vadd.f32 %v10037_v19, %v10036_v26  ;;  %v2107_v7 = vsel %vm2088_vm0, %v12675_v57, 0.0  ;;  %v2119_v13 = vmul.f32 %v12675_v57, %v12675_v57  ;;  %v12793_v60 = vpop.permute.xlu0 %2467 }
 0x235   :  { %v9982_v21 = vadd.f32 %v9981_v8, %v9980_v58 }
 0x236   :  { %2137 = vadd.xlane.f32.xlu0 %v2136_v25  ;;  %v2139_v49 = vsel %vm2088_vm0, %v2119_v13, 0.0 }
 0x237   :  { %v1963_v61 = vadd.f32 %v9982_v21, %v12624_v44 }
 0x238   :  { %v12797_v1 = vpop.permute.xlu0 %2475 }
 0x239   :  { %v12681_v55 = vadd.f32 %v10038_v46, %v1963_v61 }
 0x23a   :  { %2108 = vadd.xlane.f32.xlu0 %v2107_v7 }
 0x23b   :  { %v2110_v44 = vsel %vm2088_vm0, %v12681_v55, 0.0  ;;  %v2120_v32 = vmul.f32 %v12681_v55, %v12681_v55 }
 0x23c   :  { %v12799_v5 = vpop.permute.xlu0 %2479 }
 0x23d   :  { %v2142_v17 = vsel %vm2088_vm0, %v2120_v32, 0.0 }
 0x23e   :  { %2140 = vadd.xlane.f32.xlu0 %v2139_v49  ;;  %2323 = vperm.xlu1 %11030, %v8415_v20  }
 0x240   :  { %v12801_v33 = vpop.permute.xlu0 %2535 }
 0x242   :  { %2111 = vadd.xlane.f32.xlu0 %v2110_v44  ;;  %11031 = vset.pattern.permute.xlu1 %v11506_v3  ;;  %v12713_v3 = vpop.permute.xlu1 %2379 }
 0x243   :  { %2483 = vperm.xlu1 %11031, %v12703_v34  }
 0x246   :  { %2143 = vadd.xlane.f32.xlu0 %v2142_v17  ;;  %v12716_v36 = vpop.permute.xlu1 %2227 }
 0x247   :  { %11033 = vset.pattern.permute.xlu1 %v11507_v51 }
 0x248   :  { %2403 = vperm.xlu1 %11033, %v12703_v34  }
 0x24a   :  { %v12720_v38 = vpop.permute.xlu1 %2463 }
 0x24c   :  { %11034 = vset.pattern.permute.xlu1 %v11509_v6  ;;  %v11510_v6 = vmov 9  }
 0x24d   :  { %2543 = vperm.xlu1 %11034, %v12479_v4  }
 0x24e   :  { %v12725_v51 = vpop.permute.xlu1 %2232 }
 0x251   :  { %2547 = vperm.xlu1 %11034, %v12505_v16  }
 0x252   :  { %v12737_v2 = vpop.permute.xlu1 %2303 }
 0x255   :  { %2551 = vperm.xlu1 %11034, %v12576_v42  }
 0x256   :  { %v12741_v62 = vpop.permute.xlu1 %2387 }
 0x259   :  { %2555 = vperm.xlu1 %11034, %v12515_v56  }
 0x25a   :  { %v12746_v43 = vpop.permute.xlu1 %2237 }
 0x25c   :  { %2539 = vperm.xlu0 %11027, %v12492_v12  }
 0x25d   :  { %2559 = vperm.xlu1 %11034, %v12529_v23  }
 0x25e   :  { %v12752_v45 = vpop.permute.xlu1 %2471 }
 0x260   :  { %11032 = vset.pattern.permute.xlu0 %v11508_v28  ;;  %v15649_v28 = vmov 11  }
 0x261   :  { %2563 = vperm.xlu1 %11034, %v12703_v34   ;;  %2623 = vperm.xlu0 %11032, %v12479_v4  }
 0x265   :  { %11035 = vset.pattern.permute.xlu1 %v11510_v6  ;;  %2627 = vperm.xlu0 %11032, %v12505_v16  }
 0x266   :  { %2335 = vperm.xlu1 %11035, %v12734_v40  }
 0x269   :  { %2631 = vperm.xlu0 %11032, %v12576_v42  }
 0x26a   :  { %11036 = vset.pattern.permute.xlu1 %v15649_v28 }
 0x26b   :  { %2419 = vperm.xlu1 %11036, %v12492_v12  }
 0x26d   :  { %2635 = vperm.xlu0 %11032, %v12515_v56   ;;  %v2071_v56 = vld [vmem:[%s15681_s4] sm:$0xff] }
 0x26f   :  { %2423 = vperm.xlu1 %11036, %v12479_v4  }
 0x271   :  { %2639 = vperm.xlu0 %11032, %v12529_v23   ;;  %v12761_v23 = vpop.permute.xlu1 %2391 }
 0x273   :  { %11039 = vset.pattern.permute.xlu1 %v11510_v6 }
 0x274   :  { %2343 = vperm.xlu1 %11039, %v12479_v4   ;;  %v2073_v4 = vld [vmem:[%s15681_s4 + $0x10] sm:$0xff] }
 0x275   :  { %2643 = vperm.xlu0 %11032, %v12703_v34  }
 0x278   :  { %11040 = vset.pattern.permute.xlu1 %v15649_v28 }
 0x279   :  { %2427 = vperm.xlu1 %11040, %v12505_v16   ;;  %11037 = vset.pattern.permute.xlu0 %v11510_v6  ;;  %v12768_v16 = vpop.permute.xlu1 %2313 }
 0x27a   :  { %2339 = vperm.xlu0 %11037, %v12492_v12   ;;  %v8410_v12 = vld [vmem:[%s15681_s4 + $0x50] sm:$0xff] }
 0x27d   :  { %11041 = vset.pattern.permute.xlu1 %v15651_v0  ;;  %v12776_v41 = vpop.permute.xlu1 %2615 }
 0x27e   :  { %11038 = vset.pattern.permute.xlu0 %v15651_v0 }
 0x27f   :  { %2212 = vperm.xlu0 %11038, %v2071_v56  }
 0x281   :  { %v12781_v24 = vpop.permute.xlu1 %2395 }
 0x283   :  { %2222 = vperm.xlu0 %11038, %v2073_v4  }
 0x285   :  { %v12783_v27 = vpop.permute.xlu1 %2247 }
 0x287   :  { %2298 = vperm.xlu0 %11038, %v8410_v12  }
 0x289   :  { %v12787_v59 = vpop.permute.xlu1 %2318 }
 0x28b   :  { %2308 = vperm.xlu0 %11038, %v8412_v52  }
 0x28d   :  { %v12791_v31 = vpop.permute.xlu1 %2619 }
 0x28f   :  { %2242 = vperm.xlu0 %11038, %v2077_v54  }
 0x291   :  { %v12795_v22 = vpop.permute.xlu1 %2399 }
 0x29e   :  { %v2091_v63 = vpop.xlane.xlu1 %2090 }
 0x2a2   :  { %v2123_v35 = vpop.xlane.xlu1 %2122 }
 0x2a6   :  { %v2094_v50 = vpop.xlane.xlu1 %2093 }
 0x2aa   :  { %v2126_v8 = vpop.xlane.xlu1 %2125 }
 0x2ae   :  { %v2097_v61 = vpop.xlane.xlu1 %2096 }
 0x2b2   :  { %v2129_v32 = vpop.xlane.xlu1 %2128 }
 0x2b6   :  { %v2100_v28 = vpop.xlane.xlu1 %2099 }
 0x2b7   :  { %v2103_v26 = vpop.xlane.xlu0 %2102 }
 0x2b8   :  { %v2145_v58 = vadd.f32 %v2103_v26, %v2091_v63 }
 0x2ba   :  { %v2154_v19 = vmul.f32 0.0078125, %v2145_v58 }
 0x2bb   :  { %v2135_v46 = vpop.xlane.xlu0 %2134 }
 0x2bc   :  { %2184 = vperm.xlu1 %11041, %v2154_v19   ;;  %v2149_v7 = vadd.f32 %v2135_v46, %v2123_v35  ;;  %v2162_v17 = vmul.f32 %v2154_v19, %v2154_v19 }
 0x2be   :  { %v2158_v49 = vmul.f32 0.0078125, %v2149_v7 }
 0x2bf   :  { %v2106_v21 = vpop.xlane.xlu0 %2105 }
 0x2c0   :  { %v2146_v25 = vadd.f32 %v2106_v21, %v2094_v50  ;;  %v2166_v12 = vsub.f32 %v2158_v49, %v2162_v17  ;;  %v15655_v17 = vmov 15  }
 0x2c2   :  { %v2155_v13 = vmul.f32 0.0078125, %v2146_v25  ;;  %v2170_v50 = vmax.f32 %v2166_v12, 0.0 }
 0x2c3   :  { %v2138_v20 = vpop.xlane.xlu0 %2137 }
 0x2c4   :  { %2189 = vperm.xlu1 %11041, %v2155_v13   ;;  %v2150_v44 = vadd.f32 %v2138_v20, %v2126_v8  ;;  %v2163_v63 = vmul.f32 %v2155_v13, %v2155_v13  ;;  %v2174_v8 = vadd.f32 1e-05, %v2170_v50  ;;  %v2132_v20 = vpop.xlane.xlu1 %2131  ;;  %v15685_v50 = vmov 11  }
 0x2c6   :  { %v2159_v52 = vmul.f32 0.0078125, %v2150_v44  ;;  %11334 = vrsqrt.f32 %v2174_v8  ;;  %v12835_v8 = vld [vmem:[%s15678_s8 + $0x30] sm:$0xff] }
 0x2c7   :  { %v2109_v56 = vpop.xlane.xlu0 %2108 }
 0x2c8   :  { %v2147_v4 = vadd.f32 %v2109_v56, %v2097_v61  ;;  %v2167_v21 = vsub.f32 %v2159_v52, %v2163_v63  ;;  %v15656_v52 = vmov 13   ;;  %v12819_v63 = vld [vmem:[%s15678_s8 + $0x28] sm:$0xff] }
 0x2ca   :  { %v2156_v54 = vmul.f32 0.0078125, %v2147_v4  ;;  %v2171_v19 = vmax.f32 %v2167_v21, 0.0 }
 0x2cb   :  { %v2141_v26 = vpop.xlane.xlu0 %2140 }
 0x2cc   :  { %v2151_v58 = vadd.f32 %v2141_v26, %v2129_v32  ;;  %2194 = vperm.xlu1 %11041, %v2156_v54   ;;  %v2164_v46 = vmul.f32 %v2156_v54, %v2156_v54  ;;  %v2175_v44 = vadd.f32 1e-05, %v2171_v19  ;;  %v12842_v19 = vld [vmem:[%s15678_s8 + $0x8] sm:$0xff] }
 0x2ce   :  { %v2160_v35 = vmul.f32 0.0078125, %v2151_v58  ;;  %11336 = vrsqrt.f32 %v2175_v44  ;;  %v15684_v58 = vmov 0  }
 0x2cf   :  { %v2112_v25 = vpop.xlane.xlu0 %2111 }
 0x2d0   :  { %v2148_v0 = vadd.f32 %v2112_v25, %v2100_v28  ;;  %11043 = vset.pattern.permute.xlu1 %v11510_v6  ;;  %v2168_v7 = vsub.f32 %v2160_v35, %v2164_v46  ;;  %v11335_v26 = vpop.eup %11334  ;;  %v12828_v35 = vld [vmem:[%s15678_s8 + $0x20] sm:$0xff] }
 0x2d1   :  { %2351 = vperm.xlu1 %11043, %v12576_v42  }
 0x2d2   :  { %v2157_v61 = vmul.f32 0.0078125, %v2148_v0  ;;  %v2172_v32 = vmax.f32 %v2168_v7, 0.0  ;;  %v12811_v0 = vld [vmem:[%s15678_s8 + $0x18] sm:$0xff]  ;;  %v12845_v7 = vpop.permute.xlu1 %2323 }
 0x2d3   :  { %v2144_v13 = vpop.xlane.xlu0 %2143  ;;  %15683 = vst [vmem:[#allocation3_spill] sm:$0xff] %v12811_v0 }
 0x2d4   :  { %v2152_v49 = vadd.f32 %v2144_v13, %v2132_v20  ;;  %2199 = vperm.xlu0 %11038, %v2157_v61   ;;  %v2165_v56 = vmul.f32 %v2157_v61, %v2157_v61  ;;  %v2176_v42 = vadd.f32 1e-05, %v2172_v32  ;;  %v12851_v61 = vld [vmem:[%s15678_s8 + $0x10] sm:$0xff]  ;;  %v15653_v13 = vmov 17  }
 0x2d5   :  { %11044 = vset.pattern.permute.xlu1 %v15655_v17  ;;  %15686 = vst [vmem:[#allocation4_spill] sm:$0xff] %v12851_v61 }
 0x2d6   :  { %v2161_v28 = vmul.f32 0.0078125, %v2152_v49  ;;  %2575 = vperm.xlu1 %11044, %v12734_v40   ;;  %11338 = vrsqrt.f32 %v2176_v42  ;;  %v12856_v20 = vpop.permute.xlu1 %2483 }
 0x2d8   :  { %v2169_v4 = vsub.f32 %v2161_v28, %v2165_v56  ;;  %11042 = vset.pattern.permute.xlu0 %v11510_v6  ;;  %v11337_v21 = vpop.eup %11336 }
 0x2d9   :  { %2347 = vperm.xlu0 %11042, %v12811_v0  }
 0x2da   :  { %v2173_v12 = vmax.f32 %v2169_v4, 0.0  ;;  %11046 = vset.pattern.permute.xlu1 %v15656_v52  ;;  %v12863_v49 = vpop.permute.xlu1 %2403 }
 0x2db   :  { %2495 = vperm.xlu1 %11046, %v12734_v40   ;;  %v12889_v4 = vpop.permute.xlu0 %2539 }
 0x2dc   :  { %v2177_v54 = vadd.f32 1e-05, %v2173_v12 }
 0x2dd   :  { %2355 = vperm.xlu0 %11042, %v12819_v63  }
 0x2de   :  { %11340 = vrsqrt.f32 %v2177_v54  ;;  %v12868_v44 = vpop.permute.xlu1 %2543 }
 0x2df   :  { %11047 = vset.pattern.permute.xlu1 %v15684_v58  ;;  %15687 = vst [vmem:[#allocation5_spill] sm:$0xff] %v12868_v44 }
 0x2e0   :  { %2260 = vperm.xlu1 %11047, %v11335_v26   ;;  %v11339_v46 = vpop.eup %11338  ;;  %v12895_v12 = vpop.permute.xlu0 %2623  ;;  %v9499_v26 = vld [vmem:[%s15693_s0 + $0x40] sm:$0xff]  }
 0x2e1   :  { %11045 = vset.pattern.permute.xlu0 %v15685_v50  ;;  %10671 = vmatprep.subr.bf16.mxu1 %v9499_v26  ;;  %v9493_v26 = vld [vmem:[%s15693_s0 + $0x10] sm:$0xff]  }
 0x2e2   :  { %2415 = vperm.xlu0 %11045, %v12734_v40   ;;  %v12872_v32 = vpop.permute.xlu1 %2547 }
 0x2e3   :  { %15688 = vst [vmem:[#allocation6_spill] sm:$0xff] %v12872_v32 }
 0x2e4   :  { %2265 = vperm.xlu1 %11047, %v11337_v21   ;;  %v9500_v21 = vld [vmem:[%s15693_s0 + $0x48] sm:$0xff]  }
 0x2e6   :  { %2431 = vperm.xlu0 %11045, %v12828_v35   ;;  %v12877_v56 = vpop.permute.xlu1 %2551 }
 0x2e8   :  { %2270 = vperm.xlu1 %11047, %v11339_v46   ;;  %v11341_v25 = vpop.eup %11340  ;;  %v12909_v46 = vpop.permute.xlu0 %2627 }
 0x2e9   :  { %15694 = vst [vmem:[#allocation11_spill] sm:$0xff] %v12909_v46 }
 0x2ea   :  { %2435 = vperm.xlu0 %11045, %v12819_v63  }
 0x2ec   :  { %2275 = vperm.xlu1 %11047, %v11341_v25   ;;  %v9492_v25 = vld [vmem:[%s15693_s0 + $0x8] sm:$0xff]  }
 0x2ee   :  { %2439 = vperm.xlu0 %11045, %v12835_v8  }
 0x2f0   :  { %11048 = vset.pattern.permute.xlu1 %v15655_v17 }
 0x2f1   :  { %2579 = vperm.xlu1 %11048, %v12842_v19  }
 0x2f2   :  { %11051 = vset.pattern.permute.xlu0 %v15655_v17 }
 0x2f3   :  { %2583 = vperm.xlu0 %11051, %v12851_v61  }
 0x2f5   :  { %11049 = vset.pattern.permute.xlu1 %v11510_v6 }
 0x2f6   :  { %2359 = vperm.xlu1 %11049, %v12835_v8  }
 0x2f7   :  { %2587 = vperm.xlu0 %11051, %v12811_v0  }
 0x2fa   :  { %11050 = vset.pattern.permute.xlu1 %v15685_v50  ;;  %v9170_v50 = vld [vmem:[%s15693_s0] sm:$0xff]  }
 0x2fb   :  { %11054 = vset.pattern.permute.xlu0 %v15653_v13  ;;  %2443 = vperm.xlu1 %11050, %v12703_v34  }
 0x2fc   :  { %2655 = vperm.xlu0 %11054, %v12734_v40   ;;  %10673 = vmatpush3.bf16.msra.mxu1 %v9170_v50  ;;  %v9502_v50 = vld [vmem:[%s15693_s0 + $0x58] sm:$0xff]  }
 0x2fd   :  { %10675 = vmatprep.subr.bf16.mxu1 %v9500_v21  ;;  %v12925_v21 = vpop.permute.xlu0 %2631 }
 0x2ff   :  { %11052 = vset.pattern.permute.xlu1 %v11510_v6  ;;  %v12881_v6 = vpop.permute.xlu1 %2555 }
 0x300   :  { %2667 = vperm.xlu0 %11054, %v12811_v0   ;;  %2363 = vperm.xlu1 %11052, %v12703_v34   ;;  %15689 = vst [vmem:[#allocation7_spill] sm:$0xff] %v12881_v6 }
 0x301   :  { %10677 = vmatpush3.bf16.msra.mxu1 %v9492_v25  ;;  %v12935_v25 = vpop.permute.xlu0 %2635 }
 0x302   :  { %15697 = vst [vmem:[#allocation14_spill] sm:$0xff] %v12935_v25 }
 0x303   :  { %v12885_v28 = vpop.permute.xlu1 %2559 }
 0x304   :  { %11053 = vset.pattern.permute.xlu1 %v15656_v52  ;;  %15690 = vst [vmem:[#allocation8_spill] sm:$0xff] %v12885_v28 }
 0x305   :  { %2503 = vperm.xlu1 %11053, %v12851_v61  }
 0x307   :  { %v12891_v42 = vpop.permute.xlu1 %2563 }
 0x308   :  { %15691 = vst [vmem:[#allocation9_spill] sm:$0xff] %v12891_v42 }
 0x309   :  { %2507 = vperm.xlu1 %11053, %v12811_v0  }
 0x30b   :  { %v12897_v54 = vpop.permute.xlu1 %2335 }
 0x30c   :  { %15692 = vst [vmem:[#allocation10_spill] sm:$0xff] %v12897_v54  ;;  %v9495_v54 = vld [vmem:[%s15693_s0 + $0x20] sm:$0xff]  }
 0x30d   :  { %11055 = vset.pattern.permute.xlu1 %v15653_v13 }
 0x30e   :  { %2659 = vperm.xlu1 %11055, %v12842_v19  }
 0x312   :  { %11056 = vset.pattern.permute.xlu1 %v15655_v17 }
 0x313   :  { %2591 = vperm.xlu1 %11056, %v12828_v35  }
 0x317   :  { %11057 = vset.pattern.permute.xlu1 %v15653_v13 }
 0x318   :  { %2663 = vperm.xlu1 %11057, %v12851_v61  }
 0x31c   :  { %11058 = vset.pattern.permute.xlu1 %v15655_v17 }
 0x31d   :  { %2595 = vperm.xlu1 %11058, %v12819_v63  }
 0x321   :  { %11059 = vset.pattern.permute.xlu1 %v15653_v13  ;;  %v12914_v13 = vpop.permute.xlu1 %2419 }
 0x322   :  { %2671 = vperm.xlu1 %11059, %v12828_v35   ;;  %15695 = vst [vmem:[#allocation12_spill] sm:$0xff] %v12914_v13  ;;  %v9494_v13 = vld [vmem:[%s15693_s0 + $0x18] sm:$0xff]  }
 0x325   :  { %v12927_v52 = vpop.permute.xlu1 %2423 }
 0x326   :  { %11081 = vset.pattern.permute.xlu1 %v15655_v17  ;;  %v9501_v17 = vld [vmem:[%s15693_s0 + $0x50] sm:$0xff]   ;;  %15696 = vst [vmem:[#allocation13_spill] sm:$0xff] %v12927_v52 }
 0x327   :  { %10679 = vmatprep.subr.bf16.mxu1 %v9501_v17  ;;  %v9503_v17 = vld [vmem:[%s15693_s0 + $0x60] sm:$0xff]  }
 0x328   :  { %10681 = vmatpush3.bf16.msra.mxu1 %v9493_v26  ;;  %v9504_v26 = vld [vmem:[%s15693_s0 + $0x68] sm:$0xff]  }
 0x329   :  { %10683 = vmatprep.subr.bf16.mxu1 %v9502_v50  ;;  %v12940_v0 = vpop.permute.xlu1 %2343  ;;  %v9496_v50 = vld [vmem:[%s15693_s0 + $0x28] sm:$0xff]  }
 0x32a   :  { %15698 = vst [vmem:[#allocation15_spill] sm:$0xff] %v12940_v0  ;;  %v9497_v0 = vld [vmem:[%s15693_s0 + $0x30] sm:$0xff]  }
 0x32c   :  { %10685 = vmatpush3.bf16.msra.mxu1 %v9494_v13  ;;  %v9505_v13 = vld [vmem:[%s15693_s0 + $0x70] sm:$0xff]  }
 0x32d   :  { %10687 = vmatprep.subr.bf16.mxu1 %v9503_v17  ;;  %v12951_v17 = vpop.permute.xlu0 %2639  ;;  %v12953_v52 = vpop.permute.xlu1 %2427 }
 0x32e   :  { %15699 = vst [vmem:[#allocation16_spill] sm:$0xff] %v12951_v17  ;;  %15700 = vst [vmem:[#allocation17_spill] sm:$0xff] %v12953_v52 }
 0x330   :  { %10689 = vmatpush3.bf16.msra.mxu1 %v9495_v54 }
 0x331   :  { %10691 = vmatprep.subr.bf16.mxu1 %v9504_v26  ;;  %v12958_v54 = vpop.permute.xlu0 %2643 }
 0x332   :  { %15701 = vst [vmem:[#allocation18_spill] sm:$0xff] %v12958_v54  ;;  %v9498_v54 = vld [vmem:[%s15693_s0 + $0x38] sm:$0xff]  }
 0x334   :  { %10693 = vmatpush3.bf16.msra.mxu1 %v9496_v50 }
 0x335   :  { %10695 = vmatprep.subr.bf16.mxu1 %v9505_v13  ;;  %v12960_v40 = vpop.permute.xlu0 %2339 }
 0x336   :  { %15702 = vst [vmem:[#allocation19_spill] sm:$0xff] %v12960_v40  ;;  %v9506_v40 = vld [vmem:[%s15693_s0 + $0x78] sm:$0xff]  }
 0x338   :  { %10697 = vmatpush3.bf16.msra.mxu1 %v9497_v0 }
 0x339   :  { %v2213_v58 = vpop.permute.xlu0 %2212  ;;  %10699 = vmatprep.subr.bf16.mxu1 %v9506_v40  ;;  %v9516_v40 = vld [vmem:[%s15693_s0 + $0xc8] sm:$0xff]  }
 0x33b   :  { %v2185_v26 = vpop.permute.xlu1 %2184 }
 0x33c   :  { %v2202_v50 = vsub.f32 %v12626_v9, %v2185_v26  ;;  %v2206_v13 = vsub.f32 %v12653_v15, %v2185_v26  ;;  %10701 = vmatpush3.bf16.msra.mxu1 %v9498_v54 }
 0x33d   :  { %v2223_v17 = vpop.permute.xlu0 %2222 }
 0x33e   :  { %v2250_v9 = vmul.f32 %v2213_v58, %v2202_v50  ;;  %v2254_v26 = vmul.f32 %v12725_v51, %v2206_v13 }
 0x341   :  { %v12970_v25 = vpop.permute.xlu0 %2298 }
 0x343   :  { %v2190_v61 = vpop.permute.xlu1 %2189 }
 0x344   :  { %v2203_v15 = vsub.f32 %v12634_v11, %v2190_v61  ;;  %v2207_v6 = vsub.f32 %v12667_v29, %v2190_v61  ;;  %v9508_v29 = vld [vmem:[%s15693_s0 + $0x88] sm:$0xff]  }
 0x345   :  { %v2309_v46 = vpop.permute.xlu0 %2308 }
 0x346   :  { %v2251_v58 = vmul.f32 %v12673_v37, %v2203_v15  ;;  %v2255_v61 = vmul.f32 %v12746_v43, %v2207_v6  ;;  %v9510_v15 = vld [vmem:[%s15693_s0 + $0x98] sm:$0xff]  }
 0x349   :  { %v2243_v6 = vpop.permute.xlu0 %2242 }
 0x34b   :  { %v12962_v42 = vpop.permute.xlu1 %2194 }
 0x350   :  { %v12964_v28 = vpop.permute.xlu1 %2351 }
 0x351   :  { %15703 = vst [vmem:[#allocation20_spill] sm:$0xff] %v12964_v28  ;;  %v9515_v28 = vld [vmem:[%s15693_s0 + $0xc0] sm:$0xff]  }
 0x352   :  { %10703 = vmatprep.subr.bf16.mxu0 %v9515_v28 }
 0x355   :  { %v12966_v52 = vpop.permute.xlu1 %2575 }
 0x356   :  { %15704 = vst [vmem:[#allocation21_spill] sm:$0xff] %v12966_v52  ;;  %v9507_v52 = vld [vmem:[%s15693_s0 + $0x80] sm:$0xff]  }
 0x357   :  { %10705 = vmatpush3.bf16.msra.mxu0 %v9507_v52 }
 0x358   :  { %10707 = vmatprep.subr.bf16.mxu0 %v9516_v40 }
 0x35a   :  { %v12972_v0 = vpop.permute.xlu1 %2495 }
 0x35b   :  { %15705 = vst [vmem:[#allocation22_spill] sm:$0xff] %v12972_v0  ;;  %10709 = vmatpush3.bf16.msra.mxu0 %v9508_v29 }
 0x35f   :  { %v2261_v0 = vpop.permute.xlu1 %2260 }
 0x360   :  { %v2278_v32 = vmul.f32 %v2261_v0, %v2250_v9  ;;  %v2282_v44 = vmul.f32 %v2261_v0, %v2254_v26  ;;  %v2200_v26 = vpop.permute.xlu0 %2199 }
 0x362   :  { %v12993_v11 = vadd.f32 %v12679_v10, %v2278_v32  ;;  %v12995_v51 = vadd.f32 %v2309_v46, %v2282_v44  ;;  %v9517_v10 = vld [vmem:[%s15693_s0 + $0xd0] sm:$0xff]   ;;  %v2204_v44 = vsub.f32 %v12642_v18, %v12962_v42 }
 0x363   :  { %v2266_v28 = vpop.permute.xlu1 %2265  ;;  %10711 = vmatprep.subr.bf16.mxu0 %v9517_v10 }
 0x364   :  { %v2279_v52 = vmul.f32 %v2266_v28, %v2251_v58  ;;  %v2410_v54 = vmul.f32 %v12761_v23, %v12995_v51  ;;  %v2490_v37 = vmul.f32 %v12752_v45, %v12995_v51  ;;  %v2406_v32 = vmul.f32 %v12698_v39, %v12993_v11  ;;  %v9509_v23 = vld [vmem:[%s15693_s0 + $0x90] sm:$0xff]   ;;  %v9518_v45 = vld [vmem:[%s15693_s0 + $0xd8] sm:$0xff]   ;;  %v9511_v58 = vld [vmem:[%s15693_s0 + $0xa0] sm:$0xff]  }
 0x365   :  { %v2486_v43 = vmul.f32 %v12690_v30, %v12993_v11  ;;  %v2283_v50 = vmul.f32 %v2266_v28, %v2255_v61  ;;  %v2208_v39 = vsub.f32 %v12675_v57, %v12962_v42  ;;  %10713 = vmatpush3.bf16.msra.mxu0 %v9509_v23 }
 0x366   :  { %v13019_v46 = vadd.f32 %v12709_v14, %v2279_v52  ;;  %v11066_v18 = vpack.i.bf16 %v2410_v54, %v2490_v37  ;;  %v2252_v14 = vmul.f32 %v2223_v17, %v2204_v44  ;;  %10715 = vmatprep.subr.bf16.mxu0 %v9518_v45  ;;  %v9519_v17 = vld [vmem:[%s15693_s0 + $0xe0] sm:$0xff]   ;;  %v15706_v52 = vmov 13  }
 0x367   :  { %v11060_v13 = vpack.i.bf16 %v2406_v32, %v2486_v43  ;;  %v2271_v30 = vpop.permute.xlu1 %2270  ;;  %v13036_v42 = vadd.f32 %v12768_v16, %v2283_v50  ;;  %v2256_v40 = vmul.f32 %v2243_v6, %v2208_v39  ;;  %v2566_v54 = vmul.f32 %v12801_v33, %v12993_v11 }
 0x368   :  { %v2407_v0 = vmul.f32 %v12713_v3, %v13019_v46  ;;  %v2487_v9 = vmul.f32 %v12789_v47, %v13019_v46  ;;  %11067 = vrot.lane.b32.xlu1 %v11066_v18, %s11515_s5  ;;  %v2280_v3 = vmul.f32 %v2271_v30, %v2252_v14  ;;  %v2205_v47 = vsub.f32 %v12645_v53, %v2200_v26 }
 0x369   :  { %11061 = vrot.lane.b32.xlu0 %v11060_v13, %s11515_s5  ;;  %10717 = vmatpush3.bf16.msra.mxu0 %v9510_v15  ;;  %v2284_v28 = vmul.f32 %v2271_v30, %v2256_v40  ;;  %v2411_v53 = vmul.f32 %v12781_v24, %v13036_v42  ;;  %v9520_v24 = vld [vmem:[%s15693_s0 + $0xe8] sm:$0xff]   ;;  %v2646_v32 = vmul.f32 %v12776_v41, %v12993_v11  ;;  %v15710_v40 = vld [vmem:[#allocation6_spill] sm:$0xff] }
 0x36a   :  { %v11071_v57 = vpack.i.bf16 %v2407_v0, %v2487_v9  ;;  %10719 = vmatprep.subr.bf16.mxu0 %v9519_v17  ;;  %v13048_v16 = vadd.f32 %v12970_v25, %v2280_v3  ;;  %v2253_v61 = vmul.f32 %v12716_v36, %v2205_v47  ;;  %v9512_v36 = vld [vmem:[%s15693_s0 + $0xa8] sm:$0xff]   ;;  %v2647_v41 = vmul.f32 %v12791_v31, %v13019_v46 }
 0x36b   :  { %v2276_v29 = vpop.permute.xlu1 %2275  ;;  %v13058_v10 = vadd.f32 %v12787_v59, %v2284_v28  ;;  %v11082_v44 = vpack.i.bf16 %v2566_v54, %v2411_v53  ;;  %v2491_v59 = vmul.f32 %v12797_v1, %v13036_v42  ;;  %v2209_v50 = vsub.f32 %v12681_v55, %v2200_v26  ;;  %v15713_v53 = vld [vmem:[#allocation14_spill] sm:$0xff] }
 0x36c   :  { %11072 = vrot.lane.b32.xlu1 %v11071_v57, %s11515_s5  ;;  %v2281_v25 = vmul.f32 %v2276_v29, %v2253_v61  ;;  %v2408_v37 = vmul.f32 %v12785_v48, %v13048_v16  ;;  %v2488_v33 = vmul.f32 %v12720_v38, %v13048_v16  ;;  %v9521_v48 = vld [vmem:[%s15693_s0 + $0xf0] sm:$0xff]   ;;  %v2567_v39 = vmul.f32 %v12889_v4, %v13019_v46  ;;  %v13125_v4 = vld [vmem:[%s15693_s0 + $0x100] sm:$0xff]   ;;  %v15709_v57 = vld [vmem:[#allocation5_spill] sm:$0xff] }
 0x36d   :  { %2675 = vperm.xlu0 %11054, %v12819_v63   ;;  %10721 = vmatpush3.bf16.msra.mxu0 %v9511_v58  ;;  %v9513_v38 = vld [vmem:[%s15693_s0 + $0xb0] sm:$0xff]   ;;  %v2492_v23 = vmul.f32 %v12799_v5, %v13058_v10  ;;  %v11076_v6 = vpack.i.bf16 %v2646_v32, %v2491_v59  ;;  %v9514_v5 = vld [vmem:[%s15693_s0 + $0xb8] sm:$0xff]   ;;  %v2412_v55 = vmul.f32 %v12795_v22, %v13058_v10  ;;  %v15708_v26 = vmov 17   ;;  %v15712_v58 = vld [vmem:[#allocation7_spill] sm:$0xff]  ;;  %v13166_v32 = vpop.permute.xlu0 %2347 }
 0x36e   :  { %10723 = vmatprep.subr.bf16.mxu0 %v9520_v24  ;;  %v13085_v1 = vadd.f32 %v12737_v2, %v2281_v25  ;;  %v11087_v43 = vpack.i.bf16 %v2408_v37, %v2488_v33  ;;  %v9522_v2 = vld [vmem:[%s15693_s0 + $0xf8] sm:$0xff]   ;;  %v2257_v31 = vmul.f32 %v12783_v27, %v2209_v50  ;;  %v2650_v9 = vmul.f32 %v12925_v21, %v12995_v51  ;;  %v15715_v24 = vld [vmem:[#allocation16_spill] sm:$0xff]  ;;  %v15718_v59 = vld [vmem:[#allocation18_spill] sm:$0xff] }
 0x36f   :  { %v11092_v18 = vpack.i.bf16 %v2647_v41, %v2492_v23  ;;  %10735 = vmatprep.subr.bf16.mxu1 %v13125_v4  ;;  %v15707_v21 = vmov 15   ;;  %v2571_v28 = vmul.f32 %v15712_v58, %v13036_v42  ;;  %v15716_v25 = vmov 0   ;;  %v15717_v37 = vld [vmem:[#allocation9_spill] sm:$0xff]  ;;  %v8432_v41 = vld [vmem:[%s15681_s4 + $0xc0] sm:$0xff] }
 0x370   :  { %2599 = vperm.xlu1 %11081, %v12835_v8   ;;  %v2409_v13 = vmul.f32 %v12741_v62, %v13085_v1  ;;  %v2489_v45 = vmul.f32 %v12793_v60, %v13085_v1  ;;  %v2285_v0 = vmul.f32 %v2276_v29, %v2257_v31  ;;  %v11097_v62 = vpack.i.bf16 %v2567_v39, %v2412_v55  ;;  %v13154_v29 = vpop.permute.xlu1 %2579  ;;  %v8426_v39 = vld [vmem:[%s15681_s4 + $0x90] sm:$0xff] }
 0x371   :  { %11065 = vset.pattern.permute.xlu0 %v15706_v52  ;;  %10725 = vmatpush3.bf16.msra.mxu0 %v9512_v36  ;;  %v2570_v60 = vmul.f32 %v12877_v56, %v12995_v51  ;;  %v2569_v47 = vmul.f32 %v15710_v40, %v13085_v1  ;;  %v2652_v36 = vmul.f32 %v15715_v24, %v13058_v10  ;;  %v11516_v50 = vmov 21   ;;  %v9524_v24 = vld [vmem:[%s15693_s0 + $0x108] sm:$0xff]  }
 0x372   :  { %2499 = vperm.xlu0 %11065, %v12842_v19   ;;  %10727 = vmatprep.subr.bf16.mxu0 %v9521_v48  ;;  %v11102_v30 = vpack.i.bf16 %v2409_v13, %v2489_v45  ;;  %v13118_v27 = vadd.f32 %v12845_v7, %v2285_v0  ;;  %v2648_v7 = vmul.f32 %v12895_v12, %v13048_v16  ;;  %v15711_v12 = vld [vmem:[#allocation11_spill] sm:$0xff]  ;;  %v11517_v13 = vmov 23  }
 0x373   :  { %v11108_v22 = vpack.i.bf16 %v2570_v60, %v2650_v9  ;;  %v2649_v17 = vmul.f32 %v15711_v12, %v13085_v1  ;;  %v11518_v45 = vmov 19   ;;  %v8433_v60 = vld [vmem:[%s15681_s4 + $0xc8] sm:$0xff] }
 0x374   :  { %11083 = vrot.lane.b32.xlu1 %v11082_v44, %s11515_s5  ;;  %v2493_v56 = vmul.f32 %v12856_v20, %v13118_v27  ;;  %v2413_v15 = vmul.f32 %v12863_v49, %v13118_v27  ;;  %v2568_v20 = vmul.f32 %v15709_v57, %v13048_v16  ;;  %v2573_v33 = vmul.f32 %v15717_v37, %v13118_v27  ;;  %v15721_v9 = vld [vmem:[#allocation3_spill] sm:$0xff]  ;;  %v15723_v37 = vld [vmem:[#allocation12_spill] sm:$0xff] }
 0x375   :  { %11107 = vset.pattern.permute.xlu1 %v15706_v52  ;;  %10729 = vmatpush3.bf16.msra.mxu0 %v9513_v38  ;;  %v11124_v49 = vpack.i.bf16 %v2569_v47, %v2649_v17  ;;  %v15714_v52 = vld [vmem:[#allocation8_spill] sm:$0xff]  ;;  %v13168_v48 = vpop.permute.xlu1 %2359 }
 0x376   :  { %2511 = vperm.xlu0 %11065, %v12828_v35   ;;  %10731 = vmatprep.subr.bf16.mxu0 %v9522_v2  ;;  %v11114_v14 = vpack.i.bf16 %v2648_v7, %v2493_v56  ;;  %v11119_v3 = vpack.i.bf16 %v2568_v20, %v2413_v15  ;;  %v2572_v54 = vmul.f32 %v15714_v52, %v13058_v10  ;;  %v15719_v2 = vld [vmem:[#allocation2_spill] sm:$0xff]  ;;  %v8427_v20 = vld [vmem:[%s15681_s4 + $0x98] sm:$0xff]  ;;  %v15665_v52 = vmov 25  }
 0x378   :  { %11088 = vrot.lane.b32.xlu1 %v11087_v43, %s11515_s5  ;;  %v11136_v44 = vpack.i.bf16 %v2572_v54, %v2652_v36  ;;  %v13172_v43 = vpop.permute.xlu0 %2355 }
 0x379   :  { %10733 = vmatpush3.bf16.msra.mxu0 %v9514_v5 }
 0x37a   :  { %11077 = vrot.lane.b32.xlu0 %v11076_v6, %s11515_s5  ;;  %v13174_v23 = vpop.permute.xlu1 %2443  ;;  %v8425_v6 = vld [vmem:[%s15681_s4 + $0x88] sm:$0xff] }
 0x37c   :  { %11093 = vrot.lane.b32.xlu1 %v11092_v18, %s11515_s5  ;;  %v2416_v5 = vpop.permute.xlu0 %2415 }
 0x37d   :  { %v2446_v17 = vmul.f32 %v2416_v5, %v12993_v11 }
 0x37e   :  { %2515 = vperm.xlu0 %11065, %v12819_v63  }
 0x37f   :  { %v13184_v18 = vpop.permute.xlu1 %2363 }
 0x380   :  { %11103 = vrot.lane.b32.xlu1 %v11102_v30, %s11515_s5  ;;  %v13189_v55 = vpop.permute.xlu0 %2431  ;;  %v15720_v30 = vld [vmem:[#allocation4_spill] sm:$0xff] }
 0x382   :  { %11098 = vrot.lane.b32.xlu0 %v11097_v62, %s11515_s5 }
 0x384   :  { %2519 = vperm.xlu1 %11107, %v12835_v8   ;;  %v13191_v31 = vpop.permute.xlu1 %2503  ;;  %v13199_v0 = vpop.permute.xlu0 %2435 }
 0x386   :  { %11109 = vrot.lane.b32.xlu0 %v11108_v22, %s11515_s5 }
 0x388   :  { %11113 = vset.pattern.permute.xlu1 %v15707_v21  ;;  %v13201_v62 = vpop.permute.xlu1 %2507  ;;  %v13208_v22 = vpop.permute.xlu0 %2439  ;;  %v11519_v21 = vmov 22  }
 0x389   :  { %2603 = vperm.xlu1 %11113, %v12703_v34  }
 0x38a   :  { %2523 = vperm.xlu0 %11065, %v12703_v34  }
 0x38c   :  { %v13215_v7 = vpop.permute.xlu0 %2583 }
 0x38d   :  { %11115 = vrot.lane.b32.xlu1 %v11114_v14, %s11515_s5  ;;  %v13210_v56 = vpop.permute.xlu1 %2659 }
 0x38e   :  { %11135 = vset.pattern.permute.xlu0 %v15708_v26  ;;  %11129 = vset.pattern.permute.xlu1 %v15708_v26 }
 0x38f   :  { %2683 = vperm.xlu0 %11135, %v12703_v34   ;;  %v2651_v34 = vmul.f32 %v15713_v53, %v13036_v42 }
 0x391   :  { %11120 = vrot.lane.b32.xlu1 %v11119_v3, %s11515_s5  ;;  %v11130_v61 = vpack.i.bf16 %v2571_v28, %v2651_v34  ;;  %v15722_v28 = vld [vmem:[#allocation10_spill] sm:$0xff] }
 0x392   :  { %v13217_v14 = vpop.permute.xlu1 %2591  ;;  %v2366_v53 = vmul.f32 %v15722_v28, %v12993_v11 }
 0x393   :  { %11149 = vset.pattern.permute.xlu0 %v11516_v50 }
 0x394   :  { %3722 = vperm.xlu0 %11149, %v15719_v2  }
 0x395   :  { %11125 = vrot.lane.b32.xlu1 %v11124_v49, %s11515_s5 }
 0x397   :  { %v13226_v15 = vpop.permute.xlu1 %2663 }
 0x398   :  { %11158 = vset.pattern.permute.xlu0 %v11517_v13 }
 0x399   :  { %2679 = vperm.xlu1 %11129, %v12835_v8   ;;  %v2653_v8 = vmul.f32 %v15718_v59, %v13118_v27  ;;  %3806 = vperm.xlu0 %11158, %v12842_v19   ;;  %v15724_v59 = vld [vmem:[#allocation19_spill] sm:$0xff] }
 0x39b   :  { %v11141_v38 = vpack.i.bf16 %v2573_v33, %v2653_v8  ;;  %v2447_v33 = vmul.f32 %v15723_v37, %v13019_v46  ;;  %v2367_v8 = vmul.f32 %v15724_v59, %v13019_v46 }
 0x39c   :  { %v13233_v57 = vpop.permute.xlu1 %2595 }
 0x39d   :  { %11131 = vrot.lane.b32.xlu1 %v11130_v61, %s11515_s5  ;;  %3810 = vperm.xlu0 %11158, %v15720_v30  }
 0x39e   :  { %11146 = vset.pattern.permute.xlu1 %v15716_v25 }
 0x3a1   :  { %11137 = vrot.lane.b32.xlu1 %v11136_v44, %s11515_s5  ;;  %3814 = vperm.xlu0 %11158, %v15721_v9   ;;  %v13241_v40 = vpop.permute.xlu1 %2671 }
 0x3a5   :  { %11142 = vrot.lane.b32.xlu1 %v11141_v38, %s11515_s5  ;;  %3818 = vperm.xlu0 %11158, %v12828_v35   ;;  %v13224_v35 = vpop.permute.xlu0 %2587 }
 0x3a9   :  { %3484 = vperm.xlu1 %11146, %v8425_v6   ;;  %3822 = vperm.xlu0 %11158, %v12819_v63   ;;  %v15664_v63 = vmov 24   ;;  %v13231_v26 = vpop.permute.xlu0 %2655 }
 0x3ad   :  { %3555 = vperm.xlu1 %11146, %v8432_v41   ;;  %11183 = vset.pattern.permute.xlu0 %v11519_v21  ;;  %v13239_v3 = vpop.permute.xlu0 %2667  ;;  %v9525_v41 = vld [vmem:[%s15693_s0 + $0x110] sm:$0xff]  }
 0x3ae   :  { %3766 = vperm.xlu0 %11183, %v12842_v19  }
 0x3b1   :  { %11147 = vset.pattern.permute.xlu1 %v11518_v45 }
 0x3b2   :  { %3642 = vperm.xlu1 %11147, %v15719_v2  }
 0x3b6   :  { %11148 = vset.pattern.permute.xlu1 %v15716_v25 }
 0x3b7   :  { %3489 = vperm.xlu1 %11148, %v8426_v39  }
 0x3bb   :  { %3560 = vperm.xlu1 %11148, %v8433_v60   ;;  %v8435_v60 = vld [vmem:[%s15681_s4 + $0xd8] sm:$0xff] }
 0x3bf   :  { %11150 = vset.pattern.permute.xlu1 %v11519_v21 }
 0x3c0   :  { %3762 = vperm.xlu1 %11150, %v15719_v2  }
 0x3c4   :  { %11151 = vset.pattern.permute.xlu1 %v11518_v45 }
 0x3c5   :  { %3646 = vperm.xlu1 %11151, %v12842_v19  }
 0x3c9   :  { %11152 = vset.pattern.permute.xlu1 %v11517_v13 }
 0x3ca   :  { %3802 = vperm.xlu1 %11152, %v15719_v2  }
 0x3ce   :  { %11153 = vset.pattern.permute.xlu1 %v15664_v63 }
 0x3cf   :  { %3842 = vperm.xlu1 %11153, %v15719_v2  }
 0x3d3   :  { %11154 = vset.pattern.permute.xlu1 %v15716_v25 }
 0x3d4   :  { %3494 = vperm.xlu1 %11154, %v8427_v20  }
 0x3d8   :  { %11155 = vset.pattern.permute.xlu1 %v11516_v50 }
 0x3d9   :  { %3726 = vperm.xlu1 %11155, %v12842_v19  }
 0x3da   :  { %v13245_v12 = vpop.permute.xlu1 %11067 }
 0x3db   :  { %v11062_v47 = vpop.permute.xlu0 %11061 }
 0x3dc   :  { %v11064_v49 = vunpack.i.h.bf16 %v11062_v47  ;;  %v11063_v58 = vunpack.i.l.bf16 %v11062_v47 }
 0x3dd   :  { %11156 = vset.pattern.permute.xlu1 %v15665_v52 }
 0x3de   :  { %v2830_v34 = vsel %vm2088_vm0, %v2446_v17, %v11063_v58  ;;  %v2822_v61 = vsel %vm2088_vm0, %v2366_v53, %v11064_v49  ;;  %v11073_v54 = vpop.permute.xlu1 %11072  ;;  %3882 = vperm.xlu1 %11156, %v15719_v2   ;;  %v11522_v2 = vmov 20   ;;  %v15725_v58 = vld [vmem:[#allocation13_spill] sm:$0xff] }
 0x3df   :  { %3086 = vmatprep.mubr.f32.mxu1 %v2830_v34  ;;  %v11075_v36 = vunpack.i.h.bf16 %v11073_v54  ;;  %v11074_v44 = vunpack.i.l.bf16 %v11073_v54  ;;  %v15726_v54 = vld [vmem:[#allocation15_spill] sm:$0xff] }
 0x3e0   :  { %3087 = vmatmul.mubr.f32.vlgmr.msra.gmra.mrb[64].mxu1 %v2822_v61 }
 0x3e1   :  { %10737 = vmatpush3.bf16.msra.mxu1 %v13125_v4  ;;  %v2831_v38 = vsel %vm2088_vm0, %v2447_v33, %v11074_v44  ;;  %v2823_v6 = vsel %vm2088_vm0, %v2367_v8, %v11075_v36  ;;  %v9526_v4 = vld [vmem:[%s15693_s0 + $0x118] sm:$0xff]   ;;  %v15728_v8 = vld [vmem:[#allocation22_spill] sm:$0xff]  ;;  %s11530_s0 = smov 80  }
 0x3e2   :  { %10739 = vmatprep.subr.bf16.mxu1 %v9524_v24  ;;  %3091 = vmatprep.mubr.f32.mxu1 %v2831_v38  ;;  %v15727_v44 = vld [vmem:[#allocation21_spill] sm:$0xff]  ;;  %v2526_v38 = vmul.f32 %v15728_v8, %v12993_v11 }
 0x3e3   :  { %11157 = vset.pattern.permute.xlu1 %v11518_v45  ;;  %v2606_v37 = vmul.f32 %v15727_v44, %v12993_v11 }
 0x3e4   :  { %3092 = vmatmul.mubr.f32.gmra.mrb[66].mxu1 %v2823_v6  ;;  %3650 = vperm.xlu1 %11157, %v15720_v30  }
 0x3e5   :  { %10741 = vmatpush3.bf16.msra.mxu1 %v9524_v24  ;;  %v2368_v24 = vmul.f32 %v15726_v54, %v13048_v16 }
 0x3e6   :  { %10743 = vmatprep.subr.bf16.mxu1 %v9525_v41 }
 0x3e8   :  { %11159 = vset.pattern.permute.xlu1 %v11522_v2 }
 0x3e9   :  { %10745 = vmatpush3.bf16.msra.mxu1 %v9525_v41  ;;  %3690 = vperm.xlu1 %11159, %v15720_v30  }
 0x3ea   :  { %10747 = vmatprep.subr.bf16.mxu1 %v9526_v4 }
 0x3ec   :  { %v13274_v5 = vpop.permute.xlu0 %2675 }
 0x3ed   :  { %10749 = vmatpush3.bf16.msra.mxu1 %v9526_v4  ;;  %11160 = vset.pattern.permute.xlu1 %v15664_v63  ;;  %v2607_v4 = vmul.f32 %v13154_v29, %v13019_v46 }
 0x3ee   :  { %3846 = vperm.xlu1 %11160, %v12842_v19   ;;  %v2448_v19 = vmul.f32 %v15725_v58, %v13048_v16 }
 0x3ef   :  { %v13278_v39 = vpop.permute.xlu1 %2599 }
 0x3f1   :  { %v2500_v20 = vpop.permute.xlu0 %2499 }
 0x3f2   :  { %11161 = vset.pattern.permute.xlu1 %v15716_v25 }
 0x3f3   :  { %3570 = vperm.xlu1 %11161, %v8435_v60   ;;  %v13284_v47 = vpop.permute.xlu1 %11083 }
 0x3f4   :  { %v11086_v28 = vunpack.i.h.bf16 %v13284_v47 }
 0x3f5   :  { %v13286_v17 = vpop.permute.xlu0 %2511 }
 0x3f6   :  { %v2838_v58 = vsel %vm2088_vm0, %v2526_v38, %v11086_v28  ;;  %v2527_v28 = vmul.f32 %v2500_v20, %v13019_v46 }
 0x3f7   :  { %11162 = vset.pattern.permute.xlu1 %v11516_v50  ;;  %v11089_v49 = vpop.permute.xlu1 %11088 }
 0x3f8   :  { %3730 = vperm.xlu1 %11162, %v15720_v30   ;;  %v11091_v53 = vunpack.i.h.bf16 %v11089_v49  ;;  %v11090_v34 = vunpack.i.l.bf16 %v11089_v49 }
 0x3f9   :  { %v11078_v61 = vpop.permute.xlu0 %11077 }
 0x3fa   :  { %v11080_v36 = vunpack.i.h.bf16 %v11078_v61  ;;  %v2832_v33 = vsel %vm2088_vm0, %v2448_v19, %v11090_v34  ;;  %v2824_v59 = vsel %vm2088_vm0, %v2368_v24, %v11091_v53  ;;  %v15729_v34 = vld [vmem:[#allocation17_spill] sm:$0xff]  ;;  %v11069_v24 = vunpack.i.l.bf16 %v13245_v12 }
 0x3fb   :  { %v11094_v6 = vpop.permute.xlu1 %11093  ;;  %3096 = vmatprep.mubr.f32.mxu1 %v2832_v33  ;;  %v2449_v54 = vmul.f32 %v15729_v34, %v13085_v1  ;;  %v11079_v20 = vunpack.i.l.bf16 %v11078_v61 }
 0x3fc   :  { %v2846_v41 = vsel %vm2088_vm0, %v2606_v37, %v11080_v36  ;;  %11163 = vset.pattern.permute.xlu1 %v11519_v21  ;;  %v11096_v60 = vunpack.i.h.bf16 %v11094_v6  ;;  %3097 = vmatmul.mubr.f32.gmra.mrb[68].mxu1 %v2824_v59  ;;  %v2369_v37 = vmul.f32 %v13166_v32, %v13085_v1  ;;  %v2450_v59 = vmul.f32 %v13189_v55, %v12995_v51  ;;  %v15730_v55 = vld [vmem:[#allocation20_spill] sm:$0xff] }
 0x3fd   :  { %v13305_v49 = vpop.permute.xlu0 %2515  ;;  %3191 = vmatprep.mubr.f32.mxu0 %v2846_v41  ;;  %3770 = vperm.xlu1 %11163, %v15720_v30   ;;  %v11070_v41 = vunpack.i.h.bf16 %v13245_v12  ;;  %v11085_v12 = vunpack.i.l.bf16 %v13284_v47  ;;  %v11095_v61 = vunpack.i.l.bf16 %v11094_v6  ;;  %v2608_v6 = vmul.f32 %v13215_v7, %v13048_v16 }
 0x3fe   :  { %3192 = vmatmul.mubr.f32.vlgmr.msra.gmra.mrb[80].mxu0 %v2838_v58  ;;  %v2847_v19 = vsel %vm2088_vm0, %v2607_v4, %v11096_v60  ;;  %v2834_v60 = vsel %vm2088_vm0, %v2450_v59, %v11069_v24  ;;  %v2370_v58 = vmul.f32 %v15730_v55, %v12995_v51  ;;  %v2371_v24 = vmul.f32 %v13172_v43, %v13036_v42 }
 0x3ff   :  { %v11104_v53 = vpop.permute.xlu1 %11103  ;;  %3196 = vmatprep.mubr.f32.mxu0 %v2847_v19  ;;  %v2451_v19 = vmul.f32 %v13199_v0, %v13036_v42  ;;  %v2452_v0 = vmul.f32 %v13208_v22, %v13058_v10  ;;  %v2372_v43 = vmul.f32 %v13168_v48, %v13058_v10  ;;  %v2453_v22 = vmul.f32 %v13174_v23, %v13118_v27 }
 0x400   :  { %v11106_v29 = vunpack.i.h.bf16 %v11104_v53  ;;  %v11105_v36 = vunpack.i.l.bf16 %v11104_v53  ;;  %v2826_v53 = vsel %vm2088_vm0, %v2370_v58, %v11070_v41  ;;  %v2827_v47 = vsel %vm2088_vm0, %v2371_v24, %v11085_v12 }
 0x401   :  { %v11099_v44 = vpop.permute.xlu0 %11098  ;;  %11164 = vset.pattern.permute.xlu1 %v11518_v45  ;;  %v2373_v48 = vmul.f32 %v13184_v18, %v13118_v27  ;;  %v2528_v23 = vmul.f32 %v13191_v31, %v13048_v16  ;;  %v2609_v18 = vmul.f32 %v13224_v35, %v13085_v1  ;;  %v2529_v31 = vmul.f32 %v13201_v62, %v13085_v1 }
 0x402   :  { %v11101_v33 = vunpack.i.h.bf16 %v11099_v44  ;;  %v2833_v8 = vsel %vm2088_vm0, %v2449_v54, %v11105_v36  ;;  %v2825_v38 = vsel %vm2088_vm0, %v2369_v37, %v11106_v29  ;;  %3654 = vperm.xlu1 %11164, %v15721_v9   ;;  %v2835_v54 = vsel %vm2088_vm0, %v2451_v19, %v11079_v20 }
 0x403   :  { %v13323_v4 = vpop.permute.xlu1 %2519  ;;  %3101 = vmatprep.mubr.f32.mxu1 %v2833_v8  ;;  %v11100_v29 = vunpack.i.l.bf16 %v11099_v44  ;;  %v2836_v37 = vsel %vm2088_vm0, %v2452_v0, %v11095_v61  ;;  %v8436_v8 = vld [vmem:[%s15681_s4 + $0xe0] sm:$0xff]  ;;  %v2686_v20 = vmul.f32 %v13231_v26, %v12993_v11  ;;  %v2687_v11 = vmul.f32 %v13210_v56, %v13019_v46 }
 0x404   :  { %v2839_v32 = vsel %vm2088_vm0, %v2527_v28, %v11101_v33  ;;  %3102 = vmatmul.mubr.f32.gmra.mrb[70].mxu1 %v2825_v38  ;;  %v2610_v26 = vmul.f32 %v13217_v14, %v12995_v51  ;;  %v2688_v35 = vmul.f32 %v13226_v15, %v13048_v16  ;;  %v2689_v16 = vmul.f32 %v13239_v3, %v13085_v1 }
 0x405   :  { %3197 = vmatmul.mubr.f32.gmra.mrb[82].mxu0 %v2839_v32  ;;  %3106 = vmatprep.mubr.f32.mxu1 %v2834_v60  ;;  %v2828_v33 = vsel %vm2088_vm0, %v2372_v43, %v11100_v29  ;;  %v11110_v32 = vpop.permute.xlu0 %11109  ;;  %v2530_v14 = vmul.f32 %v13286_v17, %v12995_v51  ;;  %v2690_v15 = vmul.f32 %v13241_v40, %v12995_v51 }
 0x406   :  { %11165 = vset.pattern.permute.xlu1 %v11522_v2  ;;  %v11111_v19 = vunpack.i.l.bf16 %v11110_v32  ;;  %v2531_v1 = vmul.f32 %v13305_v49, %v13036_v42  ;;  %v2691_v51 = vmul.f32 %v13274_v5, %v13036_v42  ;;  %v2532_v49 = vmul.f32 %v13323_v4, %v13058_v10 }
 0x407   :  { %3694 = vperm.xlu1 %11165, %v15721_v9  }
 0x408   :  { %v13335_v34 = vpop.permute.xlu1 %2603  ;;  %3107 = vmatmul.mubr.f32.gmra.mrb[72].mxu1 %v2826_v53  ;;  %v2850_v56 = vsel %vm2088_vm0, %v2610_v26, %v11111_v19 }
 0x409   :  { %3111 = vmatprep.mubr.f32.mxu1 %v2835_v54  ;;  %v11112_v54 = vunpack.i.h.bf16 %v11110_v32  ;;  %v2524_v46 = vpop.permute.xlu0 %2523 }
 0x40a   :  { %v2533_v4 = vmul.f32 %v2524_v46, %v13118_v27 }
 0x40b   :  { %11166 = vset.pattern.permute.xlu1 %v15664_v63  ;;  %v2842_v29 = vsel %vm2088_vm0, %v2530_v14, %v11112_v54 }
 0x40c   :  { %v11116_v36 = vpop.permute.xlu1 %11115  ;;  %3112 = vmatmul.mubr.f32.gmra.mrb[74].mxu1 %v2827_v47  ;;  %3850 = vperm.xlu1 %11166, %v15720_v30   ;;  %v2611_v47 = vmul.f32 %v13233_v57, %v13036_v42  ;;  %v2612_v57 = vmul.f32 %v13278_v39, %v13058_v10  ;;  %v13418_v39 = vld [vmem:[%s15678_s8 + $0x20] sm:$0xff] }
 0x40d   :  { %v11118_v44 = vunpack.i.h.bf16 %v11116_v36  ;;  %v11117_v28 = vunpack.i.l.bf16 %v11116_v36  ;;  %3116 = vmatprep.mubr.f32.mxu1 %v2836_v37 }
 0x40e   :  { %v2684_v40 = vpop.permute.xlu0 %2683 }
 0x40f   :  { %v2848_v59 = vsel %vm2088_vm0, %v2608_v6, %v11118_v44  ;;  %v2837_v7 = vsel %vm2088_vm0, %v2453_v22, %v11117_v28  ;;  %v2693_v42 = vmul.f32 %v2684_v40, %v13118_v27  ;;  %v2613_v28 = vmul.f32 %v13335_v34, %v13118_v27  ;;  %v8437_v27 = vld [vmem:[%s15681_s4 + $0xe8] sm:$0xff] }
 0x410   :  { %v11121_v30 = vpop.permute.xlu1 %11120  ;;  %3117 = vmatmul.mubr.f32.gmra.mrb[76].mxu1 %v2828_v33  ;;  %3201 = vmatprep.mubr.f32.mxu0 %v2848_v59  ;;  %v13448_v34 = vld [vmem:[%s15678_s8 + $0x28] sm:$0xff] }
 0x411   :  { %v11123_v38 = vunpack.i.h.bf16 %v11121_v30  ;;  %v11122_v41 = vunpack.i.l.bf16 %v11121_v30  ;;  %3121 = vmatprep.mubr.f32.mxu1 %v2837_v7  ;;  %11167 = vset.pattern.permute.xlu1 %v15716_v25  ;;  %v13433_v30 = vld [vmem:[%s15678_s8 + $0x18] sm:$0xff] }
 0x412   :  { %3575 = vperm.xlu1 %11167, %v8436_v8  }
 0x413   :  { %v2829_v60 = vsel %vm2088_vm0, %v2373_v48, %v11122_v41  ;;  %v2840_v55 = vsel %vm2088_vm0, %v2528_v23, %v11123_v38  ;;  %v8438_v48 = vld [vmem:[%s15681_s4 + $0xf0] sm:$0xff] }
 0x414   :  { %v11126_v58 = vpop.permute.xlu1 %11125  ;;  %3122 = vmatmul.mubr.f32.gmra.mrb[78].mxu1 %v2829_v60  ;;  %3202 = vmatmul.mubr.f32.gmra.mrb[84].mxu0 %v2840_v55  ;;  %v13467_v23 = vld [vmem:[%s15678_s8 + $0x30] sm:$0xff] }
 0x415   :  { %v11128_v12 = vunpack.i.h.bf16 %v11126_v58  ;;  %v11127_v53 = vunpack.i.l.bf16 %v11126_v58  ;;  %10252 = vmatprep.mubr.msk.f32.mxu1 %vm2088_vm0, %v2686_v20 }
 0x416   :  { %11168 = vset.pattern.permute.xlu1 %v11516_v50 }
 0x417   :  { %v2849_v61 = vsel %vm2088_vm0, %v2609_v18, %v11127_v53  ;;  %v2841_v62 = vsel %vm2088_vm0, %v2529_v31, %v11128_v12  ;;  %3734 = vperm.xlu1 %11168, %v15721_v9  }
 0x418   :  { %v2680_v24 = vpop.permute.xlu1 %2679  ;;  %3206 = vmatprep.mubr.f32.mxu0 %v2849_v61  ;;  %10253 = vmatmul.mubr.msk.f32.vlgmr.msra.gmra.mrb[80].mxu1 %vm2088_vm0, %v2687_v11 }
 0x419   :  { %3207 = vmatmul.mubr.f32.gmra.mrb[86].mxu0 %v2841_v62  ;;  %10255 = vmatprep.mubr.msk.f32.mxu1 %vm2088_vm0, %v2688_v35  ;;  %v2692_v6 = vmul.f32 %v2680_v24, %v13058_v10 }
 0x41a   :  { %3211 = vmatprep.mubr.f32.mxu0 %v2850_v56 }
 0x41b   :  { %11169 = vset.pattern.permute.xlu1 %v11519_v21 }
 0x41c   :  { %v11132_v0 = vpop.permute.xlu1 %11131  ;;  %10256 = vmatmul.mubr.msk.f32.gmra.mrb[82].mxu1 %vm2088_vm0, %v2689_v16  ;;  %3774 = vperm.xlu1 %11169, %v15721_v9  }
 0x41d   :  { %v11134_v3 = vunpack.i.h.bf16 %v11132_v0  ;;  %v11133_v17 = vunpack.i.l.bf16 %v11132_v0  ;;  %3212 = vmatmul.mubr.f32.gmra.mrb[88].mxu0 %v2842_v29  ;;  %10258 = vmatprep.mubr.msk.f32.mxu1 %vm2088_vm0, %v2690_v15 }
 0x41f   :  { %v2851_v36 = vsel %vm2088_vm0, %v2611_v47, %v11133_v17  ;;  %v2843_v9 = vsel %vm2088_vm0, %v2531_v1, %v11134_v3 }
 0x420   :  { %v11138_v37 = vpop.permute.xlu1 %11137  ;;  %3216 = vmatprep.mubr.f32.mxu0 %v2851_v36  ;;  %10259 = vmatmul.mubr.msk.f32.gmra.mrb[84].mxu1 %vm2088_vm0, %v2691_v51 }
 0x421   :  { %v11140_v43 = vunpack.i.h.bf16 %v11138_v37  ;;  %v11139_v22 = vunpack.i.l.bf16 %v11138_v37  ;;  %3217 = vmatmul.mubr.f32.gmra.mrb[90].mxu0 %v2843_v9  ;;  %10261 = vmatprep.mubr.msk.f32.mxu1 %vm2088_vm0, %v2692_v6 }
 0x422   :  { %11170 = vset.pattern.permute.xlu1 %v11518_v45 }
 0x423   :  { %v2852_v5 = vsel %vm2088_vm0, %v2612_v57, %v11139_v22  ;;  %v2844_v44 = vsel %vm2088_vm0, %v2532_v49, %v11140_v43  ;;  %3658 = vperm.xlu1 %11170, %v13418_v39  }
 0x424   :  { %v11143_v10 = vpop.permute.xlu1 %11142  ;;  %3221 = vmatprep.mubr.f32.mxu0 %v2852_v5  ;;  %10262 = vmatmul.mubr.msk.f32.gmra.mrb[86].mxu1 %vm2088_vm0, %v2693_v42 }
 0x425   :  { %v11145_v33 = vunpack.i.h.bf16 %v11143_v10  ;;  %v11144_v59 = vunpack.i.l.bf16 %v11143_v10  ;;  %3222 = vmatmul.mubr.f32.gmra.mrb[92].mxu0 %v2844_v44 }
 0x427   :  { %v2853_v7 = vsel %vm2088_vm0, %v2613_v28, %v11144_v59  ;;  %v2845_v8 = vsel %vm2088_vm0, %v2533_v4, %v11145_v33  ;;  %11171 = vset.pattern.permute.xlu1 %v11522_v2 }
 0x428   :  { %3226 = vmatprep.mubr.f32.mxu0 %v2853_v7  ;;  %3698 = vperm.xlu1 %11171, %v13418_v39   ;;  %v13475_v38 = vpop.permute.xlu1 %3484 }
 0x429   :  { %3227 = vmatmul.mubr.f32.gmra.mrb[94].mxu0 %v2845_v8 }
 0x42c   :  { %11172 = vset.pattern.permute.xlu1 %v15664_v63  ;;  %v13477_v41 = vpop.permute.xlu1 %3555 }
 0x42d   :  { %3854 = vperm.xlu1 %11172, %v13433_v30  }
 0x431   :  { %11173 = vset.pattern.permute.xlu1 %v15716_v25  ;;  %v13479_v32 = vpop.permute.xlu1 %3642 }
 0x432   :  { %3580 = vperm.xlu1 %11173, %v8437_v27  }
 0x436   :  { %11174 = vset.pattern.permute.xlu1 %v11516_v50  ;;  %v13481_v20 = vpop.permute.xlu1 %3489 }
 0x437   :  { %3738 = vperm.xlu1 %11174, %v13418_v39   ;;  %15731 = vst [vmem:[#allocation5_spill] sm:$0xff] %v13481_v20 }
 0x43a   :  { %v13483_v60 = vpop.permute.xlu1 %3560 }
 0x43b   :  { %11175 = vset.pattern.permute.xlu1 %v11519_v21 }
 0x43c   :  { %3778 = vperm.xlu1 %11175, %v13418_v39  }
 0x43f   :  { %v13485_v55 = vpop.permute.xlu1 %3762 }
 0x440   :  { %11176 = vset.pattern.permute.xlu1 %v11518_v45 }
 0x441   :  { %3662 = vperm.xlu1 %11176, %v13448_v34  }
 0x444   :  { %v13487_v19 = vpop.permute.xlu1 %3646 }
 0x445   :  { %11177 = vset.pattern.permute.xlu1 %v11522_v2 }
 0x446   :  { %3702 = vperm.xlu1 %11177, %v13448_v34  }
 0x449   :  { %v13489_v26 = vpop.permute.xlu1 %3802 }
 0x44a   :  { %11178 = vset.pattern.permute.xlu1 %v15664_v63 }
 0x44b   :  { %3858 = vperm.xlu1 %11178, %v13418_v39  }
 0x44e   :  { %v13491_v35 = vpop.permute.xlu1 %3842 }
 0x44f   :  { %11179 = vset.pattern.permute.xlu1 %v15716_v25 }
 0x450   :  { %3585 = vperm.xlu1 %11179, %v8438_v48  }
 0x453   :  { %v13493_v61 = vpop.permute.xlu1 %3494 }
 0x454   :  { %11180 = vset.pattern.permute.xlu1 %v11516_v50  ;;  %15732 = vst [vmem:[#allocation6_spill] sm:$0xff] %v13493_v61 }
 0x455   :  { %3742 = vperm.xlu1 %11180, %v13448_v34  }
 0x458   :  { %v13495_v62 = vpop.permute.xlu1 %3726 }
 0x459   :  { %11181 = vset.pattern.permute.xlu1 %v11519_v21 }
 0x45a   :  { %3782 = vperm.xlu1 %11181, %v13448_v34  }
 0x45d   :  { %v13497_v15 = vpop.permute.xlu1 %3882 }
 0x45e   :  { %11182 = vset.pattern.permute.xlu1 %v11518_v45 }
 0x45f   :  { %3666 = vperm.xlu1 %11182, %v13467_v23  }
 0x463   :  { %11184 = vset.pattern.permute.xlu1 %v11522_v2  ;;  %v13499_v40 = vpop.permute.xlu1 %3650 }
 0x464   :  { %3706 = vperm.xlu1 %11184, %v13467_v23   ;;  %15733 = vst [vmem:[#allocation11_spill] sm:$0xff] %v13499_v40 }
 0x468   :  { %11185 = vset.pattern.permute.xlu1 %v15664_v63  ;;  %v13501_v49 = vpop.permute.xlu1 %3690 }
 0x469   :  { %3862 = vperm.xlu1 %11185, %v13448_v34   ;;  %15734 = vst [vmem:[#allocation7_spill] sm:$0xff] %v13501_v49 }
 0x46d   :  { %11186 = vset.pattern.permute.xlu1 %v11516_v50  ;;  %v13503_v10 = vpop.permute.xlu1 %3846 }
 0x4b3   :  { %v10071_v18 = vpop.f32.mrb[64].mxu1 }
 0x4b4   :  { %v10072_v58 = vpop.f32.mrb[65].mxu1 }
 0x4b5   :  { %v10073_v31 = vadd.f32 %v10072_v58, %v10071_v18  ;;  %v13505_v18 = vpop.permute.xlu1 %3570 }
 0x4b6   :  { %15735 = vst [vmem:[#allocation14_spill] sm:$0xff] %v13505_v18 }
 0x4b7   :  { %v10074_v12 = vpop.f32.mrb[66].mxu1 }
 0x4b8   :  { %v10075_v53 = vpop.f32.mrb[67].mxu1 }
 0x4b9   :  { %v10076_v11 = vadd.f32 %v10075_v53, %v10074_v12 }
 0x4cf   :  { %v10077_v54 = vpop.f32.mrb[68].mxu1 }
 0x4d0   :  { %v10078_v24 = vpop.f32.mrb[69].mxu1 }
 0x4d1   :  { %v10127_v46 = vpop.f32.mrb[80].mxu0  ;;  %v10079_v56 = vadd.f32 %v10078_v24, %v10077_v54 }
 0x4d2   :  { %v10128_v16 = vpop.f32.mrb[81].mxu0 }
 0x4d3   :  { %v10129_v14 = vadd.f32 %v10128_v16, %v10127_v46 }
 0x4d5   :  { %v3194_v0 = vadd.f32 %v10129_v14, %v10073_v31 }
 0x4d7   :  { %v10080_v29 = vpop.f32.mrb[70].mxu1 }
 0x4d8   :  { %v10130_v47 = vpop.f32.mrb[82].mxu0  ;;  %v10081_v1 = vpop.f32.mrb[71].mxu1 }
 0x4d9   :  { %v10131_v3 = vpop.f32.mrb[83].mxu0  ;;  %v10082_v17 = vadd.f32 %v10081_v1, %v10080_v29 }
 0x4da   :  { %v10132_v51 = vadd.f32 %v10131_v3, %v10130_v47 }
 0x4db   :  { %v10083_v6 = vpop.f32.mrb[72].mxu1 }
 0x4dc   :  { %v3199_v36 = vadd.f32 %v10132_v51, %v10076_v11  ;;  %v10084_v9 = vpop.f32.mrb[73].mxu1  ;;  %v13521_v51 = vpop.permute.xlu1 %3730 }
 0x4dd   :  { %v10085_v37 = vadd.f32 %v10084_v9, %v10083_v6  ;;  %15736 = vst [vmem:[#allocation8_spill] sm:$0xff] %v13521_v51 }
 0x4df   :  { %v10086_v57 = vpop.f32.mrb[74].mxu1 }
 0x4e0   :  { %v10087_v43 = vpop.f32.mrb[75].mxu1 }
 0x4e1   :  { %v10088_v22 = vadd.f32 %v10087_v43, %v10086_v57 }
 0x4e3   :  { %v10089_v42 = vpop.f32.mrb[76].mxu1 }
 0x4e4   :  { %v10090_v5 = vpop.f32.mrb[77].mxu1 }
 0x4e5   :  { %v10091_v44 = vadd.f32 %v10090_v5, %v10089_v42 }
 0x4e7   :  { %v10092_v4 = vpop.f32.mrb[78].mxu1  ;;  %v10133_v28 = vpop.f32.mrb[84].mxu0 }
 0x4e8   :  { %v10093_v33 = vpop.f32.mrb[79].mxu1  ;;  %v10134_v59 = vpop.f32.mrb[85].mxu0 }
 0x4e9   :  { %v10094_v7 = vadd.f32 %v10093_v33, %v10092_v4  ;;  %v10135_v8 = vadd.f32 %v10134_v59, %v10133_v28 }
 0x4eb   :  { %v10254_v27 = vpop.f32.mrb[80].mxu1  ;;  %v3204_v48 = vadd.f32 %v10135_v8, %v10079_v56 }
 0x4ec   :  { %v13507_v58 = vadd.f32 %v10254_v27, %v3199_v36  ;;  %v10136_v31 = vpop.f32.mrb[86].mxu0  ;;  %v3298_v12 = vpop.f32.mrb[81].mxu1 }
 0x4ed   :  { %v13509_v53 = vadd.f32 %v3298_v12, %v3194_v0  ;;  %v10137_v11 = vpop.f32.mrb[87].mxu0  ;;  %v13531_v27 = vpop.permute.xlu1 %3770 }
 0x4ee   :  { %v10138_v54 = vadd.f32 %v10137_v11, %v10136_v31  ;;  %v3359_v24 = vsel %vm3355_vm1, %v13507_v58, 0.0  ;;  %v3381_v46 = vmul.f32 %v13507_v58, %v13507_v58  ;;  %15737 = vst [vmem:[#allocation16_spill] sm:$0xff] %v13531_v27  ;;  %v8428_v27 = vld [vmem:[%s15681_s4 + $0xa0] sm:$0xff] }
 0x4ef   :  { %3360 = vadd.xlane.f32.xlu1 %v3359_v24  ;;  %v10257_v16 = vpop.f32.mrb[82].mxu1  ;;  %v3356_v56 = vsel %vm3355_vm1, %v13509_v53, 0.0  ;;  %v3380_v14 = vmul.f32 %v13509_v53, %v13509_v53 }
 0x4f0   :  { %v3209_v29 = vadd.f32 %v10138_v54, %v10082_v17  ;;  %v10139_v47 = vpop.f32.mrb[88].mxu0  ;;  %v3308_v0 = vpop.f32.mrb[83].mxu1  ;;  %3357 = vadd.xlane.f32.xlu0 %v3356_v56  ;;  %v3391_v9 = vsel %vm3355_vm1, %v3381_v46, 0.0 }
 0x4f1   :  { %v13519_v1 = vadd.f32 %v3308_v0, %v3204_v48  ;;  %v10140_v3 = vpop.f32.mrb[89].mxu0  ;;  %v3388_v43 = vsel %vm3355_vm1, %v3380_v14, 0.0 }
 0x4f2   :  { %v13523_v6 = vadd.f32 %v10257_v16, %v3209_v29  ;;  %v10141_v36 = vadd.f32 %v10140_v3, %v10139_v47 }
 0x4f3   :  { %3392 = vadd.xlane.f32.xlu1 %v3391_v9  ;;  %v10260_v57 = vpop.f32.mrb[84].mxu1  ;;  %v3362_v24 = vsel %vm3355_vm1, %v13519_v1, 0.0  ;;  %v3382_v3 = vmul.f32 %v13519_v1, %v13519_v1 }
 0x4f4   :  { %v10142_v42 = vpop.f32.mrb[90].mxu0  ;;  %v3214_v5 = vadd.f32 %v10141_v36, %v10085_v37  ;;  %v3318_v17 = vpop.f32.mrb[85].mxu1  ;;  %3389 = vadd.xlane.f32.xlu0 %v3388_v43  ;;  %v3365_v59 = vsel %vm3355_vm1, %v13523_v6, 0.0  ;;  %v3383_v46 = vmul.f32 %v13523_v6, %v13523_v6 }
 0x4f5   :  { %v10143_v4 = vpop.f32.mrb[91].mxu0  ;;  %v13546_v36 = vpop.permute.xlu1 %3654 }
 0x4f6   :  { %v13527_v28 = vadd.f32 %v3318_v17, %v3214_v5  ;;  %v10144_v33 = vadd.f32 %v10143_v4, %v10142_v42  ;;  %v3397_v0 = vsel %vm3355_vm1, %v3383_v46, 0.0  ;;  %15738 = vst [vmem:[#allocation9_spill] sm:$0xff] %v13546_v36 }
 0x4f7   :  { %3366 = vadd.xlane.f32.xlu1 %v3365_v59  ;;  %v10263_v8 = vpop.f32.mrb[86].mxu1 }
 0x4f8   :  { %v3219_v48 = vadd.f32 %v10144_v33, %v10088_v22  ;;  %v10145_v31 = vpop.f32.mrb[92].mxu0  ;;  %v3328_v12 = vpop.f32.mrb[87].mxu1  ;;  %v3368_v42 = vsel %vm3355_vm1, %v13527_v28, 0.0  ;;  %v13573_v33 = vld [vmem:[%s15678_s8 + $0x8] sm:$0xff] }
 0x4f9   :  { %v10146_v11 = vpop.f32.mrb[93].mxu0  ;;  %v13551_v43 = vpop.permute.xlu1 %3694 }
 0x4fa   :  { %v13533_v54 = vadd.f32 %v10260_v57, %v3219_v48  ;;  %v10147_v37 = vadd.f32 %v10146_v11, %v10145_v31  ;;  %15739 = vst [vmem:[#allocation18_spill] sm:$0xff] %v13551_v43  ;;  %v8429_v43 = vld [vmem:[%s15681_s4 + $0xa8] sm:$0xff] }
 0x4fb   :  { %3363 = vadd.xlane.f32.xlu1 %v3362_v24 }
 0x4fc   :  { %v3224_v16 = vadd.f32 %v10147_v37, %v10091_v44  ;;  %v10148_v56 = vpop.f32.mrb[94].mxu0  ;;  %v3371_v14 = vsel %vm3355_vm1, %v13533_v54, 0.0  ;;  %v3394_v44 = vsel %vm3355_vm1, %v3382_v3, 0.0  ;;  %v3384_v37 = vmul.f32 %v13527_v28, %v13527_v28 }
 0x4fd   :  { %v10149_v29 = vpop.f32.mrb[95].mxu0  ;;  %3372 = vadd.xlane.f32.xlu0 %v3371_v14  ;;  %v13555_v5 = vpop.permute.xlu1 %3850 }
 0x4fe   :  { %v13541_v22 = vadd.f32 %v3328_v12, %v3224_v16  ;;  %v10150_v47 = vadd.f32 %v10149_v29, %v10148_v56  ;;  %15740 = vst [vmem:[#allocation2_spill] sm:$0xff] %v13555_v5  ;;  %v3385_v12 = vmul.f32 %v13533_v54, %v13533_v54 }
 0x4ff   :  { %3398 = vadd.xlane.f32.xlu1 %v3397_v0 }
 0x500   :  { %v3229_v9 = vadd.f32 %v10150_v47, %v10094_v7  ;;  %v13566_v7 = vld [vmem:[%s15678_s8] sm:$0xff]  ;;  %v3403_v11 = vsel %vm3355_vm1, %v3385_v12, 0.0  ;;  %v3374_v16 = vsel %vm3355_vm1, %v13541_v22, 0.0  ;;  %v3386_v29 = vmul.f32 %v13541_v22, %v13541_v22 }
 0x501   :  { %v13557_v17 = vpop.permute.xlu1 %3575 }
 0x502   :  { %v13548_v57 = vadd.f32 %v10263_v8, %v3229_v9  ;;  %v13586_v8 = vld [vmem:[%s15678_s8 + $0x38] sm:$0xff]  ;;  %v3406_v0 = vsel %vm3355_vm1, %v3386_v29, 0.0 }
 0x503   :  { %3395 = vadd.xlane.f32.xlu1 %v3394_v44  ;;  %v13634_v44 = vpop.permute.xlu0 %3722 }
 0x504   :  { %v3377_v46 = vsel %vm3355_vm1, %v13548_v57, 0.0 }
 0x505   :  { %v13560_v4 = vpop.permute.xlu1 %3734 }
 0x506   :  { %15741 = vst [vmem:[#allocation4_spill] sm:$0xff] %v13560_v4 }
 0x507   :  { %3369 = vadd.xlane.f32.xlu1 %v3368_v42  ;;  %v13638_v12 = vpop.permute.xlu0 %3806 }
 0x509   :  { %v13576_v59 = vpop.permute.xlu1 %3774 }
 0x50a   :  { %15742 = vst [vmem:[#allocation3_spill] sm:$0xff] %v13576_v59 }
 0x513   :  { %3786 = vperm.xlu0 %11183, %v13467_v23  }
 0x517   :  { %11188 = vset.pattern.permute.xlu0 %v11522_v2  ;;  %v13581_v2 = vpop.permute.xlu1 %3658 }
 0x518   :  { %3682 = vperm.xlu0 %11188, %v13566_v7   ;;  %3746 = vperm.xlu1 %11186, %v13467_v23  }
 0x51b   :  { %v13591_v48 = vpop.permute.xlu1 %3698 }
 0x51c   :  { %3686 = vperm.xlu0 %11188, %v13573_v33   ;;  %11187 = vset.pattern.permute.xlu1 %v15665_v52  ;;  %15743 = vst [vmem:[#allocation10_spill] sm:$0xff] %v13591_v48 }
 0x51d   :  { %3902 = vperm.xlu1 %11187, %v13448_v34  }
 0x521   :  { %11189 = vset.pattern.permute.xlu1 %v11518_v45  ;;  %v13595_v45 = vpop.permute.xlu1 %3854 }
 0x522   :  { %3670 = vperm.xlu1 %11189, %v13586_v8   ;;  %15744 = vst [vmem:[#allocation12_spill] sm:$0xff] %v13595_v45  ;;  %v8424_v45 = vld [vmem:[%s15681_s4 + $0x80] sm:$0xff] }
 0x525   :  { %v13599_v31 = vpop.permute.xlu1 %3580 }
 0x526   :  { %11190 = vset.pattern.permute.xlu1 %v11517_v13 }
 0x527   :  { %3826 = vperm.xlu1 %11190, %v13467_v23  }
 0x529   :  { %v13608_v24 = vpop.permute.xlu1 %3738 }
 0x52a   :  { %15745 = vst [vmem:[#allocation19_spill] sm:$0xff] %v13608_v24 }
 0x52b   :  { %11192 = vset.pattern.permute.xlu1 %v15664_v63 }
 0x52c   :  { %3866 = vperm.xlu1 %11192, %v13467_v23  }
 0x530   :  { %11193 = vset.pattern.permute.xlu1 %v11516_v50  ;;  %v3400_v50 = vsel %vm3355_vm1, %v3384_v37, 0.0  ;;  %v13643_v37 = vpop.permute.xlu0 %3810 }
 0x531   :  { %3750 = vperm.xlu1 %11193, %v13586_v8   ;;  %15752 = vst [vmem:[#allocation23_spill] sm:$0xff] %v13643_v37  ;;  %v8434_v37 = vld [vmem:[%s15681_s4 + $0xd0] sm:$0xff] }
 0x535   :  { %11195 = vset.pattern.permute.xlu1 %v11519_v21  ;;  %v13614_v21 = vpop.permute.xlu1 %3778 }
 0x536   :  { %3790 = vperm.xlu1 %11195, %v13586_v8   ;;  %15746 = vst [vmem:[#allocation13_spill] sm:$0xff] %v13614_v21 }
 0x539   :  { %v13622_v56 = vpop.permute.xlu1 %3662 }
 0x53a   :  { %11196 = vset.pattern.permute.xlu1 %v11517_v13  ;;  %v3387_v13 = vmul.f32 %v13548_v57, %v13548_v57 }
 0x53b   :  { %3404 = vadd.xlane.f32.xlu0 %v3403_v11  ;;  %3830 = vperm.xlu1 %11196, %v13586_v8  }
 0x53c   :  { %v3409_v14 = vsel %vm3355_vm1, %v3387_v13, 0.0 }
 0x53d   :  { %v13627_v47 = vpop.permute.xlu1 %3702 }
 0x53e   :  { %15747 = vst [vmem:[#allocation15_spill] sm:$0xff] %v13627_v47 }
 0x53f   :  { %3401 = vadd.xlane.f32.xlu0 %v3400_v50  ;;  %11197 = vset.pattern.permute.xlu1 %v15716_v25 }
 0x541   :  { %v13630_v3 = vpop.permute.xlu1 %3858 }
 0x542   :  { %15748 = vst [vmem:[#allocation21_spill] sm:$0xff] %v13630_v3 }
 0x543   :  { %3378 = vadd.xlane.f32.xlu0 %v3377_v46  ;;  %v13649_v46 = vpop.permute.xlu0 %3814 }
 0x544   :  { %15754 = vst [vmem:[#allocation25_spill] sm:$0xff] %v13649_v46 }
 0x545   :  { %v13632_v9 = vpop.permute.xlu1 %3585 }
 0x546   :  { %15749 = vst [vmem:[#allocation22_spill] sm:$0xff] %v13632_v9 }
 0x547   :  { %3375 = vadd.xlane.f32.xlu0 %v3374_v16  ;;  %v13654_v16 = vld [vmem:[%s15678_s8 + $0x10] sm:$0xff]  ;;  %s11528_s8 = smov 32  }
 0x549   :  { %v13636_v42 = vpop.permute.xlu1 %3742 }
 0x54a   :  { %15750 = vst [vmem:[#allocation17_spill] sm:$0xff] %v13636_v42 }
 0x54b   :  { %3410 = vadd.xlane.f32.xlu0 %v3409_v14  ;;  %v13659_v14 = vpop.permute.xlu0 %3818 }
 0x54c   :  { %15756 = vst [vmem:[#allocation27_spill] sm:$0xff] %v13659_v14 }
 0x54d   :  { %v13640_v11 = vpop.permute.xlu1 %3782 }
 0x54e   :  { %15751 = vst [vmem:[#allocation20_spill] sm:$0xff] %v13640_v11 }
 0x54f   :  { %3407 = vadd.xlane.f32.xlu0 %v3406_v0  ;;  %v13665_v0 = vpop.permute.xlu0 %3822 }
 0x550   :  { %15758 = vst [vmem:[#allocation29_spill] sm:$0xff] %v13665_v0 }
 0x551   :  { %v13646_v50 = vpop.permute.xlu1 %3666 }
 0x552   :  { %15753 = vst [vmem:[#allocation24_spill] sm:$0xff] %v13646_v50 }
 0x553   :  { %v13668_v63 = vpop.permute.xlu0 %3766 }
 0x555   :  { %v13657_v13 = vpop.permute.xlu1 %3706 }
 0x556   :  { %15755 = vst [vmem:[#allocation26_spill] sm:$0xff] %v13657_v13 }
 0x559   :  { %v13662_v29 = vpop.permute.xlu1 %3862 }
 0x55a   :  { %15757 = vst [vmem:[#allocation28_spill] sm:$0xff] %v13662_v29 }
 0x565   :  { %3710 = vperm.xlu0 %11188, %v13586_v8  }
 0x569   :  { %11191 = vset.pattern.permute.xlu0 %v15665_v52 }
 0x56a   :  { %3886 = vperm.xlu0 %11191, %v13573_v33  }
 0x56e   :  { %3890 = vperm.xlu0 %11191, %v13654_v16  }
 0x572   :  { %3894 = vperm.xlu0 %11191, %v13433_v30  }
 0x576   :  { %3898 = vperm.xlu0 %11191, %v13418_v39  }
 0x57a   :  { %3906 = vperm.xlu0 %11191, %v13467_v23  }
 0x57c   :  { %v3361_v52 = vpop.xlane.xlu1 %3360 }
 0x57d   :  { %v3358_v5 = vpop.xlane.xlu0 %3357 }
 0x57e   :  { %11194 = vset.pattern.permute.xlu0 %v15716_v25 }
 0x57f   :  { %3479 = vperm.xlu0 %11194, %v8424_v45  }
 0x580   :  { %v3393_v46 = vpop.xlane.xlu1 %3392 }
 0x581   :  { %v3390_v4 = vpop.xlane.xlu0 %3389 }
 0x583   :  { %3565 = vperm.xlu0 %11194, %v8434_v37   ;;  %v8430_v37 = vld [vmem:[%s15681_s4 + $0xb0] sm:$0xff] }
 0x584   :  { %v3367_v59 = vpop.xlane.xlu1 %3366 }
 0x587   :  { %3499 = vperm.xlu0 %11194, %v8428_v27   ;;  %v8431_v27 = vld [vmem:[%s15681_s4 + $0xb8] sm:$0xff] }
 0x588   :  { %v3364_v51 = vpop.xlane.xlu1 %3363 }
 0x58a   :  { %v3373_v45 = vpop.xlane.xlu0 %3372 }
 0x58b   :  { %v3413_v49 = vadd.f32 %v3373_v45, %v3361_v52  ;;  %3504 = vperm.xlu0 %11194, %v8429_v43   ;;  %v8439_v52 = vld [vmem:[%s15681_s4 + $0xf8] sm:$0xff] }
 0x58c   :  { %v3399_v13 = vpop.xlane.xlu1 %3398 }
 0x58d   :  { %v3422_v36 = vmul.f32 0.03125, %v3413_v49 }
 0x58f   :  { %3456 = vperm.xlu1 %11197, %v3422_v36   ;;  %3509 = vperm.xlu0 %11194, %v8430_v37   ;;  %v3430_v3 = vmul.f32 %v3422_v36, %v3422_v36 }
 0x590   :  { %v3396_v40 = vpop.xlane.xlu1 %3395 }
 0x592   :  { %v13692_v29 = vpop.permute.xlu0 %3786 }
 0x593   :  { %3514 = vperm.xlu0 %11194, %v8431_v27   ;;  %15759 = vst [vmem:[#allocation30_spill] sm:$0xff] %v13692_v29 }
 0x594   :  { %v3370_v50 = vpop.xlane.xlu1 %3369 }
 0x595   :  { %v3412_v43 = vadd.f32 %v3370_v50, %v3358_v5 }
 0x597   :  { %v3421_v45 = vmul.f32 0.03125, %v3412_v43  ;;  %3590 = vperm.xlu0 %11194, %v8439_v52   ;;  %v13694_v49 = vpop.permute.xlu0 %3682 }
 0x599   :  { %3451 = vperm.xlu1 %11197, %v3421_v45   ;;  %v3429_v21 = vmul.f32 %v3421_v45, %v3421_v45 }
 0x59b   :  { %v13696_v37 = vpop.permute.xlu0 %3686 }
 0x5c8   :  { %v3405_v18 = vpop.xlane.xlu0 %3404 }
 0x5c9   :  { %v3417_v9 = vadd.f32 %v3405_v18, %v3393_v46 }
 0x5cb   :  { %v3426_v0 = vmul.f32 0.03125, %v3417_v9 }
 0x5cc   :  { %v3402_v27 = vpop.xlane.xlu0 %3401 }
 0x5cd   :  { %v3434_v11 = vsub.f32 %v3426_v0, %v3430_v3  ;;  %v3416_v14 = vadd.f32 %v3402_v27, %v3390_v4  ;;  %v11524_v27 = vmov 26  }
 0x5cf   :  { %v3438_v61 = vmax.f32 %v3434_v11, 0.0  ;;  %v3425_v47 = vmul.f32 0.03125, %v3416_v14 }
 0x5d0   :  { %v3379_v5 = vpop.xlane.xlu0 %3378 }
 0x5d1   :  { %v3442_v50 = vadd.f32 1e-05, %v3438_v61  ;;  %v3433_v52 = vsub.f32 %v3425_v47, %v3429_v21  ;;  %v3415_v43 = vadd.f32 %v3379_v5, %v3367_v59 }
 0x5d3   :  { %11342 = vrsqrt.f32 %v3442_v50  ;;  %v3437_v29 = vmax.f32 %v3433_v52, 0.0  ;;  %v3424_v42 = vmul.f32 0.03125, %v3415_v43  ;;  %v9527_v52 = vld [vmem:[%s15762_s6 + $0x8] sm:$0xff]  }
 0x5d4   :  { %v3376_v20 = vpop.xlane.xlu0 %3375 }
 0x5d5   :  { %v3441_v48 = vadd.f32 1e-05, %v3437_v29  ;;  %v3414_v24 = vadd.f32 %v3376_v20, %v3364_v51  ;;  %3466 = vperm.xlu1 %11197, %v3424_v42   ;;  %v3432_v4 = vmul.f32 %v3424_v42, %v3424_v42  ;;  %v15760_v42 = vmov 25  }
 0x5d7   :  { %11344 = vrsqrt.f32 %v3441_v48  ;;  %v3423_v18 = vmul.f32 0.03125, %v3414_v24 }
 0x5d8   :  { %v3411_v36 = vpop.xlane.xlu0 %3410 }
 0x5d9   :  { %v3419_v9 = vadd.f32 %v3411_v36, %v3399_v13  ;;  %3461 = vperm.xlu1 %11197, %v3423_v18   ;;  %v3431_v59 = vmul.f32 %v3423_v18, %v3423_v18  ;;  %v11523_v13 = vmov 18   ;;  %v9528_v18 = vld [vmem:[%s15762_s6 + $0x10] sm:$0xff]  }
 0x5db   :  { %v3428_v3 = vmul.f32 0.03125, %v3419_v9  ;;  %v9529_v9 = vld [vmem:[%s15762_s6 + $0x18] sm:$0xff]  }
 0x5dc   :  { %v3408_v11 = vpop.xlane.xlu0 %3407 }
 0x5dd   :  { %v11343_v46 = vpop.eup %11342  ;;  %v3436_v14 = vsub.f32 %v3428_v3, %v3432_v4  ;;  %v3418_v61 = vadd.f32 %v3408_v11, %v3396_v40  ;;  %v15761_v40 = vmov 24   ;;  %v9530_v11 = vld [vmem:[%s15762_s6 + $0x20] sm:$0xff]  }
 0x5de   :  { %3532 = vperm.xlu1 %11197, %v11343_v46  }
 0x5df   :  { %v3440_v21 = vmax.f32 %v3436_v14, 0.0  ;;  %v3427_v47 = vmul.f32 0.03125, %v3418_v61 }
 0x5e1   :  { %v11345_v0 = vpop.eup %11344  ;;  %v3444_v45 = vadd.f32 1e-05, %v3440_v21  ;;  %v3435_v29 = vsub.f32 %v3427_v47, %v3431_v59 }
 0x5e2   :  { %3527 = vperm.xlu1 %11197, %v11345_v0  }
 0x5e3   :  { %11346 = vrsqrt.f32 %v3444_v45  ;;  %v3439_v20 = vmax.f32 %v3435_v29, 0.0 }
 0x5e5   :  { %v3443_v51 = vadd.f32 1e-05, %v3439_v20 }
 0x5e7   :  { %11348 = vrsqrt.f32 %v3443_v51 }
 0x5ed   :  { %v11347_v48 = vpop.eup %11346 }
 0x5ee   :  { %3542 = vperm.xlu1 %11197, %v11347_v48  }
 0x5f1   :  { %v11349_v24 = vpop.eup %11348 }
 0x5f2   :  { %3537 = vperm.xlu0 %11194, %v11349_v24   ;;  %11199 = vset.pattern.permute.xlu1 %v15760_v42 }
 0x5f3   :  { %3910 = vperm.xlu1 %11199, %v13586_v8  }
 0x5f6   :  { %11198 = vset.pattern.permute.xlu0 %v15761_v40 }
 0x5f7   :  { %3870 = vperm.xlu0 %11198, %v13586_v8   ;;  %11200 = vset.pattern.permute.xlu1 %v11523_v13 }
 0x5f8   :  { %3602 = vperm.xlu1 %11200, %v13566_v7  }
 0x5fb   :  { %11204 = vset.pattern.permute.xlu0 %v11524_v27 }
 0x5fc   :  { %3934 = vperm.xlu0 %11204, %v13433_v30   ;;  %11201 = vset.pattern.permute.xlu1 %v11524_v27 }
 0x5fd   :  { %3922 = vperm.xlu1 %11201, %v13566_v7   ;;  %v13717_v7 = vpop.permute.xlu1 %3746 }
 0x600   :  { %3938 = vperm.xlu0 %11204, %v13418_v39  }
 0x601   :  { %11202 = vset.pattern.permute.xlu1 %v11523_v13 }
 0x602   :  { %3610 = vperm.xlu1 %11202, %v13654_v16  }
 0x604   :  { %11205 = vset.pattern.permute.xlu0 %v11523_v13  ;;  %v9531_v13 = vld [vmem:[%s15762_s6 + $0x28] sm:$0xff]  }
 0x605   :  { %3606 = vperm.xlu0 %11205, %v13573_v33  }
 0x606   :  { %11203 = vset.pattern.permute.xlu1 %v11524_v27 }
 0x607   :  { %3926 = vperm.xlu1 %11203, %v13573_v33   ;;  %v13720_v33 = vpop.permute.xlu1 %3902 }
 0x609   :  { %3614 = vperm.xlu0 %11205, %v13433_v30  }
 0x60b   :  { %3930 = vperm.xlu1 %11203, %v13654_v16   ;;  %v13722_v30 = vpop.permute.xlu1 %3670 }
 0x60d   :  { %3618 = vperm.xlu0 %11205, %v13418_v39   ;;  %v13726_v39 = vpop.permute.xlu0 %3710 }
 0x60f   :  { %3942 = vperm.xlu1 %11203, %v13448_v34   ;;  %v13724_v16 = vpop.permute.xlu1 %3826 }
 0x611   :  { %3622 = vperm.xlu0 %11205, %v13448_v34   ;;  %v13728_v5 = vpop.permute.xlu0 %3886  ;;  %v11525_v34 = vmov 0.0|0.0  }
 0x612   :  { %10750 = vmatprep.subr.bf16.mxu0 %v11525_v34 }
 0x613   :  { %3946 = vperm.xlu1 %11203, %v13467_v23   ;;  %v13734_v50 = vpop.permute.xlu1 %3866 }
 0x615   :  { %3626 = vperm.xlu0 %11205, %v13467_v23   ;;  %v9314_v23 = vld [vmem:[%s15762_s6] sm:$0xff]   ;;  %v13740_v43 = vpop.permute.xlu0 %3890 }
 0x616   :  { %10752 = vmatpush1.bf16.msra.mxu0 %v9314_v23 }
 0x617   :  { %10753 = vmatprep.subr.bf16.mxu0 %v11525_v34  ;;  %v13746_v36 = vpop.permute.xlu1 %3750 }
 0x619   :  { %3630 = vperm.xlu0 %11205, %v13586_v8   ;;  %v13752_v4 = vpop.permute.xlu0 %3894 }
 0x61a   :  { %10755 = vmatpush1.bf16.msra.mxu0 %v9527_v52 }
 0x61b   :  { %10756 = vmatprep.subr.bf16.mxu0 %v11525_v34  ;;  %v13754_v3 = vpop.permute.xlu1 %3790 }
 0x61d   :  { %11332 = vset.pattern.permute.xlu0 %v15716_v25  ;;  %v13760_v46 = vpop.permute.xlu0 %3898 }
 0x61e   :  { %10758 = vmatpush1.bf16.msra.mxu0 %v9528_v18 }
 0x61f   :  { %10759 = vmatprep.subr.bf16.mxu0 %v11525_v34  ;;  %v13763_v14 = vpop.permute.xlu1 %3830 }
 0x621   :  { %v13765_v61 = vpop.permute.xlu0 %3906 }
 0x622   :  { %10761 = vmatpush1.bf16.msra.mxu0 %v9529_v9 }
 0x623   :  { %10762 = vmatprep.subr.bf16.mxu0 %v11525_v34  ;;  %v3457_v59 = vpop.permute.xlu1 %3456 }
 0x624   :  { %v3470_v29 = vsub.f32 %v13507_v58, %v3457_v59 }
 0x625   :  { %v3480_v47 = vpop.permute.xlu0 %3479 }
 0x626   :  { %10764 = vmatpush1.bf16.msra.mxu0 %v9530_v11  ;;  %v3518_v48 = vmul.f32 %v13475_v38, %v3470_v29  ;;  %v3474_v38 = vsub.f32 %v13533_v54, %v3457_v59 }
 0x627   :  { %10765 = vmatprep.subr.bf16.mxu0 %v11525_v34  ;;  %v3452_v21 = vpop.permute.xlu1 %3451 }
 0x628   :  { %v3469_v51 = vsub.f32 %v13509_v53, %v3452_v21  ;;  %v3473_v23 = vsub.f32 %v13527_v28, %v3452_v21 }
 0x629   :  { %v13769_v45 = vpop.permute.xlu0 %3565 }
 0x62a   :  { %v3517_v27 = vmul.f32 %v3480_v47, %v3469_v51  ;;  %10767 = vmatpush1.bf16.msra.mxu0 %v9531_v13  ;;  %v9532_v47 = vld [vmem:[%s15762_s6 + $0x30] sm:$0xff]  }
 0x62b   :  { %10768 = vmatprep.subr.bf16.mxu0 %v11525_v34 }
 0x62d   :  { %v3500_v24 = vpop.permute.xlu0 %3499 }
 0x62e   :  { %v3521_v11 = vmul.f32 %v3500_v24, %v3473_v23  ;;  %10770 = vmatpush1.bf16.msra.mxu0 %v9532_v47  ;;  %v15763_v47 = vld [vmem:[#allocation19_spill] sm:$0xff] }
 0x62f   :  { %10771 = vmatprep.subr.bf16.mxu0 %v11525_v34 }
 0x631   :  { %v3505_v18 = vpop.permute.xlu0 %3504 }
 0x635   :  { %v3510_v59 = vpop.permute.xlu0 %3509 }
 0x639   :  { %v3515_v23 = vpop.permute.xlu0 %3514 }
 0x654   :  { %v13767_v0 = vpop.permute.xlu1 %3466 }
 0x658   :  { %v13772_v20 = vpop.permute.xlu1 %3461 }
 0x65d   :  { %v3533_v42 = vpop.permute.xlu1 %3532 }
 0x65e   :  { %v3546_v40 = vmul.f32 %v3533_v42, %v3518_v48 }
 0x660   :  { %v13782_v58 = vadd.f32 %v13483_v60, %v3546_v40 }
 0x661   :  { %v3528_v52 = vpop.permute.xlu1 %3527 }
 0x662   :  { %v3545_v53 = vmul.f32 %v3528_v52, %v3517_v27  ;;  %v3754_v21 = vmul.f32 %v13495_v62, %v13782_v58  ;;  %v3674_v54 = vmul.f32 %v13487_v19, %v13782_v58  ;;  %v3549_v29 = vmul.f32 %v3528_v52, %v3521_v11 }
 0x663   :  { %v3794_v19 = vmul.f32 %v13668_v63, %v13782_v58  ;;  %v9534_v63 = vld [vmem:[%s15762_s6 + $0x40] sm:$0xff]   ;;  %v3475_v11 = vsub.f32 %v13541_v22, %v13772_v20  ;;  %v3476_v22 = vsub.f32 %v13548_v57, %v13767_v0  ;;  %v15767_v57 = vld [vmem:[#allocation15_spill] sm:$0xff] }
 0x664   :  { %v13786_v9 = vadd.f32 %v13477_v41, %v3545_v53  ;;  %v3522_v41 = vmul.f32 %v3505_v18, %v3474_v38  ;;  %v13814_v40 = vadd.f32 %v13557_v17, %v3549_v29  ;;  %v3471_v38 = vsub.f32 %v13519_v1, %v13772_v20  ;;  %v3591_v18 = vpop.permute.xlu0 %3590 }
 0x665   :  { %v3472_v1 = vsub.f32 %v13523_v6, %v13767_v0  ;;  %v3523_v29 = vmul.f32 %v3510_v59, %v3475_v11  ;;  %v15770_v59 = vld [vmem:[#allocation27_spill] sm:$0xff]  ;;  %v15774_v11 = vld [vmem:[#allocation22_spill] sm:$0xff] }
 0x666   :  { %v3753_v28 = vmul.f32 %v13634_v44, %v13786_v9  ;;  %v3673_v60 = vmul.f32 %v13479_v32, %v13786_v9  ;;  %v3793_v44 = vmul.f32 %v13485_v55, %v13786_v9  ;;  %v3713_v62 = vmul.f32 %v13694_v49, %v13786_v9  ;;  %v9533_v32 = vld [vmem:[%s15762_s6 + $0x38] sm:$0xff]   ;;  %s11529_s6 = smov 112  }
 0x667   :  { %v3550_v24 = vmul.f32 %v3533_v42, %v3522_v41  ;;  %v3714_v55 = vmul.f32 %v13696_v37, %v13782_v58  ;;  %10773 = vmatpush1.bf16.msra.mxu0 %v9533_v32  ;;  %v3913_v42 = vmul.f32 %v13497_v15, %v13786_v9  ;;  %v3833_v27 = vmul.f32 %v13489_v26, %v13786_v9  ;;  %v15765_v41 = vld [vmem:[#allocation5_spill] sm:$0xff] }
 0x668   :  { %v11216_v51 = vpack.i.bf16 %v3754_v21, %v3753_v28  ;;  %v11206_v48 = vpack.i.bf16 %v3674_v54, %v3673_v60  ;;  %v11221_v49 = vpack.i.bf16 %v3794_v19, %v3793_v44  ;;  %10774 = vmatprep.subr.bf16.mxu0 %v11525_v34  ;;  %v3914_v15 = vmul.f32 %v13728_v5, %v13782_v58  ;;  %v15764_v21 = vld [vmem:[#allocation10_spill] sm:$0xff]  ;;  %v15769_v32 = vld [vmem:[#allocation13_spill] sm:$0xff] }
 0x669   :  { %v11211_v13 = vpack.i.bf16 %v3714_v55, %v3713_v62  ;;  %v13825_v17 = vadd.f32 %v13599_v31, %v3550_v24  ;;  %v3834_v26 = vmul.f32 %v13638_v12, %v13782_v58  ;;  %v3677_v53 = vmul.f32 %v13581_v2, %v13814_v40 }
 0x66a   :  { %11217 = vrot.lane.b32.xlu1 %v11216_v51, %s11526_s3  ;;  %11207 = vrot.lane.b32.xlu0 %v11206_v48, %s11527_s28  ;;  %v11236_v34 = vpack.i.bf16 %v3914_v15, %v3913_v42  ;;  %v3873_v31 = vmul.f32 %v13491_v35, %v13786_v9  ;;  %v3874_v35 = vmul.f32 %v13503_v10, %v13782_v58  ;;  %v15766_v10 = vld [vmem:[#allocation17_spill] sm:$0xff]  ;;  %v15768_v48 = vld [vmem:[#allocation6_spill] sm:$0xff] }
 0x66b   :  { %10776 = vmatpush1.bf16.msra.mxu0 %v9534_v63  ;;  %v11226_v52 = vpack.i.bf16 %v3834_v26, %v3833_v27  ;;  %v3678_v2 = vmul.f32 %v13622_v56, %v13825_v17  ;;  %v3757_v28 = vmul.f32 %v15763_v47, %v13814_v40  ;;  %v3717_v60 = vmul.f32 %v15764_v21, %v13814_v40  ;;  %v15771_v27 = vld [vmem:[#allocation20_spill] sm:$0xff] }
 0x66c   :  { %v11231_v20 = vpack.i.bf16 %v3874_v35, %v3873_v31  ;;  %v3519_v56 = vmul.f32 %v15765_v41, %v3471_v38  ;;  %v3758_v6 = vmul.f32 %v15766_v10, %v13825_v17  ;;  %v3718_v0 = vmul.f32 %v15767_v57, %v13825_v17 }
 0x66d   :  { %v3543_v37 = vpop.permute.xlu1 %3542  ;;  %v11241_v5 = vpack.i.bf16 %v3678_v2, %v3677_v53  ;;  %v3524_v51 = vmul.f32 %v3515_v23, %v3476_v22  ;;  %v3520_v44 = vmul.f32 %v15768_v48, %v3472_v1  ;;  %v3797_v24 = vmul.f32 %v15769_v32, %v13814_v40  ;;  %v15772_v23 = vld [vmem:[#allocation29_spill] sm:$0xff]  ;;  %v15781_v48 = vld [vmem:[#allocation7_spill] sm:$0xff] }
 0x66e   :  { %11222 = vrot.lane.b32.xlu1 %v11221_v49, %s11515_s5  ;;  %11212 = vrot.lane.b32.xlu0 %v11211_v13, %s11528_s8  ;;  %v3837_v19 = vmul.f32 %v15770_v59, %v13814_v40  ;;  %v11251_v13 = vpack.i.bf16 %v3758_v6, %v3757_v28  ;;  %v11246_v42 = vpack.i.bf16 %v3718_v0, %v3717_v60  ;;  %v15773_v53 = vld [vmem:[#allocation21_spill] sm:$0xff]  ;;  %v15780_v0 = vld [vmem:[#allocation26_spill] sm:$0xff] }
 0x66f   :  { %v3798_v63 = vmul.f32 %v15771_v27, %v13825_v17  ;;  %v3548_v15 = vmul.f32 %v3543_v37, %v3520_v44  ;;  %v3552_v26 = vmul.f32 %v3543_v37, %v3524_v51  ;;  %v3877_v31 = vmul.f32 %v15773_v53, %v13814_v40 }
 0x671   :  { %v3538_v54 = vpop.permute.xlu0 %3537  ;;  %v11256_v35 = vpack.i.bf16 %v3798_v63, %v3797_v24 }
 0x672   :  { %11237 = vrot.lane.b32.xlu1 %v11236_v34, %s11529_s6  ;;  %11227 = vrot.lane.b32.xlu0 %v11226_v52, %s11530_s0  ;;  %v13843_v12 = vpop.permute.xlu1 %3910  ;;  %v3547_v55 = vmul.f32 %v3538_v54, %v3519_v56  ;;  %v3551_v49 = vmul.f32 %v3538_v54, %v3523_v29  ;;  %v3838_v34 = vmul.f32 %v15772_v23, %v13825_v17  ;;  %v15777_v54 = vld [vmem:[#allocation24_spill] sm:$0xff]  ;;  %v15779_v29 = vld [vmem:[#allocation9_spill] sm:$0xff] }
 0x673   :  { %v3917_v52 = vmul.f32 %v13760_v46, %v13814_v40  ;;  %v13893_v46 = vadd.f32 %v3591_v18, %v3552_v26  ;;  %v15786_v23 = vld [vmem:[#allocation16_spill] sm:$0xff] }
 0x674   :  { %v13882_v38 = vadd.f32 %v13769_v45, %v3547_v55  ;;  %v13885_v2 = vadd.f32 %v15774_v11, %v3551_v49  ;;  %v11261_v1 = vpack.i.bf16 %v3838_v34, %v3837_v19  ;;  %v15776_v45 = vld [vmem:[#allocation28_spill] sm:$0xff]  ;;  %v15783_v55 = vld [vmem:[#allocation30_spill] sm:$0xff] }
 0x675   :  { %v3878_v28 = vmul.f32 %v15776_v45, %v13825_v17  ;;  %v3680_v18 = vmul.f32 %v13722_v30, %v13893_v46  ;;  %v3720_v32 = vmul.f32 %v13726_v39, %v13893_v46  ;;  %v15782_v30 = vld [vmem:[#allocation18_spill] sm:$0xff]  ;;  %v3800_v27 = vmul.f32 %v13754_v3, %v13893_v46  ;;  %v15785_v39 = vld [vmem:[#allocation4_spill] sm:$0xff]  ;;  %v15788_v3 = vld [vmem:[#allocation23_spill] sm:$0xff] }
 0x676   :  { %11242 = vrot.lane.b32.xlu1 %v11241_v5, %s11527_s28  ;;  %11232 = vrot.lane.b32.xlu0 %v11231_v20, %s11531_s11  ;;  %v3918_v5 = vmul.f32 %v13720_v33, %v13825_v17  ;;  %v15775_v20 = vld [vmem:[#allocation14_spill] sm:$0xff]  ;;  %v3679_v41 = vmul.f32 %v15777_v54, %v13885_v2  ;;  %v15778_v33 = vld [vmem:[#allocation11_spill] sm:$0xff]  ;;  %v3719_v51 = vmul.f32 %v15780_v0, %v13885_v2 }
 0x677   :  { %v13865_v62 = vpop.permute.xlu1 %3602  ;;  %v13891_v47 = vadd.f32 %v15775_v20, %v3548_v15  ;;  %v11266_v60 = vpack.i.bf16 %v3878_v28, %v3877_v31  ;;  %v3675_v56 = vmul.f32 %v15778_v33, %v13882_v38  ;;  %v3715_v44 = vmul.f32 %v15781_v48, %v13882_v38  ;;  %v15790_v20 = vld [vmem:[#allocation2_spill] sm:$0xff] }
 0x678   :  { %v11271_v21 = vpack.i.bf16 %v3918_v5, %v3917_v52  ;;  %v11311_v6 = vpack.i.bf16 %v3680_v18, %v3679_v41  ;;  %v11316_v59 = vpack.i.bf16 %v3720_v32, %v3719_v51  ;;  %v3799_v49 = vmul.f32 %v15783_v55, %v13885_v2  ;;  %v15787_v52 = vld [vmem:[#allocation3_spill] sm:$0xff] }
 0x679   :  { %v3676_v10 = vmul.f32 %v15779_v29, %v13891_v47  ;;  %v3716_v24 = vmul.f32 %v15782_v30, %v13891_v47  ;;  %v3756_v63 = vmul.f32 %v15785_v39, %v13891_v47  ;;  %v3795_v34 = vmul.f32 %v15786_v23, %v13882_v38 }
 0x67a   :  { %11252 = vrot.lane.b32.xlu1 %v11251_v13, %s11526_s3  ;;  %11247 = vrot.lane.b32.xlu0 %v11246_v42, %s11528_s8  ;;  %v15784_v13 = vld [vmem:[#allocation8_spill] sm:$0xff]  ;;  %v11326_v15 = vpack.i.bf16 %v3800_v27, %v3799_v49  ;;  %v3796_v53 = vmul.f32 %v15787_v52, %v13891_v47  ;;  %v3879_v31 = vmul.f32 %v13734_v50, %v13885_v2 }
 0x67b   :  { %v11276_v57 = vpack.i.bf16 %v3676_v10, %v3675_v56  ;;  %v11281_v19 = vpack.i.bf16 %v3716_v24, %v3715_v44  ;;  %v3755_v42 = vmul.f32 %v15784_v13, %v13882_v38  ;;  %v3875_v45 = vmul.f32 %v15790_v20, %v13882_v38  ;;  %v15791_v50 = vld [vmem:[#allocation12_spill] sm:$0xff] }
 0x67c   :  { %v3923_v37 = vpop.permute.xlu1 %3922  ;;  %v11291_v11 = vpack.i.bf16 %v3796_v53, %v3795_v34  ;;  %v3876_v28 = vmul.f32 %v15791_v50, %v13891_v47  ;;  %v3915_v54 = vmul.f32 %v13740_v43, %v13882_v38  ;;  %v3759_v33 = vmul.f32 %v13717_v7, %v13885_v2  ;;  %v3871_v43 = vpop.permute.xlu0 %3870 }
 0x67d   :  { %v3953_v22 = vmul.f32 %v3923_v37, %v13786_v9  ;;  %v11286_v26 = vpack.i.bf16 %v3756_v63, %v3755_v42  ;;  %v3835_v37 = vmul.f32 %v15788_v3, %v13882_v38  ;;  %v3919_v18 = vmul.f32 %v13765_v61, %v13885_v2 }
 0x67e   :  { %11257 = vrot.lane.b32.xlu1 %v11256_v35, %s11515_s5  ;;  %11262 = vrot.lane.b32.xlu0 %v11261_v1, %s11530_s0  ;;  %v15789_v35 = vld [vmem:[#allocation25_spill] sm:$0xff] }
 0x67f   :  { %8440 = vmatprep.mubr.msk.f32.mxu0 %vm3355_vm1, %v3953_v22  ;;  %v3836_v1 = vmul.f32 %v15789_v35, %v13891_v47  ;;  %v3840_v22 = vmul.f32 %v13763_v14, %v13893_v46  ;;  %v3916_v14 = vmul.f32 %v13752_v4, %v13891_v47  ;;  %v3839_v4 = vmul.f32 %v13724_v16, %v13885_v2 }
 0x680   :  { %v13973_v7 = vpop.permute.xlu0 %3934 }
 0x681   :  { %v11296_v5 = vpack.i.bf16 %v3836_v1, %v3835_v37  ;;  %v11306_v41 = vpack.i.bf16 %v3916_v14, %v3915_v54  ;;  %v13980_v29 = vpop.permute.xlu1 %3610 }
 0x682   :  { %11272 = vrot.lane.b32.xlu1 %v11271_v21, %s11529_s6  ;;  %11267 = vrot.lane.b32.xlu0 %v11266_v60, %s11531_s11  ;;  %v3920_v21 = vmul.f32 %v13843_v12, %v13893_v46  ;;  %v11301_v60 = vpack.i.bf16 %v3876_v28, %v3875_v45  ;;  %v3760_v12 = vmul.f32 %v13746_v36, %v13893_v46 }
 0x684   :  { %v11321_v56 = vpack.i.bf16 %v3760_v12, %v3759_v33  ;;  %v13978_v36 = vpop.permute.xlu0 %3938 }
 0x686   :  { %11312 = vrot.lane.b32.xlu0 %v11311_v6, %s11527_s28  ;;  %11277 = vrot.lane.b32.xlu1 %v11276_v57, %s11527_s28  ;;  %v3927_v16 = vpop.permute.xlu1 %3926  ;;  %s15792_s28 = sld [smem:[#allocation37_spill]] }
 0x68a   :  { %11317 = vrot.lane.b32.xlu0 %v11316_v59, %s11528_s8  ;;  %11282 = vrot.lane.b32.xlu1 %v11281_v19, %s11528_s8  ;;  %v3931_v57 = vpop.permute.xlu1 %3930  ;;  %v3633_v19 = vmul.f32 %v13865_v62, %v13786_v9 }
 0x68e   :  { %11327 = vrot.lane.b32.xlu0 %v11326_v15, %s11515_s5  ;;  %11287 = vrot.lane.b32.xlu1 %v11286_v26, %s11526_s3  ;;  %v13988_v0 = vpop.permute.xlu1 %3942 }
 0x692   :  { %4141 = vrot.lane.b32.xlu0 %v3879_v31, %s11531_s11  ;;  %11292 = vrot.lane.b32.xlu1 %v11291_v11, %s11515_s5  ;;  %v13992_v48 = vpop.permute.xlu1 %3946 }
 0x696   :  { %4111 = vrot.lane.b32.xlu0 %v3840_v22, %s11530_s0  ;;  %11297 = vrot.lane.b32.xlu1 %v11296_v5, %s11530_s0 }
 0x69a   :  { %11302 = vrot.lane.b32.xlu1 %v11301_v60, %s11531_s11  ;;  %4175 = vrot.lane.b32.xlu0 %v3920_v21, %s11529_s6  ;;  %v3954_v60 = vmul.f32 %v3927_v16, %v13782_v58 }
 0x69e   :  { %11307 = vrot.lane.b32.xlu1 %v11306_v41, %s11529_s6 }
 0x6a2   :  { %3950 = vperm.xlu1 %11203, %v13586_v8   ;;  %v3880_v8 = vmul.f32 %v3871_v43, %v13893_v46 }
 0x6a6   :  { %11322 = vrot.lane.b32.xlu1 %v11321_v56, %s11526_s3  ;;  %v3955_v56 = vmul.f32 %v3931_v57, %v13882_v38  ;;  %s15793_s3 = sld [smem:[#allocation38_spill]] }
 0x6a7   :  { %11331 = vset.pattern.permute.xlu1 %v15716_v25  ;;  %v3607_v25 = vpop.permute.xlu0 %3606 }
 0x6a8   :  { %v3634_v55 = vmul.f32 %v3607_v25, %v13782_v58 }
 0x6aa   :  { %4109 = vrot.lane.b32.xlu1 %v3839_v4, %s11530_s0 }
 0x6ab   :  { %v13982_v10 = vpop.permute.xlu0 %3614 }
 0x6ae   :  { %4173 = vrot.lane.b32.xlu1 %v3919_v18, %s11529_s6 }
 0x6af   :  { %v13984_v6 = vpop.permute.xlu0 %3618 }
 0x6b2   :  { %4143 = vrot.lane.b32.xlu1 %v3880_v8, %s11531_s11  ;;  %s15799_s11 = sld [smem:[#allocation42_spill]] }
 0x6b3   :  { %v13986_v61 = vpop.permute.xlu0 %3622 }
 0x6b7   :  { %v13990_v51 = vpop.permute.xlu0 %3626 }
 0x6bb   :  { %v13994_v44 = vpop.permute.xlu0 %3630 }
 0x6dc   :  { %v11208_v32 = vpop.permute.xlu0 %11207  ;;  %v11218_v30 = vpop.permute.xlu1 %11217 }
 0x6dd   :  { %v11210_v24 = vunpack.i.h.bf16 %v11208_v32  ;;  %v11209_v59 = vunpack.i.l.bf16 %v11208_v32  ;;  %v11219_v15 = vunpack.i.l.bf16 %v11218_v30  ;;  %v11220_v34 = vunpack.i.h.bf16 %v11218_v30 }
 0x6df   :  { %v4186_v39 = vsel %vm3355_vm1, %v3634_v55, %v11210_v24  ;;  %v4185_v63 = vsel %vm3355_vm1, %v3633_v19, %v11209_v59  ;;  %v3956_v55 = vmul.f32 %v13973_v7, %v13891_v47 }
 0x6e0   :  { %v11213_v49 = vpop.permute.xlu0 %11212  ;;  %v11223_v13 = vpop.permute.xlu1 %11222 }
 0x6e1   :  { %v11215_v42 = vunpack.i.h.bf16 %v11213_v49  ;;  %v11214_v27 = vunpack.i.l.bf16 %v11213_v49  ;;  %v11224_v53 = vunpack.i.l.bf16 %v11223_v13  ;;  %v11225_v3 = vunpack.i.h.bf16 %v11223_v13 }
 0x6e2   :  { %v3638_v49 = vmul.f32 %v13986_v61, %v13825_v17 }
 0x6e3   :  { %v4194_v26 = vsel %vm4193_vm2, %v4185_v63, %v11214_v27  ;;  %v4195_v23 = vsel %vm4193_vm2, %v4186_v39, %v11215_v42  ;;  %v3635_v42 = vmul.f32 %v13980_v29, %v13882_v38  ;;  %v3637_v27 = vmul.f32 %v13984_v6, %v13814_v40 }
 0x6e4   :  { %v4203_v9 = vsel %vm4202_vm3, %v4194_v26, %v11219_v15  ;;  %v11228_v62 = vpop.permute.xlu0 %11227  ;;  %v11238_v52 = vpop.permute.xlu1 %11237  ;;  %v4204_v31 = vsel %vm4202_vm3, %v4195_v23, %v11220_v34  ;;  %v3636_v15 = vmul.f32 %v13982_v10, %v13891_v47 }
 0x6e5   :  { %v11229_v11 = vunpack.i.l.bf16 %v11228_v62  ;;  %v4211_v37 = vsel %vm2088_vm0, %v4203_v9, %v11224_v53  ;;  %v11230_v35 = vunpack.i.h.bf16 %v11228_v62  ;;  %v4212_v5 = vsel %vm2088_vm0, %v4204_v31, %v11225_v3 }
 0x6e6   :  { %v11239_v28 = vunpack.i.l.bf16 %v11238_v52  ;;  %v11240_v12 = vunpack.i.h.bf16 %v11238_v52 }
 0x6e7   :  { %v4220_v50 = vsel %vm4219_vm4, %v4211_v37, %v11229_v11  ;;  %v4221_v41 = vsel %vm4219_vm4, %v4212_v5, %v11230_v35 }
 0x6e8   :  { %v11233_v1 = vpop.permute.xlu0 %11232  ;;  %v11243_v22 = vpop.permute.xlu1 %11242 }
 0x6e9   :  { %v11235_v20 = vunpack.i.h.bf16 %v11233_v1  ;;  %v11234_v45 = vunpack.i.l.bf16 %v11233_v1  ;;  %v11245_v30 = vunpack.i.h.bf16 %v11243_v22  ;;  %v11244_v19 = vunpack.i.l.bf16 %v11243_v22 }
 0x6eb   :  { %v4229_v21 = vsel %vm4228_vm5, %v4220_v50, %v11234_v45  ;;  %v4230_v33 = vsel %vm4228_vm5, %v4221_v41, %v11235_v20  ;;  %v4190_v26 = vsel %vm3355_vm1, %v3638_v49, %v11245_v30  ;;  %v4189_v9 = vsel %vm3355_vm1, %v3637_v27, %v11244_v19 }
 0x6ec   :  { %v14010_v54 = vpop.permute.xlu1 %11252  ;;  %v4238_v14 = vsel %vm4237_vm6, %v4229_v21, %v11239_v28  ;;  %v4239_v4 = vsel %vm4237_vm6, %v4230_v33, %v11240_v12  ;;  %v11248_v16 = vpop.permute.xlu0 %11247  ;;  %v3957_v30 = vmul.f32 %v13978_v36, %v13814_v40  ;;  %v3958_v36 = vmul.f32 %v13988_v0, %v13825_v17 }
 0x6ed   :  { %4371 = vmatmul.mubr.f32.vlgmr.msra.gmra.mrb[96].mxu0 %v4238_v14  ;;  %v11249_v39 = vunpack.i.l.bf16 %v11248_v16  ;;  %v11250_v23 = vunpack.i.h.bf16 %v11248_v16  ;;  %v11254_v38 = vunpack.i.l.bf16 %v14010_v54  ;;  %v11255_v10 = vunpack.i.h.bf16 %v14010_v54 }
 0x6ee   :  { %8441 = vmatprep.mubr.msk.f32.mxu0 %vm3355_vm1, %v3954_v60 }
 0x6ef   :  { %v4198_v47 = vsel %vm4193_vm2, %v4189_v9, %v11249_v39  ;;  %v4199_v37 = vsel %vm4193_vm2, %v4190_v26, %v11250_v23  ;;  %v3959_v26 = vmul.f32 %v13992_v48, %v13885_v2  ;;  %v3640_v48 = vmul.f32 %v13994_v44, %v13893_v46 }
 0x6f0   :  { %v14017_v43 = vpop.permute.xlu1 %11257  ;;  %v14023_v24 = vpop.permute.xlu0 %11262  ;;  %v4207_v21 = vsel %vm4202_vm3, %v4198_v47, %v11254_v38 }
 0x6f1   :  { %4376 = vmatmul.mubr.f32.gmra.mrb[98].mxu0 %v4239_v4  ;;  %v11259_v35 = vunpack.i.l.bf16 %v14017_v43  ;;  %v11264_v41 = vunpack.i.l.bf16 %v14023_v24  ;;  %v11260_v4 = vunpack.i.h.bf16 %v14017_v43  ;;  %v11265_v43 = vunpack.i.h.bf16 %v14023_v24 }
 0x6f2   :  { %8442 = vmatprep.mubr.msk.f32.mxu0 %vm3355_vm1, %v3955_v56 }
 0x6f4   :  { %v14021_v58 = vpop.permute.xlu1 %11272  ;;  %v11268_v29 = vpop.permute.xlu0 %11267 }
 0x6f5   :  { %v11275_v24 = vunpack.i.h.bf16 %v14021_v58 }
 0x6f8   :  { %v11278_v18 = vpop.permute.xlu1 %11277 }
 0x6f9   :  { %v11279_v57 = vunpack.i.l.bf16 %v11278_v18  ;;  %v11280_v61 = vunpack.i.h.bf16 %v11278_v18  ;;  %v4215_v18 = vsel %vm2088_vm0, %v4207_v21, %v11259_v35 }
 0x6fb   :  { %v4187_v62 = vsel %vm3355_vm1, %v3635_v42, %v11279_v57  ;;  %v4188_v20 = vsel %vm3355_vm1, %v3636_v15, %v11280_v61  ;;  %v11274_v57 = vunpack.i.l.bf16 %v14021_v58  ;;  %v3639_v58 = vmul.f32 %v13990_v51, %v13885_v2 }
 0x6fc   :  { %v11283_v8 = vpop.permute.xlu1 %11282 }
 0x6fd   :  { %v11284_v13 = vunpack.i.l.bf16 %v11283_v8  ;;  %v11285_v6 = vunpack.i.h.bf16 %v11283_v8  ;;  %v11269_v8 = vunpack.i.l.bf16 %v11268_v29 }
 0x6ff   :  { %v4196_v53 = vsel %vm4193_vm2, %v4187_v62, %v11284_v13  ;;  %v4197_v60 = vsel %vm4193_vm2, %v4188_v20, %v11285_v6  ;;  %v4224_v13 = vsel %vm4219_vm4, %v4215_v18, %v11264_v41 }
 0x700   :  { %v11288_v25 = vpop.permute.xlu1 %11287  ;;  %v4233_v27 = vsel %vm4228_vm5, %v4224_v13, %v11269_v8 }
 0x701   :  { %v11289_v63 = vunpack.i.l.bf16 %v11288_v25  ;;  %v11290_v11 = vunpack.i.h.bf16 %v11288_v25  ;;  %v11313_v25 = vpop.permute.xlu0 %11312  ;;  %v4242_v39 = vsel %vm4237_vm6, %v4233_v27, %v11274_v57 }
 0x702   :  { %v11314_v17 = vunpack.i.l.bf16 %v11313_v25  ;;  %v11315_v9 = vunpack.i.h.bf16 %v11313_v25 }
 0x703   :  { %v4205_v3 = vsel %vm4202_vm3, %v4196_v53, %v11289_v63  ;;  %v4206_v33 = vsel %vm4202_vm3, %v4197_v60, %v11290_v11 }
 0x704   :  { %v11293_v32 = vpop.permute.xlu1 %11292  ;;  %v4191_v62 = vsel %vm3355_vm1, %v3639_v58, %v11314_v17 }
 0x705   :  { %v11294_v34 = vunpack.i.l.bf16 %v11293_v32  ;;  %v11295_v1 = vunpack.i.h.bf16 %v11293_v32  ;;  %v11318_v40 = vpop.permute.xlu0 %11317 }
 0x706   :  { %v11319_v0 = vunpack.i.l.bf16 %v11318_v40 }
 0x707   :  { %v4213_v22 = vsel %vm2088_vm0, %v4205_v3, %v11294_v34  ;;  %v4214_v16 = vsel %vm2088_vm0, %v4206_v33, %v11295_v1 }
 0x708   :  { %v11298_v59 = vpop.permute.xlu1 %11297  ;;  %v4200_v6 = vsel %vm4193_vm2, %v4191_v62, %v11319_v0 }
 0x709   :  { %v11299_v52 = vunpack.i.l.bf16 %v11298_v59  ;;  %v11300_v45 = vunpack.i.h.bf16 %v11298_v59  ;;  %v4208_v59 = vsel %vm4202_vm3, %v4199_v37, %v11255_v10  ;;  %v11328_v34 = vpop.permute.xlu0 %11327  ;;  %v4192_v10 = vsel %vm3355_vm1, %v3640_v48, %v11315_v9  ;;  %v8451_v48 = vld [vmem:[%s15681_s4 + $0x118] sm:$0xff] }
 0x70a   :  { %v4216_v42 = vsel %vm2088_vm0, %v4208_v59, %v11260_v4  ;;  %v11329_v53 = vunpack.i.l.bf16 %v11328_v34  ;;  %v11330_v35 = vunpack.i.h.bf16 %v11328_v34 }
 0x70b   :  { %v4222_v28 = vsel %vm4219_vm4, %v4213_v22, %v11299_v52  ;;  %v4223_v32 = vsel %vm4219_vm4, %v4214_v16, %v11300_v45  ;;  %v4225_v63 = vsel %vm4219_vm4, %v4216_v42, %v11265_v43  ;;  %v11320_v52 = vunpack.i.h.bf16 %v11318_v40 }
 0x70c   :  { %v11303_v7 = vpop.permute.xlu1 %11302 }
 0x70d   :  { %v11304_v31 = vunpack.i.l.bf16 %v11303_v7  ;;  %v11305_v54 = vunpack.i.h.bf16 %v11303_v7  ;;  %v4142_v38 = vpop.permute.xlu0 %4141  ;;  %v4201_v51 = vsel %vm4193_vm2, %v4192_v10, %v11320_v52  ;;  %v8456_v10 = vld [vmem:[%s15681_s4 + $0x140] sm:$0xff] }
 0x70f   :  { %v4231_v14 = vsel %vm4228_vm5, %v4222_v28, %v11304_v31  ;;  %v4232_v19 = vsel %vm4228_vm5, %v4223_v32, %v11305_v54 }
 0x710   :  { %v11308_v5 = vpop.permute.xlu1 %11307 }
 0x711   :  { %v11309_v50 = vunpack.i.l.bf16 %v11308_v5  ;;  %v11310_v12 = vunpack.i.h.bf16 %v11308_v5  ;;  %v4112_v1 = vpop.permute.xlu0 %4111 }
 0x713   :  { %v4240_v56 = vsel %vm4237_vm6, %v4231_v14, %v11309_v50  ;;  %v4241_v49 = vsel %vm4237_vm6, %v4232_v19, %v11310_v12 }
 0x714   :  { %4381 = vmatmul.mubr.f32.gmra.mrb[100].mxu0 %v4240_v56 }
 0x715   :  { %8443 = vmatprep.mubr.msk.f32.mxu0 %vm3355_vm1, %v3956_v55  ;;  %v11270_v55 = vunpack.i.h.bf16 %v11268_v29  ;;  %v4176_v21 = vpop.permute.xlu0 %4175 }
 0x717   :  { %v4234_v15 = vsel %vm4228_vm5, %v4225_v63, %v11270_v55 }
 0x718   :  { %4386 = vmatmul.mubr.f32.gmra.mrb[102].mxu0 %v4241_v49  ;;  %v4243_v23 = vsel %vm4237_vm6, %v4234_v15, %v11275_v24 }
 0x719   :  { %8444 = vmatprep.mubr.msk.f32.mxu0 %vm3355_vm1, %v3957_v30 }
 0x71c   :  { %4391 = vmatmul.mubr.f32.gmra.mrb[104].mxu0 %v4242_v39 }
 0x71d   :  { %8445 = vmatprep.mubr.msk.f32.mxu0 %vm3355_vm1, %v3958_v36 }
 0x720   :  { %4396 = vmatmul.mubr.f32.gmra.mrb[106].mxu0 %v4243_v23 }
 0x721   :  { %v3951_v7 = vpop.permute.xlu1 %3950  ;;  %8446 = vmatprep.mubr.msk.f32.mxu0 %vm3355_vm1, %v3959_v26 }
 0x722   :  { %v3960_v5 = vmul.f32 %v3951_v7, %v13893_v46 }
 0x725   :  { %v11323_v61 = vpop.permute.xlu1 %11322 }
 0x726   :  { %v11324_v29 = vunpack.i.l.bf16 %v11323_v61  ;;  %v11325_v31 = vunpack.i.h.bf16 %v11323_v61 }
 0x728   :  { %v4209_v47 = vsel %vm4202_vm3, %v4200_v6, %v11324_v29  ;;  %v4210_v37 = vsel %vm4202_vm3, %v4201_v51, %v11325_v31  ;;  %v8448_v29 = vld [vmem:[%s15681_s4 + $0x100] sm:$0xff]  ;;  %v8449_v6 = vld [vmem:[%s15681_s4 + $0x108] sm:$0xff]  ;;  %v8450_v31 = vld [vmem:[%s15681_s4 + $0x110] sm:$0xff] }
 0x729   :  { %v4110_v11 = vpop.permute.xlu1 %4109  ;;  %v4217_v2 = vsel %vm2088_vm0, %v4209_v47, %v11329_v53  ;;  %v4218_v45 = vsel %vm2088_vm0, %v4210_v37, %v11330_v35  ;;  %v8457_v53 = vld [vmem:[%s15681_s4 + $0x148] sm:$0xff] }
 0x72a   :  { %v4226_v3 = vsel %vm4219_vm4, %v4217_v2, %v4110_v11  ;;  %v4227_v28 = vsel %vm4219_vm4, %v4218_v45, %v4112_v1  ;;  %v8453_v47 = vld [vmem:[%s15681_s4 + $0x128] sm:$0xff]  ;;  %v8452_v11 = vld [vmem:[%s15681_s4 + $0x120] sm:$0xff]  ;;  %v8458_v2 = vld [vmem:[%s15681_s4 + $0x150] sm:$0xff] }
 0x72b   :  { %v4235_v22 = vsel %vm4228_vm5, %v4226_v3, %v4142_v38 }
 0x72d   :  { %v4174_v44 = vpop.permute.xlu1 %4173 }
 0x72e   :  { %v4244_v20 = vsel %vm4237_vm6, %v4235_v22, %v4174_v44 }
 0x72f   :  { %4401 = vmatmul.mubr.f32.gmra.mrb[108].mxu0 %v4244_v20 }
 0x730   :  { %8447 = vmatprep.mubr.msk.f32.mxu0 %vm3355_vm1, %v3960_v5 }
 0x731   :  { %v4144_v50 = vpop.permute.xlu1 %4143 }
 0x732   :  { %v4236_v60 = vsel %vm4228_vm5, %v4227_v28, %v4144_v50 }
 0x733   :  { %v4245_v54 = vsel %vm4237_vm6, %v4236_v60, %v4176_v21 }
 0x734   :  { %4406 = vmatmul.mubr.f32.gmra.mrb[110].mxu0 %v4245_v54 }
 0x7c0   :  { %v14101_v14 = vpop.f32.mrb[96].mxu0 }
 0x7c1   :  { %v4454_v46 = vmul.f32 %v14101_v14, %v14101_v14  ;;  %v4374_v41 = vpop.f32.mrb[97].mxu0  ;;  %v4430_v33 = vsel %vm4429_vm7, %v14101_v14, 0.0 }
 0x7c2   :  { %4431 = vadd.xlane.f32.xlu1 %v4430_v33 }
 0x7c3   :  { %v4462_v12 = vsel %vm4429_vm7, %v4454_v46, 0.0  ;;  %v8459_v46 = vld [vmem:[%s15681_s4 + $0x158] sm:$0xff] }
 0x7c4   :  { %4463 = vadd.xlane.f32.xlu0 %v4462_v12  ;;  %v14108_v56 = vpop.f32.mrb[98].mxu0 }
 0x7c5   :  { %v4455_v4 = vmul.f32 %v14108_v56, %v14108_v56  ;;  %v4379_v18 = vpop.f32.mrb[99].mxu0  ;;  %v4433_v25 = vsel %vm4429_vm7, %v14108_v56, 0.0 }
 0x7c7   :  { %v4465_v8 = vsel %vm4429_vm7, %v4455_v4, 0.0 }
 0x7c8   :  { %4466 = vadd.xlane.f32.xlu1 %v4465_v8  ;;  %4434 = vadd.xlane.f32.xlu0 %v4433_v25 }
 0x7e7   :  { %v14115_v16 = vpop.f32.mrb[100].mxu0 }
 0x7e8   :  { %v4456_v32 = vmul.f32 %v14115_v16, %v14115_v16  ;;  %v4384_v30 = vpop.f32.mrb[101].mxu0  ;;  %v4436_v59 = vsel %vm4429_vm7, %v14115_v16, 0.0 }
 0x7e9   :  { %4437 = vadd.xlane.f32.xlu0 %v4436_v59 }
 0x7ea   :  { %v4468_v49 = vsel %vm4429_vm7, %v4456_v32, 0.0 }
 0x7eb   :  { %v14121_v19 = vpop.f32.mrb[102].mxu0 }
 0x7ec   :  { %v4457_v43 = vmul.f32 %v14121_v19, %v14121_v19  ;;  %v4389_v57 = vpop.f32.mrb[103].mxu0  ;;  %v4439_v13 = vsel %vm4429_vm7, %v14121_v19, 0.0 }
 0x7ed   :  { %4469 = vadd.xlane.f32.xlu0 %v4468_v49  ;;  %4440 = vadd.xlane.f32.xlu1 %v4439_v13 }
 0x7ee   :  { %v4471_v40 = vsel %vm4429_vm7, %v4457_v43, 0.0 }
 0x7ef   :  { %v14128_v42 = vpop.f32.mrb[104].mxu0 }
 0x7f0   :  { %v4458_v55 = vmul.f32 %v14128_v42, %v14128_v42  ;;  %v4394_v27 = vpop.f32.mrb[105].mxu0  ;;  %v4442_v36 = vsel %vm4429_vm7, %v14128_v42, 0.0 }
 0x7f1   :  { %4472 = vadd.xlane.f32.xlu1 %v4471_v40  ;;  %4443 = vadd.xlane.f32.xlu0 %v4442_v36 }
 0x7f2   :  { %v4474_v15 = vsel %vm4429_vm7, %v4458_v55, 0.0 }
 0x7f3   :  { %v14135_v24 = vpop.f32.mrb[106].mxu0 }
 0x7f4   :  { %v4459_v39 = vmul.f32 %v14135_v24, %v14135_v24  ;;  %v4399_v63 = vpop.f32.mrb[107].mxu0  ;;  %v4445_v26 = vsel %vm4429_vm7, %v14135_v24, 0.0 }
 0x7f5   :  { %4475 = vadd.xlane.f32.xlu0 %v4474_v15  ;;  %4446 = vadd.xlane.f32.xlu1 %v4445_v26 }
 0x7f6   :  { %v4477_v23 = vsel %vm4429_vm7, %v4459_v39, 0.0 }
 0x7f9   :  { %4478 = vadd.xlane.f32.xlu1 %v4477_v23 }
 0x802   :  { %v14143_v34 = vpop.f32.mrb[108].mxu0 }
 0x803   :  { %v4460_v7 = vmul.f32 %v14143_v34, %v14143_v34  ;;  %v4404_v17 = vpop.f32.mrb[109].mxu0  ;;  %v4448_v0 = vsel %vm4429_vm7, %v14143_v34, 0.0 }
 0x804   :  { %4449 = vadd.xlane.f32.xlu0 %v4448_v0 }
 0x805   :  { %v4480_v9 = vsel %vm4429_vm7, %v4460_v7, 0.0 }
 0x807   :  { %v14149_v58 = vpop.f32.mrb[110].mxu0 }
 0x808   :  { %v4461_v61 = vmul.f32 %v14149_v58, %v14149_v58  ;;  %4481 = vadd.xlane.f32.xlu0 %v4480_v9  ;;  %v4409_v62 = vpop.f32.mrb[111].mxu0  ;;  %v4451_v52 = vsel %vm4429_vm7, %v14149_v58, 0.0 }
 0x809   :  { %4452 = vadd.xlane.f32.xlu1 %v4451_v52 }
 0x80a   :  { %v4483_v38 = vsel %vm4429_vm7, %v4461_v61, 0.0 }
 0x80d   :  { %4484 = vadd.xlane.f32.xlu1 %v4483_v38 }
 0x81e   :  { %4553 = vperm.xlu1 %11331, %v8448_v29   ;;  %4568 = vperm.xlu0 %11332, %v8451_v48  }
 0x822   :  { %4558 = vperm.xlu1 %11331, %v8449_v6   ;;  %4634 = vperm.xlu0 %11332, %v8457_v53  }
 0x826   :  { %4563 = vperm.xlu1 %11331, %v8450_v31   ;;  %4578 = vperm.xlu0 %11332, %v8453_v47   ;;  %v8454_v47 = vld [vmem:[%s15681_s4 + $0x130] sm:$0xff] }
 0x82a   :  { %4629 = vperm.xlu1 %11331, %v8456_v10  }
 0x82e   :  { %4573 = vperm.xlu1 %11331, %v8452_v11   ;;  %v8460_v11 = vld [vmem:[%s15681_s4 + $0x160] sm:$0xff] }
 0x832   :  { %4639 = vperm.xlu1 %11331, %v8458_v2   ;;  %v8455_v2 = vld [vmem:[%s15681_s4 + $0x138] sm:$0xff] }
 0x84f   :  { %v4432_v3 = vpop.xlane.xlu1 %4431 }
 0x851   :  { %v4464_v51 = vpop.xlane.xlu0 %4463 }
 0x855   :  { %v4435_v37 = vpop.xlane.xlu0 %4434  ;;  %v4467_v35 = vpop.xlane.xlu1 %4466 }
 0x876   :  { %v4438_v1 = vpop.xlane.xlu0 %4437 }
 0x87a   :  { %v4470_v44 = vpop.xlane.xlu0 %4469  ;;  %v4441_v22 = vpop.xlane.xlu1 %4440 }
 0x87e   :  { %v4473_v5 = vpop.xlane.xlu1 %4472  ;;  %v4444_v20 = vpop.xlane.xlu0 %4443 }
 0x87f   :  { %v4486_v45 = vadd.f32 %v4444_v20, %v4432_v3  ;;  %v8461_v3 = vld [vmem:[%s15681_s4 + $0x168] sm:$0xff]  ;;  %v4675_v20 = vld [vmem:[%s15793_s3] sm:$0xff] }
 0x880   :  { %10280 = vmatprep.mubr.msk.f32.mxu1 %vm2088_vm0, %v4675_v20 }
 0x881   :  { %v4495_v50 = vmul.f32 0.125, %v4486_v45  ;;  %v4697_v45 = vld [vmem:[%s15792_s28 + $0x50] sm:$0xff] }
 0x882   :  { %v4476_v28 = vpop.xlane.xlu0 %4475  ;;  %v4447_v21 = vpop.xlane.xlu1 %4446 }
 0x883   :  { %v4490_v60 = vadd.f32 %v4476_v28, %v4464_v51  ;;  %v4487_v54 = vadd.f32 %v4447_v21, %v4435_v37  ;;  %4525 = vperm.xlu0 %11332, %v4495_v50   ;;  %v4503_v12 = vmul.f32 %v4495_v50, %v4495_v50  ;;  %v8462_v51 = vld [vmem:[%s15681_s4 + $0x170] sm:$0xff]  ;;  %v4691_v37 = vld [vmem:[%s15792_s28 + $0x20] sm:$0xff]  ;;  %v4688_v50 = vld [vmem:[%s15792_s28 + $0x8] sm:$0xff] }
 0x884   :  { %v4695_v28 = vld [vmem:[%s15792_s28 + $0x40] sm:$0xff]  ;;  %v4698_v21 = vld [vmem:[%s15792_s28 + $0x58] sm:$0xff] }
 0x885   :  { %v4499_v41 = vmul.f32 0.125, %v4490_v60  ;;  %v4496_v33 = vmul.f32 0.125, %v4487_v54  ;;  %v4693_v60 = vld [vmem:[%s15792_s28 + $0x30] sm:$0xff]  ;;  %v4696_v54 = vld [vmem:[%s15792_s28 + $0x48] sm:$0xff] }
 0x886   :  { %v4479_v4 = vpop.xlane.xlu1 %4478 }
 0x887   :  { %v4491_v18 = vadd.f32 %v4479_v4, %v4467_v35  ;;  %4530 = vperm.xlu1 %11331, %v4496_v33   ;;  %4644 = vperm.xlu0 %11332, %v8459_v46   ;;  %v4507_v8 = vsub.f32 %v4499_v41, %v4503_v12  ;;  %v4504_v32 = vmul.f32 %v4496_v33, %v4496_v33  ;;  %v8463_v35 = vld [vmem:[%s15681_s4 + $0x178] sm:$0xff]  ;;  %s15798_s4 = sld [smem:[#allocation41_spill]] }
 0x888   :  { %v4694_v46 = vld [vmem:[%s15792_s28 + $0x38] sm:$0xff] }
 0x889   :  { %v4500_v25 = vmul.f32 0.125, %v4491_v18  ;;  %v4511_v30 = vmax.f32 %v4507_v8, 0.0 }
 0x88b   :  { %v4508_v59 = vsub.f32 %v4500_v25, %v4504_v32  ;;  %v4515_v43 = vadd.f32 1e-05, %v4511_v30 }
 0x88d   :  { %v4512_v57 = vmax.f32 %v4508_v59, 0.0  ;;  %11350 = vrsqrt.f32 %v4515_v43 }
 0x88f   :  { %v4516_v55 = vadd.f32 1e-05, %v4512_v57 }
 0x891   :  { %v4450_v49 = vpop.xlane.xlu0 %4449  ;;  %11352 = vrsqrt.f32 %v4516_v55 }
 0x892   :  { %v4488_v13 = vadd.f32 %v4450_v49, %v4438_v1  ;;  %v4689_v1 = vld [vmem:[%s15792_s28 + $0x10] sm:$0xff] }
 0x894   :  { %v4497_v27 = vmul.f32 0.125, %v4488_v13 }
 0x895   :  { %v4482_v40 = vpop.xlane.xlu0 %4481 }
 0x896   :  { %v4492_v36 = vadd.f32 %v4482_v40, %v4470_v44  ;;  %4535 = vperm.xlu1 %11331, %v4497_v27   ;;  %v4453_v39 = vpop.xlane.xlu1 %4452  ;;  %v4505_v15 = vmul.f32 %v4497_v27, %v4497_v27  ;;  %v4692_v44 = vld [vmem:[%s15792_s28 + $0x28] sm:$0xff] }
 0x897   :  { %v4489_v63 = vadd.f32 %v4453_v39, %v4441_v22  ;;  %v11351_v52 = vpop.eup %11350  ;;  %v4687_v22 = vld [vmem:[%s15792_s28] sm:$0xff] }
 0x898   :  { %v4501_v26 = vmul.f32 0.125, %v4492_v36 }
 0x899   :  { %v4498_v23 = vmul.f32 0.125, %v4489_v63 }
 0x89a   :  { %v4509_v7 = vsub.f32 %v4501_v26, %v4505_v15  ;;  %v4485_v17 = vpop.xlane.xlu1 %4484 }
 0x89b   :  { %v4493_v0 = vadd.f32 %v4485_v17, %v4473_v5  ;;  %4540 = vperm.xlu1 %11331, %v4498_v23   ;;  %v4506_v61 = vmul.f32 %v4498_v23, %v4498_v23  ;;  %v11353_v6 = vpop.eup %11352  ;;  %v4690_v5 = vld [vmem:[%s15792_s28 + $0x18] sm:$0xff] }
 0x89c   :  { %v4513_v9 = vmax.f32 %v4509_v7, 0.0 }
 0x89d   :  { %v4502_v62 = vmul.f32 0.125, %v4493_v0  ;;  %v4569_v8 = vpop.permute.xlu0 %4568 }
 0x89e   :  { %v4517_v38 = vadd.f32 1e-05, %v4513_v9  ;;  %v4554_v41 = vpop.permute.xlu1 %4553 }
 0x89f   :  { %v4510_v29 = vsub.f32 %v4502_v62, %v4506_v61  ;;  %4601 = vperm.xlu1 %11331, %v11351_v52  }
 0x8a0   :  { %11354 = vrsqrt.f32 %v4517_v38 }
 0x8a1   :  { %v4514_v48 = vmax.f32 %v4510_v29, 0.0  ;;  %v4635_v32 = vpop.permute.xlu0 %4634 }
 0x8a2   :  { %v4559_v33 = vpop.permute.xlu1 %4558 }
 0x8a3   :  { %v4518_v53 = vadd.f32 1e-05, %v4514_v48  ;;  %4606 = vperm.xlu1 %11331, %v11353_v6  }
 0x8a5   :  { %11356 = vrsqrt.f32 %v4518_v53  ;;  %v4579_v59 = vpop.permute.xlu0 %4578 }
 0x8a6   :  { %v4564_v12 = vpop.permute.xlu1 %4563 }
 0x8aa   :  { %v11355_v31 = vpop.eup %11354  ;;  %v4630_v4 = vpop.permute.xlu1 %4629 }
 0x8ab   :  { %4611 = vperm.xlu1 %11331, %v11355_v31  }
 0x8ae   :  { %v4574_v18 = vpop.permute.xlu1 %4573 }
 0x8af   :  { %v11357_v10 = vpop.eup %11356  ;;  %4583 = vperm.xlu1 %11331, %v8454_v47  }
 0x8b0   :  { %4616 = vperm.xlu0 %11332, %v11357_v10  }
 0x8b2   :  { %v4640_v25 = vpop.permute.xlu1 %4639 }
 0x8b3   :  { %4649 = vperm.xlu1 %11331, %v8460_v11  }
 0x8b4   :  { %4588 = vperm.xlu0 %11332, %v8455_v2  }
 0x8b7   :  { %4659 = vperm.xlu1 %11331, %v8462_v51  }
 0x8b8   :  { %4654 = vperm.xlu0 %11332, %v8461_v3  }
 0x8bb   :  { %4721 = vperm.xlu1 %11331, %v4691_v37  }
 0x8bc   :  { %4664 = vperm.xlu0 %11332, %v8463_v35  }
 0x8bf   :  { %4711 = vperm.xlu1 %11331, %v4689_v1  }
 0x8c0   :  { %4726 = vperm.xlu0 %11332, %v4692_v44  }
 0x8c3   :  { %4701 = vperm.xlu1 %11331, %v4687_v22  }
 0x8c4   :  { %4716 = vperm.xlu0 %11332, %v4690_v5  }
 0x8c7   :  { %4751 = vperm.xlu1 %11331, %v4697_v45  }
 0x8c8   :  { %4706 = vperm.xlu0 %11332, %v4688_v50  }
 0x8cb   :  { %4741 = vperm.xlu1 %11331, %v4695_v28  }
 0x8cc   :  { %4756 = vperm.xlu0 %11332, %v4698_v21   ;;  %v4676_v21 = vld [vmem:[%s15793_s3 + $0x8] sm:$0xff] }
 0x8cf   :  { %4731 = vperm.xlu1 %11331, %v4693_v60   ;;  %v4677_v60 = vld [vmem:[%s15793_s3 + $0x10] sm:$0xff] }
 0x8d0   :  { %4746 = vperm.xlu0 %11332, %v4696_v54   ;;  %v4678_v54 = vld [vmem:[%s15793_s3 + $0x18] sm:$0xff] }
 0x8d4   :  { %4736 = vperm.xlu0 %11332, %v4694_v46   ;;  %v4679_v46 = vld [vmem:[%s15793_s3 + $0x20] sm:$0xff] }
 0x902   :  { %v4526_v57 = vpop.permute.xlu0 %4525 }
 0x903   :  { %v4543_v13 = vsub.f32 %v14101_v14, %v4526_v57  ;;  %v4547_v38 = vsub.f32 %v14128_v42, %v4526_v57 }
 0x905   :  { %v4591_v40 = vmul.f32 %v4554_v41, %v4543_v13  ;;  %v4680_v41 = vld [vmem:[%s15793_s3 + $0x28] sm:$0xff] }
 0x906   :  { %v4531_v30 = vpop.permute.xlu1 %4530  ;;  %v4645_v0 = vpop.permute.xlu0 %4644 }
 0x907   :  { %v4544_v55 = vsub.f32 %v14108_v56, %v4531_v30  ;;  %v4548_v48 = vsub.f32 %v14135_v24, %v4531_v30 }
 0x909   :  { %v4592_v39 = vmul.f32 %v4559_v33, %v4544_v55  ;;  %v4596_v2 = vmul.f32 %v4579_v59, %v4548_v48  ;;  %v4681_v33 = vld [vmem:[%s15793_s3 + $0x30] sm:$0xff] }
 0x915   :  { %v4536_v43 = vpop.permute.xlu1 %4535 }
 0x916   :  { %v4545_v17 = vsub.f32 %v14115_v16, %v4536_v43  ;;  %v4595_v16 = vmul.f32 %v4574_v18, %v4547_v38  ;;  %v4549_v10 = vsub.f32 %v14143_v34, %v4536_v43  ;;  %v4684_v18 = vld [vmem:[%s15793_s3 + $0x48] sm:$0xff] }
 0x918   :  { %v4593_v9 = vmul.f32 %v4564_v12, %v4545_v17  ;;  %v4682_v12 = vld [vmem:[%s15793_s3 + $0x38] sm:$0xff] }
 0x91a   :  { %v4541_v49 = vpop.permute.xlu1 %4540 }
 0x91b   :  { %v4546_v14 = vsub.f32 %v14121_v19, %v4541_v49  ;;  %v4550_v11 = vsub.f32 %v14149_v58, %v4541_v49 }
 0x91d   :  { %v4594_v52 = vmul.f32 %v4569_v8, %v4546_v14  ;;  %v4685_v8 = vld [vmem:[%s15793_s3 + $0x50] sm:$0xff] }
 0x91e   :  { %v4602_v27 = vpop.permute.xlu1 %4601 }
 0x91f   :  { %v4619_v36 = vmul.f32 %v4602_v27, %v4591_v40  ;;  %v4623_v42 = vmul.f32 %v4602_v27, %v4595_v16 }
 0x921   :  { %v14247_v26 = vadd.f32 %v4630_v4, %v4619_v36  ;;  %v4683_v4 = vld [vmem:[%s15793_s3 + $0x40] sm:$0xff] }
 0x922   :  { %v4607_v63 = vpop.permute.xlu1 %4606 }
 0x923   :  { %v4620_v15 = vmul.f32 %v4607_v63, %v4592_v39  ;;  %v4624_v3 = vmul.f32 %v4607_v63, %v4596_v2 }
 0x925   :  { %v14249_v23 = vadd.f32 %v4635_v32, %v4620_v15 }
 0x927   :  { %v10777_v7 = vpack.c.bf16 %v14249_v23, %v14247_v26 }
 0x929   :  { %10778 = vmatprep.subr.bf16.mxu1 %v10777_v7 }
 0x92a   :  { %10780 = vmatpush3.bf16.msra.mxu1 %v10777_v7  ;;  %v4612_v56 = vpop.permute.xlu1 %4611 }
 0x92b   :  { %v4621_v61 = vmul.f32 %v4612_v56, %v4593_v9 }
 0x92d   :  { %v14257_v53 = vadd.f32 %v4640_v25, %v4621_v61  ;;  %v4686_v25 = vld [vmem:[%s15793_s3 + $0x58] sm:$0xff] }
 0x92e   :  { %v4584_v62 = vpop.permute.xlu1 %4583 }
 0x92f   :  { %v4617_v29 = vpop.permute.xlu0 %4616  ;;  %v4597_v37 = vmul.f32 %v4584_v62, %v4549_v10 }
 0x930   :  { %v4622_v6 = vmul.f32 %v4617_v29, %v4594_v52 }
 0x931   :  { %v4625_v5 = vmul.f32 %v4612_v56, %v4597_v37 }
 0x932   :  { %v14259_v31 = vadd.f32 %v4645_v0, %v4622_v6  ;;  %v4650_v47 = vpop.permute.xlu1 %4649 }
 0x933   :  { %v4589_v19 = vpop.permute.xlu0 %4588  ;;  %v14265_v1 = vadd.f32 %v4650_v47, %v4623_v42 }
 0x934   :  { %v10781_v51 = vpack.c.bf16 %v14259_v31, %v14257_v53  ;;  %v4598_v24 = vmul.f32 %v4589_v19, %v4550_v11 }
 0x936   :  { %10782 = vmatprep.subr.bf16.mxu1 %v10781_v51  ;;  %v4660_v22 = vpop.permute.xlu1 %4659  ;;  %v4626_v58 = vmul.f32 %v4617_v29, %v4598_v24 }
 0x937   :  { %v4655_v35 = vpop.permute.xlu0 %4654  ;;  %10784 = vmatpush3.bf16.msra.mxu1 %v10781_v51  ;;  %v14271_v45 = vadd.f32 %v4660_v22, %v4625_v5 }
 0x938   :  { %v14267_v44 = vadd.f32 %v4655_v35, %v4624_v3 }
 0x93a   :  { %v10785_v34 = vpack.c.bf16 %v14267_v44, %v14265_v1  ;;  %v4722_v30 = vpop.permute.xlu1 %4721 }
 0x93b   :  { %v4665_v20 = vpop.permute.xlu0 %4664 }
 0x93c   :  { %v14273_v50 = vadd.f32 %v4665_v20, %v4626_v58  ;;  %10786 = vmatprep.subr.bf16.mxu1 %v10785_v34 }
 0x93d   :  { %10788 = vmatpush3.bf16.msra.mxu1 %v10785_v34 }
 0x93e   :  { %v10789_v28 = vpack.c.bf16 %v14273_v50, %v14271_v45  ;;  %v4712_v43 = vpop.permute.xlu1 %4711 }
 0x93f   :  { %v4727_v32 = vpop.permute.xlu0 %4726 }
 0x940   :  { %10790 = vmatprep.subr.bf16.mxu1 %v10789_v28 }
 0x941   :  { %10792 = vmatpush3.bf16.msra.mxu1 %v10789_v28 }
 0x942   :  { %v4702_v49 = vpop.permute.xlu1 %4701 }
 0x943   :  { %v4717_v59 = vpop.permute.xlu0 %4716 }
 0x944   :  { %10281 = vmatmul.mubr.msk.f32.vlgmr.msra.gmra.mrb[88].mxu1 %vm2088_vm0, %v4676_v21 }
 0x945   :  { %10283 = vmatprep.mubr.msk.f32.mxu1 %vm2088_vm0, %v4677_v60 }
 0x946   :  { %v4752_v27 = vpop.permute.xlu1 %4751 }
 0x947   :  { %v4707_v57 = vpop.permute.xlu0 %4706 }
 0x948   :  { %10284 = vmatmul.mubr.msk.f32.gmra.mrb[90].mxu1 %vm2088_vm0, %v4678_v54 }
 0x949   :  { %10286 = vmatprep.mubr.msk.f32.mxu1 %vm2088_vm0, %v4679_v46 }
 0x94a   :  { %v4742_v56 = vpop.permute.xlu1 %4741 }
 0x94b   :  { %v4757_v13 = vpop.permute.xlu0 %4756 }
 0x94c   :  { %10287 = vmatmul.mubr.msk.f32.gmra.mrb[92].mxu1 %vm2088_vm0, %v4680_v41 }
 0x94d   :  { %10289 = vmatprep.mubr.msk.f32.mxu1 %vm2088_vm0, %v4681_v33 }
 0x94e   :  { %v4732_v6 = vpop.permute.xlu1 %4731 }
 0x94f   :  { %v14321_v17 = vpop.permute.xlu0 %4746 }
 0x950   :  { %10290 = vmatmul.mubr.msk.f32.gmra.mrb[94].mxu1 %vm2088_vm0, %v4682_v12 }
 0x951   :  { %10292 = vmatprep.mubr.msk.f32.mxu1 %vm2088_vm0, %v4683_v4 }
 0x953   :  { %v4737_v38 = vpop.permute.xlu0 %4736 }
 0x954   :  { %10293 = vmatmul.mubr.msk.f32.gmra.mrb[96].mxu1 %vm2088_vm0, %v4684_v18 }
 0x955   :  { %10295 = vmatprep.mubr.msk.f32.mxu1 %vm2088_vm0, %v4685_v8 }
 0x958   :  { %10296 = vmatmul.mubr.msk.f32.gmra.mrb[98].mxu1 %vm2088_vm0, %v4686_v25 }
 0xa17   :  { %v10282_v55 = vpop.f32.mrb[88].mxu1 }
 0xa18   :  { %v4867_v40 = vadd.f32 %v10282_v55, %v4707_v57  ;;  %v4861_v36 = vpop.f32.mrb[89].mxu1 }
 0xa19   :  { %v4862_v39 = vadd.f32 %v4861_v36, %v4702_v49 }
 0xa1b   :  { %v10799_v63 = vpack.c.bf16 %v4867_v40, %v4862_v39  ;;  %v10285_v15 = vpop.f32.mrb[90].mxu1 }
 0xa1c   :  { %v4871_v7 = vpop.f32.mrb[91].mxu1  ;;  %v4877_v51 = vadd.f32 %v10285_v15, %v4717_v59 }
 0xa1d   :  { %v4872_v14 = vadd.f32 %v4871_v7, %v4712_v43 }
 0xa1f   :  { %v10288_v0 = vpop.f32.mrb[92].mxu1  ;;  %10302 = vmatprep.mubr.msk.f32.mxu1 %vm4429_vm7, %v4872_v14 }
 0xa20   :  { %v4887_v9 = vadd.f32 %v10288_v0, %v4727_v32  ;;  %v4881_v61 = vpop.f32.mrb[93].mxu1 }
 0xa21   :  { %v4882_v62 = vadd.f32 %v4881_v61, %v4722_v30 }
 0xa23   :  { %v10793_v29 = vpack.c.bf16 %v4887_v9, %v4882_v62  ;;  %v10291_v48 = vpop.f32.mrb[94].mxu1 }
 0xa24   :  { %v4897_v16 = vadd.f32 %v10291_v48, %v4737_v38  ;;  %v4891_v47 = vpop.f32.mrb[95].mxu1 }
 0xa25   :  { %v4892_v19 = vadd.f32 %v4891_v47, %v4732_v6  ;;  %10795 = vmatprep.subr.msk.bf16.mxu1 %vm14326_vm8, %v10793_v29 }
 0xa26   :  { %10798 = vmatpush3.bf16.xpose.msk.msra.mxu1 %vm14326_vm8, %v10793_v29 }
 0xa27   :  { %v10809_v10 = vpack.c.bf16 %v4897_v16, %v4892_v19  ;;  %v10294_v11 = vpop.f32.mrb[96].mxu1  ;;  %10800 = vmatprep.subr.bf16.mxu1 %v10799_v63 }
 0xa28   :  { %v4901_v2 = vpop.f32.mrb[97].mxu1  ;;  %v4907_v15 = vadd.f32 %v10294_v11, %v14321_v17 }
 0xa2b   :  { %v10297_v42 = vpop.f32.mrb[98].mxu1 }
 0xa2c   :  { %v4917_v3 = vadd.f32 %v10297_v42, %v4757_v13  ;;  %v4911_v37 = vpop.f32.mrb[99].mxu1 }
 0xa2d   :  { %v4912_v24 = vadd.f32 %v4911_v37, %v4752_v27  ;;  %10303 = vmatmul.mubr.msk.f32.vlgmr.msra.gmra.mrb[100].mxu1 %vm4429_vm7, %v4877_v51 }
 0xa2e   :  { %10802 = vmatpush3.bf16.msra.mxu1 %v10799_v63  ;;  %v4902_v63 = vadd.f32 %v4901_v2, %v4742_v56 }
 0xa2f   :  { %v10803_v35 = vpack.c.bf16 %v4917_v3, %v4912_v24 }
 0xa31   :  { %10805 = vmatprep.subr.msk.bf16.mxu1 %vm14326_vm8, %v10803_v35 }
 0xb00   :  { %v10304_v22 = vpop.f32.mrb[100].mxu1 }
 0xb01   :  { %v5008_v5 = vsel %vm3355_vm1, %v10304_v22, -inf  ;;  %v4998_v34 = vpop.f32.mrb[101].mxu1 }
 0xb02   :  { %v5007_v58 = vsel %vm3355_vm1, %v4998_v34, -inf }
 0xb03   :  { %v5009_v20 = vmax.f32 %v5007_v58, %v5008_v5 }
 0xb05   :  { %v5010_v28 = vrot.slane %v5009_v20, 4 }
 0xb07   :  { %v5011_v21 = vmax.f32 %v5009_v20, %v5010_v28 }
 0xb09   :  { %v5012_v60 = vrot.slane %v5011_v21, 2 }
 0xb0b   :  { %v5013_v54 = vmax.f32 %v5011_v21, %v5012_v60  ;;  %v5310_v60 = vld [vmem:[%s15796_s9] sm:$0xff] }
 0xb0d   :  { %v5014_v46 = vrot.slane %v5013_v54, 1 }
 0xb0f   :  { %v5015_v41 = vmax.f32 %v5013_v54, %v5014_v46 }
 0xb11   :  { %v5016_v33 = vsub.f32 %v4998_v34, %v5015_v41  ;;  %v5017_v12 = vsub.f32 %v10304_v22, %v5015_v41 }
 0xb13   :  { %v5018_v4 = vmul.f32 1.442695, %v5016_v33  ;;  %v5020_v18 = vmul.f32 1.442695, %v5017_v12  ;;  %v5311_v33 = vld [vmem:[%s15796_s9 + $0x8] sm:$0xff]  ;;  %v5312_v12 = vld [vmem:[%s15796_s9 + $0x10] sm:$0xff] }
 0xb15   :  { %11358 = vpow2.f32 %v5018_v4  ;;  %v5313_v4 = vld [vmem:[%s15796_s9 + $0x18] sm:$0xff] }
 0xb16   :  { %11360 = vpow2.f32 %v5020_v18 }
 0xb1f   :  { %v11359_v8 = vpop.eup %11358 }
 0xb20   :  { %v11361_v25 = vpop.eup %11360  ;;  %v5022_v32 = vsel %vm3355_vm1, %v11359_v8, 0.0 }
 0xb21   :  { %v5023_v30 = vsel %vm3355_vm1, %v11361_v25, 0.0 }
 0xb22   :  { %v5024_v59 = vadd.f32 %v5023_v30, %v5022_v32 }
 0xb24   :  { %v5025_v43 = vrot.slane %v5024_v59, 4 }
 0xb26   :  { %v5026_v57 = vadd.f32 %v5025_v43, %v5024_v59 }
 0xb28   :  { %v5027_v49 = vrot.slane %v5026_v57, 2 }
 0xb2a   :  { %v5028_v13 = vadd.f32 %v5027_v49, %v5026_v57 }
 0xb2c   :  { %v5029_v55 = vrot.slane %v5028_v13, 1 }
 0xb2e   :  { %v5030_v27 = vadd.f32 %v5029_v55, %v5028_v13 }
 0xb30   :  { %11362 = vrcp.f32 %v5030_v27 }
 0xb3a   :  { %v11363_v40 = vpop.eup %11362 }
 0xb3b   :  { %v5032_v36 = vmul.f32 %v11363_v40, %v11359_v8  ;;  %v5033_v39 = vmul.f32 %v11363_v40, %v11361_v25 }
 0xb3d   :  { %10309 = vmatprep.mubr.msk.f32.mxu1 %vm3355_vm1, %v5032_v36 }
 0xb3e   :  { %10310 = vmatmul.mubr.msk.f32.vlgmr.msra.gmra.mrb[102].mxu1 %vm3355_vm1, %v5033_v39 }
 0xb3f   :  { %10808 = vmatpush3.bf16.xpose.msk.msra.mxu1 %vm14326_vm8, %v10803_v35  ;;  %10316 = vmatprep.mubr.msk.f32.mxu1 %vm4429_vm7, %v4902_v63 }
 0xb40   :  { %10810 = vmatprep.subr.bf16.mxu1 %v10809_v10 }
 0xb46   :  { %10317 = vmatmul.mubr.msk.f32.vlgmr.msra.gmra.mrb[104].mxu1 %vm4429_vm7, %v4907_v15  ;;  %v5411_v15 = vld [vmem:[%s15797_s10] sm:$0xff] }
 0xb47   :  { %10812 = vmatpush3.bf16.msra.mxu1 %v10809_v10 }
 0xc11   :  { %v10311_v7 = vpop.f32.mrb[102].mxu1 }
 0xc12   :  { %v5106_v14 = vpop.f32.mrb[103].mxu1 }
 0xc13   :  { %v10813_v0 = vpack.c.bf16 %v10311_v7, %v5106_v14  ;;  %v5413_v7 = vld [vmem:[%s15797_s10 + $0x10] sm:$0xff]  ;;  %v5412_v14 = vld [vmem:[%s15797_s10 + $0x8] sm:$0xff] }
 0xc15   :  { %10814 = vmatprep.subr.bf16.mxu1 %v10813_v0 }
 0xc19   :  { %v10318_v56 = vpop.f32.mrb[104].mxu1 }
 0xc1a   :  { %v5203_v9 = vsel %vm3355_vm1, %v10318_v56, -inf  ;;  %v5193_v61 = vpop.f32.mrb[105].mxu1 }
 0xc1b   :  { %v5202_v62 = vsel %vm3355_vm1, %v5193_v61, -inf }
 0xc1c   :  { %v5204_v52 = vmax.f32 %v5202_v62, %v5203_v9 }
 0xc1e   :  { %v5205_v38 = vrot.slane %v5204_v52, 4 }
 0xc20   :  { %v5206_v29 = vmax.f32 %v5204_v52, %v5205_v38 }
 0xc22   :  { %v5207_v48 = vrot.slane %v5206_v29, 2 }
 0xc24   :  { %v5208_v6 = vmax.f32 %v5206_v29, %v5207_v48 }
 0xc26   :  { %v5209_v16 = vrot.slane %v5208_v6, 1 }
 0xc28   :  { %v5210_v17 = vmax.f32 %v5208_v6, %v5209_v16 }
 0xc2a   :  { %v5211_v47 = vsub.f32 %v5193_v61, %v5210_v17  ;;  %v5212_v19 = vsub.f32 %v10318_v56, %v5210_v17 }
 0xc2c   :  { %v5213_v10 = vmul.f32 1.442695, %v5211_v47  ;;  %v5215_v11 = vmul.f32 1.442695, %v5212_v19 }
 0xc2e   :  { %11364 = vpow2.f32 %v5213_v10 }
 0xc2f   :  { %11366 = vpow2.f32 %v5215_v11 }
 0xc38   :  { %v11365_v2 = vpop.eup %11364 }
 0xc39   :  { %v11367_v51 = vpop.eup %11366  ;;  %v5217_v42 = vsel %vm3355_vm1, %v11365_v2, 0.0 }
 0xc3a   :  { %v5218_v3 = vsel %vm3355_vm1, %v11367_v51, 0.0 }
 0xc3b   :  { %v5219_v37 = vadd.f32 %v5218_v3, %v5217_v42 }
 0xc3d   :  { %v5220_v24 = vrot.slane %v5219_v37, 4 }
 0xc3f   :  { %v5221_v35 = vadd.f32 %v5220_v24, %v5219_v37 }
 0xc41   :  { %v5222_v22 = vrot.slane %v5221_v35, 2 }
 0xc43   :  { %v5223_v5 = vadd.f32 %v5222_v22, %v5221_v35 }
 0xc45   :  { %v5224_v34 = vrot.slane %v5223_v5, 1 }
 0xc47   :  { %v5225_v58 = vadd.f32 %v5224_v34, %v5223_v5 }
 0xc49   :  { %11368 = vrcp.f32 %v5225_v58 }
 0xc53   :  { %v11369_v20 = vpop.eup %11368 }
 0xc54   :  { %v5227_v28 = vmul.f32 %v11369_v20, %v11365_v2  ;;  %v5228_v21 = vmul.f32 %v11369_v20, %v11367_v51  ;;  %v8492_v20 = vld [vmem:[%s15797_s10 + $0x20] sm:$0xff] }
 0xc56   :  { %10323 = vmatprep.mubr.msk.f32.mxu1 %vm3355_vm1, %v5227_v28  ;;  %v8493_v28 = vld [vmem:[%s15797_s10 + $0x28] sm:$0xff] }
 0xc57   :  { %10324 = vmatmul.mubr.msk.f32.vlgmr.msra.gmra.mrb[106].mxu1 %vm3355_vm1, %v5228_v21  ;;  %v8494_v21 = vld [vmem:[%s15797_s10 + $0x30] sm:$0xff] }
 0xc58   :  { %10816 = vmatpush3.bf16.msra.mxu1 %v10813_v0  ;;  %10334 = vmatprep.mubr.msk.f32.mxu1 %vm4193_vm2, %v5310_v60  ;;  %v5414_v0 = vld [vmem:[%s15797_s10 + $0x18] sm:$0xff] }
 0xc59   :  { %v8495_v60 = vld [vmem:[%s15797_s10 + $0x38] sm:$0xff] }
 0xd2a   :  { %v10325_v54 = vpop.f32.mrb[106].mxu1 }
 0xd2b   :  { %v5301_v46 = vpop.f32.mrb[107].mxu1 }
 0xd2c   :  { %v10817_v41 = vpack.c.bf16 %v10325_v54, %v5301_v46  ;;  %v5550_v54 = vld [vmem:[%s15798_s4] sm:$0xff] }
 0xd2d   :  { %v5554_v46 = vld [vmem:[%s15798_s4 + $0x20] sm:$0xff] }
 0xd2e   :  { %10818 = vmatprep.subr.bf16.mxu1 %v10817_v41 }
 0xd2f   :  { %10820 = vmatpush3.bf16.msra.mxu1 %v10817_v41  ;;  %v5551_v41 = vld [vmem:[%s15798_s4 + $0x8] sm:$0xff] }
 0xd32   :  { %10335 = vmatmul.mubr.msk.f32.vlgmr.msra.gmra.mrb[108].mxu1 %vm4193_vm2, %v5311_v33  ;;  %v5555_v33 = vld [vmem:[%s15798_s4 + $0x28] sm:$0xff] }
 0xd33   :  { %10337 = vmatprep.mubr.msk.f32.mxu1 %vm4193_vm2, %v5312_v12  ;;  %v5542_v12 = vld [vmem:[%s15799_s11] sm:$0xff] }
 0xd34   :  { %10348 = vmatprep.mubr.msk.f32.mxu0 %vm4193_vm2, %v5542_v12 }
 0xd36   :  { %10338 = vmatmul.mubr.msk.f32.gmra.mrb[110].mxu1 %vm4193_vm2, %v5313_v4  ;;  %v5552_v4 = vld [vmem:[%s15798_s4 + $0x10] sm:$0xff] }
 0xe05   :  { %v14370_v18 = vpop.f32.mrb[108].mxu1 }
 0xe06   :  { %v14372_v8 = vpop.f32.mrb[109].mxu1  ;;  %v5423_v25 = vsel %vm4429_vm7, %v14370_v18, 0.0  ;;  %v5433_v32 = vmul.f32 %v14370_v18, %v14370_v18 }
 0xe07   :  { %v5432_v30 = vmul.f32 %v14372_v8, %v14372_v8  ;;  %5424 = vadd.xlane.f32.xlu0 %v5423_v25  ;;  %v5420_v59 = vsel %vm4429_vm7, %v14372_v8, 0.0  ;;  %v5556_v25 = vld [vmem:[%s15798_s4 + $0x30] sm:$0xff] }
 0xe08   :  { %5421 = vadd.xlane.f32.xlu1 %v5420_v59  ;;  %v5439_v13 = vsel %vm4429_vm7, %v5433_v32, 0.0  ;;  %v5553_v32 = vld [vmem:[%s15798_s4 + $0x18] sm:$0xff]  ;;  %v5727_v59 = vld [vmem:[%s15621_s12] sm:$0xff] }
 0xe09   :  { %v5436_v43 = vsel %vm4429_vm7, %v5432_v30, 0.0  ;;  %v14383_v57 = vpop.f32.mrb[110].mxu1  ;;  %v5557_v30 = vld [vmem:[%s15798_s4 + $0x38] sm:$0xff] }
 0xe0a   :  { %v14385_v49 = vpop.f32.mrb[111].mxu1  ;;  %v5429_v27 = vsel %vm4429_vm7, %v14383_v57, 0.0  ;;  %v5435_v36 = vmul.f32 %v14383_v57, %v14383_v57 }
 0xe0b   :  { %5437 = vadd.xlane.f32.xlu0 %v5436_v43  ;;  %v5426_v55 = vsel %vm4429_vm7, %v14385_v49, 0.0  ;;  %v5434_v40 = vmul.f32 %v14385_v49, %v14385_v49  ;;  %v5728_v43 = vld [vmem:[%s15621_s12 + $0x8] sm:$0xff] }
 0xe0c   :  { %5440 = vadd.xlane.f32.xlu1 %v5439_v13  ;;  %v5445_v63 = vsel %vm4429_vm7, %v5435_v36, 0.0  ;;  %v11532_v13 = vmov 0.0  }
 0xe0d   :  { %v5442_v39 = vsel %vm4429_vm7, %v5434_v40, 0.0  ;;  %6100 = vmatprep.mubr.f32.mxu1 %v11532_v13 }
 0xe0f   :  { %5427 = vadd.xlane.f32.xlu0 %v5426_v55 }
 0xe10   :  { %5430 = vadd.xlane.f32.xlu1 %v5429_v27 }
 0xe13   :  { %5443 = vadd.xlane.f32.xlu0 %v5442_v39 }
 0xe14   :  { %5446 = vadd.xlane.f32.xlu1 %v5445_v63 }
 0xe25   :  { %5482 = vperm.xlu1 %11331, %v5411_v15  }
 0xe29   :  { %5492 = vperm.xlu1 %11331, %v5413_v7   ;;  %5487 = vperm.xlu0 %11332, %v5412_v14  }
 0xe2d   :  { %5497 = vperm.xlu0 %11332, %v5414_v0  }
 0xe94   :  { %v5425_v56 = vpop.xlane.xlu0 %5424 }
 0xe95   :  { %v5422_v9 = vpop.xlane.xlu1 %5421 }
 0xe98   :  { %v5438_v61 = vpop.xlane.xlu0 %5437 }
 0xe99   :  { %v5441_v62 = vpop.xlane.xlu1 %5440 }
 0xe9c   :  { %v5428_v52 = vpop.xlane.xlu0 %5427 }
 0xe9d   :  { %v5448_v38 = vadd.f32 %v5428_v52, %v5422_v9  ;;  %v5431_v29 = vpop.xlane.xlu1 %5430 }
 0xe9e   :  { %v5449_v48 = vadd.f32 %v5431_v29, %v5425_v56 }
 0xe9f   :  { %v5452_v6 = vmul.f32 0.125, %v5448_v38 }
 0xea0   :  { %v5453_v16 = vmul.f32 0.125, %v5449_v48  ;;  %v5444_v17 = vpop.xlane.xlu0 %5443 }
 0xea1   :  { %v5450_v47 = vadd.f32 %v5444_v17, %v5438_v61  ;;  %v5447_v19 = vpop.xlane.xlu1 %5446  ;;  %5468 = vperm.xlu0 %11332, %v5452_v6   ;;  %v5456_v11 = vmul.f32 %v5452_v6, %v5452_v6 }
 0xea2   :  { %v5451_v10 = vadd.f32 %v5447_v19, %v5441_v62  ;;  %5473 = vperm.xlu1 %11331, %v5453_v16   ;;  %v5457_v51 = vmul.f32 %v5453_v16, %v5453_v16 }
 0xea3   :  { %v5454_v2 = vmul.f32 0.125, %v5450_v47 }
 0xea4   :  { %v5455_v42 = vmul.f32 0.125, %v5451_v10 }
 0xea5   :  { %v5458_v3 = vsub.f32 %v5454_v2, %v5456_v11  ;;  %v5483_v27 = vpop.permute.xlu1 %5482 }
 0xea6   :  { %v5459_v37 = vsub.f32 %v5455_v42, %v5457_v51  ;;  %v11450_v42 = vld [vmem:[%s15680_s29 + $0x18] sm:$0xff] }
 0xea7   :  { %v5460_v24 = vmax.f32 %v5458_v3, 0.0 }
 0xea8   :  { %v5461_v35 = vmax.f32 %v5459_v37, 0.0  ;;  %v5488_v55 = vpop.permute.xlu0 %5487  ;;  %v5543_v37 = vld [vmem:[%s15799_s11 + $0x8] sm:$0xff] }
 0xea9   :  { %v5462_v22 = vadd.f32 1e-05, %v5460_v24  ;;  %v5493_v36 = vpop.permute.xlu1 %5492  ;;  %v11451_v24 = vld [vmem:[%s15680_s29] sm:$0xff] }
 0xeaa   :  { %v5463_v5 = vadd.f32 1e-05, %v5461_v35  ;;  %v11452_v35 = vld [vmem:[%s15680_s29 + $0x10] sm:$0xff] }
 0xeab   :  { %11370 = vrsqrt.f32 %v5462_v22  ;;  %v10831_v22 = vpack.c.bf16 %v11452_v35, %v11451_v24 }
 0xeac   :  { %11372 = vrsqrt.f32 %v5463_v5  ;;  %v5498_v40 = vpop.permute.xlu0 %5497  ;;  %v5544_v5 = vld [vmem:[%s15799_s11 + $0x10] sm:$0xff] }
 0xeb5   :  { %v11371_v34 = vpop.eup %11370 }
 0xeb6   :  { %v11373_v58 = vpop.eup %11372  ;;  %5506 = vperm.xlu1 %11331, %v11371_v34   ;;  %v11453_v34 = vld [vmem:[%s15680_s29 + $0x28] sm:$0xff] }
 0xeb7   :  { %5511 = vperm.xlu0 %11332, %v11373_v58   ;;  %v11454_v58 = vld [vmem:[%s15680_s29 + $0x38] sm:$0xff] }
 0xeba   :  { %5520 = vperm.xlu1 %11331, %v8492_v20   ;;  %v10833_v20 = vpack.c.bf16 %v11454_v58, %v11453_v34 }
 0xebb   :  { %5525 = vperm.xlu0 %11332, %v8493_v28   ;;  %v5545_v28 = vld [vmem:[%s15799_s11 + $0x18] sm:$0xff] }
 0xebe   :  { %5530 = vperm.xlu1 %11331, %v8494_v21   ;;  %v11455_v21 = vld [vmem:[%s15680_s29 + $0x20] sm:$0xff] }
 0xebf   :  { %5535 = vperm.xlu0 %11332, %v8495_v60   ;;  %v11456_v60 = vld [vmem:[%s15680_s29 + $0x30] sm:$0xff] }
 0xec2   :  { %5560 = vperm.xlu1 %11331, %v5550_v54   ;;  %v10835_v54 = vpack.c.bf16 %v11456_v60, %v11455_v21 }
 0xec3   :  { %5580 = vperm.xlu0 %11332, %v5554_v46   ;;  %v5546_v46 = vld [vmem:[%s15799_s11 + $0x20] sm:$0xff] }
 0xec6   :  { %5565 = vperm.xlu1 %11331, %v5551_v41   ;;  %v11457_v41 = vld [vmem:[%s15680_s29 + $0x48] sm:$0xff] }
 0xec7   :  { %5585 = vperm.xlu0 %11332, %v5555_v33   ;;  %v11458_v33 = vld [vmem:[%s15680_s29 + $0x58] sm:$0xff] }
 0xec8   :  { %v10837_v12 = vpack.c.bf16 %v11458_v33, %v11457_v41 }
 0xeca   :  { %5570 = vperm.xlu1 %11331, %v5552_v4   ;;  %v5547_v4 = vld [vmem:[%s15799_s11 + $0x28] sm:$0xff] }
 0xecb   :  { %5590 = vperm.xlu0 %11332, %v5556_v25   ;;  %v11459_v25 = vld [vmem:[%s15680_s29 + $0x40] sm:$0xff] }
 0xece   :  { %5575 = vperm.xlu1 %11331, %v5553_v32   ;;  %v11460_v32 = vld [vmem:[%s15680_s29 + $0x50] sm:$0xff] }
 0xecf   :  { %5595 = vperm.xlu0 %11332, %v5557_v30   ;;  %v10839_v30 = vpack.c.bf16 %v11460_v32, %v11459_v25 }
 0xed2   :  { %5866 = vperm.xlu1 %11331, %v5727_v59   ;;  %v5548_v59 = vld [vmem:[%s15799_s11 + $0x30] sm:$0xff] }
 0xed6   :  { %5871 = vperm.xlu1 %11331, %v5728_v43   ;;  %v11461_v43 = vld [vmem:[%s15680_s29 + $0x68] sm:$0xff] }
 0xf20   :  { %v5469_v39 = vpop.permute.xlu0 %5468 }
 0xf21   :  { %v5474_v63 = vpop.permute.xlu1 %5473  ;;  %v5476_v15 = vsub.f32 %v14372_v8, %v5469_v39  ;;  %v5478_v0 = vsub.f32 %v14385_v49, %v5469_v39  ;;  %v11464_v39 = vld [vmem:[%s15680_s29 + $0x70] sm:$0xff] }
 0xf22   :  { %v5477_v7 = vsub.f32 %v14370_v18, %v5474_v63  ;;  %v5479_v61 = vsub.f32 %v14383_v57, %v5474_v63  ;;  %v11449_v57 = vld [vmem:[%s15680_s29 + $0x8] sm:$0xff] }
 0xf23   :  { %v5500_v56 = vmul.f32 %v5483_v27, %v5476_v15  ;;  %v5502_v48 = vmul.f32 %v5493_v36, %v5478_v0  ;;  %v10829_v3 = vpack.c.bf16 %v11450_v42, %v11449_v57  ;;  %v11463_v36 = vld [vmem:[%s15680_s29 + $0x60] sm:$0xff]  ;;  %v6192_v0 = vld [vmem:[%s15622_s14 + $0x18] sm:$0xff] }
 0xf24   :  { %v5501_v62 = vmul.f32 %v5488_v55, %v5477_v7  ;;  %v5503_v17 = vmul.f32 %v5498_v40, %v5479_v61  ;;  %v11462_v55 = vld [vmem:[%s15680_s29 + $0x78] sm:$0xff]  ;;  %v10843_v63 = vpack.c.bf16 %v11464_v39, %v11463_v36  ;;  %v6189_v15 = vld [vmem:[%s15622_s14] sm:$0xff]  ;;  %v6190_v7 = vld [vmem:[%s15622_s14 + $0x8] sm:$0xff] }
 0xf25   :  { %v10841_v27 = vpack.c.bf16 %v11462_v55, %v11461_v43  ;;  %v5549_v40 = vld [vmem:[%s15799_s11 + $0x38] sm:$0xff]  ;;  %v5729_v36 = vld [vmem:[%s15621_s12 + $0x10] sm:$0xff] }
 0xf35   :  { %v5507_v14 = vpop.permute.xlu1 %5506 }
 0xf36   :  { %v5512_v9 = vpop.permute.xlu0 %5511  ;;  %v5514_v52 = vmul.f32 %v5507_v14, %v5500_v56  ;;  %v5516_v19 = vmul.f32 %v5507_v14, %v5502_v48  ;;  %v6191_v14 = vld [vmem:[%s15622_s14 + $0x10] sm:$0xff]  ;;  %v6446_v56 = vld [vmem:[%s15623_s16] sm:$0xff] }
 0xf37   :  { %v5515_v38 = vmul.f32 %v5512_v9, %v5501_v62  ;;  %v5517_v8 = vmul.f32 %v5512_v9, %v5503_v17  ;;  %v6447_v9 = vld [vmem:[%s15623_s16 + $0x8] sm:$0xff] }
 0xf39   :  { %v5521_v29 = vpop.permute.xlu1 %5520 }
 0xf3a   :  { %v5538_v6 = vadd.f32 %v5521_v29, %v5514_v52  ;;  %v5526_v16 = vpop.permute.xlu0 %5525 }
 0xf3b   :  { %v5539_v47 = vadd.f32 %v5526_v16, %v5515_v38 }
 0xf3d   :  { %v10821_v10 = vpack.c.bf16 %v5539_v47, %v5538_v6  ;;  %v5531_v18 = vpop.permute.xlu1 %5530 }
 0xf3e   :  { %v5540_v11 = vadd.f32 %v5531_v18, %v5516_v19  ;;  %v5536_v2 = vpop.permute.xlu0 %5535 }
 0xf3f   :  { %v5541_v49 = vadd.f32 %v5536_v2, %v5517_v8  ;;  %10822 = vmatprep.subr.bf16.mxu0 %v10821_v10 }
 0xf40   :  { %10824 = vmatpush3.bf16.msra.mxu0 %v10821_v10 }
 0xf41   :  { %v10825_v51 = vpack.c.bf16 %v5541_v49, %v5540_v11  ;;  %v5561_v61 = vpop.permute.xlu1 %5560 }
 0xf42   :  { %v5581_v48 = vpop.permute.xlu0 %5580 }
 0xf43   :  { %10826 = vmatprep.subr.bf16.mxu0 %v10825_v51 }
 0xf44   :  { %10828 = vmatpush3.bf16.msra.mxu0 %v10825_v51 }
 0xf45   :  { %10830 = vmatprep.subr.bf16.mxu0 %v10829_v3  ;;  %v5566_v62 = vpop.permute.xlu1 %5565 }
 0xf46   :  { %v5586_v2 = vpop.permute.xlu0 %5585 }
 0xf47   :  { %10349 = vmatmul.mubr.msk.f32.vlgmr.msra.gmra.mrb[112].mxu0 %vm4193_vm2, %v5543_v37 }
 0xf48   :  { %10351 = vmatprep.mubr.msk.f32.mxu0 %vm4193_vm2, %v5544_v5  ;;  %10832 = vmatpush1.bf16.msra.mxu0 %v10831_v22 }
 0xf49   :  { %10834 = vmatprep.subr.bf16.mxu0 %v10833_v20  ;;  %v5571_v47 = vpop.permute.xlu1 %5570 }
 0xf4b   :  { %10352 = vmatmul.mubr.msk.f32.gmra.mrb[114].mxu0 %vm4193_vm2, %v5545_v28 }
 0xf4c   :  { %10354 = vmatprep.mubr.msk.f32.mxu0 %vm4193_vm2, %v5546_v46  ;;  %10836 = vmatpush1.bf16.msra.mxu0 %v10835_v54 }
 0xf4d   :  { %10838 = vmatprep.subr.bf16.mxu0 %v10837_v12  ;;  %v5576_v42 = vpop.permute.xlu1 %5575 }
 0xf4f   :  { %10355 = vmatmul.mubr.msk.f32.gmra.mrb[116].mxu0 %vm4193_vm2, %v5547_v4 }
 0xf50   :  { %10357 = vmatprep.mubr.msk.f32.mxu0 %vm4193_vm2, %v5548_v59  ;;  %10840 = vmatpush1.bf16.msra.mxu0 %v10839_v30 }
 0xf51   :  { %10842 = vmatprep.subr.bf16.mxu0 %v10841_v27 }
 0xf53   :  { %10358 = vmatmul.mubr.msk.f32.gmra.mrb[118].mxu0 %vm4193_vm2, %v5549_v40 }
 0xf54   :  { %10844 = vmatpush1.bf16.msra.mxu0 %v10843_v63  ;;  %6269 = vmatprep.mubr.f32.mxu0 %v11532_v13 }
 0xf55   :  { %10846 = vmatprep.subr.bf16.mxu0 %v10829_v3 }
 0xf57   :  { %8522 = vmatmul.mubr.msk.f32.vlgmr.msra.gmra.mrb[120].mxu0 %vm2088_vm0, %v6189_v15 }
 0xf58   :  { %6275 = vmatprep.mubr.f32.mxu0 %v11532_v13  ;;  %10848 = vmatpush1.bf16.msra.mxu0 %v10831_v22 }
 0xf59   :  { %10850 = vmatprep.subr.bf16.mxu0 %v10833_v20 }
 0xf5b   :  { %8523 = vmatmul.mubr.msk.f32.gmra.mrb[122].mxu0 %vm2088_vm0, %v6190_v7 }
 0xf5c   :  { %6281 = vmatprep.mubr.f32.mxu0 %v11532_v13  ;;  %10852 = vmatpush1.bf16.msra.mxu0 %v10835_v54 }
 0xf5d   :  { %10854 = vmatprep.subr.bf16.mxu0 %v10837_v12 }
 0xf5f   :  { %8524 = vmatmul.mubr.msk.f32.gmra.mrb[124].mxu0 %vm2088_vm0, %v6191_v14 }
 0xf60   :  { %10856 = vmatpush1.bf16.msra.mxu0 %v10839_v30  ;;  %6287 = vmatprep.mubr.f32.mxu0 %v11532_v13 }
 0xf61   :  { %10858 = vmatprep.subr.bf16.mxu0 %v10841_v27 }
 0xf63   :  { %8525 = vmatmul.mubr.msk.f32.gmra.mrb[126].mxu0 %vm2088_vm0, %v6192_v0 }
 0xf64   :  { %10860 = vmatpush1.bf16.msra.mxu0 %v10843_v63  ;;  %6518 = vmatprep.mubr.f32.mxu0 %v11532_v13 }
 0xf67   :  { %8530 = vmatmul.mubr.msk.f32.vlgmr.msra.gmra.mrb[128].mxu0 %vm2088_vm0, %v6446_v56 }
 0xf68   :  { %6524 = vmatprep.mubr.f32.mxu0 %v11532_v13 }
 0xf6b   :  { %8531 = vmatmul.mubr.msk.f32.gmra.mrb[130].mxu0 %vm2088_vm0, %v6447_v9 }
0x101a   :  { %v10350_v52 = vpop.f32.mrb[112].mxu0 }
0x101b   :  { %v14567_v38 = vadd.f32 %v10350_v52, %v5566_v62  ;;  %v5688_v29 = vpop.f32.mrb[113].mxu0 }
0x101c   :  { %v14569_v6 = vadd.f32 %v5688_v29, %v5561_v61 }
0x101d   :  { %v5747_v16 = vsel %vm4429_vm7, %v14567_v38, 0.0  ;;  %v5769_v17 = vmul.f32 %v14567_v38, %v14567_v38 }
0x101e   :  { %5748 = vadd.xlane.f32.xlu0 %v5747_v16  ;;  %v10353_v19 = vpop.f32.mrb[114].mxu0  ;;  %v5744_v8 = vsel %vm4429_vm7, %v14569_v6, 0.0  ;;  %v5768_v11 = vmul.f32 %v14569_v6, %v14569_v6 }
0x101f   :  { %v5698_v10 = vpop.f32.mrb[115].mxu0  ;;  %5745 = vadd.xlane.f32.xlu1 %v5744_v8  ;;  %v5779_v18 = vsel %vm4429_vm7, %v5769_v17, 0.0  ;;  %v14582_v3 = vadd.f32 %v10353_v19, %v5576_v42  ;;  %v8504_v42 = vld [vmem:[%s15621_s12 + $0x40] sm:$0xff] }
0x1020   :  { %v5776_v37 = vsel %vm4429_vm7, %v5768_v11, 0.0  ;;  %v14591_v5 = vadd.f32 %v5698_v10, %v5571_v47 }
0x1021   :  { %v5753_v34 = vsel %vm4429_vm7, %v14582_v3, 0.0  ;;  %v5771_v46 = vmul.f32 %v14582_v3, %v14582_v3 }
0x1022   :  { %5780 = vadd.xlane.f32.xlu0 %v5779_v18  ;;  %v10356_v49 = vpop.f32.mrb[116].mxu0  ;;  %v5750_v54 = vsel %vm4429_vm7, %v14591_v5, 0.0  ;;  %v5770_v59 = vmul.f32 %v14591_v5, %v14591_v5 }
0x1023   :  { %v14580_v51 = vadd.f32 %v10356_v49, %v5586_v2  ;;  %v5708_v57 = vpop.f32.mrb[117].mxu0  ;;  %v5785_v30 = vsel %vm4429_vm7, %v5771_v46, 0.0 }
0x1024   :  { %v14637_v15 = vadd.f32 %v5708_v57, %v5581_v48  ;;  %v5782_v7 = vsel %vm4429_vm7, %v5770_v59, 0.0 }
0x1025   :  { %v5759_v24 = vsel %vm4429_vm7, %v14580_v51, 0.0 }
0x1026   :  { %v14587_v35 = vpop.f32.mrb[118].mxu0  ;;  %5777 = vadd.xlane.f32.xlu0 %v5776_v37  ;;  %5760 = vadd.xlane.f32.xlu1 %v5759_v24  ;;  %v5756_v52 = vsel %vm4429_vm7, %v14637_v15, 0.0  ;;  %v5773_v37 = vmul.f32 %v14580_v51, %v14580_v51  ;;  %v5591_v24 = vpop.permute.xlu0 %5590 }
0x1027   :  { %v14589_v22 = vpop.f32.mrb[119].mxu0 }
0x102a   :  { %5754 = vadd.xlane.f32.xlu0 %v5753_v34  ;;  %v14595_v58 = vpop.f32.mrb[120].mxu0  ;;  %v5791_v34 = vsel %vm4429_vm7, %v5773_v37, 0.0 }
0x102b   :  { %v6315_v20 = vmul.f32 %v14595_v58, %v14595_v58  ;;  %v14599_v28 = vpop.f32.mrb[121].mxu0 }
0x102c   :  { %v14603_v21 = vadd.f32 %v14599_v28, %v14595_v58  ;;  %v6316_v60 = vmul.f32 %v14599_v28, %v14599_v28 }
0x102e   :  { %5751 = vadd.xlane.f32.xlu0 %v5750_v54  ;;  %v14611_v41 = vpop.f32.mrb[122].mxu0  ;;  %v6323_v33 = vadd.f32 %v6316_v60, %v6315_v20  ;;  %v5772_v20 = vmul.f32 %v14637_v15, %v14637_v15  ;;  %v5596_v60 = vpop.permute.xlu0 %5595 }
0x102f   :  { %v6317_v12 = vmul.f32 %v14611_v41, %v14611_v41  ;;  %v14615_v4 = vpop.f32.mrb[123].mxu0  ;;  %v14681_v54 = vadd.f32 %v14587_v35, %v5596_v60 }
0x1030   :  { %v6306_v25 = vadd.f32 %v14615_v4, %v14611_v41  ;;  %v6318_v32 = vmul.f32 %v14615_v4, %v14615_v4  ;;  %v5788_v46 = vsel %vm4429_vm7, %v5772_v20, 0.0 }
0x1031   :  { %v5775_v59 = vmul.f32 %v14681_v54, %v14681_v54 }
0x1032   :  { %5786 = vadd.xlane.f32.xlu0 %v5785_v30  ;;  %v14624_v43 = vpop.f32.mrb[124].mxu0  ;;  %v6326_v55 = vadd.f32 %v6318_v32, %v6317_v12  ;;  %v14685_v12 = vadd.f32 %v14589_v22, %v5591_v24  ;;  %v5765_v32 = vsel %vm4429_vm7, %v14681_v54, 0.0 }
0x1033   :  { %v6319_v27 = vmul.f32 %v14624_v43, %v14624_v43  ;;  %v14628_v40 = vpop.f32.mrb[125].mxu0  ;;  %v5797_v35 = vsel %vm4429_vm7, %v5775_v59, 0.0 }
0x1034   :  { %v6309_v39 = vadd.f32 %v14628_v40, %v14624_v43  ;;  %v6320_v63 = vmul.f32 %v14628_v40, %v14628_v40  ;;  %v5762_v30 = vsel %vm4429_vm7, %v14685_v12, 0.0 }
0x1036   :  { %5783 = vadd.xlane.f32.xlu0 %v5782_v7  ;;  %v14640_v14 = vpop.f32.mrb[126].mxu0  ;;  %v6329_v0 = vadd.f32 %v6320_v63, %v6319_v27  ;;  %v5774_v27 = vmul.f32 %v14685_v12, %v14685_v12  ;;  %v8509_v63 = vld [vmem:[%s15621_s12 + $0x68] sm:$0xff] }
0x1037   :  { %5876 = vperm.xlu1 %11331, %v5729_v36   ;;  %v6321_v56 = vmul.f32 %v14640_v14, %v14640_v14  ;;  %v14644_v9 = vpop.f32.mrb[127].mxu0  ;;  %v5730_v36 = vld [vmem:[%s15621_s12 + $0x18] sm:$0xff]  ;;  %v5732_v7 = vld [vmem:[%s15621_s12 + $0x28] sm:$0xff] }
0x1038   :  { %v6312_v61 = vadd.f32 %v14644_v9, %v14640_v14  ;;  %v6322_v62 = vmul.f32 %v14644_v9, %v14644_v9  ;;  %v5794_v22 = vsel %vm4429_vm7, %v5774_v27, 0.0 }
0x103a   :  { %5757 = vadd.xlane.f32.xlu0 %v5756_v52  ;;  %v14652_v29 = vpop.f32.mrb[128].mxu0  ;;  %v6332_v48 = vadd.f32 %v6322_v62, %v6321_v56  ;;  %v5733_v56 = vld [vmem:[%s15621_s12 + $0x30] sm:$0xff] }
0x103b   :  { %v6542_v16 = vmul.f32 %v14652_v29, %v14652_v29  ;;  %v14656_v17 = vpop.f32.mrb[129].mxu0 }
0x103c   :  { %v6536_v47 = vadd.f32 %v14656_v17, %v14652_v29  ;;  %v6543_v19 = vmul.f32 %v14656_v17, %v14656_v17 }
0x103e   :  { %v14662_v8 = vpop.f32.mrb[130].mxu0  ;;  %v6546_v10 = vadd.f32 %v6543_v19, %v6542_v16 }
0x103f   :  { %v6544_v18 = vmul.f32 %v14662_v8, %v14662_v8  ;;  %v14666_v11 = vpop.f32.mrb[131].mxu0 }
0x1040   :  { %v6539_v2 = vadd.f32 %v14666_v11, %v14662_v8  ;;  %v6545_v49 = vmul.f32 %v14666_v11, %v14666_v11 }
0x1042   :  { %v6549_v57 = vadd.f32 %v6545_v49, %v6544_v18 }
0x1050   :  { %5942 = vperm.xlu0 %11332, %v8504_v42  }
0x105b   :  { %5792 = vadd.xlane.f32.xlu1 %v5791_v34 }
0x105f   :  { %5789 = vadd.xlane.f32.xlu1 %v5788_v46 }
0x1063   :  { %5766 = vadd.xlane.f32.xlu1 %v5765_v32 }
0x1067   :  { %5763 = vadd.xlane.f32.xlu1 %v5762_v30 }
0x106b   :  { %5798 = vadd.xlane.f32.xlu1 %v5797_v35 }
0x106f   :  { %6304 = vadd.xlane.f32.xlu0 %v14603_v21  ;;  %5795 = vadd.xlane.f32.xlu1 %v5794_v22  ;;  %v8505_v21 = vld [vmem:[%s15621_s12 + $0x48] sm:$0xff] }
0x1073   :  { %6324 = vadd.xlane.f32.xlu0 %v6323_v33  ;;  %6310 = vadd.xlane.f32.xlu1 %v6309_v39  ;;  %v8507_v33 = vld [vmem:[%s15621_s12 + $0x58] sm:$0xff]  ;;  %v5731_v39 = vld [vmem:[%s15621_s12 + $0x20] sm:$0xff] }
0x1077   :  { %6307 = vadd.xlane.f32.xlu0 %v6306_v25  ;;  %6330 = vadd.xlane.f32.xlu1 %v6329_v0  ;;  %v8506_v25 = vld [vmem:[%s15621_s12 + $0x50] sm:$0xff]  ;;  %v14722_v0 = vpop.permute.xlu1 %5866 }
0x107b   :  { %6327 = vadd.xlane.f32.xlu0 %v6326_v55  ;;  %6313 = vadd.xlane.f32.xlu1 %v6312_v61  ;;  %v8508_v55 = vld [vmem:[%s15621_s12 + $0x60] sm:$0xff]  ;;  %v14727_v61 = vpop.permute.xlu1 %5871 }
0x107f   :  { %6537 = vadd.xlane.f32.xlu0 %v6536_v47  ;;  %6333 = vadd.xlane.f32.xlu1 %v6332_v48 }
0x1083   :  { %6547 = vadd.xlane.f32.xlu0 %v6546_v10  ;;  %6540 = vadd.xlane.f32.xlu1 %v6539_v2 }
0x1087   :  { %6550 = vadd.xlane.f32.xlu1 %v6549_v57 }
0x1098   :  { %5881 = vperm.xlu1 %11331, %v5730_v36  }
0x1099   :  { %5947 = vperm.xlu0 %11332, %v8505_v21  }
0x109c   :  { %5957 = vperm.xlu1 %11331, %v8507_v33  }
0x109d   :  { %5952 = vperm.xlu0 %11332, %v8506_v25  }
0x10a0   :  { %5962 = vperm.xlu1 %11331, %v8508_v55  }
0x10a1   :  { %5886 = vperm.xlu0 %11332, %v5731_v39  }
0x10a4   :  { %5967 = vperm.xlu1 %11331, %v8509_v63  }
0x10a5   :  { %5891 = vperm.xlu0 %11332, %v5732_v7  }
0x10a9   :  { %5896 = vperm.xlu0 %11332, %v5733_v56  }
0x10ab   :  { %v5749_v62 = vpop.xlane.xlu0 %5748 }
0x10ac   :  { %v5746_v52 = vpop.xlane.xlu1 %5745 }
0x10af   :  { %v5781_v48 = vpop.xlane.xlu0 %5780 }
0x10b3   :  { %v5778_v16 = vpop.xlane.xlu0 %5777  ;;  %v5761_v47 = vpop.xlane.xlu1 %5760 }
0x10b4   :  { %v5801_v19 = vadd.f32 %v5761_v47, %v5749_v62 }
0x10b6   :  { %v5809_v10 = vmul.f32 0.125, %v5801_v19  ;;  %v8510_v19 = vld [vmem:[%s15621_s12 + $0x70] sm:$0xff] }
0x10b7   :  { %v5755_v18 = vpop.xlane.xlu0 %5754  ;;  %v14729_v34 = vpop.permute.xlu1 %5876 }
0x10b8   :  { %5843 = vperm.xlu1 %11331, %v5809_v10   ;;  %v5817_v46 = vmul.f32 %v5809_v10, %v5809_v10 }
0x10bb   :  { %v5752_v2 = vpop.xlane.xlu0 %5751 }
0x10bf   :  { %v5787_v49 = vpop.xlane.xlu0 %5786 }
0x10c3   :  { %v5784_v57 = vpop.xlane.xlu0 %5783 }
0x10c7   :  { %v5758_v42 = vpop.xlane.xlu0 %5757 }
0x10c8   :  { %v5800_v37 = vadd.f32 %v5758_v42, %v5746_v52 }
0x10ca   :  { %v5808_v24 = vmul.f32 0.125, %v5800_v37 }
0x10cc   :  { %5838 = vperm.xlu0 %11332, %v5808_v24   ;;  %v5816_v27 = vmul.f32 %v5808_v24, %v5808_v24 }
0x10e8   :  { %v5793_v20 = vpop.xlane.xlu1 %5792 }
0x10e9   :  { %v5805_v60 = vadd.f32 %v5793_v20, %v5781_v48  ;;  %v14731_v48 = vpop.permute.xlu0 %5942 }
0x10eb   :  { %v5813_v32 = vmul.f32 0.125, %v5805_v60 }
0x10ec   :  { %v5790_v30 = vpop.xlane.xlu1 %5789 }
0x10ed   :  { %v5821_v59 = vsub.f32 %v5813_v32, %v5817_v46  ;;  %v5804_v35 = vadd.f32 %v5790_v30, %v5778_v16 }
0x10ef   :  { %v5825_v22 = vmax.f32 %v5821_v59, 0.0  ;;  %v5812_v36 = vmul.f32 0.125, %v5804_v35 }
0x10f0   :  { %v5767_v21 = vpop.xlane.xlu1 %5766 }
0x10f1   :  { %v5829_v33 = vadd.f32 1e-05, %v5825_v22  ;;  %v5820_v25 = vsub.f32 %v5812_v36, %v5816_v27  ;;  %v5803_v55 = vadd.f32 %v5767_v21, %v5755_v18 }
0x10f3   :  { %11374 = vrsqrt.f32 %v5829_v33  ;;  %v5824_v39 = vmax.f32 %v5820_v25, 0.0  ;;  %v5811_v63 = vmul.f32 0.125, %v5803_v55 }
0x10f4   :  { %v5764_v7 = vpop.xlane.xlu1 %5763 }
0x10f5   :  { %v5828_v56 = vadd.f32 1e-05, %v5824_v39  ;;  %v5802_v62 = vadd.f32 %v5764_v7, %v5752_v2  ;;  %5853 = vperm.xlu1 %11331, %v5811_v63   ;;  %v5819_v10 = vmul.f32 %v5811_v63, %v5811_v63  ;;  %v8511_v2 = vld [vmem:[%s15621_s12 + $0x78] sm:$0xff] }
0x10f7   :  { %11376 = vrsqrt.f32 %v5828_v56  ;;  %v5810_v52 = vmul.f32 0.125, %v5802_v62 }
0x10f8   :  { %v5799_v47 = vpop.xlane.xlu1 %5798 }
0x10f9   :  { %v5807_v16 = vadd.f32 %v5799_v47, %v5787_v49  ;;  %5848 = vperm.xlu1 %11331, %v5810_v52   ;;  %v5818_v46 = vmul.f32 %v5810_v52, %v5810_v52  ;;  %v6004_v47 = vld [vmem:[%s15624_s13] sm:$0xff] }
0x10fb   :  { %v5815_v18 = vmul.f32 0.125, %v5807_v16  ;;  %v6006_v16 = vcombine.high %v6004_v47, %v6004_v47 }
0x10fc   :  { %v6305_v42 = vpop.xlane.xlu0 %6304  ;;  %v5796_v37 = vpop.xlane.xlu1 %5795 }
0x10fd   :  { %v11375_v24 = vpop.eup %11374  ;;  %v5823_v20 = vsub.f32 %v5815_v18, %v5819_v10  ;;  %v5806_v60 = vadd.f32 %v5796_v37, %v5784_v57  ;;  %5972 = vperm.xlu1 %11331, %v8510_v19   ;;  %v5734_v57 = vld [vmem:[%s15621_s12 + $0x38] sm:$0xff]  ;;  %8512 = vmatprep.subr.msk.mxu1 %vm6031_vm9, %v6006_v16  ;;  %v6295_v16 = vld [vmem:[%s15626_s15 + $0x8] sm:$0xff] }
0x10fe   :  { %5919 = vperm.xlu0 %11332, %v11375_v24   ;;  %8513 = vmatpush1.msk.msra.mxu1 %vm6031_vm9, %v6004_v47 }
0x10ff   :  { %v5827_v49 = vmax.f32 %v5823_v20, 0.0  ;;  %v5814_v32 = vmul.f32 0.125, %v5806_v60 }
0x1100   :  { %v6325_v30 = vpop.xlane.xlu0 %6324  ;;  %v6311_v59 = vpop.xlane.xlu1 %6310 }
0x1101   :  { %v11377_v35 = vpop.eup %11376  ;;  %v5831_v27 = vadd.f32 1e-05, %v5827_v49  ;;  %v5822_v22 = vsub.f32 %v5814_v32, %v5818_v46  ;;  %v6335_v36 = vadd.f32 %v6311_v59, %v6305_v42  ;;  %5977 = vperm.xlu1 %11331, %v8511_v2   ;;  %v6294_v59 = vld [vmem:[%s15626_s15] sm:$0xff] }
0x1102   :  { %5914 = vperm.xlu0 %11332, %v11377_v35  }
0x1103   :  { %11378 = vrsqrt.f32 %v5831_v27  ;;  %v5826_v21 = vmax.f32 %v5822_v22, 0.0  ;;  %v6340_v39 = vmul.f32 0.001953125, %v6335_v36 }
0x1104   :  { %v6308_v33 = vpop.xlane.xlu0 %6307  ;;  %v6331_v25 = vpop.xlane.xlu1 %6330 }
0x1105   :  { %v5830_v55 = vadd.f32 1e-05, %v5826_v21  ;;  %v6337_v63 = vadd.f32 %v6331_v25, %v6325_v30  ;;  %v6344_v52 = vmul.f32 %v6340_v39, %v6340_v39  ;;  %v6531_v30 = vld [vmem:[%s15625_s17] sm:$0xff]  ;;  %v6532_v25 = vld [vmem:[%s15625_s17 + $0x8] sm:$0xff] }
0x1106   :  { %5901 = vperm.xlu0 %11332, %v5734_v57  }
0x1107   :  { %11380 = vrsqrt.f32 %v5830_v55  ;;  %v6342_v7 = vmul.f32 0.001953125, %v6337_v63  ;;  %v8532_v55 = vld [vmem:[%s15625_s17 + $0x10] sm:$0xff] }
0x1108   :  { %v6328_v56 = vpop.xlane.xlu0 %6327  ;;  %v6314_v62 = vpop.xlane.xlu1 %6313 }
0x1109   :  { %v6346_v19 = vsub.f32 %v6342_v7, %v6344_v52  ;;  %v6336_v60 = vadd.f32 %v6314_v62, %v6308_v33  ;;  %v6296_v62 = vld [vmem:[%s15626_s15 + $0x10] sm:$0xff] }
0x110b   :  { %v6348_v37 = vmax.f32 %v6346_v19, 0.0  ;;  %v6341_v22 = vmul.f32 0.001953125, %v6336_v60 }
0x110c   :  { %v6334_v10 = vpop.xlane.xlu1 %6333  ;;  %v6538_v42 = vpop.xlane.xlu0 %6537 }
0x110d   :  { %v11379_v18 = vpop.eup %11378  ;;  %v6350_v46 = vadd.f32 1e-05, %v6348_v37  ;;  %v6338_v49 = vadd.f32 %v6334_v10, %v6328_v56 }
0x110e   :  { %5929 = vperm.xlu1 %11331, %v11379_v18   ;;  %v8533_v18 = vld [vmem:[%s15625_s17 + $0x18] sm:$0xff] }
0x110f   :  { %11382 = vrsqrt.f32 %v6350_v46  ;;  %v6343_v21 = vmul.f32 0.001953125, %v6338_v49  ;;  %v8529_v46 = vld [vmem:[%s15626_s15 + $0x38] sm:$0xff] }
0x1110   :  { %v6541_v24 = vpop.xlane.xlu1 %6540  ;;  %v6548_v35 = vpop.xlane.xlu0 %6547 }
0x1111   :  { %v11381_v20 = vpop.eup %11380  ;;  %v6552_v2 = vadd.f32 %v6541_v24, %v6538_v42  ;;  %v6297_v42 = vld [vmem:[%s15626_s15 + $0x18] sm:$0xff]  ;;  %v8528_v24 = vld [vmem:[%s15626_s15 + $0x30] sm:$0xff] }
0x1112   :  { %5924 = vperm.xlu0 %11332, %v11381_v20   ;;  %6356 = vperm.xlu1 %11331, %v6340_v39   ;;  %v6345_v39 = vmul.f32 %v6341_v22, %v6341_v22  ;;  %v8526_v20 = vld [vmem:[%s15626_s15 + $0x20] sm:$0xff] }
0x1113   :  { %v6554_v32 = vmul.f32 0.001953125, %v6552_v2  ;;  %v8527_v2 = vld [vmem:[%s15626_s15 + $0x28] sm:$0xff] }
0x1114   :  { %v6551_v27 = vpop.xlane.xlu1 %6550  ;;  %v6347_v7 = vsub.f32 %v6343_v21, %v6345_v39 }
0x1115   :  { %v6553_v36 = vadd.f32 %v6551_v27, %v6548_v35  ;;  %v6556_v57 = vmul.f32 %v6554_v32, %v6554_v32 }
0x1116   :  { %6572 = vperm.xlu0 %11332, %v6531_v30   ;;  %6374 = vperm.xlu1 %11331, %v6294_v59   ;;  %v6349_v47 = vmax.f32 %v6347_v7, 0.0 }
0x1117   :  { %v6555_v33 = vmul.f32 0.001953125, %v6553_v36 }
0x1118   :  { %v6351_v10 = vadd.f32 1e-05, %v6349_v47  ;;  %v5948_v49 = vpop.permute.xlu0 %5947 }
0x1119   :  { %v6557_v63 = vsub.f32 %v6555_v33, %v6556_v57  ;;  %v11383_v19 = vpop.eup %11382 }
0x111a   :  { %6577 = vperm.xlu0 %11332, %v6532_v25   ;;  %6595 = vperm.xlu1 %11331, %v8532_v55  }
0x111b   :  { %v6558_v56 = vmax.f32 %v6557_v63, 0.0 }
0x111c   :  { %v5953_v30 = vpop.permute.xlu0 %5952 }
0x111d   :  { %v6559_v52 = vadd.f32 1e-05, %v6558_v56 }
0x111e   :  { %6384 = vperm.xlu1 %11331, %v6296_v62   ;;  %6361 = vperm.xlu0 %11332, %v6341_v22  }
0x111f   :  { %11384 = vrsqrt.f32 %v6559_v52 }
0x1120   :  { %11386 = vrsqrt.f32 %v6351_v10  ;;  %v5887_v35 = vpop.permute.xlu0 %5886 }
0x1122   :  { %6402 = vperm.xlu1 %11331, %v11383_v19   ;;  %6379 = vperm.xlu0 %11332, %v6295_v16  }
0x1124   :  { %v5892_v22 = vpop.permute.xlu0 %5891 }
0x1126   :  { %6600 = vperm.xlu1 %11331, %v8533_v18   ;;  %6563 = vperm.xlu0 %11332, %v6554_v32   ;;  %v5882_v32 = vpop.permute.xlu1 %5881 }
0x1128   :  { %v5897_v57 = vpop.permute.xlu0 %5896 }
0x1129   :  { %v11385_v37 = vpop.eup %11384 }
0x112a   :  { %6389 = vperm.xlu1 %11331, %v6297_v42   ;;  %6586 = vperm.xlu0 %11332, %v11385_v37   ;;  %v11387_v60 = vpop.eup %11386  ;;  %v5958_v59 = vpop.permute.xlu1 %5957 }
0x112e   :  { %6430 = vperm.xlu1 %11331, %v8528_v24   ;;  %6420 = vperm.xlu0 %11332, %v8526_v20   ;;  %v5963_v27 = vpop.permute.xlu1 %5962 }
0x1132   :  { %6407 = vperm.xlu0 %11332, %v11387_v60   ;;  %v5968_v36 = vpop.permute.xlu1 %5967 }
0x1136   :  { %6425 = vperm.xlu0 %11332, %v8527_v2  }
0x1137   :  { %v5844_v21 = vpop.permute.xlu1 %5843 }
0x1138   :  { %v5857_v55 = vsub.f32 %v14567_v38, %v5844_v21 }
0x113a   :  { %6435 = vperm.xlu0 %11332, %v8529_v46   ;;  %v5905_v56 = vmul.f32 %v14727_v61, %v5857_v55 }
0x114b   :  { %v5839_v25 = vpop.permute.xlu0 %5838 }
0x114c   :  { %v5856_v39 = vsub.f32 %v14569_v6, %v5839_v25  ;;  %v5860_v2 = vsub.f32 %v14637_v15, %v5839_v25 }
0x114e   :  { %v5904_v52 = vmul.f32 %v14722_v0, %v5856_v39  ;;  %v5908_v55 = vmul.f32 %v5887_v35, %v5860_v2 }
0x1174   :  { %v5854_v33 = vpop.permute.xlu1 %5853 }
0x1175   :  { %v5859_v6 = vsub.f32 %v14582_v3, %v5854_v33 }
0x1178   :  { %v5849_v63 = vpop.permute.xlu1 %5848 }
0x1179   :  { %v5858_v0 = vsub.f32 %v14591_v5, %v5849_v63  ;;  %v5862_v15 = vsub.f32 %v14685_v12, %v5849_v63 }
0x117c   :  { %v5973_v19 = vpop.permute.xlu1 %5972 }
0x117d   :  { %v5920_v7 = vpop.permute.xlu0 %5919 }
0x117e   :  { %v5933_v62 = vmul.f32 %v5920_v7, %v5905_v56 }
0x1180   :  { %v5981_v10 = vadd.f32 %v5948_v49, %v5933_v62  ;;  %v5978_v24 = vpop.permute.xlu1 %5977  ;;  %v5861_v49 = vsub.f32 %v14580_v51, %v5844_v21 }
0x1181   :  { %v5915_v47 = vpop.permute.xlu0 %5914 }
0x1182   :  { %v5932_v16 = vmul.f32 %v5915_v47, %v5904_v52  ;;  %v5989_v37 = vadd.f32 %v5981_v10, %v14249_v23  ;;  %v5906_v23 = vmul.f32 %v14729_v34, %v5858_v0  ;;  %v5936_v39 = vmul.f32 %v5915_v47, %v5908_v55 }
0x1183   :  { %v5909_v52 = vmul.f32 %v5892_v22, %v5861_v49 }
0x1184   :  { %v5980_v18 = vadd.f32 %v14731_v48, %v5932_v16  ;;  %v5997_v61 = vmax.f32 %v5989_v37, 0.0  ;;  %v5907_v48 = vmul.f32 %v5882_v32, %v5859_v6  ;;  %v5984_v34 = vadd.f32 %v5963_v27, %v5936_v39 }
0x1185   :  { %v5902_v20 = vpop.permute.xlu0 %5901  ;;  %v5937_v10 = vmul.f32 %v5920_v7, %v5909_v52  ;;  %v5910_v37 = vmul.f32 %v5897_v57, %v5862_v15 }
0x1186   :  { %v5988_v42 = vadd.f32 %v5980_v18, %v14247_v26  ;;  %v5992_v22 = vadd.f32 %v5984_v34, %v14265_v1 }
0x1187   :  { %v5985_v12 = vadd.f32 %v5968_v36, %v5937_v10 }
0x1188   :  { %v5996_v38 = vmax.f32 %v5988_v42, 0.0 }
0x1189   :  { %v5993_v7 = vadd.f32 %v5985_v12, %v14267_v44 }
0x118a   :  { %8514 = vmatmul.mubr.msk.f32.vlgmr.msra.gmra.mrb[112].mxu1 %vm4429_vm7, %v5996_v38 }
0x118b   :  { %6106 = vmatprep.mubr.f32.mxu1 %v11532_v13  ;;  %v6001_v38 = vmax.f32 %v5993_v7, 0.0 }
0x118d   :  { %v5930_v60 = vpop.permute.xlu1 %5929 }
0x118e   :  { %8515 = vmatmul.mubr.msk.f32.gmra.mrb[114].mxu1 %vm4429_vm7, %v5997_v61  ;;  %v5935_v26 = vmul.f32 %v5930_v60, %v5907_v48 }
0x118f   :  { %6112 = vmatprep.mubr.f32.mxu1 %v11532_v13 }
0x1190   :  { %v5983_v56 = vadd.f32 %v5958_v59, %v5935_v26 }
0x1191   :  { %v5925_v3 = vpop.permute.xlu0 %5924  ;;  %v14796_v46 = vpop.permute.xlu1 %6356 }
0x1192   :  { %v5934_v5 = vmul.f32 %v5925_v3, %v5906_v23  ;;  %v5991_v18 = vadd.f32 %v5983_v56, %v14259_v31  ;;  %v5938_v59 = vmul.f32 %v5925_v3, %v5910_v37 }
0x1194   :  { %v5982_v62 = vadd.f32 %v5953_v30, %v5934_v5  ;;  %v5863_v30 = vsub.f32 %v14681_v54, %v5854_v33  ;;  %v5999_v21 = vmax.f32 %v5991_v18, 0.0  ;;  %v5986_v57 = vadd.f32 %v5973_v19, %v5938_v59 }
0x1195   :  { %v6573_v32 = vpop.permute.xlu0 %6572  ;;  %v14800_v25 = vpop.permute.xlu1 %6374  ;;  %v6000_v54 = vmax.f32 %v5992_v22, 0.0 }
0x1196   :  { %v5990_v16 = vadd.f32 %v5982_v62, %v14257_v53  ;;  %v5911_v53 = vmul.f32 %v5902_v20, %v5863_v30  ;;  %v5994_v36 = vadd.f32 %v5986_v57, %v14271_v45  ;;  %v6365_v45 = vsub.f32 %v14599_v28, %v14796_v46 }
0x1198   :  { %v5998_v42 = vmax.f32 %v5990_v16, 0.0  ;;  %v5939_v31 = vmul.f32 %v5930_v60, %v5911_v53  ;;  %v6002_v2 = vmax.f32 %v5994_v36, 0.0 }
0x1199   :  { %v6578_v51 = vpop.permute.xlu0 %6577  ;;  %v6596_v35 = vpop.permute.xlu1 %6595 }
0x119a   :  { %8516 = vmatmul.mubr.msk.f32.gmra.mrb[116].mxu1 %vm4429_vm7, %v5998_v42  ;;  %v5987_v1 = vadd.f32 %v5978_v24, %v5939_v31  ;;  %v6369_v24 = vsub.f32 %v14628_v40, %v14796_v46  ;;  %v6368_v40 = vsub.f32 %v14624_v43, %v14796_v46 }
0x119b   :  { %6118 = vmatprep.mubr.f32.mxu1 %v11532_v13 }
0x119c   :  { %v5995_v60 = vadd.f32 %v5987_v1, %v14273_v50  ;;  %v6393_v50 = vmul.f32 %v14800_v25, %v6365_v45 }
0x119d   :  { %v14808_v63 = vpop.permute.xlu0 %6361  ;;  %v6385_v27 = vpop.permute.xlu1 %6384 }
0x119e   :  { %8517 = vmatmul.mubr.msk.f32.gmra.mrb[118].mxu1 %vm4429_vm7, %v5999_v21  ;;  %v6397_v3 = vmul.f32 %v6385_v27, %v6369_v24  ;;  %v6003_v55 = vmax.f32 %v5995_v60, 0.0  ;;  %v6396_v52 = vmul.f32 %v6385_v27, %v6368_v40  ;;  %v11468_v24 = vld [vmem:[%s15680_s29 + $0x18] sm:$0xff] }
0x119f   :  { %6124 = vmatprep.mubr.f32.mxu1 %v11532_v13 }
0x11a1   :  { %v14813_v33 = vpop.permute.xlu0 %6379  ;;  %v6403_v47 = vpop.permute.xlu1 %6402 }
0x11a2   :  { %8518 = vmatmul.mubr.msk.f32.gmra.mrb[120].mxu1 %vm4429_vm7, %v6000_v54  ;;  %v6411_v56 = vmul.f32 %v6403_v47, %v6393_v50  ;;  %v6415_v62 = vmul.f32 %v6403_v47, %v6397_v3  ;;  %v6414_v37 = vmul.f32 %v6403_v47, %v6396_v52  ;;  %v11469_v3 = vld [vmem:[%s15680_s29 + $0x20] sm:$0xff] }
0x11a3   :  { %6130 = vmatprep.mubr.f32.mxu1 %v11532_v13 }
0x11a5   :  { %v6564_v6 = vpop.permute.xlu0 %6563  ;;  %v6601_v0 = vpop.permute.xlu1 %6600 }
0x11a6   :  { %v6566_v19 = vsub.f32 %v14652_v29, %v6564_v6  ;;  %v6567_v61 = vsub.f32 %v14656_v17, %v6564_v6  ;;  %v6568_v44 = vsub.f32 %v14662_v8, %v6564_v6  ;;  %v6569_v20 = vsub.f32 %v14666_v11, %v6564_v6  ;;  %8519 = vmatmul.mubr.msk.f32.gmra.mrb[122].mxu1 %vm4429_vm7, %v6001_v38 }
0x11a7   :  { %6136 = vmatprep.mubr.f32.mxu1 %v11532_v13  ;;  %v6364_v8 = vsub.f32 %v14595_v58, %v14796_v46 }
0x11a8   :  { %v6580_v29 = vmul.f32 %v6573_v32, %v6566_v19  ;;  %v6582_v48 = vmul.f32 %v6578_v51, %v6568_v44  ;;  %v6581_v17 = vmul.f32 %v6573_v32, %v6567_v61  ;;  %v6583_v26 = vmul.f32 %v6578_v51, %v6569_v20  ;;  %v6757_v51 = vld [vmem:[%s15627_s18] sm:$0xff]  ;;  %v11466_v19 = vld [vmem:[%s15680_s29 + $0x8] sm:$0xff]  ;;  %v11467_v20 = vld [vmem:[%s15680_s29 + $0x10] sm:$0xff] }
0x11a9   :  { %v6587_v11 = vpop.permute.xlu0 %6586  ;;  %v6390_v23 = vpop.permute.xlu1 %6389  ;;  %v6392_v32 = vmul.f32 %v14800_v25, %v6364_v8  ;;  %v6366_v25 = vsub.f32 %v14611_v41, %v14808_v63  ;;  %v6370_v41 = vsub.f32 %v14640_v14, %v14808_v63 }
0x11aa   :  { %v6589_v49 = vmul.f32 %v6587_v11, %v6580_v29  ;;  %v6591_v28 = vmul.f32 %v6587_v11, %v6582_v48  ;;  %8520 = vmatmul.mubr.msk.f32.gmra.mrb[124].mxu1 %vm4429_vm7, %v6002_v2  ;;  %v6590_v5 = vmul.f32 %v6587_v11, %v6581_v17  ;;  %v6592_v39 = vmul.f32 %v6587_v11, %v6583_v26 }
0x11ab   :  { %6142 = vmatprep.mubr.f32.mxu1 %v11532_v13  ;;  %v6410_v42 = vmul.f32 %v6403_v47, %v6392_v32  ;;  %v6394_v22 = vmul.f32 %v14813_v33, %v6366_v25  ;;  %v6398_v57 = vmul.f32 %v6390_v23, %v6370_v41  ;;  %v11476_v41 = vld [vmem:[%s15680_s29 + $0x58] sm:$0xff] }
0x11ac   :  { %v14836_v58 = vadd.f32 %v6596_v35, %v6589_v49  ;;  %v14838_v15 = vadd.f32 %v6601_v0, %v6591_v28  ;;  %v6604_v34 = vadd.f32 %v6596_v35, %v6590_v5  ;;  %v14841_v18 = vadd.f32 %v6601_v0, %v6592_v39  ;;  %v11470_v28 = vld [vmem:[%s15680_s29 + $0x28] sm:$0xff]  ;;  %v11471_v5 = vld [vmem:[%s15680_s29 + $0x30] sm:$0xff] }
0x11ad   :  { %v6421_v16 = vpop.permute.xlu0 %6420  ;;  %v6431_v10 = vpop.permute.xlu1 %6430  ;;  %v6367_v35 = vsub.f32 %v14615_v4, %v14808_v63  ;;  %v6371_v4 = vsub.f32 %v14644_v9, %v14808_v63  ;;  %v11465_v63 = vld [vmem:[%s15680_s29] sm:$0xff] }
0x11ae   :  { %v6439_v43 = vadd.f32 %v6421_v16, %v6411_v56  ;;  %v6443_v46 = vadd.f32 %v6431_v10, %v6415_v62  ;;  %8521 = vmatmul.mubr.msk.f32.gmra.mrb[126].mxu1 %vm4429_vm7, %v6003_v55  ;;  %6607 = vmatprep.subr.mxu1 %v6604_v34  ;;  %v6438_v30 = vadd.f32 %v6421_v16, %v6410_v42  ;;  %v11472_v62 = vld [vmem:[%s15680_s29 + $0x38] sm:$0xff] }
0x11af   :  { %6682 = vmatprep.subr.mxu0 %v14841_v18  ;;  %6608 = vmatpush1.xpose.msra.mxu1 %v14836_v58  ;;  %v6442_v59 = vadd.f32 %v6431_v10, %v6414_v37  ;;  %v6395_v21 = vmul.f32 %v14813_v33, %v6367_v35  ;;  %v6399_v7 = vmul.f32 %v6390_v23, %v6371_v4  ;;  %v11474_v35 = vld [vmem:[%s15680_s29 + $0x48] sm:$0xff] }
0x11b0   :  { %6683 = vmatpush1.xpose.msra.mxu0 %v14838_v15  ;;  %6671 = vmatprep.mubr.f32.mxu1 %v6439_v43 }
0x11b1   :  { %6746 = vmatprep.mubr.f32.mxu0 %v6443_v46  ;;  %v6408_v12 = vpop.permute.xlu0 %6407  ;;  %10360 = vmatprep.subr.mxu1 %v6757_v51 }
0x11b2   :  { %6672 = vmatmul.mubr.f32.vlgmr.msra.gmra.mrb[128].mxu1 %v6438_v30  ;;  %v6412_v53 = vmul.f32 %v6408_v12, %v6394_v22  ;;  %v6413_v27 = vmul.f32 %v6408_v12, %v6395_v21  ;;  %v6416_v33 = vmul.f32 %v6408_v12, %v6398_v57  ;;  %v6417_v1 = vmul.f32 %v6408_v12, %v6399_v7  ;;  %v11475_v12 = vld [vmem:[%s15680_s29 + $0x50] sm:$0xff] }
0x11b3   :  { %6747 = vmatmul.mubr.f32.vlgmr.msra.gmra.mrb[132].mxu0 %v6442_v59  ;;  %10361 = vmatpush3.msra.mxu1 %v6757_v51  ;;  %v11473_v51 = vld [vmem:[%s15680_s29 + $0x40] sm:$0xff] }
0x11b4   :  { %7167 = vmatprep.subr.mxu1 %v6604_v34 }
0x11b5   :  { %v6426_v31 = vpop.permute.xlu0 %6425 }
0x11b6   :  { %v6440_v54 = vadd.f32 %v6426_v31, %v6412_v53  ;;  %v6441_v47 = vadd.f32 %v6426_v31, %v6413_v27 }
0x11b8   :  { %6676 = vmatprep.mubr.f32.mxu1 %v6441_v47 }
0x11b9   :  { %v6436_v36 = vpop.permute.xlu0 %6435  ;;  %6677 = vmatmul.mubr.f32.gmra.mrb[130].mxu1 %v6440_v54 }
0x11ba   :  { %v6444_v38 = vadd.f32 %v6436_v36, %v6416_v33  ;;  %v6445_v6 = vadd.f32 %v6436_v36, %v6417_v1  ;;  %v11477_v1 = vld [vmem:[%s15680_s29 + $0x60] sm:$0xff] }
0x11bc   :  { %6751 = vmatprep.mubr.f32.mxu0 %v6445_v6 }
0x11bd   :  { %6752 = vmatmul.mubr.f32.gmra.mrb[134].mxu0 %v6444_v38  ;;  %v11478_v38 = vld [vmem:[%s15680_s29 + $0x68] sm:$0xff] }
0x125d   :  { %v6102_v14 = vpop.f32.mrb[112].mxu1 }
0x125e   :  { %v6104_v9 = vpop.f32.mrb[113].mxu1  ;;  %v6149_v0 = vmul.f32 %v11465_v63, %v6102_v14 }
0x125f   :  { %v6150_v61 = vmul.f32 %v11466_v19, %v6104_v9  ;;  %v11479_v9 = vld [vmem:[%s15680_s29 + $0x70] sm:$0xff] }
0x1260   :  { %v6165_v29 = vadd.f32 %v11465_v63, %v6149_v0 }
0x1261   :  { %v6108_v44 = vpop.f32.mrb[114].mxu1  ;;  %v6166_v17 = vadd.f32 %v11466_v19, %v6150_v61  ;;  %v11480_v19 = vld [vmem:[%s15680_s29 + $0x78] sm:$0xff] }
0x1262   :  { %v6151_v60 = vmul.f32 %v11467_v20, %v6108_v44  ;;  %v6110_v45 = vpop.f32.mrb[115].mxu1 }
0x1263   :  { %v6152_v2 = vmul.f32 %v11468_v24, %v6110_v45 }
0x1264   :  { %v6167_v48 = vadd.f32 %v11467_v20, %v6151_v60 }
0x1265   :  { %v6168_v26 = vadd.f32 %v11468_v24, %v6152_v2 }
0x1266   :  { %v14872_v8 = vpack.c.bf16 %v6167_v48, %v6165_v29 }
0x1267   :  { %v14874_v11 = vpack.c.bf16 %v6168_v26, %v6166_v17 }
0x126d   :  { %v6114_v23 = vpop.f32.mrb[116].mxu1 }
0x126e   :  { %v6116_v50 = vpop.f32.mrb[117].mxu1  ;;  %v6153_v49 = vmul.f32 %v11469_v3, %v6114_v23 }
0x126f   :  { %v6154_v40 = vmul.f32 %v11470_v28, %v6116_v50 }
0x1270   :  { %v6169_v52 = vadd.f32 %v11469_v3, %v6153_v49 }
0x1271   :  { %v6120_v55 = vpop.f32.mrb[118].mxu1  ;;  %v6170_v10 = vadd.f32 %v11470_v28, %v6154_v40  ;;  %v6928_v28 = vld [vmem:[%s15628_s20] sm:$0xff] }
0x1272   :  { %v6155_v39 = vmul.f32 %v11471_v5, %v6120_v55  ;;  %v6122_v56 = vpop.f32.mrb[119].mxu1  ;;  %10376 = vmatprep.mubr.msk.f32.mxu0 %vm4193_vm2, %v6928_v28 }
0x1273   :  { %v6156_v32 = vmul.f32 %v11472_v62, %v6122_v56 }
0x1274   :  { %v6171_v16 = vadd.f32 %v11471_v5, %v6155_v39 }
0x1275   :  { %v6172_v34 = vadd.f32 %v11472_v62, %v6156_v32  ;;  %v6126_v43 = vpop.f32.mrb[120].mxu1 }
0x1276   :  { %v14888_v46 = vpack.c.bf16 %v6171_v16, %v6169_v52  ;;  %v6128_v42 = vpop.f32.mrb[121].mxu1  ;;  %v6157_v25 = vmul.f32 %v11473_v51, %v6126_v43 }
0x1277   :  { %v14890_v37 = vpack.c.bf16 %v6172_v34, %v6170_v10  ;;  %v6158_v30 = vmul.f32 %v11474_v35, %v6128_v42 }
0x1278   :  { %v6173_v53 = vadd.f32 %v11473_v51, %v6157_v25 }
0x1279   :  { %v6132_v59 = vpop.f32.mrb[122].mxu1  ;;  %v6174_v31 = vadd.f32 %v11474_v35, %v6158_v30 }
0x127a   :  { %v6159_v22 = vmul.f32 %v11475_v12, %v6132_v59  ;;  %v6134_v21 = vpop.f32.mrb[123].mxu1 }
0x127b   :  { %v6160_v4 = vmul.f32 %v11476_v41, %v6134_v21 }
0x127c   :  { %v6175_v27 = vadd.f32 %v11475_v12, %v6159_v22 }
0x127d   :  { %v6176_v57 = vadd.f32 %v11476_v41, %v6160_v4  ;;  %v6138_v7 = vpop.f32.mrb[124].mxu1 }
0x127e   :  { %v14904_v54 = vpack.c.bf16 %v6175_v27, %v6173_v53  ;;  %v6140_v47 = vpop.f32.mrb[125].mxu1  ;;  %v6161_v36 = vmul.f32 %v11477_v1, %v6138_v7 }
0x127f   :  { %v14906_v33 = vpack.c.bf16 %v6176_v57, %v6174_v31  ;;  %v6162_v6 = vmul.f32 %v11478_v38, %v6140_v47 }
0x1280   :  { %v6177_v44 = vadd.f32 %v11477_v1, %v6161_v36 }
0x1281   :  { %v6144_v14 = vpop.f32.mrb[126].mxu1  ;;  %v6178_v60 = vadd.f32 %v11478_v38, %v6162_v6 }
0x1282   :  { %v6163_v63 = vmul.f32 %v11479_v9, %v6144_v14  ;;  %v6146_v0 = vpop.f32.mrb[127].mxu1 }
0x1283   :  { %v6164_v61 = vmul.f32 %v11480_v19, %v6146_v0 }
0x1284   :  { %v6179_v20 = vadd.f32 %v11479_v9, %v6163_v63 }
0x1285   :  { %v6180_v45 = vadd.f32 %v11480_v19, %v6164_v61  ;;  %v14922_v2 = vpop.f32.mrb[128].mxu1 }
0x1286   :  { %v14920_v24 = vpack.c.bf16 %v6179_v20, %v6177_v44  ;;  %v14924_v29 = vpop.f32.mrb[132].mxu0  ;;  %v6675_v48 = vpop.f32.mrb[129].mxu1  ;;  %10362 = vmatprep.mubr.msk.f32.mxu1 %vm6758_vm10, %v14922_v2 }
0x1287   :  { %v6750_v17 = vpop.f32.mrb[133].mxu0  ;;  %v14928_v26 = vpack.c.bf16 %v6180_v45, %v6178_v60  ;;  %v8539_v48 = vld [vmem:[%s15629_s19] ss:$0 sm:$0xff] }
0x128c   :  { %v14930_v23 = vpop.f32.mrb[130].mxu1 }
0x128d   :  { %v6680_v50 = vpop.f32.mrb[131].mxu1  ;;  %10363 = vmatmul.mubr.msk.f32.vlgmr.msra.gmra.mrb[132].mxu1 %vm6758_vm10, %v14930_v23 }
0x128e   :  { %7168 = vmatpush1.msra.mxu1 %v14836_v58  ;;  %10365 = vmatprep.mubr.msk.f32.mxu1 %vm6758_vm10, %v14924_v29 }
0x1290   :  { %v14937_v3 = vpop.f32.mrb[134].mxu0 }
0x1291   :  { %v6755_v49 = vpop.f32.mrb[135].mxu0  ;;  %10366 = vmatmul.mubr.msk.f32.gmra.mrb[134].mxu1 %vm6758_vm10, %v14937_v3 }
0x1292   :  { %7231 = vmatprep.mubr.f32.mxu1 %v11532_v13 }
0x1360   :  { %v10364_v40 = vpop.f32.mrb[132].mxu1 }
0x1361   :  { %v6860_v58 = vsel %vm6758_vm10, %v10364_v40, 0.0  ;;  %v6873_v55 = vmul.f32 %v10364_v40, %v10364_v40  ;;  %v6837_v5 = vpop.f32.mrb[133].mxu1 }
0x1362   :  { %v6859_v39 = vsel %vm6758_vm10, %v6837_v5, 0.0  ;;  %v6872_v56 = vmul.f32 %v6837_v5, %v6837_v5 }
0x1363   :  { %v6877_v62 = vsel %vm6758_vm10, %v6873_v55, 0.0  ;;  %v6861_v32 = vadd.f32 %v6860_v58, %v6859_v39  ;;  %v8540_v55 = vld [vmem:[%s15629_s19 + $0x1] ss:$0 sm:$0xff] }
0x1364   :  { %v6876_v52 = vsel %vm6758_vm10, %v6872_v56, 0.0  ;;  %v10367_v16 = vpop.f32.mrb[134].mxu1 }
0x1365   :  { %v6878_v10 = vadd.f32 %v6877_v62, %v6876_v52  ;;  %v6847_v34 = vpop.f32.mrb[135].mxu1  ;;  %v6875_v43 = vmul.f32 %v10367_v16, %v10367_v16  ;;  %v6864_v35 = vsel %vm6758_vm10, %v10367_v16, 0.0 }
0x1366   :  { %v6862_v42 = vsel %vm6758_vm10, %v6847_v34, 0.0  ;;  %v6874_v51 = vmul.f32 %v6847_v34, %v6847_v34 }
0x1367   :  { %v6863_v25 = vadd.f32 %v6862_v42, %v6861_v32  ;;  %v6881_v22 = vsel %vm6758_vm10, %v6875_v43, 0.0 }
0x1368   :  { %v6879_v30 = vsel %vm6758_vm10, %v6874_v51, 0.0 }
0x1369   :  { %v6865_v59 = vadd.f32 %v6864_v35, %v6863_v25  ;;  %v6880_v12 = vadd.f32 %v6879_v30, %v6878_v10  ;;  %v6929_v35 = vld [vmem:[%s15628_s20 + $0x8] sm:$0xff] }
0x136b   :  { %v6866_v21 = vrot.slane %v6865_v59, 4  ;;  %v6882_v41 = vadd.f32 %v6881_v22, %v6880_v12 }
0x136d   :  { %v6867_v4 = vadd.f32 %v6866_v21, %v6865_v59  ;;  %v6883_v53 = vrot.slane %v6882_v41, 4 }
0x136f   :  { %v6868_v27 = vrot.slane %v6867_v4, 2  ;;  %v6884_v31 = vadd.f32 %v6883_v53, %v6882_v41 }
0x1371   :  { %v6869_v57 = vadd.f32 %v6868_v27, %v6867_v4  ;;  %v6885_v7 = vrot.slane %v6884_v31, 2 }
0x1373   :  { %v6870_v47 = vrot.slane %v6869_v57, 1  ;;  %v6886_v1 = vadd.f32 %v6885_v7, %v6884_v31 }
0x1375   :  { %v6871_v36 = vadd.f32 %v6870_v47, %v6869_v57  ;;  %v6887_v38 = vrot.slane %v6886_v1, 1  ;;  %v7029_v47 = vld [vmem:[%s15630_s21] sm:$0xff] }
0x1377   :  { %v6888_v6 = vadd.f32 %v6887_v38, %v6886_v1  ;;  %v6889_v14 = vmul.f32 0.03125, %v6871_v36  ;;  %v7030_v1 = vld [vmem:[%s15630_s21 + $0x8] sm:$0xff]  ;;  %v7031_v36 = vld [vmem:[%s15630_s21 + $0x10] sm:$0xff]  ;;  %v8545_v38 = vld [vmem:[%s15630_s21 + $0x20] sm:$0xff] }
0x1379   :  { %v6890_v9 = vmul.f32 0.03125, %v6888_v6  ;;  %v6891_v63 = vmul.f32 %v6889_v14, %v6889_v14  ;;  %v6898_v0 = vsub.f32 %v6847_v34, %v6889_v14  ;;  %v6896_v19 = vsub.f32 %v6837_v5, %v6889_v14 }
0x137a   :  { %v6897_v61 = vsub.f32 %v10364_v40, %v6889_v14  ;;  %v6899_v44 = vsub.f32 %v10367_v16, %v6889_v14 }
0x137b   :  { %v6892_v20 = vsub.f32 %v6890_v9, %v6891_v63  ;;  %v6908_v17 = vmul.f32 %v8539_v48, %v6898_v0  ;;  %v6906_v50 = vmul.f32 %v8539_v48, %v6896_v19 }
0x137c   :  { %v6907_v49 = vmul.f32 %v8539_v48, %v6897_v61  ;;  %v6909_v28 = vmul.f32 %v8539_v48, %v6899_v44 }
0x137d   :  { %v6893_v60 = vmax.f32 %v6892_v20, 0.0 }
0x137f   :  { %v6894_v45 = vadd.f32 1e-05, %v6893_v60 }
0x1381   :  { %11388 = vrsqrt.f32 %v6894_v45 }
0x138b   :  { %v11389_v58 = vpop.eup %11388 }
0x138c   :  { %v6912_v5 = vmul.f32 %v11389_v58, %v6908_v17  ;;  %v6910_v40 = vmul.f32 %v11389_v58, %v6906_v50  ;;  %v6911_v39 = vmul.f32 %v11389_v58, %v6907_v49  ;;  %v6913_v56 = vmul.f32 %v11389_v58, %v6909_v28 }
0x138e   :  { %v6920_v62 = vadd.f32 %v8540_v55, %v6910_v40  ;;  %v6921_v32 = vadd.f32 %v8540_v55, %v6911_v39  ;;  %v6922_v52 = vadd.f32 %v8540_v55, %v6912_v5  ;;  %v6923_v16 = vadd.f32 %v8540_v55, %v6913_v56  ;;  %v7032_v5 = vld [vmem:[%s15630_s21 + $0x18] sm:$0xff] }
0x1390   :  { %v6924_v10 = vadd.f32 %v6920_v62, %v14922_v2  ;;  %v6925_v34 = vadd.f32 %v6921_v32, %v14930_v23  ;;  %v6926_v43 = vadd.f32 %v6922_v52, %v14924_v29  ;;  %v6927_v42 = vadd.f32 %v6923_v16, %v14937_v3  ;;  %v6930_v2 = vld [vmem:[%s15628_s20 + $0x10] sm:$0xff]  ;;  %v6931_v29 = vld [vmem:[%s15628_s20 + $0x18] sm:$0xff] }
0x1391   :  { %v8547_v32 = vld [vmem:[%s15630_s21 + $0x30] sm:$0xff] }
0x1392   :  { %v10861_v51 = vpack.c.bf16 %v6925_v34, %v6924_v10  ;;  %v10865_v25 = vpack.c.bf16 %v6927_v42, %v6926_v43  ;;  %v8546_v43 = vld [vmem:[%s15630_s21 + $0x28] sm:$0xff]  ;;  %v8548_v42 = vld [vmem:[%s15630_s21 + $0x38] sm:$0xff] }
0x1394   :  { %10862 = vmatprep.subr.bf16.mxu0 %v10861_v51 }
0x1395   :  { %10864 = vmatpush3.bf16.msra.mxu0 %v10861_v51 }
0x1396   :  { %10866 = vmatprep.subr.bf16.mxu0 %v10865_v25 }
0x1399   :  { %10868 = vmatpush3.bf16.msra.mxu0 %v10865_v25 }
0x139a   :  { %7250 = vmatprep.subr.mxu0 %v14841_v18 }
0x139c   :  { %10377 = vmatmul.mubr.msk.f32.vlgmr.msra.gmra.mrb[136].mxu0 %vm4193_vm2, %v6929_v35 }
0x139d   :  { %7251 = vmatpush1.msra.mxu0 %v14838_v15  ;;  %10379 = vmatprep.mubr.msk.f32.mxu0 %vm4193_vm2, %v6930_v2 }
0x13a0   :  { %10380 = vmatmul.mubr.msk.f32.gmra.mrb[138].mxu0 %vm4193_vm2, %v6931_v29 }
0x13a1   :  { %7314 = vmatprep.mubr.f32.mxu0 %v11532_v13 }
0x146f   :  { %v14979_v23 = vpop.f32.mrb[136].mxu0 }
0x1470   :  { %v14981_v18 = vpop.f32.mrb[137].mxu0  ;;  %v7051_v27 = vmul.f32 %v14979_v23, %v14979_v23  ;;  %v7041_v31 = vsel %vm6758_vm10, %v14979_v23, 0.0 }
0x1471   :  { %v7050_v3 = vmul.f32 %v14981_v18, %v14981_v18  ;;  %v7038_v15 = vsel %vm6758_vm10, %v14981_v18, 0.0 }
0x1472   :  { %7039 = vadd.xlane.f32.xlu1 %v7038_v15  ;;  %v7057_v7 = vsel %vm6758_vm10, %v7051_v27, 0.0 }
0x1473   :  { %v7054_v30 = vsel %vm6758_vm10, %v7050_v3, 0.0  ;;  %v14988_v59 = vpop.f32.mrb[138].mxu0 }
0x1474   :  { %7055 = vadd.xlane.f32.xlu0 %v7054_v30  ;;  %v7047_v12 = vsel %vm6758_vm10, %v14988_v59, 0.0  ;;  %v14992_v22 = vpop.f32.mrb[139].mxu0  ;;  %v7053_v53 = vmul.f32 %v14988_v59, %v14988_v59 }
0x1475   :  { %v7052_v21 = vmul.f32 %v14992_v22, %v14992_v22  ;;  %v7044_v41 = vsel %vm6758_vm10, %v14992_v22, 0.0 }
0x1476   :  { %7048 = vadd.xlane.f32.xlu1 %v7047_v12  ;;  %v7063_v57 = vsel %vm6758_vm10, %v7053_v53, 0.0 }
0x1477   :  { %v7060_v4 = vsel %vm6758_vm10, %v7052_v21, 0.0 }
0x1478   :  { %7045 = vadd.xlane.f32.xlu0 %v7044_v41 }
0x147a   :  { %7061 = vadd.xlane.f32.xlu1 %v7060_v4 }
0x147c   :  { %7042 = vadd.xlane.f32.xlu0 %v7041_v31 }
0x147e   :  { %7064 = vadd.xlane.f32.xlu1 %v7063_v57 }
0x1480   :  { %7058 = vadd.xlane.f32.xlu0 %v7057_v7 }
0x148f   :  { %7101 = vperm.xlu1 %11331, %v7029_v47  }
0x1493   :  { %7106 = vperm.xlu1 %11331, %v7030_v1  }
0x1496   :  { %7111 = vperm.xlu0 %11332, %v7031_v36  }
0x1497   :  { %7139 = vperm.xlu1 %11331, %v8545_v38  }
0x14ff   :  { %v7040_v6 = vpop.xlane.xlu1 %7039 }
0x1501   :  { %v7056_v14 = vpop.xlane.xlu0 %7055 }
0x1503   :  { %v7049_v9 = vpop.xlane.xlu1 %7048 }
0x1505   :  { %v7046_v63 = vpop.xlane.xlu0 %7045 }
0x1506   :  { %v7066_v0 = vadd.f32 %v7046_v63, %v7040_v6 }
0x1507   :  { %v7062_v19 = vpop.xlane.xlu1 %7061 }
0x1508   :  { %v7071_v61 = vmul.f32 0.0625, %v7066_v0  ;;  %v7068_v44 = vadd.f32 %v7062_v19, %v7056_v14 }
0x1509   :  { %v7043_v20 = vpop.xlane.xlu0 %7042 }
0x150a   :  { %v7075_v60 = vmul.f32 %v7071_v61, %v7071_v61  ;;  %v7073_v45 = vmul.f32 0.0625, %v7068_v44  ;;  %v7067_v48 = vadd.f32 %v7049_v9, %v7043_v20  ;;  %7087 = vperm.xlu0 %11332, %v7071_v61  }
0x150b   :  { %v7065_v49 = vpop.xlane.xlu1 %7064 }
0x150c   :  { %v7077_v17 = vsub.f32 %v7073_v45, %v7075_v60  ;;  %v7072_v50 = vmul.f32 0.0625, %v7067_v48 }
0x150d   :  { %v7059_v28 = vpop.xlane.xlu0 %7058 }
0x150e   :  { %v7079_v58 = vmax.f32 %v7077_v17, 0.0  ;;  %v7069_v55 = vadd.f32 %v7065_v49, %v7059_v28  ;;  %7092 = vperm.xlu1 %11331, %v7072_v50   ;;  %v7076_v39 = vmul.f32 %v7072_v50, %v7072_v50  ;;  %v7327_v28 = vld [vmem:[%s15631_s22] sm:$0xff] }
0x150f   :  { %v7102_v51 = vpop.permute.xlu1 %7101 }
0x1510   :  { %v7081_v40 = vadd.f32 1e-05, %v7079_v58  ;;  %v7074_v56 = vmul.f32 0.0625, %v7069_v55  ;;  %v7328_v58 = vld [vmem:[%s15631_s22 + $0x8] sm:$0xff]  ;;  %v7329_v55 = vld [vmem:[%s15631_s22 + $0x10] sm:$0xff] }
0x1512   :  { %11390 = vrsqrt.f32 %v7081_v40  ;;  %v7078_v62 = vsub.f32 %v7074_v56, %v7076_v39  ;;  %7116 = vperm.xlu1 %11331, %v7032_v5   ;;  %v7330_v5 = vld [vmem:[%s15631_s22 + $0x18] sm:$0xff]  ;;  %v7331_v40 = vld [vmem:[%s15631_s22 + $0x20] sm:$0xff]  ;;  %v7332_v39 = vld [vmem:[%s15631_s22 + $0x28] sm:$0xff] }
0x1513   :  { %v7107_v25 = vpop.permute.xlu1 %7106  ;;  %v7333_v56 = vld [vmem:[%s15631_s22 + $0x30] sm:$0xff] }
0x1514   :  { %v7080_v52 = vmax.f32 %v7078_v62, 0.0  ;;  %v7334_v62 = vld [vmem:[%s15631_s22 + $0x38] sm:$0xff] }
0x1515   :  { %v7112_v2 = vpop.permute.xlu0 %7111 }
0x1516   :  { %v7082_v16 = vadd.f32 1e-05, %v7080_v52  ;;  %7149 = vperm.xlu1 %11331, %v8547_v32  }
0x1517   :  { %v7140_v35 = vpop.permute.xlu1 %7139 }
0x1518   :  { %11392 = vrsqrt.f32 %v7082_v16 }
0x151c   :  { %v11391_v10 = vpop.eup %11390 }
0x151d   :  { %7125 = vperm.xlu0 %11332, %v11391_v10  }
0x1522   :  { %v11393_v34 = vpop.eup %11392 }
0x1523   :  { %7130 = vperm.xlu0 %11332, %v11393_v34  }
0x1527   :  { %7144 = vperm.xlu0 %11332, %v8546_v43  }
0x152b   :  { %7154 = vperm.xlu0 %11332, %v8548_v42  }
0x1589   :  { %v7088_v3 = vpop.permute.xlu0 %7087 }
0x158a   :  { %v7095_v15 = vsub.f32 %v14981_v18, %v7088_v3  ;;  %v7097_v30 = vsub.f32 %v14992_v22, %v7088_v3 }
0x158c   :  { %v7119_v21 = vmul.f32 %v7102_v51, %v7095_v15  ;;  %v7121_v41 = vmul.f32 %v7112_v2, %v7097_v30 }
0x158d   :  { %v7093_v29 = vpop.permute.xlu1 %7092 }
0x158e   :  { %v7096_v57 = vsub.f32 %v14979_v23, %v7093_v29  ;;  %v7098_v22 = vsub.f32 %v14988_v59, %v7093_v29 }
0x1590   :  { %v7120_v18 = vmul.f32 %v7107_v25, %v7096_v57 }
0x1591   :  { %v7117_v12 = vpop.permute.xlu1 %7116 }
0x1592   :  { %v7122_v6 = vmul.f32 %v7117_v12, %v7098_v22 }
0x1595   :  { %v7150_v31 = vpop.permute.xlu1 %7149 }
0x159c   :  { %v7126_v4 = vpop.permute.xlu0 %7125 }
0x159d   :  { %v7133_v53 = vmul.f32 %v7126_v4, %v7119_v21  ;;  %v7135_v27 = vmul.f32 %v7126_v4, %v7121_v41 }
0x159f   :  { %v7157_v7 = vadd.f32 %v7140_v35, %v7133_v53  ;;  %v7159_v47 = vadd.f32 %v7150_v31, %v7135_v27 }
0x15a1   :  { %8549 = vmatmul.mubr.msk.f32.vlgmr.msra.gmra.mrb[136].mxu1 %vm6758_vm10, %v7157_v7  ;;  %8551 = vmatmul.mubr.msk.f32.vlgmr.msra.gmra.mrb[140].mxu0 %vm6758_vm10, %v7159_v47 }
0x15a2   :  { %v7131_v1 = vpop.permute.xlu0 %7130  ;;  %7237 = vmatprep.mubr.f32.mxu1 %v11532_v13  ;;  %7320 = vmatprep.mubr.f32.mxu0 %v11532_v13 }
0x15a3   :  { %v7134_v36 = vmul.f32 %v7131_v1, %v7120_v18  ;;  %v7136_v9 = vmul.f32 %v7131_v1, %v7122_v6 }
0x15a6   :  { %v7145_v38 = vpop.permute.xlu0 %7144 }
0x15a7   :  { %v7158_v14 = vadd.f32 %v7145_v38, %v7134_v36 }
0x15a9   :  { %8550 = vmatmul.mubr.msk.f32.gmra.mrb[138].mxu1 %vm6758_vm10, %v7158_v14 }
0x15aa   :  { %v7155_v23 = vpop.permute.xlu0 %7154  ;;  %7423 = vmatprep.mubr.f32.mxu1 %v11532_v13 }
0x15ab   :  { %v7160_v63 = vadd.f32 %v7155_v23, %v7136_v9 }
0x15ad   :  { %8552 = vmatmul.mubr.msk.f32.gmra.mrb[142].mxu0 %vm6758_vm10, %v7160_v63 }
0x15ae   :  { %7901 = vmatprep.mubr.f32.mxu0 %v11532_v13 }
0x1674   :  { %v7233_v0 = vpop.f32.mrb[136].mxu1  ;;  %v7316_v19 = vpop.f32.mrb[140].mxu0 }
0x1675   :  { %v7235_v61 = vpop.f32.mrb[137].mxu1  ;;  %v7318_v44 = vpop.f32.mrb[141].mxu0 }
0x167c   :  { %v7239_v59 = vpop.f32.mrb[138].mxu1 }
0x167d   :  { %v10871_v20 = vpack.c.bf16 %v7239_v59, %v7233_v0  ;;  %v7241_v60 = vpop.f32.mrb[139].mxu1 }
0x167e   :  { %v10869_v45 = vpack.c.bf16 %v7241_v60, %v7235_v61 }
0x1680   :  { %v7322_v48 = vpop.f32.mrb[142].mxu0  ;;  %10870 = vmatprep.subr.bf16.mxu1 %v10869_v45 }
0x1681   :  { %v10875_v17 = vpack.c.bf16 %v7322_v48, %v7316_v19  ;;  %v7324_v50 = vpop.f32.mrb[143].mxu0  ;;  %10872 = vmatpush1.bf16.msra.mxu1 %v10871_v20 }
0x1682   :  { %v10873_v49 = vpack.c.bf16 %v7324_v50, %v7318_v44 }
0x1684   :  { %10874 = vmatprep.subr.bf16.mxu1 %v10873_v49 }
0x1685   :  { %10876 = vmatpush1.bf16.msra.mxu1 %v10875_v17 }
0x1686   :  { %10909 = vmatprep.subr.bf16.mxu1 %v14874_v11 }
0x1688   :  { %8553 = vmatmul.mubr.msk.f32.vlgmr.msra.gmra.mrb[140].mxu1 %vm4193_vm2, %v7327_v28 }
0x1689   :  { %10913 = vmatpush1.bf16.msra.mxu1 %v14872_v8  ;;  %7429 = vmatprep.mubr.f32.mxu1 %v11532_v13 }
0x168a   :  { %10910 = vmatprep.subr.bf16.mxu1 %v14890_v37 }
0x168c   :  { %8554 = vmatmul.mubr.msk.f32.gmra.mrb[142].mxu1 %vm4193_vm2, %v7328_v58  ;;  %v7472_v58 = vld [vmem:[%s15632_s23] sm:$0xff] }
0x168d   :  { %10914 = vmatpush1.bf16.msra.mxu1 %v14888_v46  ;;  %7435 = vmatprep.mubr.f32.mxu1 %v11532_v13 }
0x168e   :  { %10911 = vmatprep.subr.bf16.mxu1 %v14906_v33 }
0x1690   :  { %8555 = vmatmul.mubr.msk.f32.gmra.mrb[144].mxu1 %vm4193_vm2, %v7329_v55  ;;  %v7473_v55 = vld [vmem:[%s15632_s23 + $0x8] sm:$0xff] }
0x1691   :  { %10915 = vmatpush1.bf16.msra.mxu1 %v14904_v54  ;;  %7441 = vmatprep.mubr.f32.mxu1 %v11532_v13 }
0x1692   :  { %10912 = vmatprep.subr.bf16.mxu1 %v14928_v26 }
0x1694   :  { %8556 = vmatmul.mubr.msk.f32.gmra.mrb[146].mxu1 %vm4193_vm2, %v7330_v5  ;;  %v7474_v5 = vld [vmem:[%s15632_s23 + $0x10] sm:$0xff] }
0x1695   :  { %10916 = vmatpush1.bf16.msra.mxu1 %v14920_v24  ;;  %7447 = vmatprep.mubr.f32.mxu1 %v11532_v13 }
0x1698   :  { %8557 = vmatmul.mubr.msk.f32.gmra.mrb[148].mxu1 %vm4193_vm2, %v7331_v40  ;;  %v7475_v40 = vld [vmem:[%s15632_s23 + $0x18] sm:$0xff] }
0x1699   :  { %7453 = vmatprep.mubr.f32.mxu1 %v11532_v13 }
0x169c   :  { %8558 = vmatmul.mubr.msk.f32.gmra.mrb[150].mxu1 %vm4193_vm2, %v7332_v39  ;;  %v8561_v39 = vld [vmem:[%s15632_s23 + $0x40] sm:$0xff] }
0x169d   :  { %7459 = vmatprep.mubr.f32.mxu1 %v11532_v13 }
0x16a0   :  { %8559 = vmatmul.mubr.msk.f32.gmra.mrb[152].mxu1 %vm4193_vm2, %v7333_v56  ;;  %v8562_v56 = vld [vmem:[%s15632_s23 + $0x48] sm:$0xff] }
0x16a1   :  { %7465 = vmatprep.mubr.f32.mxu1 %v11532_v13 }
0x16a4   :  { %8560 = vmatmul.mubr.msk.f32.gmra.mrb[154].mxu1 %vm4193_vm2, %v7334_v62  ;;  %v7476_v62 = vld [vmem:[%s15632_s23 + $0x20] sm:$0xff] }
0x16a5   :  { %8056 = vmatprep.mubr.f32.mxu1 %v11532_v13 }
0x175b   :  { %v15091_v32 = vpop.f32.mrb[140].mxu1 }
0x175c   :  { %v7513_v52 = vmul.f32 %v15091_v32, %v15091_v32  ;;  %v15095_v16 = vpop.f32.mrb[141].mxu1 }
0x175d   :  { %v7489_v10 = vadd.f32 %v15095_v16, %v15091_v32  ;;  %v7514_v34 = vmul.f32 %v15095_v16, %v15095_v16 }
0x175f   :  { %v7529_v43 = vadd.f32 %v7514_v34, %v7513_v52  ;;  %v15101_v42 = vpop.f32.mrb[142].mxu1  ;;  %7490 = vadd.xlane.f32.xlu1 %v7489_v10  ;;  %v7477_v52 = vld [vmem:[%s15632_s23 + $0x28] sm:$0xff]  ;;  %v8563_v10 = vld [vmem:[%s15632_s23 + $0x50] sm:$0xff]  ;;  %v8564_v34 = vld [vmem:[%s15632_s23 + $0x58] sm:$0xff] }
0x1760   :  { %v7515_v51 = vmul.f32 %v15101_v42, %v15101_v42  ;;  %v15105_v25 = vpop.f32.mrb[143].mxu1 }
0x1761   :  { %7530 = vadd.xlane.f32.xlu0 %v7529_v43  ;;  %v7492_v35 = vadd.f32 %v15105_v25, %v15101_v42  ;;  %v7516_v2 = vmul.f32 %v15105_v25, %v15105_v25 }
0x1763   :  { %v15111_v29 = vpop.f32.mrb[144].mxu1  ;;  %v7532_v3 = vadd.f32 %v7516_v2, %v7515_v51 }
0x1764   :  { %v7517_v15 = vmul.f32 %v15111_v29, %v15111_v29  ;;  %v15115_v30 = vpop.f32.mrb[145].mxu1 }
0x1765   :  { %7493 = vadd.xlane.f32.xlu0 %v7492_v35  ;;  %v7495_v12 = vadd.f32 %v15115_v30, %v15111_v29  ;;  %v7518_v21 = vmul.f32 %v15115_v30, %v15115_v30  ;;  %7533 = vadd.xlane.f32.xlu1 %v7532_v3 }
0x1767   :  { %v15121_v41 = vpop.f32.mrb[146].mxu1  ;;  %v7535_v4 = vadd.f32 %v7518_v21, %v7517_v15 }
0x1768   :  { %v7519_v53 = vmul.f32 %v15121_v41, %v15121_v41  ;;  %v15125_v27 = vpop.f32.mrb[147].mxu1 }
0x1769   :  { %v7498_v31 = vadd.f32 %v15125_v27, %v15121_v41  ;;  %v7520_v57 = vmul.f32 %v15125_v27, %v15125_v27  ;;  %7496 = vadd.xlane.f32.xlu0 %v7495_v12 }
0x176b   :  { %7499 = vadd.xlane.f32.xlu1 %v7498_v31  ;;  %v15131_v7 = vpop.f32.mrb[148].mxu1  ;;  %v7538_v47 = vadd.f32 %v7520_v57, %v7519_v53 }
0x176c   :  { %v7521_v1 = vmul.f32 %v15131_v7, %v15131_v7  ;;  %v15135_v18 = vpop.f32.mrb[149].mxu1 }
0x176d   :  { %7536 = vadd.xlane.f32.xlu0 %v7535_v4  ;;  %v7501_v22 = vadd.f32 %v15135_v18, %v15131_v7  ;;  %v7522_v36 = vmul.f32 %v15135_v18, %v15135_v18 }
0x176f   :  { %7539 = vadd.xlane.f32.xlu1 %v7538_v47  ;;  %v15141_v38 = vpop.f32.mrb[150].mxu1  ;;  %v7541_v6 = vadd.f32 %v7522_v36, %v7521_v1 }
0x1770   :  { %v7523_v14 = vmul.f32 %v15141_v38, %v15141_v38  ;;  %v15145_v9 = vpop.f32.mrb[151].mxu1 }
0x1771   :  { %v7504_v23 = vadd.f32 %v15145_v9, %v15141_v38  ;;  %v7524_v63 = vmul.f32 %v15145_v9, %v15145_v9  ;;  %7502 = vadd.xlane.f32.xlu0 %v7501_v22 }
0x1773   :  { %7505 = vadd.xlane.f32.xlu1 %v7504_v23  ;;  %v15151_v0 = vpop.f32.mrb[152].mxu1  ;;  %v7544_v19 = vadd.f32 %v7524_v63, %v7523_v14 }
0x1774   :  { %v7525_v61 = vmul.f32 %v15151_v0, %v15151_v0  ;;  %v15155_v44 = vpop.f32.mrb[153].mxu1 }
0x1775   :  { %7542 = vadd.xlane.f32.xlu0 %v7541_v6  ;;  %v7507_v59 = vadd.f32 %v15155_v44, %v15151_v0  ;;  %v7526_v20 = vmul.f32 %v15155_v44, %v15155_v44 }
0x1777   :  { %7545 = vadd.xlane.f32.xlu1 %v7544_v19  ;;  %v15161_v60 = vpop.f32.mrb[154].mxu1  ;;  %v7547_v45 = vadd.f32 %v7526_v20, %v7525_v61 }
0x1778   :  { %v7527_v48 = vmul.f32 %v15161_v60, %v15161_v60  ;;  %v15165_v17 = vpop.f32.mrb[155].mxu1 }
0x1779   :  { %v7510_v50 = vadd.f32 %v15165_v17, %v15161_v60  ;;  %v7528_v49 = vmul.f32 %v15165_v17, %v15165_v17  ;;  %7508 = vadd.xlane.f32.xlu0 %v7507_v59 }
0x177b   :  { %7511 = vadd.xlane.f32.xlu1 %v7510_v50  ;;  %v7550_v28 = vadd.f32 %v7528_v49, %v7527_v48 }
0x177d   :  { %7548 = vadd.xlane.f32.xlu0 %v7547_v45 }
0x177f   :  { %7551 = vadd.xlane.f32.xlu1 %v7550_v28 }
0x1790   :  { %7627 = vperm.xlu1 %11331, %v7472_v58  }
0x1793   :  { %7632 = vperm.xlu0 %11332, %v7473_v55  }
0x1794   :  { %7637 = vperm.xlu1 %11331, %v7474_v5  }
0x1797   :  { %7642 = vperm.xlu0 %11332, %v7475_v40  }
0x1798   :  { %7719 = vperm.xlu1 %11331, %v8561_v39  }
0x179b   :  { %7724 = vperm.xlu0 %11332, %v8562_v56  }
0x179c   :  { %7647 = vperm.xlu1 %11331, %v7476_v62  }
0x179f   :  { %7652 = vperm.xlu0 %11332, %v7477_v52  }
0x17a0   :  { %7729 = vperm.xlu1 %11331, %v8563_v10  }
0x17a3   :  { %7734 = vperm.xlu0 %11332, %v8564_v34  }
0x17ec   :  { %v7491_v51 = vpop.xlane.xlu1 %7490 }
0x17ee   :  { %v7531_v43 = vpop.xlane.xlu0 %7530 }
0x17f2   :  { %v7494_v35 = vpop.xlane.xlu0 %7493  ;;  %v7534_v2 = vpop.xlane.xlu1 %7533 }
0x17f6   :  { %v7497_v3 = vpop.xlane.xlu0 %7496 }
0x17f8   :  { %v7500_v15 = vpop.xlane.xlu1 %7499 }
0x17fa   :  { %v7537_v12 = vpop.xlane.xlu0 %7536 }
0x17fc   :  { %v7540_v21 = vpop.xlane.xlu1 %7539 }
0x17fe   :  { %v7503_v4 = vpop.xlane.xlu0 %7502 }
0x17ff   :  { %v7553_v53 = vadd.f32 %v7503_v4, %v7491_v51 }
0x1800   :  { %v7506_v31 = vpop.xlane.xlu1 %7505 }
0x1801   :  { %v7561_v57 = vmul.f32 0.001953125, %v7553_v53  ;;  %v7554_v47 = vadd.f32 %v7506_v31, %v7494_v35 }
0x1802   :  { %v7543_v1 = vpop.xlane.xlu0 %7542 }
0x1803   :  { %v7562_v22 = vmul.f32 0.001953125, %v7554_v47  ;;  %v7557_v36 = vadd.f32 %v7543_v1, %v7531_v43  ;;  %7591 = vperm.xlu0 %11332, %v7561_v57   ;;  %v7569_v14 = vmul.f32 %v7561_v57, %v7561_v57  ;;  %v7478_v1 = vld [vmem:[%s15632_s23 + $0x30] sm:$0xff] }
0x1804   :  { %v7546_v6 = vpop.xlane.xlu1 %7545 }
0x1805   :  { %v7565_v23 = vmul.f32 0.001953125, %v7557_v36  ;;  %v7558_v63 = vadd.f32 %v7546_v6, %v7534_v2  ;;  %7596 = vperm.xlu1 %11331, %v7562_v22   ;;  %v7570_v61 = vmul.f32 %v7562_v22, %v7562_v22  ;;  %v7479_v22 = vld [vmem:[%s15632_s23 + $0x38] sm:$0xff]  ;;  %v8565_v36 = vld [vmem:[%s15632_s23 + $0x60] sm:$0xff]  ;;  %v8566_v6 = vld [vmem:[%s15632_s23 + $0x68] sm:$0xff] }
0x1806   :  { %v7509_v19 = vpop.xlane.xlu0 %7508 }
0x1807   :  { %v7573_v59 = vsub.f32 %v7565_v23, %v7569_v14  ;;  %v7566_v20 = vmul.f32 0.001953125, %v7558_v63  ;;  %v7555_v45 = vadd.f32 %v7509_v19, %v7497_v3  ;;  %v8567_v14 = vld [vmem:[%s15632_s23 + $0x70] sm:$0xff]  ;;  %v8568_v23 = vld [vmem:[%s15632_s23 + $0x78] sm:$0xff]  ;;  %v6185_v19 = vld [vmem:[%s15633_s24 + $0x20] sm:$0xff] }
0x1808   :  { %v7512_v48 = vpop.xlane.xlu1 %7511  ;;  %v6184_v63 = vld [vmem:[%s15633_s24 + $0x18] sm:$0xff] }
0x1809   :  { %v7577_v50 = vmax.f32 %v7573_v59, 0.0  ;;  %v7574_v49 = vsub.f32 %v7566_v20, %v7570_v61  ;;  %v7563_v28 = vmul.f32 0.001953125, %v7555_v45  ;;  %v7556_v58 = vadd.f32 %v7512_v48, %v7500_v15  ;;  %8580 = vmatmul.mubr.msk.f32.vlgmr.msra.gmra.mrb[156].mxu1 %vm2088_vm0, %v6184_v63  ;;  %v6186_v61 = vld [vmem:[%s15633_s24 + $0x28] sm:$0xff]  ;;  %v6187_v59 = vld [vmem:[%s15633_s24 + $0x30] sm:$0xff]  ;;  %v6188_v20 = vld [vmem:[%s15633_s24 + $0x38] sm:$0xff] }
0x180a   :  { %v7549_v55 = vpop.xlane.xlu0 %7548  ;;  %8062 = vmatprep.mubr.f32.mxu1 %v11532_v13 }
0x180b   :  { %v7581_v5 = vadd.f32 1e-05, %v7577_v50  ;;  %v7578_v40 = vmax.f32 %v7574_v49, 0.0  ;;  %v7564_v39 = vmul.f32 0.001953125, %v7556_v58  ;;  %7601 = vperm.xlu1 %11331, %v7563_v28   ;;  %v7559_v56 = vadd.f32 %v7549_v55, %v7537_v12 }
0x180c   :  { %v7552_v62 = vpop.xlane.xlu1 %7551  ;;  %v7571_v34 = vmul.f32 %v7563_v28, %v7563_v28 }
0x180d   :  { %11394 = vrsqrt.f32 %v7581_v5  ;;  %v7582_v52 = vadd.f32 1e-05, %v7578_v40  ;;  %v7560_v10 = vadd.f32 %v7552_v62, %v7540_v21  ;;  %7606 = vperm.xlu0 %11332, %v7564_v39   ;;  %v7567_v43 = vmul.f32 0.001953125, %v7559_v56  ;;  %8581 = vmatmul.mubr.msk.f32.gmra.mrb[158].mxu1 %vm2088_vm0, %v6185_v19 }
0x180e   :  { %v7572_v51 = vmul.f32 %v7564_v39, %v7564_v39  ;;  %8068 = vmatprep.mubr.f32.mxu1 %v11532_v13 }
0x180f   :  { %11396 = vrsqrt.f32 %v7582_v52  ;;  %v7568_v35 = vmul.f32 0.001953125, %v7560_v10  ;;  %v7575_v2 = vsub.f32 %v7567_v43, %v7571_v34 }
0x1810   :  { %v7628_v45 = vpop.permute.xlu1 %7627 }
0x1811   :  { %v7576_v3 = vsub.f32 %v7568_v35, %v7572_v51  ;;  %v7579_v4 = vmax.f32 %v7575_v2, 0.0  ;;  %8582 = vmatmul.mubr.msk.f32.gmra.mrb[160].mxu1 %vm2088_vm0, %v6186_v61  ;;  %v11484_v61 = vld [vmem:[%s15680_s29 + $0x18] sm:$0xff] }
0x1812   :  { %8074 = vmatprep.mubr.f32.mxu1 %v11532_v13  ;;  %v7633_v48 = vpop.permute.xlu0 %7632 }
0x1813   :  { %v7580_v15 = vmax.f32 %v7576_v3, 0.0  ;;  %v7583_v53 = vadd.f32 1e-05, %v7579_v4 }
0x1814   :  { %v7638_v50 = vpop.permute.xlu1 %7637 }
0x1815   :  { %v7584_v31 = vadd.f32 1e-05, %v7580_v15  ;;  %11398 = vrsqrt.f32 %v7583_v53  ;;  %8583 = vmatmul.mubr.msk.f32.gmra.mrb[162].mxu1 %vm2088_vm0, %v6187_v59 }
0x1816   :  { %8080 = vmatprep.mubr.f32.mxu1 %v11532_v13  ;;  %v7643_v49 = vpop.permute.xlu0 %7642 }
0x1817   :  { %v11395_v57 = vpop.eup %11394  ;;  %11400 = vrsqrt.f32 %v7584_v31 }
0x1818   :  { %7683 = vperm.xlu1 %11331, %v11395_v57   ;;  %v7720_v28 = vpop.permute.xlu1 %7719 }
0x1819   :  { %v11397_v12 = vpop.eup %11396  ;;  %8584 = vmatmul.mubr.msk.f32.gmra.mrb[164].mxu1 %vm2088_vm0, %v6188_v20 }
0x181a   :  { %7688 = vperm.xlu0 %11332, %v11397_v12   ;;  %v7725_v58 = vpop.permute.xlu0 %7724 }
0x181c   :  { %v7648_v55 = vpop.permute.xlu1 %7647 }
0x181e   :  { %v7653_v5 = vpop.permute.xlu0 %7652 }
0x181f   :  { %v11399_v47 = vpop.eup %11398 }
0x1820   :  { %7693 = vperm.xlu1 %11331, %v11399_v47   ;;  %v7730_v40 = vpop.permute.xlu1 %7729 }
0x1821   :  { %v11401_v21 = vpop.eup %11400 }
0x1822   :  { %7698 = vperm.xlu0 %11332, %v11401_v21   ;;  %v15243_v39 = vpop.permute.xlu0 %7734 }
0x1824   :  { %7657 = vperm.xlu1 %11331, %v7478_v1  }
0x1826   :  { %7662 = vperm.xlu0 %11332, %v7479_v22  }
0x1828   :  { %7739 = vperm.xlu1 %11331, %v8565_v36  }
0x182a   :  { %7744 = vperm.xlu0 %11332, %v8566_v6  }
0x182c   :  { %7749 = vperm.xlu1 %11331, %v8567_v14  }
0x182e   :  { %7754 = vperm.xlu0 %11332, %v8568_v23  }
0x1882   :  { %v7592_v56 = vpop.permute.xlu0 %7591 }
0x1883   :  { %v7609_v52 = vsub.f32 %v15091_v32, %v7592_v56  ;;  %v7610_v10 = vsub.f32 %v15095_v16, %v7592_v56  ;;  %v7617_v16 = vsub.f32 %v15131_v7, %v7592_v56  ;;  %v7618_v57 = vsub.f32 %v15135_v18, %v7592_v56  ;;  %v11481_v7 = vld [vmem:[%s15680_s29] sm:$0xff] }
0x1884   :  { %v7597_v62 = vpop.permute.xlu1 %7596 }
0x1885   :  { %v7611_v43 = vsub.f32 %v15101_v42, %v7597_v62  ;;  %v7612_v51 = vsub.f32 %v15105_v25, %v7597_v62  ;;  %v7665_v2 = vmul.f32 %v7628_v45, %v7609_v52  ;;  %v7666_v3 = vmul.f32 %v7628_v45, %v7610_v10 }
0x1886   :  { %v7620_v19 = vsub.f32 %v15145_v9, %v7597_v62  ;;  %v7673_v20 = vmul.f32 %v7648_v55, %v7617_v16  ;;  %v7674_v45 = vmul.f32 %v7648_v55, %v7618_v57 }
0x1887   :  { %v7667_v31 = vmul.f32 %v7633_v48, %v7611_v43  ;;  %v7668_v32 = vmul.f32 %v7633_v48, %v7612_v51 }
0x188a   :  { %v15247_v34 = vpop.permute.xlu1 %7601 }
0x188b   :  { %v7613_v1 = vsub.f32 %v15111_v29, %v15247_v34  ;;  %v7614_v22 = vsub.f32 %v15115_v30, %v15247_v34  ;;  %v11482_v29 = vld [vmem:[%s15680_s29 + $0x8] sm:$0xff]  ;;  %v7619_v30 = vsub.f32 %v15141_v38, %v7597_v62 }
0x188c   :  { %v15251_v35 = vpop.permute.xlu0 %7606 }
0x188d   :  { %v7615_v36 = vsub.f32 %v15121_v41, %v15251_v35  ;;  %v7616_v6 = vsub.f32 %v15125_v27, %v15251_v35  ;;  %v11483_v41 = vld [vmem:[%s15680_s29 + $0x10] sm:$0xff]  ;;  %v7669_v48 = vmul.f32 %v7638_v50, %v7613_v1 }
0x188f   :  { %v7672_v56 = vmul.f32 %v7643_v49, %v7616_v6  ;;  %v11488_v6 = vld [vmem:[%s15680_s29 + $0x38] sm:$0xff] }
0x1897   :  { %v15253_v4 = vpop.permute.xlu1 %7683 }
0x1898   :  { %v7701_v15 = vmul.f32 %v15253_v4, %v7665_v2  ;;  %v7702_v53 = vmul.f32 %v15253_v4, %v7666_v3  ;;  %v7675_v3 = vmul.f32 %v7653_v5, %v7619_v30 }
0x1899   :  { %v7689_v12 = vpop.permute.xlu0 %7688 }
0x189a   :  { %v7757_v42 = vadd.f32 %v7720_v28, %v7701_v15  ;;  %v7758_v47 = vadd.f32 %v7720_v28, %v7702_v53  ;;  %v7703_v25 = vmul.f32 %v7689_v12, %v7667_v31  ;;  %v7704_v21 = vmul.f32 %v7689_v12, %v7668_v32 }
0x189b   :  { %v7670_v28 = vmul.f32 %v7638_v50, %v7614_v22  ;;  %v7676_v15 = vmul.f32 %v7653_v5, %v7620_v19  ;;  %v7621_v50 = vsub.f32 %v15151_v0, %v15247_v34  ;;  %v7623_v5 = vsub.f32 %v15161_v60, %v15251_v35  ;;  %v11487_v60 = vld [vmem:[%s15680_s29 + $0x30] sm:$0xff] }
0x189c   :  { %v7773_v18 = vadd.f32 %v11481_v7, %v7757_v42  ;;  %v7759_v14 = vadd.f32 %v7725_v58, %v7703_v25  ;;  %v7760_v23 = vadd.f32 %v7725_v58, %v7704_v21  ;;  %v7774_v63 = vadd.f32 %v11482_v29, %v7758_v47 }
0x189d   :  { %v7671_v58 = vmul.f32 %v7643_v49, %v7615_v36  ;;  %v7622_v49 = vsub.f32 %v15155_v44, %v15247_v34  ;;  %v7624_v21 = vsub.f32 %v15165_v17, %v15251_v35  ;;  %v7709_v44 = vmul.f32 %v15253_v4, %v7673_v20 }
0x189e   :  { %v7775_v27 = vadd.f32 %v11483_v41, %v7759_v14  ;;  %v7776_v59 = vadd.f32 %v11484_v61, %v7760_v23  ;;  %v7790_v38 = vmax.f32 %v7774_v63, 0.0  ;;  %v7789_v9 = vmax.f32 %v7773_v18, 0.0 }
0x189f   :  { %v7694_v52 = vpop.permute.xlu1 %7693  ;;  %v7710_v34 = vmul.f32 %v15253_v4, %v7674_v45  ;;  %v7711_v35 = vmul.f32 %v7689_v12, %v7675_v3  ;;  %v7712_v36 = vmul.f32 %v7689_v12, %v7676_v15 }
0x18a0   :  { %v7792_v10 = vmax.f32 %v7776_v59, 0.0  ;;  %v7791_v62 = vmax.f32 %v7775_v27, 0.0  ;;  %v7705_v43 = vmul.f32 %v7694_v52, %v7669_v48  ;;  %v7706_v51 = vmul.f32 %v7694_v52, %v7670_v28  ;;  %v11489_v28 = vld [vmem:[%s15680_s29 + $0x40] sm:$0xff] }
0x18a1   :  { %v7699_v2 = vpop.permute.xlu0 %7698 }
0x18a2   :  { %v7707_v53 = vmul.f32 %v7699_v2, %v7671_v58  ;;  %v7708_v31 = vmul.f32 %v7699_v2, %v7672_v56  ;;  %v10877_v32 = vpack.c.bf16 %v7792_v10, %v7790_v38  ;;  %v10879_v42 = vpack.c.bf16 %v7791_v62, %v7789_v9  ;;  %v11490_v56 = vld [vmem:[%s15680_s29 + $0x48] sm:$0xff]  ;;  %v11491_v62 = vld [vmem:[%s15680_s29 + $0x50] sm:$0xff] }
0x18a3   :  { %v7761_v16 = vadd.f32 %v7730_v40, %v7705_v43  ;;  %v7762_v55 = vadd.f32 %v7730_v40, %v7706_v51  ;;  %v7658_v25 = vpop.permute.xlu1 %7657  ;;  %v11485_v40 = vld [vmem:[%s15680_s29 + $0x20] sm:$0xff]  ;;  %v11492_v51 = vld [vmem:[%s15680_s29 + $0x58] sm:$0xff] }
0x18a4   :  { %v7763_v57 = vadd.f32 %v15243_v39, %v7707_v53  ;;  %v7764_v47 = vadd.f32 %v15243_v39, %v7708_v31  ;;  %10878 = vmatprep.subr.bf16.mxu0 %v10877_v32  ;;  %v11486_v39 = vld [vmem:[%s15680_s29 + $0x28] sm:$0xff]  ;;  %v7677_v18 = vmul.f32 %v7658_v25, %v7621_v50  ;;  %v7678_v14 = vmul.f32 %v7658_v25, %v7622_v49  ;;  %v11493_v25 = vld [vmem:[%s15680_s29 + $0x60] sm:$0xff] }
0x18a5   :  { %v7777_v0 = vadd.f32 %v11485_v40, %v7761_v16  ;;  %v7663_v1 = vpop.permute.xlu0 %7662  ;;  %10880 = vmatpush1.bf16.msra.mxu0 %v10879_v42  ;;  %v7778_v22 = vadd.f32 %v11486_v39, %v7762_v55 }
0x18a6   :  { %v7779_v17 = vadd.f32 %v11487_v60, %v7763_v57  ;;  %v7780_v7 = vadd.f32 %v11488_v6, %v7764_v47  ;;  %v7679_v4 = vmul.f32 %v7663_v1, %v7623_v5  ;;  %v7680_v23 = vmul.f32 %v7663_v1, %v7624_v21  ;;  %v11494_v21 = vld [vmem:[%s15680_s29 + $0x68] sm:$0xff] }
0x18a7   :  { %v7740_v29 = vpop.permute.xlu1 %7739  ;;  %v7794_v63 = vmax.f32 %v7778_v22, 0.0  ;;  %v7793_v19 = vmax.f32 %v7777_v0, 0.0  ;;  %v7713_v10 = vmul.f32 %v7694_v52, %v7677_v18  ;;  %v7714_v9 = vmul.f32 %v7694_v52, %v7678_v14  ;;  %v11495_v0 = vld [vmem:[%s15680_s29 + $0x70] sm:$0xff]  ;;  %v7806_v18 = vld [vmem:[%s15634_s25 + $0x8] sm:$0xff] }
0x18a8   :  { %v7796_v30 = vmax.f32 %v7780_v7, 0.0  ;;  %v7795_v41 = vmax.f32 %v7779_v17, 0.0  ;;  %v7765_v27 = vadd.f32 %v7740_v29, %v7709_v44  ;;  %v7766_v61 = vadd.f32 %v7740_v29, %v7710_v34  ;;  %v11496_v44 = vld [vmem:[%s15680_s29 + $0x78] sm:$0xff]  ;;  %v7805_v7 = vld [vmem:[%s15634_s25] sm:$0xff]  ;;  %v6183_v14 = vld [vmem:[%s15633_s24 + $0x10] sm:$0xff] }
0x18a9   :  { %v7745_v59 = vpop.permute.xlu0 %7744  ;;  %v7715_v53 = vmul.f32 %v7699_v2, %v7679_v4  ;;  %v7716_v31 = vmul.f32 %v7699_v2, %v7680_v23 }
0x18aa   :  { %v7767_v20 = vadd.f32 %v7745_v59, %v7711_v35  ;;  %v7768_v45 = vadd.f32 %v7745_v59, %v7712_v36  ;;  %v10881_v12 = vpack.c.bf16 %v7796_v30, %v7794_v63  ;;  %v10883_v48 = vpack.c.bf16 %v7795_v41, %v7793_v19 }
0x18ab   :  { %v7781_v58 = vadd.f32 %v11489_v28, %v7765_v27  ;;  %v7782_v38 = vadd.f32 %v11490_v56, %v7766_v61  ;;  %v7750_v15 = vpop.permute.xlu1 %7749 }
0x18ac   :  { %v7783_v43 = vadd.f32 %v11491_v62, %v7767_v20  ;;  %v7784_v3 = vadd.f32 %v11492_v51, %v7768_v45  ;;  %10882 = vmatprep.subr.bf16.mxu0 %v10881_v12  ;;  %v7769_v16 = vadd.f32 %v7750_v15, %v7713_v10  ;;  %v7770_v55 = vadd.f32 %v7750_v15, %v7714_v9 }
0x18ad   :  { %v7797_v32 = vmax.f32 %v7781_v58, 0.0  ;;  %v7798_v42 = vmax.f32 %v7782_v38, 0.0  ;;  %v7755_v50 = vpop.permute.xlu0 %7754  ;;  %10884 = vmatpush1.bf16.msra.mxu0 %v10883_v48 }
0x18ae   :  { %v7799_v52 = vmax.f32 %v7783_v43, 0.0  ;;  %v7800_v49 = vmax.f32 %v7784_v3, 0.0  ;;  %v7771_v57 = vadd.f32 %v7755_v50, %v7715_v53  ;;  %v7772_v47 = vadd.f32 %v7755_v50, %v7716_v31 }
0x18af   :  { %v7785_v5 = vadd.f32 %v11493_v25, %v7769_v16  ;;  %v7786_v2 = vadd.f32 %v11494_v21, %v7770_v55 }
0x18b0   :  { %v10887_v40 = vpack.c.bf16 %v7799_v52, %v7797_v32  ;;  %v7787_v1 = vadd.f32 %v11495_v0, %v7771_v57  ;;  %v7788_v34 = vadd.f32 %v11496_v44, %v7772_v47  ;;  %v10885_v39 = vpack.c.bf16 %v7800_v49, %v7798_v42 }
0x18b1   :  { %v7801_v22 = vmax.f32 %v7785_v5, 0.0  ;;  %v7802_v60 = vmax.f32 %v7786_v2, 0.0 }
0x18b2   :  { %v7803_v17 = vmax.f32 %v7787_v1, 0.0  ;;  %v7804_v35 = vmax.f32 %v7788_v34, 0.0  ;;  %10886 = vmatprep.subr.bf16.mxu0 %v10885_v39 }
0x18b3   :  { %10888 = vmatpush1.bf16.msra.mxu0 %v10887_v40 }
0x18b4   :  { %v10891_v36 = vpack.c.bf16 %v7803_v17, %v7801_v22  ;;  %v10889_v6 = vpack.c.bf16 %v7804_v35, %v7802_v60 }
0x18b6   :  { %10890 = vmatprep.subr.bf16.mxu0 %v10889_v6 }
0x18b7   :  { %10892 = vmatpush1.bf16.msra.mxu0 %v10891_v36 }
0x18b8   :  { %10894 = vmatprep.subr.bf16.mxu0 %v14874_v11  ;;  %v7807_v11 = vld [vmem:[%s15634_s25 + $0x10] sm:$0xff] }
0x18ba   :  { %8569 = vmatmul.mubr.msk.f32.vlgmr.msra.gmra.mrb[144].mxu0 %vm2088_vm0, %v7805_v7 }
0x18bb   :  { %10896 = vmatpush1.bf16.msra.mxu0 %v14872_v8  ;;  %7907 = vmatprep.mubr.f32.mxu0 %v11532_v13  ;;  %v7808_v8 = vld [vmem:[%s15634_s25 + $0x18] sm:$0xff] }
0x18bc   :  { %10898 = vmatprep.subr.bf16.mxu0 %v14890_v37  ;;  %v7810_v37 = vld [vmem:[%s15634_s25 + $0x28] sm:$0xff] }
0x18be   :  { %8570 = vmatmul.mubr.msk.f32.gmra.mrb[146].mxu0 %vm2088_vm0, %v7806_v18 }
0x18bf   :  { %10900 = vmatpush1.bf16.msra.mxu0 %v14888_v46  ;;  %7913 = vmatprep.mubr.f32.mxu0 %v11532_v13  ;;  %v7809_v46 = vld [vmem:[%s15634_s25 + $0x20] sm:$0xff] }
0x18c0   :  { %10902 = vmatprep.subr.bf16.mxu0 %v14906_v33  ;;  %v7812_v33 = vld [vmem:[%s15634_s25 + $0x38] sm:$0xff] }
0x18c2   :  { %8571 = vmatmul.mubr.msk.f32.gmra.mrb[148].mxu0 %vm2088_vm0, %v7807_v11 }
0x18c3   :  { %10904 = vmatpush1.bf16.msra.mxu0 %v14904_v54  ;;  %7919 = vmatprep.mubr.f32.mxu0 %v11532_v13  ;;  %v7811_v54 = vld [vmem:[%s15634_s25 + $0x30] sm:$0xff] }
0x18c4   :  { %10906 = vmatprep.subr.bf16.mxu0 %v14928_v26  ;;  %v6182_v26 = vld [vmem:[%s15633_s24 + $0x8] sm:$0xff] }
0x18c6   :  { %8572 = vmatmul.mubr.msk.f32.gmra.mrb[150].mxu0 %vm2088_vm0, %v7808_v8 }
0x18c7   :  { %10908 = vmatpush1.bf16.msra.mxu0 %v14920_v24  ;;  %7925 = vmatprep.mubr.f32.mxu0 %v11532_v13  ;;  %v6181_v24 = vld [vmem:[%s15633_s24] sm:$0xff] }
0x18ca   :  { %8573 = vmatmul.mubr.msk.f32.gmra.mrb[152].mxu0 %vm2088_vm0, %v7809_v46 }
0x18cb   :  { %7931 = vmatprep.mubr.f32.mxu0 %v11532_v13 }
0x18ce   :  { %8574 = vmatmul.mubr.msk.f32.gmra.mrb[154].mxu0 %vm2088_vm0, %v7810_v37 }
0x18cf   :  { %7937 = vmatprep.mubr.f32.mxu0 %v11532_v13 }
0x18d2   :  { %8575 = vmatmul.mubr.msk.f32.gmra.mrb[156].mxu0 %vm2088_vm0, %v7811_v54 }
0x18d3   :  { %7943 = vmatprep.mubr.f32.mxu0 %v11532_v13 }
0x18d6   :  { %8576 = vmatmul.mubr.msk.f32.gmra.mrb[158].mxu0 %vm2088_vm0, %v7812_v33 }
0x18d7   :  { %8038 = vmatprep.mubr.f32.mxu0 %v11532_v13 }
0x18da   :  { %8577 = vmatmul.mubr.msk.f32.vlgmr.msra.gmra.mrb[144].mxu0 %vm2088_vm0, %v6181_v24 }
0x18db   :  { %8044 = vmatprep.mubr.f32.mxu0 %v11532_v13 }
0x18dc   :  { %v8058_v4 = vpop.f32.mrb[156].mxu1 }
0x18dd   :  { %v8060_v23 = vpop.f32.mrb[157].mxu1 }
0x18de   :  { %8578 = vmatmul.mubr.msk.f32.gmra.mrb[146].mxu0 %vm2088_vm0, %v6182_v26 }
0x18df   :  { %8050 = vmatprep.mubr.f32.mxu0 %v11532_v13 }
0x18e0   :  { %v8064_v29 = vpop.f32.mrb[158].mxu1 }
0x18e1   :  { %v8066_v63 = vpop.f32.mrb[159].mxu1 }
0x18e2   :  { %8579 = vmatmul.mubr.msk.f32.gmra.mrb[148].mxu0 %vm2088_vm0, %v6183_v14 }
0x18e4   :  { %v8070_v30 = vpop.f32.mrb[160].mxu1 }
0x18e5   :  { %v8072_v19 = vpop.f32.mrb[161].mxu1 }
0x18e8   :  { %v8076_v41 = vpop.f32.mrb[162].mxu1 }
0x18e9   :  { %v8078_v27 = vpop.f32.mrb[163].mxu1 }
0x18ec   :  { %v8082_v61 = vpop.f32.mrb[164].mxu1 }
0x18ed   :  { %v8084_v59 = vpop.f32.mrb[165].mxu1 }
0x1999   :  { %v7921_v20 = vpop.f32.mrb[150].mxu0 }
0x199a   :  { %v15391_v45 = vadd.f32 %v8058_v4, %v7921_v20  ;;  %v7923_v13 = vpop.f32.mrb[151].mxu0  ;;  %v8090_v20 = vld [vmem:[%s15635_s26 + $0x18] sm:$0xff] }
0x199b   :  { %v15393_v12 = vadd.f32 %v8060_v23, %v7923_v13  ;;  %v8587_v13 = vld [vmem:[%s15635_s26 + $0x50] sm:$0xff] }
0x199c   :  { %v8134_v48 = vmul.f32 %v15391_v45, %v15391_v45 }
0x199d   :  { %v8135_v28 = vmul.f32 %v15393_v12, %v15393_v12  ;;  %v8113_v58 = vadd.f32 %v15393_v12, %v15391_v45  ;;  %v7927_v56 = vpop.f32.mrb[152].mxu0 }
0x199e   :  { %v15401_v38 = vadd.f32 %v8064_v29, %v7927_v56  ;;  %v7929_v10 = vpop.f32.mrb[153].mxu0  ;;  %v8586_v56 = vld [vmem:[%s15635_s26 + $0x48] sm:$0xff] }
0x199f   :  { %8114 = vadd.xlane.f32.xlu1 %v8113_v58  ;;  %v15403_v9 = vadd.f32 %v8066_v63, %v7929_v10  ;;  %v8153_v3 = vadd.f32 %v8135_v28, %v8134_v48  ;;  %v8092_v48 = vld [vmem:[%s15635_s26 + $0x28] sm:$0xff]  ;;  %v8589_v28 = vld [vmem:[%s15635_s26 + $0x60] sm:$0xff]  ;;  %v8094_v58 = vld [vmem:[%s15635_s26 + $0x38] sm:$0xff] }
0x19a0   :  { %v8136_v62 = vmul.f32 %v15401_v38, %v15401_v38  ;;  %v8588_v10 = vld [vmem:[%s15635_s26 + $0x58] sm:$0xff] }
0x19a1   :  { %v8137_v43 = vmul.f32 %v15403_v9, %v15403_v9  ;;  %v7933_v51 = vpop.f32.mrb[154].mxu0  ;;  %v8116_v15 = vadd.f32 %v15403_v9, %v15401_v38 }
0x19a2   :  { %v15411_v53 = vadd.f32 %v8070_v30, %v7933_v51  ;;  %v7935_v31 = vpop.f32.mrb[155].mxu0  ;;  %v8087_v30 = vld [vmem:[%s15635_s26] sm:$0xff] }
0x19a3   :  { %v15413_v32 = vadd.f32 %v8072_v19, %v7935_v31  ;;  %8154 = vadd.xlane.f32.xlu1 %v8153_v3  ;;  %8117 = vadd.xlane.f32.xlu0 %v8116_v15  ;;  %v8156_v52 = vadd.f32 %v8137_v43, %v8136_v62  ;;  %v8089_v19 = vld [vmem:[%s15635_s26 + $0x10] sm:$0xff]  ;;  %v8590_v62 = vld [vmem:[%s15635_s26 + $0x68] sm:$0xff] }
0x19a4   :  { %v8138_v42 = vmul.f32 %v15411_v53, %v15411_v53 }
0x19a5   :  { %v8139_v16 = vmul.f32 %v15413_v32, %v15413_v32  ;;  %v8119_v55 = vadd.f32 %v15413_v32, %v15411_v53  ;;  %v7939_v50 = vpop.f32.mrb[156].mxu0 }
0x19a6   :  { %v15421_v49 = vadd.f32 %v8076_v41, %v7939_v50  ;;  %v7941_v57 = vpop.f32.mrb[157].mxu0  ;;  %v8091_v41 = vld [vmem:[%s15635_s26 + $0x20] sm:$0xff] }
0x19a7   :  { %8120 = vadd.xlane.f32.xlu1 %v8119_v55  ;;  %v15423_v47 = vadd.f32 %v8078_v27, %v7941_v57  ;;  %8157 = vadd.xlane.f32.xlu0 %v8156_v52  ;;  %v8159_v5 = vadd.f32 %v8139_v16, %v8138_v42  ;;  %v8093_v27 = vld [vmem:[%s15635_s26 + $0x30] sm:$0xff] }
0x19a8   :  { %v8140_v23 = vmul.f32 %v15421_v49, %v15421_v49 }
0x19a9   :  { %v7945_v25 = vpop.f32.mrb[158].mxu0  ;;  %v8122_v21 = vadd.f32 %v15423_v47, %v15421_v49  ;;  %v8141_v29 = vmul.f32 %v15423_v47, %v15423_v47 }
0x19aa   :  { %v15427_v2 = vadd.f32 %v8082_v61, %v7945_v25  ;;  %v7947_v40 = vpop.f32.mrb[159].mxu0  ;;  %v8088_v61 = vld [vmem:[%s15635_s26 + $0x8] sm:$0xff] }
0x19ab   :  { %v15429_v0 = vadd.f32 %v8084_v59, %v7947_v40  ;;  %8160 = vadd.xlane.f32.xlu1 %v8159_v5  ;;  %8123 = vadd.xlane.f32.xlu0 %v8122_v21  ;;  %v8162_v63 = vadd.f32 %v8141_v29, %v8140_v23  ;;  %v8585_v59 = vld [vmem:[%s15635_s26 + $0x40] sm:$0xff] }
0x19ac   :  { %v8142_v11 = vmul.f32 %v15427_v2, %v15427_v2 }
0x19ad   :  { %v15431_v1 = vpop.f32.mrb[144].mxu0  ;;  %v8125_v44 = vadd.f32 %v15429_v0, %v15427_v2  ;;  %v8143_v8 = vmul.f32 %v15429_v0, %v15429_v0 }
0x19ae   :  { %v8128_v34 = vmul.f32 %v15431_v1, %v15431_v1  ;;  %v15437_v39 = vpop.f32.mrb[145].mxu0 }
0x19af   :  { %v8104_v22 = vadd.f32 %v15437_v39, %v15431_v1  ;;  %v8129_v60 = vmul.f32 %v15437_v39, %v15437_v39  ;;  %8126 = vadd.xlane.f32.xlu1 %v8125_v44  ;;  %v8165_v4 = vadd.f32 %v8143_v8, %v8142_v11 }
0x19b1   :  { %v15443_v17 = vpop.f32.mrb[146].mxu0  ;;  %v8144_v35 = vadd.f32 %v8129_v60, %v8128_v34 }
0x19b2   :  { %v8130_v36 = vmul.f32 %v15443_v17, %v15443_v17  ;;  %v15447_v6 = vpop.f32.mrb[147].mxu0 }
0x19b3   :  { %v8107_v7 = vadd.f32 %v15447_v6, %v15443_v17  ;;  %v8131_v18 = vmul.f32 %v15447_v6, %v15447_v6  ;;  %8145 = vadd.xlane.f32.xlu0 %v8144_v35  ;;  %8105 = vadd.xlane.f32.xlu1 %v8104_v22 }
0x19b5   :  { %v15457_v46 = vpop.f32.mrb[148].mxu0  ;;  %v8147_v37 = vadd.f32 %v8131_v18, %v8130_v36 }
0x19b6   :  { %v8132_v54 = vmul.f32 %v15457_v46, %v15457_v46  ;;  %v15461_v33 = vpop.f32.mrb[149].mxu0 }
0x19b7   :  { %v8110_v24 = vadd.f32 %v15461_v33, %v15457_v46  ;;  %v8133_v26 = vmul.f32 %v15461_v33, %v15461_v33  ;;  %8148 = vadd.xlane.f32.xlu1 %v8147_v37  ;;  %8108 = vadd.xlane.f32.xlu0 %v8107_v7 }
0x19b9   :  { %v8150_v14 = vadd.f32 %v8133_v26, %v8132_v54 }
0x19bb   :  { %8166 = vadd.xlane.f32.xlu1 %v8165_v4  ;;  %8111 = vadd.xlane.f32.xlu0 %v8110_v24 }
0x19bf   :  { %8151 = vadd.xlane.f32.xlu0 %v8150_v14 }
0x19c3   :  { %8163 = vadd.xlane.f32.xlu0 %v8162_v63 }
0x19cc   :  { %8242 = vperm.xlu1 %11331, %v8087_v30  }
0x19d0   :  { %8252 = vperm.xlu1 %11331, %v8089_v19  }
0x19d4   :  { %8262 = vperm.xlu1 %11331, %v8091_v41  }
0x19d8   :  { %8272 = vperm.xlu1 %11331, %v8093_v27  }
0x19d9   :  { %8247 = vperm.xlu0 %11332, %v8088_v61  }
0x19dc   :  { %8334 = vperm.xlu1 %11331, %v8585_v59  }
0x19dd   :  { %8257 = vperm.xlu0 %11332, %v8090_v20  }
0x19e0   :  { %8344 = vperm.xlu1 %11331, %v8587_v13  }
0x19e1   :  { %8267 = vperm.xlu0 %11332, %v8092_v48  }
0x19e4   :  { %8354 = vperm.xlu1 %11331, %v8589_v28  }
0x19e5   :  { %8277 = vperm.xlu0 %11332, %v8094_v58  }
0x19e9   :  { %8339 = vperm.xlu0 %11332, %v8586_v56  }
0x19ed   :  { %8349 = vperm.xlu0 %11332, %v8588_v10  }
0x19f1   :  { %8359 = vperm.xlu0 %11332, %v8590_v62  }
0x1a2c   :  { %v8115_v43 = vpop.xlane.xlu1 %8114 }
0x1a30   :  { %v8155_v51 = vpop.xlane.xlu1 %8154  ;;  %v8118_v3 = vpop.xlane.xlu0 %8117 }
0x1a34   :  { %v8121_v15 = vpop.xlane.xlu1 %8120  ;;  %v8158_v31 = vpop.xlane.xlu0 %8157 }
0x1a38   :  { %v8161_v42 = vpop.xlane.xlu1 %8160  ;;  %v8124_v16 = vpop.xlane.xlu0 %8123 }
0x1a3c   :  { %v8127_v55 = vpop.xlane.xlu1 %8126 }
0x1a3d   :  { %v8171_v50 = vadd.f32 %v8127_v55, %v8115_v43 }
0x1a3f   :  { %v8179_v52 = vmul.f32 0.001953125, %v8171_v50 }
0x1a40   :  { %v8146_v57 = vpop.xlane.xlu0 %8145  ;;  %v8106_v25 = vpop.xlane.xlu1 %8105 }
0x1a41   :  { %v8172_v5 = vadd.f32 %v8158_v31, %v8146_v57  ;;  %v8168_v21 = vadd.f32 %v8118_v3, %v8106_v25  ;;  %8221 = vperm.xlu0 %11332, %v8179_v52   ;;  %v8187_v4 = vmul.f32 %v8179_v52, %v8179_v52 }
0x1a43   :  { %v8176_v40 = vmul.f32 0.001953125, %v8168_v21  ;;  %v8180_v22 = vmul.f32 0.001953125, %v8172_v5 }
0x1a44   :  { %v8149_v44 = vpop.xlane.xlu1 %8148  ;;  %v8109_v34 = vpop.xlane.xlu0 %8108 }
0x1a45   :  { %v8184_v60 = vmul.f32 %v8176_v40, %v8176_v40  ;;  %v8173_v35 = vadd.f32 %v8161_v42, %v8149_v44  ;;  %v8169_v36 = vadd.f32 %v8121_v15, %v8109_v34  ;;  %8206 = vperm.xlu0 %11332, %v8176_v40   ;;  %v8592_v15 = vld [vmem:[%s15635_s26 + $0x78] sm:$0xff]  ;;  %v8591_v42 = vld [vmem:[%s15635_s26 + $0x70] sm:$0xff] }
0x1a47   :  { %v8188_v7 = vsub.f32 %v8180_v22, %v8184_v60  ;;  %v8177_v18 = vmul.f32 0.001953125, %v8169_v36  ;;  %v8181_v11 = vmul.f32 0.001953125, %v8173_v35 }
0x1a48   :  { %v8167_v8 = vpop.xlane.xlu1 %8166  ;;  %v8112_v37 = vpop.xlane.xlu0 %8111 }
0x1a49   :  { %v8192_v54 = vmax.f32 %v8188_v7, 0.0  ;;  %v8185_v24 = vmul.f32 %v8177_v18, %v8177_v18  ;;  %v8175_v26 = vadd.f32 %v8167_v8, %v8155_v51  ;;  %v8170_v14 = vadd.f32 %v8124_v16, %v8112_v37  ;;  %8211 = vperm.xlu1 %11331, %v8177_v18  }
0x1a4b   :  { %v8196_v23 = vadd.f32 1e-05, %v8192_v54  ;;  %v8189_v29 = vsub.f32 %v8181_v11, %v8185_v24  ;;  %v8183_v63 = vmul.f32 0.001953125, %v8175_v26  ;;  %v8178_v30 = vmul.f32 0.001953125, %v8170_v14 }
0x1a4c   :  { %v8152_v19 = vpop.xlane.xlu0 %8151  ;;  %v8243_v55 = vpop.permute.xlu1 %8242 }
0x1a4d   :  { %11402 = vrsqrt.f32 %v8196_v23  ;;  %v8191_v41 = vsub.f32 %v8183_v63, %v8187_v4  ;;  %8216 = vperm.xlu1 %11331, %v8178_v30   ;;  %v8193_v27 = vmax.f32 %v8189_v29, 0.0  ;;  %v8186_v28 = vmul.f32 %v8178_v30, %v8178_v30 }
0x1a4f   :  { %v8195_v61 = vmax.f32 %v8191_v41, 0.0  ;;  %v8197_v48 = vadd.f32 1e-05, %v8193_v27 }
0x1a50   :  { %v8164_v59 = vpop.xlane.xlu0 %8163  ;;  %v15519_v52 = vpop.permute.xlu1 %8252 }
0x1a51   :  { %v8199_v20 = vadd.f32 1e-05, %v8195_v61  ;;  %v8174_v13 = vadd.f32 %v8164_v59, %v8152_v19 }
0x1a53   :  { %11404 = vrsqrt.f32 %v8199_v20  ;;  %v8182_v58 = vmul.f32 0.001953125, %v8174_v13 }
0x1a54   :  { %11406 = vrsqrt.f32 %v8197_v48  ;;  %v8263_v25 = vpop.permute.xlu1 %8262 }
0x1a55   :  { %v8190_v56 = vsub.f32 %v8182_v58, %v8186_v28 }
0x1a57   :  { %v11403_v10 = vpop.eup %11402  ;;  %v8194_v62 = vmax.f32 %v8190_v56, 0.0 }
0x1a58   :  { %8298 = vperm.xlu1 %11331, %v11403_v10   ;;  %v8248_v16 = vpop.permute.xlu0 %8247  ;;  %v15521_v21 = vpop.permute.xlu1 %8272 }
0x1a59   :  { %v8198_v43 = vadd.f32 1e-05, %v8194_v62 }
0x1a5b   :  { %11408 = vrsqrt.f32 %v8198_v43 }
0x1a5c   :  { %v8258_v50 = vpop.permute.xlu0 %8257  ;;  %v8335_v44 = vpop.permute.xlu1 %8334 }
0x1a5d   :  { %v11405_v51 = vpop.eup %11404 }
0x1a5e   :  { %8313 = vperm.xlu0 %11332, %v11405_v51   ;;  %v11407_v3 = vpop.eup %11406 }
0x1a60   :  { %v8268_v57 = vpop.permute.xlu0 %8267  ;;  %v15525_v22 = vpop.permute.xlu1 %8344 }
0x1a62   :  { %8303 = vperm.xlu0 %11332, %v11407_v3  }
0x1a64   :  { %v8278_v5 = vpop.permute.xlu0 %8277  ;;  %v8355_v35 = vpop.permute.xlu1 %8354 }
0x1a65   :  { %v11409_v31 = vpop.eup %11408 }
0x1a66   :  { %8369 = vperm.xlu0 %11332, %v8592_v15   ;;  %8308 = vperm.xlu1 %11331, %v11409_v31  }
0x1a68   :  { %v15523_v40 = vpop.permute.xlu0 %8339 }
0x1a6a   :  { %8364 = vperm.xlu1 %11331, %v8591_v42  }
0x1a6c   :  { %v8350_v34 = vpop.permute.xlu0 %8349 }
0x1a70   :  { %v15527_v60 = vpop.permute.xlu0 %8359 }
0x1ac0   :  { %v8222_v36 = vpop.permute.xlu0 %8221 }
0x1ac1   :  { %v8230_v29 = vsub.f32 %v15391_v45, %v8222_v36  ;;  %v8231_v63 = vsub.f32 %v15393_v12, %v8222_v36 }
0x1ac3   :  { %v8286_v45 = vmul.f32 %v8258_v50, %v8230_v29  ;;  %v8287_v12 = vmul.f32 %v8258_v50, %v8231_v63 }
0x1ac4   :  { %v8207_v18 = vpop.permute.xlu0 %8206 }
0x1ac5   :  { %v8224_v11 = vsub.f32 %v15431_v1, %v8207_v18  ;;  %v8225_v8 = vsub.f32 %v15437_v39, %v8207_v18  ;;  %v8232_v37 = vsub.f32 %v15401_v38, %v8207_v18  ;;  %v8233_v54 = vsub.f32 %v15403_v9, %v8207_v18 }
0x1ac7   :  { %v8280_v26 = vmul.f32 %v8243_v55, %v8224_v11  ;;  %v8281_v14 = vmul.f32 %v8243_v55, %v8225_v8  ;;  %v8288_v4 = vmul.f32 %v8263_v25, %v8232_v37  ;;  %v8289_v23 = vmul.f32 %v8263_v25, %v8233_v54 }
0x1ac8   :  { %v8212_v7 = vpop.permute.xlu1 %8211 }
0x1ac9   :  { %v8226_v9 = vsub.f32 %v15443_v17, %v8212_v7  ;;  %v8227_v20 = vsub.f32 %v15447_v6, %v8212_v7  ;;  %v8234_v13 = vsub.f32 %v15411_v53, %v8212_v7  ;;  %v8235_v48 = vsub.f32 %v15413_v32, %v8212_v7 }
0x1aca   :  { %v8238_v53 = vsub.f32 %v15427_v2, %v8222_v36  ;;  %v8239_v32 = vsub.f32 %v15429_v0, %v8222_v36 }
0x1acb   :  { %v8282_v10 = vmul.f32 %v8248_v16, %v8226_v9  ;;  %v8283_v62 = vmul.f32 %v8248_v16, %v8227_v20  ;;  %v8290_v3 = vmul.f32 %v8268_v57, %v8234_v13  ;;  %v8291_v15 = vmul.f32 %v8268_v57, %v8235_v48 }
0x1acc   :  { %v15533_v24 = vpop.permute.xlu1 %8216  ;;  %v8294_v42 = vmul.f32 %v8278_v5, %v8238_v53  ;;  %v8295_v55 = vmul.f32 %v8278_v5, %v8239_v32 }
0x1acd   :  { %v8228_v58 = vsub.f32 %v15457_v46, %v15533_v24  ;;  %v8229_v56 = vsub.f32 %v15461_v33, %v15533_v24  ;;  %v8236_v2 = vsub.f32 %v15421_v49, %v15533_v24  ;;  %v8237_v0 = vsub.f32 %v15423_v47, %v15533_v24 }
0x1acf   :  { %v8284_v49 = vmul.f32 %v15519_v52, %v8228_v58  ;;  %v8285_v57 = vmul.f32 %v15519_v52, %v8229_v56  ;;  %v8292_v18 = vmul.f32 %v15521_v21, %v8236_v2  ;;  %v8293_v11 = vmul.f32 %v15521_v21, %v8237_v0 }
0x1ad7   :  { %v8299_v30 = vpop.permute.xlu1 %8298 }
0x1ad8   :  { %v8316_v19 = vmul.f32 %v8299_v30, %v8280_v26  ;;  %v8317_v41 = vmul.f32 %v8299_v30, %v8281_v14  ;;  %v8324_v1 = vmul.f32 %v8299_v30, %v8288_v4  ;;  %v8325_v27 = vmul.f32 %v8299_v30, %v8289_v23 }
0x1ada   :  { %v8372_v39 = vadd.f32 %v8335_v44, %v8316_v19  ;;  %v8373_v61 = vadd.f32 %v8335_v44, %v8317_v41  ;;  %v8380_v38 = vadd.f32 %v8355_v35, %v8324_v1  ;;  %v8381_v59 = vadd.f32 %v8355_v35, %v8325_v27 }
0x1adc   :  { %8388 = vst [vmem:[%s15636_s27] sm:$0xff] %v8372_v39  ;;  %8389 = vst [vmem:[%s15636_s27 + $0x8] sm:$0xff] %v8373_v61 }
0x1add   :  { %8396 = vst [vmem:[%s15636_s27 + $0x40] sm:$0xff] %v8380_v38  ;;  %8397 = vst [vmem:[%s15636_s27 + $0x48] sm:$0xff] %v8381_v59  ;;  %v8314_v17 = vpop.permute.xlu0 %8313 }
0x1ade   :  { %v8322_v6 = vmul.f32 %v8314_v17, %v8286_v45  ;;  %v8323_v28 = vmul.f32 %v8314_v17, %v8287_v12  ;;  %v8330_v47 = vmul.f32 %v8314_v17, %v8294_v42  ;;  %v8331_v25 = vmul.f32 %v8314_v17, %v8295_v55 }
0x1ae0   :  { %v8378_v43 = vadd.f32 %v8350_v34, %v8322_v6  ;;  %v8379_v51 = vadd.f32 %v8350_v34, %v8323_v28 }
0x1ae1   :  { %v8304_v31 = vpop.permute.xlu0 %8303 }
0x1ae2   :  { %8394 = vst [vmem:[%s15636_s27 + $0x30] sm:$0xff] %v8378_v43  ;;  %8395 = vst [vmem:[%s15636_s27 + $0x38] sm:$0xff] %v8379_v51  ;;  %v8318_v46 = vmul.f32 %v8304_v31, %v8282_v10  ;;  %v8319_v33 = vmul.f32 %v8304_v31, %v8283_v62  ;;  %v8326_v16 = vmul.f32 %v8304_v31, %v8290_v3 }
0x1ae3   :  { %v8327_v50 = vmul.f32 %v8304_v31, %v8291_v15 }
0x1ae4   :  { %v8374_v5 = vadd.f32 %v15523_v40, %v8318_v46  ;;  %v8375_v44 = vadd.f32 %v15523_v40, %v8319_v33  ;;  %v8382_v34 = vadd.f32 %v15527_v60, %v8326_v16 }
0x1ae5   :  { %v8383_v35 = vadd.f32 %v15527_v60, %v8327_v50  ;;  %v8309_v36 = vpop.permute.xlu1 %8308  ;;  %v8370_v7 = vpop.permute.xlu0 %8369 }
0x1ae6   :  { %8390 = vst [vmem:[%s15636_s27 + $0x10] sm:$0xff] %v8374_v5  ;;  %8391 = vst [vmem:[%s15636_s27 + $0x18] sm:$0xff] %v8375_v44  ;;  %v8320_v52 = vmul.f32 %v8309_v36, %v8284_v49  ;;  %v8321_v40 = vmul.f32 %v8309_v36, %v8285_v57  ;;  %v8386_v60 = vadd.f32 %v8370_v7, %v8330_v47 }
0x1ae7   :  { %8398 = vst [vmem:[%s15636_s27 + $0x50] sm:$0xff] %v8382_v34  ;;  %8399 = vst [vmem:[%s15636_s27 + $0x58] sm:$0xff] %v8383_v35  ;;  %v8387_v21 = vadd.f32 %v8370_v7, %v8331_v25  ;;  %v8328_v54 = vmul.f32 %v8309_v36, %v8292_v18  ;;  %v8329_v24 = vmul.f32 %v8309_v36, %v8293_v11 }
0x1ae8   :  { %v8376_v8 = vadd.f32 %v15525_v22, %v8320_v52  ;;  %v8377_v37 = vadd.f32 %v15525_v22, %v8321_v40  ;;  %8402 = vst [vmem:[%s15636_s27 + $0x70] sm:$0xff] %v8386_v60 }
0x1ae9   :  { %8403 = vst [vmem:[%s15636_s27 + $0x78] sm:$0xff] %v8387_v21  ;;  %v8365_v26 = vpop.permute.xlu1 %8364 }
0x1aea   :  { %8392 = vst [vmem:[%s15636_s27 + $0x20] sm:$0xff] %v8376_v8  ;;  %8393 = vst [vmem:[%s15636_s27 + $0x28] sm:$0xff] %v8377_v37  ;;  %v8384_v22 = vadd.f32 %v8365_v26, %v8328_v54  ;;  %v8385_v14 = vadd.f32 %v8365_v26, %v8329_v24 }
0x1aec   :  { %8400 = vst [vmem:[%s15636_s27 + $0x60] sm:$0xff] %v8384_v22  ;;  %8401 = vst [vmem:[%s15636_s27 + $0x68] sm:$0xff] %v8385_v14 }

</bundles_post_ra>
